<compile_context>
chip_gen: v7x
topology: tpu7x:2x2x1
jax: 0.10.0
libtpu: 0.0.40
codegen_flags: <defaults>
</compile_context>

<pallas_src>
import functools

import jax
import jax.numpy as jnp
from jax.experimental import pallas as pl
from jax.experimental.pallas import tpu as pltpu


def _round_up(x, m):
    return ((x + m - 1) // m) * m


def _pad2(x, rows, cols):
    r, c = x.shape
    if (r, c) == (rows, cols):
        return x
    return jnp.pad(x, ((0, rows - r), (0, cols - c)))


def _full_block_specs(arrs):
    specs = []
    for a in arrs:
        specs.append(pl.BlockSpec(a.shape, lambda i, _nd=a.ndim: (0,) * _nd))
    return specs


def _call(kernel, inputs, out_shape, out_dtype):
    """Single-grid-step pallas_call; every operand is one full VMEM block."""
    return pl.pallas_call(
        kernel,
        out_shape=jax.ShapeDtypeStruct(out_shape, out_dtype),
        grid=(1,),
        in_specs=_full_block_specs(inputs),
        out_specs=pl.BlockSpec(out_shape, lambda i, _nd=len(out_shape): (0,) * _nd),
        compiler_params=pltpu.CompilerParams(
            dimension_semantics=("arbitrary",)),
    )(*inputs)


# ----------------------------------------------------------------------------
# In-kernel BatchNorm (training-mode batch statistics) epilogue.
# ----------------------------------------------------------------------------
def _bn_epilogue(acc, gamma, beta, *, count, eps, m_real):
    """acc: (Mp, Np) f32. Returns gamma*(acc-mean)*rsqrt(var+eps)+beta."""
    mp = acc.shape[0]
    if m_real != mp:
        # Padded rows must not pollute the batch statistics.
        row = jax.lax.broadcasted_iota(jnp.int32, acc.shape, 0)
        stat_src = jnp.where(row < m_real, acc, 0.0)
    else:
        stat_src = acc
    inv = 1.0 / float(count)
    mean = jnp.sum(stat_src, axis=0, keepdims=True) * inv
    msq = jnp.sum(stat_src * stat_src, axis=0, keepdims=True) * inv
    var = jnp.maximum(msq - mean * mean, 0.0)          # biased, as PyTorch
    scale = gamma * jax.lax.rsqrt(var + eps)
    shift = beta - mean * scale
    return acc * scale + shift


# ----------------------------------------------------------------------------
# Kernel A: conv (as matmul) + bias + BN + ReLU, single tile.
# ----------------------------------------------------------------------------
def _conv_bn_relu_kernel(a_ref, w_ref, b_ref, g_ref, be_ref, o_ref, *,
                         count, eps, m_real):
    acc = jnp.dot(a_ref[...], w_ref[...], preferred_element_type=jnp.float32)
    acc = acc + b_ref[...]
    y = _bn_epilogue(acc, g_ref[...], be_ref[...],
                     count=count, eps=eps, m_real=m_real)
    o_ref[...] = jnp.maximum(y, 0.0).astype(o_ref.dtype)


# ----------------------------------------------------------------------------
# Kernel B: conv + BN + residual add + ReLU + label gate, single tile.
# ----------------------------------------------------------------------------
def _conv_bn_res_gate_kernel(a_ref, w_ref, g_ref, be_ref, id_ref, gate_ref,
                             o_ref, *, count, eps, m_real):
    acc = jnp.dot(a_ref[...], w_ref[...], preferred_element_type=jnp.float32)
    y = _bn_epilogue(acc, g_ref[...], be_ref[...],
                     count=count, eps=eps, m_real=m_real)
    y = jnp.maximum(y + id_ref[...].astype(jnp.float32), 0.0)
    o_ref[...] = (y * gate_ref[...]).astype(o_ref.dtype)


# ----------------------------------------------------------------------------
# Kernel B': same as B but the identity path is itself a (2x2/s2) conv,
# fused as a second matmul (downsampling blocks).
# ----------------------------------------------------------------------------
def _conv_bn_dsres_gate_kernel(a_ref, w_ref, g_ref, be_ref, da_ref, dw_ref,
                               db_ref, gate_ref, o_ref, *, count, eps, m_real):
    acc = jnp.dot(a_ref[...], w_ref[...], preferred_element_type=jnp.float32)
    ident = jnp.dot(da_ref[...], dw_ref[...],
                    preferred_element_type=jnp.float32) + db_ref[...]
    y = _bn_epilogue(acc, g_ref[...], be_ref[...],
                     count=count, eps=eps, m_real=m_real)
    y = jnp.maximum(y + ident, 0.0)
    o_ref[...] = (y * gate_ref[...]).astype(o_ref.dtype)


# ----------------------------------------------------------------------------
# Kernel C: plain matmul + bias (label Linears, output FCs).
# ----------------------------------------------------------------------------
def _matmul_bias_kernel(a_ref, w_ref, b_ref, o_ref):
    o_ref[...] = (jnp.dot(a_ref[...], w_ref[...],
                          preferred_element_type=jnp.float32)
                  + b_ref[...]).astype(o_ref.dtype)


# ----------------------------------------------------------------------------
# Wrappers (pad to aligned shapes, call, slice back).
# ----------------------------------------------------------------------------
def conv_bn_relu(patches, w, bias, gamma, beta, eps=1e-5):
    M, K = patches.shape
    _, N = w.shape
    Mp, Kp, Np = _round_up(M, 8), _round_up(K, 128), _round_up(N, 128)
    a = _pad2(patches.astype(jnp.bfloat16), Mp, Kp)
    wp = _pad2(w.astype(jnp.bfloat16), Kp, Np)
    bp = _pad2(bias.reshape(1, N).astype(jnp.float32), 1, Np)
    gp = _pad2(gamma.reshape(1, N).astype(jnp.float32), 1, Np)
    bep = _pad2(beta.reshape(1, N).astype(jnp.float32), 1, Np)
    kern = functools.partial(_conv_bn_relu_kernel, count=M, eps=eps, m_real=M)
    out = _call(kern, [a, wp, bp, gp, bep], (Mp, Np), jnp.bfloat16)
    return out[:M, :N]


def conv_bn_res_gate(patches, w, gamma, beta, identity, gate, eps=1e-5):
    M, K = patches.shape
    _, N = w.shape
    Mp, Kp, Np = _round_up(M, 8), _round_up(K, 128), _round_up(N, 128)
    a = _pad2(patches.astype(jnp.bfloat16), Mp, Kp)
    wp = _pad2(w.astype(jnp.bfloat16), Kp, Np)
    gp = _pad2(gamma.reshape(1, N).astype(jnp.float32), 1, Np)
    bep = _pad2(beta.reshape(1, N).astype(jnp.float32), 1, Np)
    idp = _pad2(identity.astype(jnp.bfloat16), Mp, Np)
    gtp = _pad2(gate.astype(jnp.float32), Mp, Np)
    kern = functools.partial(_conv_bn_res_gate_kernel, count=M, eps=eps, m_real=M)
    out = _call(kern, [a, wp, gp, bep, idp, gtp], (Mp, Np), jnp.bfloat16)
    return out[:M, :N]


def conv_bn_dsres_gate(patches, w, gamma, beta, ds_patches, ds_w, ds_b, gate,
                       eps=1e-5):
    M, K = patches.shape
    _, N = w.shape
    Kd = ds_patches.shape[1]
    Mp, Kp, Np = _round_up(M, 8), _round_up(K, 128), _round_up(N, 128)
    Kdp = _round_up(Kd, 128)
    a = _pad2(patches.astype(jnp.bfloat16), Mp, Kp)
    wp = _pad2(w.astype(jnp.bfloat16), Kp, Np)
    gp = _pad2(gamma.reshape(1, N).astype(jnp.float32), 1, Np)
    bep = _pad2(beta.reshape(1, N).astype(jnp.float32), 1, Np)
    da = _pad2(ds_patches.astype(jnp.bfloat16), Mp, Kdp)
    dw = _pad2(ds_w.astype(jnp.bfloat16), Kdp, Np)
    db = _pad2(ds_b.reshape(1, N).astype(jnp.float32), 1, Np)
    gtp = _pad2(gate.astype(jnp.float32), Mp, Np)
    kern = functools.partial(_conv_bn_dsres_gate_kernel,
                             count=M, eps=eps, m_real=M)
    out = _call(kern, [a, wp, gp, bep, da, dw, db, gtp], (Mp, Np), jnp.bfloat16)
    return out[:M, :N]


def matmul_bias(x, w, b):
    M, K = x.shape
    _, N = w.shape
    Mp, Kp, Np = _round_up(M, 8), _round_up(K, 128), _round_up(N, 128)
    a = _pad2(x.astype(jnp.bfloat16), Mp, Kp)
    wp = _pad2(w.astype(jnp.bfloat16), Kp, Np)
    bp = _pad2(b.reshape(1, N).astype(jnp.float32), 1, Np)
    out = _call(_matmul_bias_kernel, [a, wp, bp], (Mp, Np), jnp.float32)
    return out[:M, :N]


# ----------------------------------------------------------------------------
# JAX glue (layout plumbing only)
# ----------------------------------------------------------------------------
def _im2col(x, kh, kw, stride, pad):
    """x: (N, H, W, C) -> bf16 patches (N*Ho*Wo, kh*kw*C), (ki, kj, c) order."""
    N, H, W, C = x.shape
    if pad:
        x = jnp.pad(x, ((0, 0), (pad, pad), (pad, pad), (0, 0)))
    Ho = (H + 2 * pad - kh) // stride + 1
    Wo = (W + 2 * pad - kw) // stride + 1
    cols = []
    for i in range(kh):
        for j in range(kw):
            cols.append(x[:, i:i + stride * Ho:stride,
                          j:j + stride * Wo:stride, :])
    patches = jnp.stack(cols, axis=3).reshape(N * Ho * Wo, kh * kw * C)
    return patches.astype(jnp.bfloat16), (Ho, Wo)


def res_block_apply(x, gate, blk):
    """res_block_with_label_condition, NHWC. x: (B,H,W,Cin); gate: (B,Cout)."""
    B, H, W, Cin = x.shape
    cout = blk["cout"]

    # conv1 + bn1 + relu fused in one Pallas call.
    p1, (Ho, Wo) = _im2col(x, 3, 3, blk["stride"], 1)
    zero_b = jnp.zeros((cout,), jnp.float32)
    act1 = conv_bn_relu(p1, blk["conv1_w"], zero_b,
                        blk["bn1_gamma"], blk["bn1_beta"])
    act1 = act1.reshape(B, Ho, Wo, cout)

    # conv2 patches.
    p2, _ = _im2col(act1, 3, 3, 1, 1)
    M = B * Ho * Wo

    # Label gate broadcast to one value per output row.
    gate_rows = jnp.broadcast_to(gate[:, None, :],
                                 (B, Ho * Wo, cout)).reshape(M, cout)

    if blk["downsample"]:
        pd, _ = _im2col(x, 2, 2, 2, 0)
        out = conv_bn_dsres_gate(p2, blk["conv2_w"],
                                 blk["bn2_gamma"], blk["bn2_beta"],
                                 pd, blk["ds_w"], blk["ds_b"], gate_rows)
    else:
        ident = x.reshape(M, cout)
        out = conv_bn_res_gate(p2, blk["conv2_w"],
                               blk["bn2_gamma"], blk["bn2_beta"],
                               ident, gate_rows)
    return out.reshape(B, Ho, Wo, cout)


def fn_coefficient_forward(params, x_nchw, label):
    # NCHW (PyTorch convention) -> NHWC for the kernels; activations in bf16.
    x = jnp.transpose(x_nchw, (0, 2, 3, 1)).astype(jnp.bfloat16)
    B = x.shape[0]

    # Embedding lookup (gather) — plain JAX glue.
    label_emb = params["emb_table"][label]  # (B, 256)

    # All per-block label Linears fused into one Pallas matmul.
    lab_w = jnp.concatenate([blk["label_w"] for blk in params["blocks"]],
                            axis=1)
    lab_b = jnp.concatenate([blk["label_b"] for blk in params["blocks"]],
                            axis=0)
    lab_all = matmul_bias(label_emb, lab_w, lab_b)
    gates = []
    off = 0
    for blk in params["blocks"]:
        l = lab_all[:, off:off + blk["cout"]]
        off += blk["cout"]
        # NOTE: divides by the global max as in the reference (fragile if ~0).
        gates.append(1.0 + jax.nn.sigmoid(l / jnp.max(l)))

    # Stem: Conv(in->8, 3x3, s1, p1, bias) + BN + ReLU, one fused Pallas call.
    p0, (Ho, Wo) = _im2col(x, 3, 3, 1, 1)
    act = conv_bn_relu(p0, params["stem_w"], params["stem_b"],
                       params["stem_gamma"], params["stem_beta"])
    x = act.reshape(B, Ho, Wo, 8)

    for blk, gate in zip(params["blocks"], gates):
        x = res_block_apply(x, gate, blk)

    # torch.Flatten flattens NCHW -> (N, C*H*W); replicate that ordering.
    feat = jnp.transpose(x, (0, 3, 1, 2)).reshape(B, -1)

    # fc_xy / fc_yx / fc_bias fused into one lane-padded Pallas matmul.
    nft2 = params["fc_xy_w"].shape[1]  # 2 * num_fourier_terms
    fc_w = jnp.concatenate([params["fc_xy_w"], params["fc_yx_w"],
                            params["fc_bias_w"]], axis=1)
    fc_b = jnp.concatenate([params["fc_xy_b"], params["fc_yx_b"],
                            params["fc_bias_b"]], axis=0)
    fc_out = matmul_bias(feat, fc_w, fc_b)
    x1 = fc_out[:, :nft2]
    x2 = fc_out[:, nft2:2 * nft2]
    x3 = fc_out[:, 2 * nft2:2 * nft2 + 1]

    Axy, Bxy = jnp.split(x1, 2, axis=1)
    Ayx, Byx = jnp.split(x2, 2, axis=1)
    return {"Axy": Axy, "Bxy": Bxy, "Ayx": Ayx, "Byx": Byx, "A0": x3}


# ----------------------------------------------------------------------------
# Deterministic parameter initialization (synthetic, no checkpoint)
# ----------------------------------------------------------------------------
def init_params(key, input_size, in_channels, num_fourier_terms, num_classes):
    keys = iter(jax.random.split(key, 256))

    def nrm(shape, scale=0.1):
        return (scale * jax.random.normal(next(keys), shape)).astype(jnp.float32)

    p = {}
    p["emb_table"] = nrm((num_classes, 256))
    p["stem_w"] = nrm((3 * 3 * in_channels, 8))
    p["stem_b"] = nrm((8,))
    p["stem_gamma"] = jnp.ones((8,), jnp.float32)
    p["stem_beta"] = jnp.zeros((8,), jnp.float32)

    blocks = []
    c = 8
    size = input_size
    for _ in range(4):
        # block A: c -> c, stride 1, no downsample
        blocks.append(dict(
            cout=c, stride=1, downsample=False,
            conv1_w=nrm((3 * 3 * c, c)),
            bn1_gamma=jnp.ones((c,), jnp.float32),
            bn1_beta=jnp.zeros((c,), jnp.float32),
            conv2_w=nrm((3 * 3 * c, c)),
            bn2_gamma=jnp.ones((c,), jnp.float32),
            bn2_beta=jnp.zeros((c,), jnp.float32),
            label_w=nrm((256, c)), label_b=nrm((c,)),
        ))
        # block B: c -> 2c, spatial /2 (conv1 stride 2 + 2x2/s2 downsample conv)
        blocks.append(dict(
            cout=2 * c, stride=2, downsample=True,
            conv1_w=nrm((3 * 3 * c, 2 * c)),
            bn1_gamma=jnp.ones((2 * c,), jnp.float32),
            bn1_beta=jnp.zeros((2 * c,), jnp.float32),
            conv2_w=nrm((3 * 3 * 2 * c, 2 * c)),
            bn2_gamma=jnp.ones((2 * c,), jnp.float32),
            bn2_beta=jnp.zeros((2 * c,), jnp.float32),
            label_w=nrm((256, 2 * c)), label_b=nrm((2 * c,)),
            ds_w=nrm((2 * 2 * c, 2 * c)), ds_b=nrm((2 * c,)),
        ))
        c *= 2
        size //= 2
    p["blocks"] = blocks

    feat_dim = c * size * size
    p["fc_xy_w"] = nrm((feat_dim, num_fourier_terms * 2))
    p["fc_xy_b"] = nrm((num_fourier_terms * 2,))
    p["fc_yx_w"] = nrm((feat_dim, num_fourier_terms * 2))
    p["fc_yx_b"] = nrm((num_fourier_terms * 2,))
    p["fc_bias_w"] = nrm((feat_dim, 1))
    p["fc_bias_b"] = nrm((1,))
    return p


# ----------------------------------------------------------------------------
if __name__ == "__main__":
    key = jax.random.PRNGKey(0)
    kx, kl, kp = jax.random.split(key, 3)

    batch, in_channels, input_size = 2, 4, 16
    num_fourier_terms, num_classes = 8, 10

    x = jax.random.normal(kx, (batch, in_channels, input_size, input_size),
                          jnp.float32)
    label = jax.random.randint(kl, (batch,), 0, num_classes)

    params = init_params(kp, input_size, in_channels, num_fourier_terms,
                         num_classes)

    # Close over params so static config fields (cout/stride/downsample)
    # stay plain Python values under jit tracing.
    fwd = jax.jit(lambda xx, ll: fn_coefficient_forward(params, xx, ll))

    out = fwd(x, label)
    out = jax.block_until_ready(out)

    assert out["Axy"].shape == (batch, num_fourier_terms)
    assert out["Bxy"].shape == (batch, num_fourier_terms)
    assert out["Ayx"].shape == (batch, num_fourier_terms)
    assert out["Byx"].shape == (batch, num_fourier_terms)
    assert out["A0"].shape == (batch, 1)
    for v in out.values():
        assert jnp.all(jnp.isfinite(v))

    print("KERNEL_OK")
</pallas_src>

<mosaic_0001>
module attributes {stable_mosaic.version = 11 : i64} {
  func.func @_conv_bn_relu_kernel(%arg0: i32, %arg1: memref<512x128xbf16, #tpu.memory_space<vmem>>, %arg2: memref<128x128xbf16, #tpu.memory_space<vmem>>, %arg3: memref<1x128xf32, #tpu.memory_space<vmem>>, %arg4: memref<1x128xf32, #tpu.memory_space<vmem>>, %arg5: memref<1x128xf32, #tpu.memory_space<vmem>>, %arg6: memref<512x128xbf16, #tpu.memory_space<vmem>>) attributes {dimension_semantics = [#tpu.dimension_semantics<arbitrary>], iteration_bounds = array<i64: 1>, scalar_prefetch = 0 : i64, scratch_operands = 0 : i64, tpu.core_type = #tpu.core_type<tc>, window_params = [{pipeline_mode = #tpu.pipeline_mode<synchronous>, transform_indices = @transform_0, window_bounds = array<i64: 512, 128>}, {pipeline_mode = #tpu.pipeline_mode<synchronous>, transform_indices = @transform_1, window_bounds = array<i64: 128, 128>}, {pipeline_mode = #tpu.pipeline_mode<synchronous>, transform_indices = @transform_2, window_bounds = array<i64: 1, 128>}, {pipeline_mode = #tpu.pipeline_mode<synchronous>, transform_indices = @transform_3, window_bounds = array<i64: 1, 128>}, {pipeline_mode = #tpu.pipeline_mode<synchronous>, transform_indices = @transform_4, window_bounds = array<i64: 1, 128>}, {pipeline_mode = #tpu.pipeline_mode<synchronous>, transform_indices = @transform_5, window_bounds = array<i64: 512, 128>}]} {
    %c0 = arith.constant 0 : index
    %c0_0 = arith.constant 0 : index
    %0 = vector.load %arg1[%c0, %c0_0] : memref<512x128xbf16, #tpu.memory_space<vmem>>, vector<512x128xbf16>
    %c0_1 = arith.constant 0 : index
    %c0_2 = arith.constant 0 : index
    %1 = vector.load %arg2[%c0_1, %c0_2] : memref<128x128xbf16, #tpu.memory_space<vmem>>, vector<128x128xbf16>
    %cst = arith.constant dense<0.000000e+00> : vector<512x128xf32>
    %2 = tpu.matmul %0, %1, %cst {dimension_numbers = #tpu.dot_dimension_numbers<[1], [0], [0], [1], [0, 0, 1, 1], [], []>} : vector<512x128xbf16>, vector<128x128xbf16>, vector<512x128xf32> -> vector<512x128xf32>
    %c0_3 = arith.constant 0 : index
    %c0_4 = arith.constant 0 : index
    %3 = vector.load %arg3[%c0_3, %c0_4] : memref<1x128xf32, #tpu.memory_space<vmem>>, vector<1x128xf32>
    %4 = vector.broadcast %3 : vector<1x128xf32> to vector<512x128xf32>
    %5 = arith.addf %2, %4 : vector<512x128xf32>
    %c0_5 = arith.constant 0 : index
    %c0_6 = arith.constant 0 : index
    %6 = vector.load %arg4[%c0_5, %c0_6] : memref<1x128xf32, #tpu.memory_space<vmem>>, vector<1x128xf32>
    %c0_7 = arith.constant 0 : index
    %c0_8 = arith.constant 0 : index
    %7 = vector.load %arg5[%c0_7, %c0_8] : memref<1x128xf32, #tpu.memory_space<vmem>>, vector<1x128xf32>
    %cst_9 = arith.constant dense<0.000000e+00> : vector<128xf32>
    %8 = vector.multi_reduction <add>, %5, %cst_9 [0] : vector<512x128xf32> to vector<128xf32>
    %9 = vector.shape_cast %8 : vector<128xf32> to vector<1x128xf32>
    %cst_10 = arith.constant 0.001953125 : f32
    %10 = vector.broadcast %cst_10 : f32 to vector<1x128xf32>
    %11 = arith.mulf %9, %10 : vector<1x128xf32>
    %12 = arith.mulf %5, %5 : vector<512x128xf32>
    %cst_11 = arith.constant dense<0.000000e+00> : vector<128xf32>
    %13 = vector.multi_reduction <add>, %12, %cst_11 [0] : vector<512x128xf32> to vector<128xf32>
    %14 = vector.shape_cast %13 : vector<128xf32> to vector<1x128xf32>
    %cst_12 = arith.constant 0.001953125 : f32
    %15 = vector.broadcast %cst_12 : f32 to vector<1x128xf32>
    %16 = arith.mulf %14, %15 : vector<1x128xf32>
    %17 = arith.mulf %11, %11 : vector<1x128xf32>
    %18 = arith.subf %16, %17 : vector<1x128xf32>
    %cst_13 = arith.constant 0.000000e+00 : f32
    %19 = vector.broadcast %cst_13 : f32 to vector<1x128xf32>
    %20 = arith.maximumf %18, %19 : vector<1x128xf32>
    %cst_14 = arith.constant 9.99999974E-6 : f32
    %21 = vector.broadcast %cst_14 : f32 to vector<1x128xf32>
    %22 = arith.addf %20, %21 : vector<1x128xf32>
    %23 = math.rsqrt %22 : vector<1x128xf32>
    %24 = arith.mulf %6, %23 : vector<1x128xf32>
    %25 = arith.mulf %11, %24 : vector<1x128xf32>
    %26 = arith.subf %7, %25 : vector<1x128xf32>
    %27 = vector.broadcast %24 : vector<1x128xf32> to vector<512x128xf32>
    %28 = arith.mulf %5, %27 : vector<512x128xf32>
    %29 = vector.broadcast %26 : vector<1x128xf32> to vector<512x128xf32>
    %30 = arith.addf %28, %29 : vector<512x128xf32>
    %cst_15 = arith.constant 0.000000e+00 : f32
    %31 = vector.broadcast %cst_15 : f32 to vector<512x128xf32>
    %32 = arith.maximumf %30, %31 : vector<512x128xf32>
    %33 = arith.truncf %32 : vector<512x128xf32> to vector<512x128xbf16>
    %c0_16 = arith.constant 0 : index
    %c0_17 = arith.constant 0 : index
    %34 = vector.load %arg6[%c0_16, %c0_17] : memref<512x128xbf16, #tpu.memory_space<vmem>>, vector<512x128xbf16>
    tpu.vector_store %arg6[%c0_16, %c0_17], %33 {strides = array<i32>} : memref<512x128xbf16, #tpu.memory_space<vmem>>, vector<512x128xbf16>,
    return
  }
  func.func @transform_0(%arg0: i32) -> (i32, i32) {
    %c0_i32 = arith.constant 0 : i32
    %c0_i32_0 = arith.constant 0 : i32
    %c0_i32_1 = arith.constant 0 : i32
    return %c0_i32, %c0_i32_0 : i32, i32
  }
  func.func @transform_1(%arg0: i32) -> (i32, i32) {
    %c0_i32 = arith.constant 0 : i32
    %c0_i32_0 = arith.constant 0 : i32
    %c0_i32_1 = arith.constant 0 : i32
    return %c0_i32, %c0_i32_0 : i32, i32
  }
  func.func @transform_2(%arg0: i32) -> (i32, i32) {
    %c0_i32 = arith.constant 0 : i32
    %c0_i32_0 = arith.constant 0 : i32
    %c0_i32_1 = arith.constant 0 : i32
    return %c0_i32, %c0_i32_0 : i32, i32
  }
  func.func @transform_3(%arg0: i32) -> (i32, i32) {
    %c0_i32 = arith.constant 0 : i32
    %c0_i32_0 = arith.constant 0 : i32
    %c0_i32_1 = arith.constant 0 : i32
    return %c0_i32, %c0_i32_0 : i32, i32
  }
  func.func @transform_4(%arg0: i32) -> (i32, i32) {
    %c0_i32 = arith.constant 0 : i32
    %c0_i32_0 = arith.constant 0 : i32
    %c0_i32_1 = arith.constant 0 : i32
    return %c0_i32, %c0_i32_0 : i32, i32
  }
  func.func @transform_5(%arg0: i32) -> (i32, i32) {
    %c0_i32 = arith.constant 0 : i32
    %c0_i32_0 = arith.constant 0 : i32
    %c0_i32_1 = arith.constant 0 : i32
    return %c0_i32, %c0_i32_0 : i32, i32
  }
}

module attributes {stable_mosaic.version = 11 : i64} {
  func.func @_matmul_bias_kernel(%arg0: i32, %arg1: memref<8x256xbf16, #tpu.memory_space<vmem>>, %arg2: memref<256x384xbf16, #tpu.memory_space<vmem>>, %arg3: memref<1x384xf32, #tpu.memory_space<vmem>>, %arg4: memref<8x384xf32, #tpu.memory_space<vmem>>) attributes {dimension_semantics = [#tpu.dimension_semantics<arbitrary>], iteration_bounds = array<i64: 1>, scalar_prefetch = 0 : i64, scratch_operands = 0 : i64, tpu.core_type = #tpu.core_type<tc>, window_params = [{pipeline_mode = #tpu.pipeline_mode<synchronous>, transform_indices = @transform_0, window_bounds = array<i64: 8, 256>}, {pipeline_mode = #tpu.pipeline_mode<synchronous>, transform_indices = @transform_1, window_bounds = array<i64: 256, 384>}, {pipeline_mode = #tpu.pipeline_mode<synchronous>, transform_indices = @transform_2, window_bounds = array<i64: 1, 384>}, {pipeline_mode = #tpu.pipeline_mode<synchronous>, transform_indices = @transform_3, window_bounds = array<i64: 8, 384>}]} {
    %c0 = arith.constant 0 : index
    %c0_0 = arith.constant 0 : index
    %0 = vector.load %arg1[%c0, %c0_0] : memref<8x256xbf16, #tpu.memory_space<vmem>>, vector<8x256xbf16>
    %c0_1 = arith.constant 0 : index
    %c0_2 = arith.constant 0 : index
    %1 = vector.load %arg2[%c0_1, %c0_2] : memref<256x384xbf16, #tpu.memory_space<vmem>>, vector<256x384xbf16>
    %cst = arith.constant dense<0.000000e+00> : vector<8x384xf32>
    %2 = tpu.matmul %0, %1, %cst {dimension_numbers = #tpu.dot_dimension_numbers<[1], [0], [0], [1], [0, 0, 1, 1], [], []>} : vector<8x256xbf16>, vector<256x384xbf16>, vector<8x384xf32> -> vector<8x384xf32>
    %c0_3 = arith.constant 0 : index
    %c0_4 = arith.constant 0 : index
    %3 = vector.load %arg3[%c0_3, %c0_4] : memref<1x384xf32, #tpu.memory_space<vmem>>, vector<1x384xf32>
    %4 = vector.broadcast %3 : vector<1x384xf32> to vector<8x384xf32>
    %5 = arith.addf %2, %4 : vector<8x384xf32>
    %c0_5 = arith.constant 0 : index
    %c0_6 = arith.constant 0 : index
    %6 = vector.load %arg4[%c0_5, %c0_6] : memref<8x384xf32, #tpu.memory_space<vmem>>, vector<8x384xf32>
    tpu.vector_store %arg4[%c0_5, %c0_6], %5 {strides = array<i32>} : memref<8x384xf32, #tpu.memory_space<vmem>>, vector<8x384xf32>,
    return
  }
  func.func @transform_0(%arg0: i32) -> (i32, i32) {
    %c0_i32 = arith.constant 0 : i32
    %c0_i32_0 = arith.constant 0 : i32
    %c0_i32_1 = arith.constant 0 : i32
    return %c0_i32, %c0_i32_0 : i32, i32
  }
  func.func @transform_1(%arg0: i32) -> (i32, i32) {
    %c0_i32 = arith.constant 0 : i32
    %c0_i32_0 = arith.constant 0 : i32
    %c0_i32_1 = arith.constant 0 : i32
    return %c0_i32, %c0_i32_0 : i32, i32
  }
  func.func @transform_2(%arg0: i32) -> (i32, i32) {
    %c0_i32 = arith.constant 0 : i32
    %c0_i32_0 = arith.constant 0 : i32
    %c0_i32_1 = arith.constant 0 : i32
    return %c0_i32, %c0_i32_0 : i32, i32
  }
  func.func @transform_3(%arg0: i32) -> (i32, i32) {
    %c0_i32 = arith.constant 0 : i32
    %c0_i32_0 = arith.constant 0 : i32
    %c0_i32_1 = arith.constant 0 : i32
    return %c0_i32, %c0_i32_0 : i32, i32
  }
}

module attributes {stable_mosaic.version = 11 : i64} {
  func.func @_conv_bn_res_gate_kernel(%arg0: i32, %arg1: memref<512x128xbf16, #tpu.memory_space<vmem>>, %arg2: memref<128x128xbf16, #tpu.memory_space<vmem>>, %arg3: memref<1x128xf32, #tpu.memory_space<vmem>>, %arg4: memref<1x128xf32, #tpu.memory_space<vmem>>, %arg5: memref<512x128xbf16, #tpu.memory_space<vmem>>, %arg6: memref<512x128xf32, #tpu.memory_space<vmem>>, %arg7: memref<512x128xbf16, #tpu.memory_space<vmem>>) attributes {dimension_semantics = [#tpu.dimension_semantics<arbitrary>], iteration_bounds = array<i64: 1>, scalar_prefetch = 0 : i64, scratch_operands = 0 : i64, tpu.core_type = #tpu.core_type<tc>, window_params = [{pipeline_mode = #tpu.pipeline_mode<synchronous>, transform_indices = @transform_0, window_bounds = array<i64: 512, 128>}, {pipeline_mode = #tpu.pipeline_mode<synchronous>, transform_indices = @transform_1, window_bounds = array<i64: 128, 128>}, {pipeline_mode = #tpu.pipeline_mode<synchronous>, transform_indices = @transform_2, window_bounds = array<i64: 1, 128>}, {pipeline_mode = #tpu.pipeline_mode<synchronous>, transform_indices = @transform_3, window_bounds = array<i64: 1, 128>}, {pipeline_mode = #tpu.pipeline_mode<synchronous>, transform_indices = @transform_4, window_bounds = array<i64: 512, 128>}, {pipeline_mode = #tpu.pipeline_mode<synchronous>, transform_indices = @transform_5, window_bounds = array<i64: 512, 128>}, {pipeline_mode = #tpu.pipeline_mode<synchronous>, transform_indices = @transform_6, window_bounds = array<i64: 512, 128>}]} {
    %c0 = arith.constant 0 : index
    %c0_0 = arith.constant 0 : index
    %0 = vector.load %arg1[%c0, %c0_0] : memref<512x128xbf16, #tpu.memory_space<vmem>>, vector<512x128xbf16>
    %c0_1 = arith.constant 0 : index
    %c0_2 = arith.constant 0 : index
    %1 = vector.load %arg2[%c0_1, %c0_2] : memref<128x128xbf16, #tpu.memory_space<vmem>>, vector<128x128xbf16>
    %cst = arith.constant dense<0.000000e+00> : vector<512x128xf32>
    %2 = tpu.matmul %0, %1, %cst {dimension_numbers = #tpu.dot_dimension_numbers<[1], [0], [0], [1], [0, 0, 1, 1], [], []>} : vector<512x128xbf16>, vector<128x128xbf16>, vector<512x128xf32> -> vector<512x128xf32>
    %c0_3 = arith.constant 0 : index
    %c0_4 = arith.constant 0 : index
    %3 = vector.load %arg3[%c0_3, %c0_4] : memref<1x128xf32, #tpu.memory_space<vmem>>, vector<1x128xf32>
    %c0_5 = arith.constant 0 : index
    %c0_6 = arith.constant 0 : index
    %4 = vector.load %arg4[%c0_5, %c0_6] : memref<1x128xf32, #tpu.memory_space<vmem>>, vector<1x128xf32>
    %cst_7 = arith.constant dense<0.000000e+00> : vector<128xf32>
    %5 = vector.multi_reduction <add>, %2, %cst_7 [0] : vector<512x128xf32> to vector<128xf32>
    %6 = vector.shape_cast %5 : vector<128xf32> to vector<1x128xf32>
    %cst_8 = arith.constant 0.001953125 : f32
    %7 = vector.broadcast %cst_8 : f32 to vector<1x128xf32>
    %8 = arith.mulf %6, %7 : vector<1x128xf32>
    %9 = arith.mulf %2, %2 : vector<512x128xf32>
    %cst_9 = arith.constant dense<0.000000e+00> : vector<128xf32>
    %10 = vector.multi_reduction <add>, %9, %cst_9 [0] : vector<512x128xf32> to vector<128xf32>
    %11 = vector.shape_cast %10 : vector<128xf32> to vector<1x128xf32>
    %cst_10 = arith.constant 0.001953125 : f32
    %12 = vector.broadcast %cst_10 : f32 to vector<1x128xf32>
    %13 = arith.mulf %11, %12 : vector<1x128xf32>
    %14 = arith.mulf %8, %8 : vector<1x128xf32>
    %15 = arith.subf %13, %14 : vector<1x128xf32>
    %cst_11 = arith.constant 0.000000e+00 : f32
    %16 = vector.broadcast %cst_11 : f32 to vector<1x128xf32>
    %17 = arith.maximumf %15, %16 : vector<1x128xf32>
    %cst_12 = arith.constant 9.99999974E-6 : f32
    %18 = vector.broadcast %cst_12 : f32 to vector<1x128xf32>
    %19 = arith.addf %17, %18 : vector<1x128xf32>
    %20 = math.rsqrt %19 : vector<1x128xf32>
    %21 = arith.mulf %3, %20 : vector<1x128xf32>
    %22 = arith.mulf %8, %21 : vector<1x128xf32>
    %23 = arith.subf %4, %22 : vector<1x128xf32>
    %24 = vector.broadcast %21 : vector<1x128xf32> to vector<512x128xf32>
    %25 = arith.mulf %2, %24 : vector<512x128xf32>
    %26 = vector.broadcast %23 : vector<1x128xf32> to vector<512x128xf32>
    %27 = arith.addf %25, %26 : vector<512x128xf32>
    %c0_13 = arith.constant 0 : index
    %c0_14 = arith.constant 0 : index
    %28 = vector.load %arg5[%c0_13, %c0_14] : memref<512x128xbf16, #tpu.memory_space<vmem>>, vector<512x128xbf16>
    %29 = arith.extf %28 : vector<512x128xbf16> to vector<512x128xf32>
    %30 = arith.addf %27, %29 : vector<512x128xf32>
    %cst_15 = arith.constant 0.000000e+00 : f32
    %31 = vector.broadcast %cst_15 : f32 to vector<512x128xf32>
    %32 = arith.maximumf %30, %31 : vector<512x128xf32>
    %c0_16 = arith.constant 0 : index
    %c0_17 = arith.constant 0 : index
    %33 = vector.load %arg6[%c0_16, %c0_17] : memref<512x128xf32, #tpu.memory_space<vmem>>, vector<512x128xf32>
    %34 = arith.mulf %32, %33 : vector<512x128xf32>
    %35 = arith.truncf %34 : vector<512x128xf32> to vector<512x128xbf16>
    %c0_18 = arith.constant 0 : index
    %c0_19 = arith.constant 0 : index
    %36 = vector.load %arg7[%c0_18, %c0_19] : memref<512x128xbf16, #tpu.memory_space<vmem>>, vector<512x128xbf16>
    tpu.vector_store %arg7[%c0_18, %c0_19], %35 {strides = array<i32>} : memref<512x128xbf16, #tpu.memory_space<vmem>>, vector<512x128xbf16>,
    return
  }
  func.func @transform_0(%arg0: i32) -> (i32, i32) {
    %c0_i32 = arith.constant 0 : i32
    %c0_i32_0 = arith.constant 0 : i32
    %c0_i32_1 = arith.constant 0 : i32
    return %c0_i32, %c0_i32_0 : i32, i32
  }
  func.func @transform_1(%arg0: i32) -> (i32, i32) {
    %c0_i32 = arith.constant 0 : i32
    %c0_i32_0 = arith.constant 0 : i32
    %c0_i32_1 = arith.constant 0 : i32
    return %c0_i32, %c0_i32_0 : i32, i32
  }
  func.func @transform_2(%arg0: i32) -> (i32, i32) {
    %c0_i32 = arith.constant 0 : i32
    %c0_i32_0 = arith.constant 0 : i32
    %c0_i32_1 = arith.constant 0 : i32
    return %c0_i32, %c0_i32_0 : i32, i32
  }
  func.func @transform_3(%arg0: i32) -> (i32, i32) {
    %c0_i32 = arith.constant 0 : i32
    %c0_i32_0 = arith.constant 0 : i32
    %c0_i32_1 = arith.constant 0 : i32
    return %c0_i32, %c0_i32_0 : i32, i32
  }
  func.func @transform_4(%arg0: i32) -> (i32, i32) {
    %c0_i32 = arith.constant 0 : i32
    %c0_i32_0 = arith.constant 0 : i32
    %c0_i32_1 = arith.constant 0 : i32
    return %c0_i32, %c0_i32_0 : i32, i32
  }
  func.func @transform_5(%arg0: i32) -> (i32, i32) {
    %c0_i32 = arith.constant 0 : i32
    %c0_i32_0 = arith.constant 0 : i32
    %c0_i32_1 = arith.constant 0 : i32
    return %c0_i32, %c0_i32_0 : i32, i32
  }
  func.func @transform_6(%arg0: i32) -> (i32, i32) {
    %c0_i32 = arith.constant 0 : i32
    %c0_i32_0 = arith.constant 0 : i32
    %c0_i32_1 = arith.constant 0 : i32
    return %c0_i32, %c0_i32_0 : i32, i32
  }
}

module attributes {stable_mosaic.version = 11 : i64} {
  func.func @_conv_bn_relu_kernel(%arg0: i32, %arg1: memref<128x128xbf16, #tpu.memory_space<vmem>>, %arg2: memref<128x128xbf16, #tpu.memory_space<vmem>>, %arg3: memref<1x128xf32, #tpu.memory_space<vmem>>, %arg4: memref<1x128xf32, #tpu.memory_space<vmem>>, %arg5: memref<1x128xf32, #tpu.memory_space<vmem>>, %arg6: memref<128x128xbf16, #tpu.memory_space<vmem>>) attributes {dimension_semantics = [#tpu.dimension_semantics<arbitrary>], iteration_bounds = array<i64: 1>, scalar_prefetch = 0 : i64, scratch_operands = 0 : i64, tpu.core_type = #tpu.core_type<tc>, window_params = [{pipeline_mode = #tpu.pipeline_mode<synchronous>, transform_indices = @transform_0, window_bounds = array<i64: 128, 128>}, {pipeline_mode = #tpu.pipeline_mode<synchronous>, transform_indices = @transform_1, window_bounds = array<i64: 128, 128>}, {pipeline_mode = #tpu.pipeline_mode<synchronous>, transform_indices = @transform_2, window_bounds = array<i64: 1, 128>}, {pipeline_mode = #tpu.pipeline_mode<synchronous>, transform_indices = @transform_3, window_bounds = array<i64: 1, 128>}, {pipeline_mode = #tpu.pipeline_mode<synchronous>, transform_indices = @transform_4, window_bounds = array<i64: 1, 128>}, {pipeline_mode = #tpu.pipeline_mode<synchronous>, transform_indices = @transform_5, window_bounds = array<i64: 128, 128>}]} {
    %c0 = arith.constant 0 : index
    %c0_0 = arith.constant 0 : index
    %0 = vector.load %arg1[%c0, %c0_0] : memref<128x128xbf16, #tpu.memory_space<vmem>>, vector<128x128xbf16>
    %c0_1 = arith.constant 0 : index
    %c0_2 = arith.constant 0 : index
    %1 = vector.load %arg2[%c0_1, %c0_2] : memref<128x128xbf16, #tpu.memory_space<vmem>>, vector<128x128xbf16>
    %cst = arith.constant dense<0.000000e+00> : vector<128x128xf32>
    %2 = tpu.matmul %0, %1, %cst {dimension_numbers = #tpu.dot_dimension_numbers<[1], [0], [0], [1], [0, 0, 1, 1], [], []>} : vector<128x128xbf16>, vector<128x128xbf16>, vector<128x128xf32> -> vector<128x128xf32>
    %c0_3 = arith.constant 0 : index
    %c0_4 = arith.constant 0 : index
    %3 = vector.load %arg3[%c0_3, %c0_4] : memref<1x128xf32, #tpu.memory_space<vmem>>, vector<1x128xf32>
    %4 = vector.broadcast %3 : vector<1x128xf32> to vector<128x128xf32>
    %5 = arith.addf %2, %4 : vector<128x128xf32>
    %c0_5 = arith.constant 0 : index
    %c0_6 = arith.constant 0 : index
    %6 = vector.load %arg4[%c0_5, %c0_6] : memref<1x128xf32, #tpu.memory_space<vmem>>, vector<1x128xf32>
    %c0_7 = arith.constant 0 : index
    %c0_8 = arith.constant 0 : index
    %7 = vector.load %arg5[%c0_7, %c0_8] : memref<1x128xf32, #tpu.memory_space<vmem>>, vector<1x128xf32>
    %cst_9 = arith.constant dense<0.000000e+00> : vector<128xf32>
    %8 = vector.multi_reduction <add>, %5, %cst_9 [0] : vector<128x128xf32> to vector<128xf32>
    %9 = vector.shape_cast %8 : vector<128xf32> to vector<1x128xf32>
    %cst_10 = arith.constant 7.812500e-03 : f32
    %10 = vector.broadcast %cst_10 : f32 to vector<1x128xf32>
    %11 = arith.mulf %9, %10 : vector<1x128xf32>
    %12 = arith.mulf %5, %5 : vector<128x128xf32>
    %cst_11 = arith.constant dense<0.000000e+00> : vector<128xf32>
    %13 = vector.multi_reduction <add>, %12, %cst_11 [0] : vector<128x128xf32> to vector<128xf32>
    %14 = vector.shape_cast %13 : vector<128xf32> to vector<1x128xf32>
    %cst_12 = arith.constant 7.812500e-03 : f32
    %15 = vector.broadcast %cst_12 : f32 to vector<1x128xf32>
    %16 = arith.mulf %14, %15 : vector<1x128xf32>
    %17 = arith.mulf %11, %11 : vector<1x128xf32>
    %18 = arith.subf %16, %17 : vector<1x128xf32>
    %cst_13 = arith.constant 0.000000e+00 : f32
    %19 = vector.broadcast %cst_13 : f32 to vector<1x128xf32>
    %20 = arith.maximumf %18, %19 : vector<1x128xf32>
    %cst_14 = arith.constant 9.99999974E-6 : f32
    %21 = vector.broadcast %cst_14 : f32 to vector<1x128xf32>
    %22 = arith.addf %20, %21 : vector<1x128xf32>
    %23 = math.rsqrt %22 : vector<1x128xf32>
    %24 = arith.mulf %6, %23 : vector<1x128xf32>
    %25 = arith.mulf %11, %24 : vector<1x128xf32>
    %26 = arith.subf %7, %25 : vector<1x128xf32>
    %27 = vector.broadcast %24 : vector<1x128xf32> to vector<128x128xf32>
    %28 = arith.mulf %5, %27 : vector<128x128xf32>
    %29 = vector.broadcast %26 : vector<1x128xf32> to vector<128x128xf32>
    %30 = arith.addf %28, %29 : vector<128x128xf32>
    %cst_15 = arith.constant 0.000000e+00 : f32
    %31 = vector.broadcast %cst_15 : f32 to vector<128x128xf32>
    %32 = arith.maximumf %30, %31 : vector<128x128xf32>
    %33 = arith.truncf %32 : vector<128x128xf32> to vector<128x128xbf16>
    %c0_16 = arith.constant 0 : index
    %c0_17 = arith.constant 0 : index
    %34 = vector.load %arg6[%c0_16, %c0_17] : memref<128x128xbf16, #tpu.memory_space<vmem>>, vector<128x128xbf16>
    tpu.vector_store %arg6[%c0_16, %c0_17], %33 {strides = array<i32>} : memref<128x128xbf16, #tpu.memory_space<vmem>>, vector<128x128xbf16>,
    return
  }
  func.func @transform_0(%arg0: i32) -> (i32, i32) {
    %c0_i32 = arith.constant 0 : i32
    %c0_i32_0 = arith.constant 0 : i32
    %c0_i32_1 = arith.constant 0 : i32
    return %c0_i32, %c0_i32_0 : i32, i32
  }
  func.func @transform_1(%arg0: i32) -> (i32, i32) {
    %c0_i32 = arith.constant 0 : i32
    %c0_i32_0 = arith.constant 0 : i32
    %c0_i32_1 = arith.constant 0 : i32
    return %c0_i32, %c0_i32_0 : i32, i32
  }
  func.func @transform_2(%arg0: i32) -> (i32, i32) {
    %c0_i32 = arith.constant 0 : i32
    %c0_i32_0 = arith.constant 0 : i32
    %c0_i32_1 = arith.constant 0 : i32
    return %c0_i32, %c0_i32_0 : i32, i32
  }
  func.func @transform_3(%arg0: i32) -> (i32, i32) {
    %c0_i32 = arith.constant 0 : i32
    %c0_i32_0 = arith.constant 0 : i32
    %c0_i32_1 = arith.constant 0 : i32
    return %c0_i32, %c0_i32_0 : i32, i32
  }
  func.func @transform_4(%arg0: i32) -> (i32, i32) {
    %c0_i32 = arith.constant 0 : i32
    %c0_i32_0 = arith.constant 0 : i32
    %c0_i32_1 = arith.constant 0 : i32
    return %c0_i32, %c0_i32_0 : i32, i32
  }
  func.func @transform_5(%arg0: i32) -> (i32, i32) {
    %c0_i32 = arith.constant 0 : i32
    %c0_i32_0 = arith.constant 0 : i32
    %c0_i32_1 = arith.constant 0 : i32
    return %c0_i32, %c0_i32_0 : i32, i32
  }
}

module attributes {stable_mosaic.version = 11 : i64} {
  func.func @_conv_bn_dsres_gate_kernel(%arg0: i32, %arg1: memref<128x256xbf16, #tpu.memory_space<vmem>>, %arg2: memref<256x128xbf16, #tpu.memory_space<vmem>>, %arg3: memref<1x128xf32, #tpu.memory_space<vmem>>, %arg4: memref<1x128xf32, #tpu.memory_space<vmem>>, %arg5: memref<128x128xbf16, #tpu.memory_space<vmem>>, %arg6: memref<128x128xbf16, #tpu.memory_space<vmem>>, %arg7: memref<1x128xf32, #tpu.memory_space<vmem>>, %arg8: memref<128x128xf32, #tpu.memory_space<vmem>>, %arg9: memref<128x128xbf16, #tpu.memory_space<vmem>>) attributes {dimension_semantics = [#tpu.dimension_semantics<arbitrary>], iteration_bounds = array<i64: 1>, scalar_prefetch = 0 : i64, scratch_operands = 0 : i64, tpu.core_type = #tpu.core_type<tc>, window_params = [{pipeline_mode = #tpu.pipeline_mode<synchronous>, transform_indices = @transform_0, window_bounds = array<i64: 128, 256>}, {pipeline_mode = #tpu.pipeline_mode<synchronous>, transform_indices = @transform_1, window_bounds = array<i64: 256, 128>}, {pipeline_mode = #tpu.pipeline_mode<synchronous>, transform_indices = @transform_2, window_bounds = array<i64: 1, 128>}, {pipeline_mode = #tpu.pipeline_mode<synchronous>, transform_indices = @transform_3, window_bounds = array<i64: 1, 128>}, {pipeline_mode = #tpu.pipeline_mode<synchronous>, transform_indices = @transform_4, window_bounds = array<i64: 128, 128>}, {pipeline_mode = #tpu.pipeline_mode<synchronous>, transform_indices = @transform_5, window_bounds = array<i64: 128, 128>}, {pipeline_mode = #tpu.pipeline_mode<synchronous>, transform_indices = @transform_6, window_bounds = array<i64: 1, 128>}, {pipeline_mode = #tpu.pipeline_mode<synchronous>, transform_indices = @transform_7, window_bounds = array<i64: 128, 128>}, {pipeline_mode = #tpu.pipeline_mode<synchronous>, transform_indices = @transform_8, window_bounds = array<i64: 128, 128>}]} {
    %c0 = arith.constant 0 : index
    %c0_0 = arith.constant 0 : index
    %0 = vector.load %arg1[%c0, %c0_0] : memref<128x256xbf16, #tpu.memory_space<vmem>>, vector<128x256xbf16>
    %c0_1 = arith.constant 0 : index
    %c0_2 = arith.constant 0 : index
    %1 = vector.load %arg2[%c0_1, %c0_2] : memref<256x128xbf16, #tpu.memory_space<vmem>>, vector<256x128xbf16>
    %cst = arith.constant dense<0.000000e+00> : vector<128x128xf32>
    %2 = tpu.matmul %0, %1, %cst {dimension_numbers = #tpu.dot_dimension_numbers<[1], [0], [0], [1], [0, 0, 1, 1], [], []>} : vector<128x256xbf16>, vector<256x128xbf16>, vector<128x128xf32> -> vector<128x128xf32>
    %c0_3 = arith.constant 0 : index
    %c0_4 = arith.constant 0 : index
    %3 = vector.load %arg5[%c0_3, %c0_4] : memref<128x128xbf16, #tpu.memory_space<vmem>>, vector<128x128xbf16>
    %c0_5 = arith.constant 0 : index
    %c0_6 = arith.constant 0 : index
    %4 = vector.load %arg6[%c0_5, %c0_6] : memref<128x128xbf16, #tpu.memory_space<vmem>>, vector<128x128xbf16>
    %cst_7 = arith.constant dense<0.000000e+00> : vector<128x128xf32>
    %5 = tpu.matmul %3, %4, %cst_7 {dimension_numbers = #tpu.dot_dimension_numbers<[1], [0], [0], [1], [0, 0, 1, 1], [], []>} : vector<128x128xbf16>, vector<128x128xbf16>, vector<128x128xf32> -> vector<128x128xf32>
    %c0_8 = arith.constant 0 : index
    %c0_9 = arith.constant 0 : index
    %6 = vector.load %arg7[%c0_8, %c0_9] : memref<1x128xf32, #tpu.memory_space<vmem>>, vector<1x128xf32>
    %7 = vector.broadcast %6 : vector<1x128xf32> to vector<128x128xf32>
    %8 = arith.addf %5, %7 : vector<128x128xf32>
    %c0_10 = arith.constant 0 : index
    %c0_11 = arith.constant 0 : index
    %9 = vector.load %arg3[%c0_10, %c0_11] : memref<1x128xf32, #tpu.memory_space<vmem>>, vector<1x128xf32>
    %c0_12 = arith.constant 0 : index
    %c0_13 = arith.constant 0 : index
    %10 = vector.load %arg4[%c0_12, %c0_13] : memref<1x128xf32, #tpu.memory_space<vmem>>, vector<1x128xf32>
    %cst_14 = arith.constant dense<0.000000e+00> : vector<128xf32>
    %11 = vector.multi_reduction <add>, %2, %cst_14 [0] : vector<128x128xf32> to vector<128xf32>
    %12 = vector.shape_cast %11 : vector<128xf32> to vector<1x128xf32>
    %cst_15 = arith.constant 7.812500e-03 : f32
    %13 = vector.broadcast %cst_15 : f32 to vector<1x128xf32>
    %14 = arith.mulf %12, %13 : vector<1x128xf32>
    %15 = arith.mulf %2, %2 : vector<128x128xf32>
    %cst_16 = arith.constant dense<0.000000e+00> : vector<128xf32>
    %16 = vector.multi_reduction <add>, %15, %cst_16 [0] : vector<128x128xf32> to vector<128xf32>
    %17 = vector.shape_cast %16 : vector<128xf32> to vector<1x128xf32>
    %cst_17 = arith.constant 7.812500e-03 : f32
    %18 = vector.broadcast %cst_17 : f32 to vector<1x128xf32>
    %19 = arith.mulf %17, %18 : vector<1x128xf32>
    %20 = arith.mulf %14, %14 : vector<1x128xf32>
    %21 = arith.subf %19, %20 : vector<1x128xf32>
    %cst_18 = arith.constant 0.000000e+00 : f32
    %22 = vector.broadcast %cst_18 : f32 to vector<1x128xf32>
    %23 = arith.maximumf %21, %22 : vector<1x128xf32>
    %cst_19 = arith.constant 9.99999974E-6 : f32
    %24 = vector.broadcast %cst_19 : f32 to vector<1x128xf32>
    %25 = arith.addf %23, %24 : vector<1x128xf32>
    %26 = math.rsqrt %25 : vector<1x128xf32>
    %27 = arith.mulf %9, %26 : vector<1x128xf32>
    %28 = arith.mulf %14, %27 : vector<1x128xf32>
    %29 = arith.subf %10, %28 : vector<1x128xf32>
    %30 = vector.broadcast %27 : vector<1x128xf32> to vector<128x128xf32>
    %31 = arith.mulf %2, %30 : vector<128x128xf32>
    %32 = vector.broadcast %29 : vector<1x128xf32> to vector<128x128xf32>
    %33 = arith.addf %31, %32 : vector<128x128xf32>
    %34 = arith.addf %33, %8 : vector<128x128xf32>
    %cst_20 = arith.constant 0.000000e+00 : f32
    %35 = vector.broadcast %cst_20 : f32 to vector<128x128xf32>
    %36 = arith.maximumf %34, %35 : vector<128x128xf32>
    %c0_21 = arith.constant 0 : index
    %c0_22 = arith.constant 0 : index
    %37 = vector.load %arg8[%c0_21, %c0_22] : memref<128x128xf32, #tpu.memory_space<vmem>>, vector<128x128xf32>
    %38 = arith.mulf %36, %37 : vector<128x128xf32>
    %39 = arith.truncf %38 : vector<128x128xf32> to vector<128x128xbf16>
    %c0_23 = arith.constant 0 : index
    %c0_24 = arith.constant 0 : index
    %40 = vector.load %arg9[%c0_23, %c0_24] : memref<128x128xbf16, #tpu.memory_space<vmem>>, vector<128x128xbf16>
    tpu.vector_store %arg9[%c0_23, %c0_24], %39 {strides = array<i32>} : memref<128x128xbf16, #tpu.memory_space<vmem>>, vector<128x128xbf16>,
    return
  }
  func.func @transform_0(%arg0: i32) -> (i32, i32) {
    %c0_i32 = arith.constant 0 : i32
    %c0_i32_0 = arith.constant 0 : i32
    %c0_i32_1 = arith.constant 0 : i32
    return %c0_i32, %c0_i32_0 : i32, i32
  }
  func.func @transform_1(%arg0: i32) -> (i32, i32) {
    %c0_i32 = arith.constant 0 : i32
    %c0_i32_0 = arith.constant 0 : i32
    %c0_i32_1 = arith.constant 0 : i32
    return %c0_i32, %c0_i32_0 : i32, i32
  }
  func.func @transform_2(%arg0: i32) -> (i32, i32) {
    %c0_i32 = arith.constant 0 : i32
    %c0_i32_0 = arith.constant 0 : i32
    %c0_i32_1 = arith.constant 0 : i32
    return %c0_i32, %c0_i32_0 : i32, i32
  }
  func.func @transform_3(%arg0: i32) -> (i32, i32) {
    %c0_i32 = arith.constant 0 : i32
    %c0_i32_0 = arith.constant 0 : i32
    %c0_i32_1 = arith.constant 0 : i32
    return %c0_i32, %c0_i32_0 : i32, i32
  }
  func.func @transform_4(%arg0: i32) -> (i32, i32) {
    %c0_i32 = arith.constant 0 : i32
    %c0_i32_0 = arith.constant 0 : i32
    %c0_i32_1 = arith.constant 0 : i32
    return %c0_i32, %c0_i32_0 : i32, i32
  }
  func.func @transform_5(%arg0: i32) -> (i32, i32) {
    %c0_i32 = arith.constant 0 : i32
    %c0_i32_0 = arith.constant 0 : i32
    %c0_i32_1 = arith.constant 0 : i32
    return %c0_i32, %c0_i32_0 : i32, i32
  }
  func.func @transform_6(%arg0: i32) -> (i32, i32) {
    %c0_i32 = arith.constant 0 : i32
    %c0_i32_0 = arith.constant 0 : i32
    %c0_i32_1 = arith.constant 0 : i32
    return %c0_i32, %c0_i32_0 : i32, i32
  }
  func.func @transform_7(%arg0: i32) -> (i32, i32) {
    %c0_i32 = arith.constant 0 : i32
    %c0_i32_0 = arith.constant 0 : i32
    %c0_i32_1 = arith.constant 0 : i32
    return %c0_i32, %c0_i32_0 : i32, i32
  }
  func.func @transform_8(%arg0: i32) -> (i32, i32) {
    %c0_i32 = arith.constant 0 : i32
    %c0_i32_0 = arith.constant 0 : i32
    %c0_i32_1 = arith.constant 0 : i32
    return %c0_i32, %c0_i32_0 : i32, i32
  }
}

module attributes {stable_mosaic.version = 11 : i64} {
  func.func @_conv_bn_relu_kernel(%arg0: i32, %arg1: memref<128x256xbf16, #tpu.memory_space<vmem>>, %arg2: memref<256x128xbf16, #tpu.memory_space<vmem>>, %arg3: memref<1x128xf32, #tpu.memory_space<vmem>>, %arg4: memref<1x128xf32, #tpu.memory_space<vmem>>, %arg5: memref<1x128xf32, #tpu.memory_space<vmem>>, %arg6: memref<128x128xbf16, #tpu.memory_space<vmem>>) attributes {dimension_semantics = [#tpu.dimension_semantics<arbitrary>], iteration_bounds = array<i64: 1>, scalar_prefetch = 0 : i64, scratch_operands = 0 : i64, tpu.core_type = #tpu.core_type<tc>, window_params = [{pipeline_mode = #tpu.pipeline_mode<synchronous>, transform_indices = @transform_0, window_bounds = array<i64: 128, 256>}, {pipeline_mode = #tpu.pipeline_mode<synchronous>, transform_indices = @transform_1, window_bounds = array<i64: 256, 128>}, {pipeline_mode = #tpu.pipeline_mode<synchronous>, transform_indices = @transform_2, window_bounds = array<i64: 1, 128>}, {pipeline_mode = #tpu.pipeline_mode<synchronous>, transform_indices = @transform_3, window_bounds = array<i64: 1, 128>}, {pipeline_mode = #tpu.pipeline_mode<synchronous>, transform_indices = @transform_4, window_bounds = array<i64: 1, 128>}, {pipeline_mode = #tpu.pipeline_mode<synchronous>, transform_indices = @transform_5, window_bounds = array<i64: 128, 128>}]} {
    %c0 = arith.constant 0 : index
    %c0_0 = arith.constant 0 : index
    %0 = vector.load %arg1[%c0, %c0_0] : memref<128x256xbf16, #tpu.memory_space<vmem>>, vector<128x256xbf16>
    %c0_1 = arith.constant 0 : index
    %c0_2 = arith.constant 0 : index
    %1 = vector.load %arg2[%c0_1, %c0_2] : memref<256x128xbf16, #tpu.memory_space<vmem>>, vector<256x128xbf16>
    %cst = arith.constant dense<0.000000e+00> : vector<128x128xf32>
    %2 = tpu.matmul %0, %1, %cst {dimension_numbers = #tpu.dot_dimension_numbers<[1], [0], [0], [1], [0, 0, 1, 1], [], []>} : vector<128x256xbf16>, vector<256x128xbf16>, vector<128x128xf32> -> vector<128x128xf32>
    %c0_3 = arith.constant 0 : index
    %c0_4 = arith.constant 0 : index
    %3 = vector.load %arg3[%c0_3, %c0_4] : memref<1x128xf32, #tpu.memory_space<vmem>>, vector<1x128xf32>
    %4 = vector.broadcast %3 : vector<1x128xf32> to vector<128x128xf32>
    %5 = arith.addf %2, %4 : vector<128x128xf32>
    %c0_5 = arith.constant 0 : index
    %c0_6 = arith.constant 0 : index
    %6 = vector.load %arg4[%c0_5, %c0_6] : memref<1x128xf32, #tpu.memory_space<vmem>>, vector<1x128xf32>
    %c0_7 = arith.constant 0 : index
    %c0_8 = arith.constant 0 : index
    %7 = vector.load %arg5[%c0_7, %c0_8] : memref<1x128xf32, #tpu.memory_space<vmem>>, vector<1x128xf32>
    %cst_9 = arith.constant dense<0.000000e+00> : vector<128xf32>
    %8 = vector.multi_reduction <add>, %5, %cst_9 [0] : vector<128x128xf32> to vector<128xf32>
    %9 = vector.shape_cast %8 : vector<128xf32> to vector<1x128xf32>
    %cst_10 = arith.constant 7.812500e-03 : f32
    %10 = vector.broadcast %cst_10 : f32 to vector<1x128xf32>
    %11 = arith.mulf %9, %10 : vector<1x128xf32>
    %12 = arith.mulf %5, %5 : vector<128x128xf32>
    %cst_11 = arith.constant dense<0.000000e+00> : vector<128xf32>
    %13 = vector.multi_reduction <add>, %12, %cst_11 [0] : vector<128x128xf32> to vector<128xf32>
    %14 = vector.shape_cast %13 : vector<128xf32> to vector<1x128xf32>
    %cst_12 = arith.constant 7.812500e-03 : f32
    %15 = vector.broadcast %cst_12 : f32 to vector<1x128xf32>
    %16 = arith.mulf %14, %15 : vector<1x128xf32>
    %17 = arith.mulf %11, %11 : vector<1x128xf32>
    %18 = arith.subf %16, %17 : vector<1x128xf32>
    %cst_13 = arith.constant 0.000000e+00 : f32
    %19 = vector.broadcast %cst_13 : f32 to vector<1x128xf32>
    %20 = arith.maximumf %18, %19 : vector<1x128xf32>
    %cst_14 = arith.constant 9.99999974E-6 : f32
    %21 = vector.broadcast %cst_14 : f32 to vector<1x128xf32>
    %22 = arith.addf %20, %21 : vector<1x128xf32>
    %23 = math.rsqrt %22 : vector<1x128xf32>
    %24 = arith.mulf %6, %23 : vector<1x128xf32>
    %25 = arith.mulf %11, %24 : vector<1x128xf32>
    %26 = arith.subf %7, %25 : vector<1x128xf32>
    %27 = vector.broadcast %24 : vector<1x128xf32> to vector<128x128xf32>
    %28 = arith.mulf %5, %27 : vector<128x128xf32>
    %29 = vector.broadcast %26 : vector<1x128xf32> to vector<128x128xf32>
    %30 = arith.addf %28, %29 : vector<128x128xf32>
    %cst_15 = arith.constant 0.000000e+00 : f32
    %31 = vector.broadcast %cst_15 : f32 to vector<128x128xf32>
    %32 = arith.maximumf %30, %31 : vector<128x128xf32>
    %33 = arith.truncf %32 : vector<128x128xf32> to vector<128x128xbf16>
    %c0_16 = arith.constant 0 : index
    %c0_17 = arith.constant 0 : index
    %34 = vector.load %arg6[%c0_16, %c0_17] : memref<128x128xbf16, #tpu.memory_space<vmem>>, vector<128x128xbf16>
    tpu.vector_store %arg6[%c0_16, %c0_17], %33 {strides = array<i32>} : memref<128x128xbf16, #tpu.memory_space<vmem>>, vector<128x128xbf16>,
    return
  }
  func.func @transform_0(%arg0: i32) -> (i32, i32) {
    %c0_i32 = arith.constant 0 : i32
    %c0_i32_0 = arith.constant 0 : i32
    %c0_i32_1 = arith.constant 0 : i32
    return %c0_i32, %c0_i32_0 : i32, i32
  }
  func.func @transform_1(%arg0: i32) -> (i32, i32) {
    %c0_i32 = arith.constant 0 : i32
    %c0_i32_0 = arith.constant 0 : i32
    %c0_i32_1 = arith.constant 0 : i32
    return %c0_i32, %c0_i32_0 : i32, i32
  }
  func.func @transform_2(%arg0: i32) -> (i32, i32) {
    %c0_i32 = arith.constant 0 : i32
    %c0_i32_0 = arith.constant 0 : i32
    %c0_i32_1 = arith.constant 0 : i32
    return %c0_i32, %c0_i32_0 : i32, i32
  }
  func.func @transform_3(%arg0: i32) -> (i32, i32) {
    %c0_i32 = arith.constant 0 : i32
    %c0_i32_0 = arith.constant 0 : i32
    %c0_i32_1 = arith.constant 0 : i32
    return %c0_i32, %c0_i32_0 : i32, i32
  }
  func.func @transform_4(%arg0: i32) -> (i32, i32) {
    %c0_i32 = arith.constant 0 : i32
    %c0_i32_0 = arith.constant 0 : i32
    %c0_i32_1 = arith.constant 0 : i32
    return %c0_i32, %c0_i32_0 : i32, i32
  }
  func.func @transform_5(%arg0: i32) -> (i32, i32) {
    %c0_i32 = arith.constant 0 : i32
    %c0_i32_0 = arith.constant 0 : i32
    %c0_i32_1 = arith.constant 0 : i32
    return %c0_i32, %c0_i32_0 : i32, i32
  }
}

module attributes {stable_mosaic.version = 11 : i64} {
  func.func @_conv_bn_res_gate_kernel(%arg0: i32, %arg1: memref<128x256xbf16, #tpu.memory_space<vmem>>, %arg2: memref<256x128xbf16, #tpu.memory_space<vmem>>, %arg3: memref<1x128xf32, #tpu.memory_space<vmem>>, %arg4: memref<1x128xf32, #tpu.memory_space<vmem>>, %arg5: memref<128x128xbf16, #tpu.memory_space<vmem>>, %arg6: memref<128x128xf32, #tpu.memory_space<vmem>>, %arg7: memref<128x128xbf16, #tpu.memory_space<vmem>>) attributes {dimension_semantics = [#tpu.dimension_semantics<arbitrary>], iteration_bounds = array<i64: 1>, scalar_prefetch = 0 : i64, scratch_operands = 0 : i64, tpu.core_type = #tpu.core_type<tc>, window_params = [{pipeline_mode = #tpu.pipeline_mode<synchronous>, transform_indices = @transform_0, window_bounds = array<i64: 128, 256>}, {pipeline_mode = #tpu.pipeline_mode<synchronous>, transform_indices = @transform_1, window_bounds = array<i64: 256, 128>}, {pipeline_mode = #tpu.pipeline_mode<synchronous>, transform_indices = @transform_2, window_bounds = array<i64: 1, 128>}, {pipeline_mode = #tpu.pipeline_mode<synchronous>, transform_indices = @transform_3, window_bounds = array<i64: 1, 128>}, {pipeline_mode = #tpu.pipeline_mode<synchronous>, transform_indices = @transform_4, window_bounds = array<i64: 128, 128>}, {pipeline_mode = #tpu.pipeline_mode<synchronous>, transform_indices = @transform_5, window_bounds = array<i64: 128, 128>}, {pipeline_mode = #tpu.pipeline_mode<synchronous>, transform_indices = @transform_6, window_bounds = array<i64: 128, 128>}]} {
    %c0 = arith.constant 0 : index
    %c0_0 = arith.constant 0 : index
    %0 = vector.load %arg1[%c0, %c0_0] : memref<128x256xbf16, #tpu.memory_space<vmem>>, vector<128x256xbf16>
    %c0_1 = arith.constant 0 : index
    %c0_2 = arith.constant 0 : index
    %1 = vector.load %arg2[%c0_1, %c0_2] : memref<256x128xbf16, #tpu.memory_space<vmem>>, vector<256x128xbf16>
    %cst = arith.constant dense<0.000000e+00> : vector<128x128xf32>
    %2 = tpu.matmul %0, %1, %cst {dimension_numbers = #tpu.dot_dimension_numbers<[1], [0], [0], [1], [0, 0, 1, 1], [], []>} : vector<128x256xbf16>, vector<256x128xbf16>, vector<128x128xf32> -> vector<128x128xf32>
    %c0_3 = arith.constant 0 : index
    %c0_4 = arith.constant 0 : index
    %3 = vector.load %arg3[%c0_3, %c0_4] : memref<1x128xf32, #tpu.memory_space<vmem>>, vector<1x128xf32>
    %c0_5 = arith.constant 0 : index
    %c0_6 = arith.constant 0 : index
    %4 = vector.load %arg4[%c0_5, %c0_6] : memref<1x128xf32, #tpu.memory_space<vmem>>, vector<1x128xf32>
    %cst_7 = arith.constant dense<0.000000e+00> : vector<128xf32>
    %5 = vector.multi_reduction <add>, %2, %cst_7 [0] : vector<128x128xf32> to vector<128xf32>
    %6 = vector.shape_cast %5 : vector<128xf32> to vector<1x128xf32>
    %cst_8 = arith.constant 7.812500e-03 : f32
    %7 = vector.broadcast %cst_8 : f32 to vector<1x128xf32>
    %8 = arith.mulf %6, %7 : vector<1x128xf32>
    %9 = arith.mulf %2, %2 : vector<128x128xf32>
    %cst_9 = arith.constant dense<0.000000e+00> : vector<128xf32>
    %10 = vector.multi_reduction <add>, %9, %cst_9 [0] : vector<128x128xf32> to vector<128xf32>
    %11 = vector.shape_cast %10 : vector<128xf32> to vector<1x128xf32>
    %cst_10 = arith.constant 7.812500e-03 : f32
    %12 = vector.broadcast %cst_10 : f32 to vector<1x128xf32>
    %13 = arith.mulf %11, %12 : vector<1x128xf32>
    %14 = arith.mulf %8, %8 : vector<1x128xf32>
    %15 = arith.subf %13, %14 : vector<1x128xf32>
    %cst_11 = arith.constant 0.000000e+00 : f32
    %16 = vector.broadcast %cst_11 : f32 to vector<1x128xf32>
    %17 = arith.maximumf %15, %16 : vector<1x128xf32>
    %cst_12 = arith.constant 9.99999974E-6 : f32
    %18 = vector.broadcast %cst_12 : f32 to vector<1x128xf32>
    %19 = arith.addf %17, %18 : vector<1x128xf32>
    %20 = math.rsqrt %19 : vector<1x128xf32>
    %21 = arith.mulf %3, %20 : vector<1x128xf32>
    %22 = arith.mulf %8, %21 : vector<1x128xf32>
    %23 = arith.subf %4, %22 : vector<1x128xf32>
    %24 = vector.broadcast %21 : vector<1x128xf32> to vector<128x128xf32>
    %25 = arith.mulf %2, %24 : vector<128x128xf32>
    %26 = vector.broadcast %23 : vector<1x128xf32> to vector<128x128xf32>
    %27 = arith.addf %25, %26 : vector<128x128xf32>
    %c0_13 = arith.constant 0 : index
    %c0_14 = arith.constant 0 : index
    %28 = vector.load %arg5[%c0_13, %c0_14] : memref<128x128xbf16, #tpu.memory_space<vmem>>, vector<128x128xbf16>
    %29 = arith.extf %28 : vector<128x128xbf16> to vector<128x128xf32>
    %30 = arith.addf %27, %29 : vector<128x128xf32>
    %cst_15 = arith.constant 0.000000e+00 : f32
    %31 = vector.broadcast %cst_15 : f32 to vector<128x128xf32>
    %32 = arith.maximumf %30, %31 : vector<128x128xf32>
    %c0_16 = arith.constant 0 : index
    %c0_17 = arith.constant 0 : index
    %33 = vector.load %arg6[%c0_16, %c0_17] : memref<128x128xf32, #tpu.memory_space<vmem>>, vector<128x128xf32>
    %34 = arith.mulf %32, %33 : vector<128x128xf32>
    %35 = arith.truncf %34 : vector<128x128xf32> to vector<128x128xbf16>
    %c0_18 = arith.constant 0 : index
    %c0_19 = arith.constant 0 : index
    %36 = vector.load %arg7[%c0_18, %c0_19] : memref<128x128xbf16, #tpu.memory_space<vmem>>, vector<128x128xbf16>
    tpu.vector_store %arg7[%c0_18, %c0_19], %35 {strides = array<i32>} : memref<128x128xbf16, #tpu.memory_space<vmem>>, vector<128x128xbf16>,
    return
  }
  func.func @transform_0(%arg0: i32) -> (i32, i32) {
    %c0_i32 = arith.constant 0 : i32
    %c0_i32_0 = arith.constant 0 : i32
    %c0_i32_1 = arith.constant 0 : i32
    return %c0_i32, %c0_i32_0 : i32, i32
  }
  func.func @transform_1(%arg0: i32) -> (i32, i32) {
    %c0_i32 = arith.constant 0 : i32
    %c0_i32_0 = arith.constant 0 : i32
    %c0_i32_1 = arith.constant 0 : i32
    return %c0_i32, %c0_i32_0 : i32, i32
  }
  func.func @transform_2(%arg0: i32) -> (i32, i32) {
    %c0_i32 = arith.constant 0 : i32
    %c0_i32_0 = arith.constant 0 : i32
    %c0_i32_1 = arith.constant 0 : i32
    return %c0_i32, %c0_i32_0 : i32, i32
  }
  func.func @transform_3(%arg0: i32) -> (i32, i32) {
    %c0_i32 = arith.constant 0 : i32
    %c0_i32_0 = arith.constant 0 : i32
    %c0_i32_1 = arith.constant 0 : i32
    return %c0_i32, %c0_i32_0 : i32, i32
  }
  func.func @transform_4(%arg0: i32) -> (i32, i32) {
    %c0_i32 = arith.constant 0 : i32
    %c0_i32_0 = arith.constant 0 : i32
    %c0_i32_1 = arith.constant 0 : i32
    return %c0_i32, %c0_i32_0 : i32, i32
  }
  func.func @transform_5(%arg0: i32) -> (i32, i32) {
    %c0_i32 = arith.constant 0 : i32
    %c0_i32_0 = arith.constant 0 : i32
    %c0_i32_1 = arith.constant 0 : i32
    return %c0_i32, %c0_i32_0 : i32, i32
  }
  func.func @transform_6(%arg0: i32) -> (i32, i32) {
    %c0_i32 = arith.constant 0 : i32
    %c0_i32_0 = arith.constant 0 : i32
    %c0_i32_1 = arith.constant 0 : i32
    return %c0_i32, %c0_i32_0 : i32, i32
  }
}

module attributes {stable_mosaic.version = 11 : i64} {
  func.func @_conv_bn_relu_kernel(%arg0: i32, %arg1: memref<32x256xbf16, #tpu.memory_space<vmem>>, %arg2: memref<256x128xbf16, #tpu.memory_space<vmem>>, %arg3: memref<1x128xf32, #tpu.memory_space<vmem>>, %arg4: memref<1x128xf32, #tpu.memory_space<vmem>>, %arg5: memref<1x128xf32, #tpu.memory_space<vmem>>, %arg6: memref<32x128xbf16, #tpu.memory_space<vmem>>) attributes {dimension_semantics = [#tpu.dimension_semantics<arbitrary>], iteration_bounds = array<i64: 1>, scalar_prefetch = 0 : i64, scratch_operands = 0 : i64, tpu.core_type = #tpu.core_type<tc>, window_params = [{pipeline_mode = #tpu.pipeline_mode<synchronous>, transform_indices = @transform_0, window_bounds = array<i64: 32, 256>}, {pipeline_mode = #tpu.pipeline_mode<synchronous>, transform_indices = @transform_1, window_bounds = array<i64: 256, 128>}, {pipeline_mode = #tpu.pipeline_mode<synchronous>, transform_indices = @transform_2, window_bounds = array<i64: 1, 128>}, {pipeline_mode = #tpu.pipeline_mode<synchronous>, transform_indices = @transform_3, window_bounds = array<i64: 1, 128>}, {pipeline_mode = #tpu.pipeline_mode<synchronous>, transform_indices = @transform_4, window_bounds = array<i64: 1, 128>}, {pipeline_mode = #tpu.pipeline_mode<synchronous>, transform_indices = @transform_5, window_bounds = array<i64: 32, 128>}]} {
    %c0 = arith.constant 0 : index
    %c0_0 = arith.constant 0 : index
    %0 = vector.load %arg1[%c0, %c0_0] : memref<32x256xbf16, #tpu.memory_space<vmem>>, vector<32x256xbf16>
    %c0_1 = arith.constant 0 : index
    %c0_2 = arith.constant 0 : index
    %1 = vector.load %arg2[%c0_1, %c0_2] : memref<256x128xbf16, #tpu.memory_space<vmem>>, vector<256x128xbf16>
    %cst = arith.constant dense<0.000000e+00> : vector<32x128xf32>
    %2 = tpu.matmul %0, %1, %cst {dimension_numbers = #tpu.dot_dimension_numbers<[1], [0], [0], [1], [0, 0, 1, 1], [], []>} : vector<32x256xbf16>, vector<256x128xbf16>, vector<32x128xf32> -> vector<32x128xf32>
    %c0_3 = arith.constant 0 : index
    %c0_4 = arith.constant 0 : index
    %3 = vector.load %arg3[%c0_3, %c0_4] : memref<1x128xf32, #tpu.memory_space<vmem>>, vector<1x128xf32>
    %4 = vector.broadcast %3 : vector<1x128xf32> to vector<32x128xf32>
    %5 = arith.addf %2, %4 : vector<32x128xf32>
    %c0_5 = arith.constant 0 : index
    %c0_6 = arith.constant 0 : index
    %6 = vector.load %arg4[%c0_5, %c0_6] : memref<1x128xf32, #tpu.memory_space<vmem>>, vector<1x128xf32>
    %c0_7 = arith.constant 0 : index
    %c0_8 = arith.constant 0 : index
    %7 = vector.load %arg5[%c0_7, %c0_8] : memref<1x128xf32, #tpu.memory_space<vmem>>, vector<1x128xf32>
    %cst_9 = arith.constant dense<0.000000e+00> : vector<128xf32>
    %8 = vector.multi_reduction <add>, %5, %cst_9 [0] : vector<32x128xf32> to vector<128xf32>
    %9 = vector.shape_cast %8 : vector<128xf32> to vector<1x128xf32>
    %cst_10 = arith.constant 3.125000e-02 : f32
    %10 = vector.broadcast %cst_10 : f32 to vector<1x128xf32>
    %11 = arith.mulf %9, %10 : vector<1x128xf32>
    %12 = arith.mulf %5, %5 : vector<32x128xf32>
    %cst_11 = arith.constant dense<0.000000e+00> : vector<128xf32>
    %13 = vector.multi_reduction <add>, %12, %cst_11 [0] : vector<32x128xf32> to vector<128xf32>
    %14 = vector.shape_cast %13 : vector<128xf32> to vector<1x128xf32>
    %cst_12 = arith.constant 3.125000e-02 : f32
    %15 = vector.broadcast %cst_12 : f32 to vector<1x128xf32>
    %16 = arith.mulf %14, %15 : vector<1x128xf32>
    %17 = arith.mulf %11, %11 : vector<1x128xf32>
    %18 = arith.subf %16, %17 : vector<1x128xf32>
    %cst_13 = arith.constant 0.000000e+00 : f32
    %19 = vector.broadcast %cst_13 : f32 to vector<1x128xf32>
    %20 = arith.maximumf %18, %19 : vector<1x128xf32>
    %cst_14 = arith.constant 9.99999974E-6 : f32
    %21 = vector.broadcast %cst_14 : f32 to vector<1x128xf32>
    %22 = arith.addf %20, %21 : vector<1x128xf32>
    %23 = math.rsqrt %22 : vector<1x128xf32>
    %24 = arith.mulf %6, %23 : vector<1x128xf32>
    %25 = arith.mulf %11, %24 : vector<1x128xf32>
    %26 = arith.subf %7, %25 : vector<1x128xf32>
    %27 = vector.broadcast %24 : vector<1x128xf32> to vector<32x128xf32>
    %28 = arith.mulf %5, %27 : vector<32x128xf32>
    %29 = vector.broadcast %26 : vector<1x128xf32> to vector<32x128xf32>
    %30 = arith.addf %28, %29 : vector<32x128xf32>
    %cst_15 = arith.constant 0.000000e+00 : f32
    %31 = vector.broadcast %cst_15 : f32 to vector<32x128xf32>
    %32 = arith.maximumf %30, %31 : vector<32x128xf32>
    %33 = arith.truncf %32 : vector<32x128xf32> to vector<32x128xbf16>
    %c0_16 = arith.constant 0 : index
    %c0_17 = arith.constant 0 : index
    %34 = vector.load %arg6[%c0_16, %c0_17] : memref<32x128xbf16, #tpu.memory_space<vmem>>, vector<32x128xbf16>
    tpu.vector_store %arg6[%c0_16, %c0_17], %33 {strides = array<i32>} : memref<32x128xbf16, #tpu.memory_space<vmem>>, vector<32x128xbf16>,
    return
  }
  func.func @transform_0(%arg0: i32) -> (i32, i32) {
    %c0_i32 = arith.constant 0 : i32
    %c0_i32_0 = arith.constant 0 : i32
    %c0_i32_1 = arith.constant 0 : i32
    return %c0_i32, %c0_i32_0 : i32, i32
  }
  func.func @transform_1(%arg0: i32) -> (i32, i32) {
    %c0_i32 = arith.constant 0 : i32
    %c0_i32_0 = arith.constant 0 : i32
    %c0_i32_1 = arith.constant 0 : i32
    return %c0_i32, %c0_i32_0 : i32, i32
  }
  func.func @transform_2(%arg0: i32) -> (i32, i32) {
    %c0_i32 = arith.constant 0 : i32
    %c0_i32_0 = arith.constant 0 : i32
    %c0_i32_1 = arith.constant 0 : i32
    return %c0_i32, %c0_i32_0 : i32, i32
  }
  func.func @transform_3(%arg0: i32) -> (i32, i32) {
    %c0_i32 = arith.constant 0 : i32
    %c0_i32_0 = arith.constant 0 : i32
    %c0_i32_1 = arith.constant 0 : i32
    return %c0_i32, %c0_i32_0 : i32, i32
  }
  func.func @transform_4(%arg0: i32) -> (i32, i32) {
    %c0_i32 = arith.constant 0 : i32
    %c0_i32_0 = arith.constant 0 : i32
    %c0_i32_1 = arith.constant 0 : i32
    return %c0_i32, %c0_i32_0 : i32, i32
  }
  func.func @transform_5(%arg0: i32) -> (i32, i32) {
    %c0_i32 = arith.constant 0 : i32
    %c0_i32_0 = arith.constant 0 : i32
    %c0_i32_1 = arith.constant 0 : i32
    return %c0_i32, %c0_i32_0 : i32, i32
  }
}

module attributes {stable_mosaic.version = 11 : i64} {
  func.func @_conv_bn_res_gate_kernel(%arg0: i32, %arg1: memref<32x384xbf16, #tpu.memory_space<vmem>>, %arg2: memref<384x128xbf16, #tpu.memory_space<vmem>>, %arg3: memref<1x128xf32, #tpu.memory_space<vmem>>, %arg4: memref<1x128xf32, #tpu.memory_space<vmem>>, %arg5: memref<32x128xbf16, #tpu.memory_space<vmem>>, %arg6: memref<32x128xf32, #tpu.memory_space<vmem>>, %arg7: memref<32x128xbf16, #tpu.memory_space<vmem>>) attributes {dimension_semantics = [#tpu.dimension_semantics<arbitrary>], iteration_bounds = array<i64: 1>, scalar_prefetch = 0 : i64, scratch_operands = 0 : i64, tpu.core_type = #tpu.core_type<tc>, window_params = [{pipeline_mode = #tpu.pipeline_mode<synchronous>, transform_indices = @transform_0, window_bounds = array<i64: 32, 384>}, {pipeline_mode = #tpu.pipeline_mode<synchronous>, transform_indices = @transform_1, window_bounds = array<i64: 384, 128>}, {pipeline_mode = #tpu.pipeline_mode<synchronous>, transform_indices = @transform_2, window_bounds = array<i64: 1, 128>}, {pipeline_mode = #tpu.pipeline_mode<synchronous>, transform_indices = @transform_3, window_bounds = array<i64: 1, 128>}, {pipeline_mode = #tpu.pipeline_mode<synchronous>, transform_indices = @transform_4, window_bounds = array<i64: 32, 128>}, {pipeline_mode = #tpu.pipeline_mode<synchronous>, transform_indices = @transform_5, window_bounds = array<i64: 32, 128>}, {pipeline_mode = #tpu.pipeline_mode<synchronous>, transform_indices = @transform_6, window_bounds = array<i64: 32, 128>}]} {
    %c0 = arith.constant 0 : index
    %c0_0 = arith.constant 0 : index
    %0 = vector.load %arg1[%c0, %c0_0] : memref<32x384xbf16, #tpu.memory_space<vmem>>, vector<32x384xbf16>
    %c0_1 = arith.constant 0 : index
    %c0_2 = arith.constant 0 : index
    %1 = vector.load %arg2[%c0_1, %c0_2] : memref<384x128xbf16, #tpu.memory_space<vmem>>, vector<384x128xbf16>
    %cst = arith.constant dense<0.000000e+00> : vector<32x128xf32>
    %2 = tpu.matmul %0, %1, %cst {dimension_numbers = #tpu.dot_dimension_numbers<[1], [0], [0], [1], [0, 0, 1, 1], [], []>} : vector<32x384xbf16>, vector<384x128xbf16>, vector<32x128xf32> -> vector<32x128xf32>
    %c0_3 = arith.constant 0 : index
    %c0_4 = arith.constant 0 : index
    %3 = vector.load %arg3[%c0_3, %c0_4] : memref<1x128xf32, #tpu.memory_space<vmem>>, vector<1x128xf32>
    %c0_5 = arith.constant 0 : index
    %c0_6 = arith.constant 0 : index
    %4 = vector.load %arg4[%c0_5, %c0_6] : memref<1x128xf32, #tpu.memory_space<vmem>>, vector<1x128xf32>
    %cst_7 = arith.constant dense<0.000000e+00> : vector<128xf32>
    %5 = vector.multi_reduction <add>, %2, %cst_7 [0] : vector<32x128xf32> to vector<128xf32>
    %6 = vector.shape_cast %5 : vector<128xf32> to vector<1x128xf32>
    %cst_8 = arith.constant 3.125000e-02 : f32
    %7 = vector.broadcast %cst_8 : f32 to vector<1x128xf32>
    %8 = arith.mulf %6, %7 : vector<1x128xf32>
    %9 = arith.mulf %2, %2 : vector<32x128xf32>
    %cst_9 = arith.constant dense<0.000000e+00> : vector<128xf32>
    %10 = vector.multi_reduction <add>, %9, %cst_9 [0] : vector<32x128xf32> to vector<128xf32>
    %11 = vector.shape_cast %10 : vector<128xf32> to vector<1x128xf32>
    %cst_10 = arith.constant 3.125000e-02 : f32
    %12 = vector.broadcast %cst_10 : f32 to vector<1x128xf32>
    %13 = arith.mulf %11, %12 : vector<1x128xf32>
    %14 = arith.mulf %8, %8 : vector<1x128xf32>
    %15 = arith.subf %13, %14 : vector<1x128xf32>
    %cst_11 = arith.constant 0.000000e+00 : f32
    %16 = vector.broadcast %cst_11 : f32 to vector<1x128xf32>
    %17 = arith.maximumf %15, %16 : vector<1x128xf32>
    %cst_12 = arith.constant 9.99999974E-6 : f32
    %18 = vector.broadcast %cst_12 : f32 to vector<1x128xf32>
    %19 = arith.addf %17, %18 : vector<1x128xf32>
    %20 = math.rsqrt %19 : vector<1x128xf32>
    %21 = arith.mulf %3, %20 : vector<1x128xf32>
    %22 = arith.mulf %8, %21 : vector<1x128xf32>
    %23 = arith.subf %4, %22 : vector<1x128xf32>
    %24 = vector.broadcast %21 : vector<1x128xf32> to vector<32x128xf32>
    %25 = arith.mulf %2, %24 : vector<32x128xf32>
    %26 = vector.broadcast %23 : vector<1x128xf32> to vector<32x128xf32>
    %27 = arith.addf %25, %26 : vector<32x128xf32>
    %c0_13 = arith.constant 0 : index
    %c0_14 = arith.constant 0 : index
    %28 = vector.load %arg5[%c0_13, %c0_14] : memref<32x128xbf16, #tpu.memory_space<vmem>>, vector<32x128xbf16>
    %29 = arith.extf %28 : vector<32x128xbf16> to vector<32x128xf32>
    %30 = arith.addf %27, %29 : vector<32x128xf32>
    %cst_15 = arith.constant 0.000000e+00 : f32
    %31 = vector.broadcast %cst_15 : f32 to vector<32x128xf32>
    %32 = arith.maximumf %30, %31 : vector<32x128xf32>
    %c0_16 = arith.constant 0 : index
    %c0_17 = arith.constant 0 : index
    %33 = vector.load %arg6[%c0_16, %c0_17] : memref<32x128xf32, #tpu.memory_space<vmem>>, vector<32x128xf32>
    %34 = arith.mulf %32, %33 : vector<32x128xf32>
    %35 = arith.truncf %34 : vector<32x128xf32> to vector<32x128xbf16>
    %c0_18 = arith.constant 0 : index
    %c0_19 = arith.constant 0 : index
    %36 = vector.load %arg7[%c0_18, %c0_19] : memref<32x128xbf16, #tpu.memory_space<vmem>>, vector<32x128xbf16>
    tpu.vector_store %arg7[%c0_18, %c0_19], %35 {strides = array<i32>} : memref<32x128xbf16, #tpu.memory_space<vmem>>, vector<32x128xbf16>,
    return
  }
  func.func @transform_0(%arg0: i32) -> (i32, i32) {
    %c0_i32 = arith.constant 0 : i32
    %c0_i32_0 = arith.constant 0 : i32
    %c0_i32_1 = arith.constant 0 : i32
    return %c0_i32, %c0_i32_0 : i32, i32
  }
  func.func @transform_1(%arg0: i32) -> (i32, i32) {
    %c0_i32 = arith.constant 0 : i32
    %c0_i32_0 = arith.constant 0 : i32
    %c0_i32_1 = arith.constant 0 : i32
    return %c0_i32, %c0_i32_0 : i32, i32
  }
  func.func @transform_2(%arg0: i32) -> (i32, i32) {
    %c0_i32 = arith.constant 0 : i32
    %c0_i32_0 = arith.constant 0 : i32
    %c0_i32_1 = arith.constant 0 : i32
    return %c0_i32, %c0_i32_0 : i32, i32
  }
  func.func @transform_3(%arg0: i32) -> (i32, i32) {
    %c0_i32 = arith.constant 0 : i32
    %c0_i32_0 = arith.constant 0 : i32
    %c0_i32_1 = arith.constant 0 : i32
    return %c0_i32, %c0_i32_0 : i32, i32
  }
  func.func @transform_4(%arg0: i32) -> (i32, i32) {
    %c0_i32 = arith.constant 0 : i32
    %c0_i32_0 = arith.constant 0 : i32
    %c0_i32_1 = arith.constant 0 : i32
    return %c0_i32, %c0_i32_0 : i32, i32
  }
  func.func @transform_5(%arg0: i32) -> (i32, i32) {
    %c0_i32 = arith.constant 0 : i32
    %c0_i32_0 = arith.constant 0 : i32
    %c0_i32_1 = arith.constant 0 : i32
    return %c0_i32, %c0_i32_0 : i32, i32
  }
  func.func @transform_6(%arg0: i32) -> (i32, i32) {
    %c0_i32 = arith.constant 0 : i32
    %c0_i32_0 = arith.constant 0 : i32
    %c0_i32_1 = arith.constant 0 : i32
    return %c0_i32, %c0_i32_0 : i32, i32
  }
}

module attributes {stable_mosaic.version = 11 : i64} {
  func.func @_conv_bn_relu_kernel(%arg0: i32, %arg1: memref<32x384xbf16, #tpu.memory_space<vmem>>, %arg2: memref<384x128xbf16, #tpu.memory_space<vmem>>, %arg3: memref<1x128xf32, #tpu.memory_space<vmem>>, %arg4: memref<1x128xf32, #tpu.memory_space<vmem>>, %arg5: memref<1x128xf32, #tpu.memory_space<vmem>>, %arg6: memref<32x128xbf16, #tpu.memory_space<vmem>>) attributes {dimension_semantics = [#tpu.dimension_semantics<arbitrary>], iteration_bounds = array<i64: 1>, scalar_prefetch = 0 : i64, scratch_operands = 0 : i64, tpu.core_type = #tpu.core_type<tc>, window_params = [{pipeline_mode = #tpu.pipeline_mode<synchronous>, transform_indices = @transform_0, window_bounds = array<i64: 32, 384>}, {pipeline_mode = #tpu.pipeline_mode<synchronous>, transform_indices = @transform_1, window_bounds = array<i64: 384, 128>}, {pipeline_mode = #tpu.pipeline_mode<synchronous>, transform_indices = @transform_2, window_bounds = array<i64: 1, 128>}, {pipeline_mode = #tpu.pipeline_mode<synchronous>, transform_indices = @transform_3, window_bounds = array<i64: 1, 128>}, {pipeline_mode = #tpu.pipeline_mode<synchronous>, transform_indices = @transform_4, window_bounds = array<i64: 1, 128>}, {pipeline_mode = #tpu.pipeline_mode<synchronous>, transform_indices = @transform_5, window_bounds = array<i64: 32, 128>}]} {
    %c0 = arith.constant 0 : index
    %c0_0 = arith.constant 0 : index
    %0 = vector.load %arg1[%c0, %c0_0] : memref<32x384xbf16, #tpu.memory_space<vmem>>, vector<32x384xbf16>
    %c0_1 = arith.constant 0 : index
    %c0_2 = arith.constant 0 : index
    %1 = vector.load %arg2[%c0_1, %c0_2] : memref<384x128xbf16, #tpu.memory_space<vmem>>, vector<384x128xbf16>
    %cst = arith.constant dense<0.000000e+00> : vector<32x128xf32>
    %2 = tpu.matmul %0, %1, %cst {dimension_numbers = #tpu.dot_dimension_numbers<[1], [0], [0], [1], [0, 0, 1, 1], [], []>} : vector<32x384xbf16>, vector<384x128xbf16>, vector<32x128xf32> -> vector<32x128xf32>
    %c0_3 = arith.constant 0 : index
    %c0_4 = arith.constant 0 : index
    %3 = vector.load %arg3[%c0_3, %c0_4] : memref<1x128xf32, #tpu.memory_space<vmem>>, vector<1x128xf32>
    %4 = vector.broadcast %3 : vector<1x128xf32> to vector<32x128xf32>
    %5 = arith.addf %2, %4 : vector<32x128xf32>
    %c0_5 = arith.constant 0 : index
    %c0_6 = arith.constant 0 : index
    %6 = vector.load %arg4[%c0_5, %c0_6] : memref<1x128xf32, #tpu.memory_space<vmem>>, vector<1x128xf32>
    %c0_7 = arith.constant 0 : index
    %c0_8 = arith.constant 0 : index
    %7 = vector.load %arg5[%c0_7, %c0_8] : memref<1x128xf32, #tpu.memory_space<vmem>>, vector<1x128xf32>
    %cst_9 = arith.constant dense<0.000000e+00> : vector<128xf32>
    %8 = vector.multi_reduction <add>, %5, %cst_9 [0] : vector<32x128xf32> to vector<128xf32>
    %9 = vector.shape_cast %8 : vector<128xf32> to vector<1x128xf32>
    %cst_10 = arith.constant 3.125000e-02 : f32
    %10 = vector.broadcast %cst_10 : f32 to vector<1x128xf32>
    %11 = arith.mulf %9, %10 : vector<1x128xf32>
    %12 = arith.mulf %5, %5 : vector<32x128xf32>
    %cst_11 = arith.constant dense<0.000000e+00> : vector<128xf32>
    %13 = vector.multi_reduction <add>, %12, %cst_11 [0] : vector<32x128xf32> to vector<128xf32>
    %14 = vector.shape_cast %13 : vector<128xf32> to vector<1x128xf32>
    %cst_12 = arith.constant 3.125000e-02 : f32
    %15 = vector.broadcast %cst_12 : f32 to vector<1x128xf32>
    %16 = arith.mulf %14, %15 : vector<1x128xf32>
    %17 = arith.mulf %11, %11 : vector<1x128xf32>
    %18 = arith.subf %16, %17 : vector<1x128xf32>
    %cst_13 = arith.constant 0.000000e+00 : f32
    %19 = vector.broadcast %cst_13 : f32 to vector<1x128xf32>
    %20 = arith.maximumf %18, %19 : vector<1x128xf32>
    %cst_14 = arith.constant 9.99999974E-6 : f32
    %21 = vector.broadcast %cst_14 : f32 to vector<1x128xf32>
    %22 = arith.addf %20, %21 : vector<1x128xf32>
    %23 = math.rsqrt %22 : vector<1x128xf32>
    %24 = arith.mulf %6, %23 : vector<1x128xf32>
    %25 = arith.mulf %11, %24 : vector<1x128xf32>
    %26 = arith.subf %7, %25 : vector<1x128xf32>
    %27 = vector.broadcast %24 : vector<1x128xf32> to vector<32x128xf32>
    %28 = arith.mulf %5, %27 : vector<32x128xf32>
    %29 = vector.broadcast %26 : vector<1x128xf32> to vector<32x128xf32>
    %30 = arith.addf %28, %29 : vector<32x128xf32>
    %cst_15 = arith.constant 0.000000e+00 : f32
    %31 = vector.broadcast %cst_15 : f32 to vector<32x128xf32>
    %32 = arith.maximumf %30, %31 : vector<32x128xf32>
    %33 = arith.truncf %32 : vector<32x128xf32> to vector<32x128xbf16>
    %c0_16 = arith.constant 0 : index
    %c0_17 = arith.constant 0 : index
    %34 = vector.load %arg6[%c0_16, %c0_17] : memref<32x128xbf16, #tpu.memory_space<vmem>>, vector<32x128xbf16>
    tpu.vector_store %arg6[%c0_16, %c0_17], %33 {strides = array<i32>} : memref<32x128xbf16, #tpu.memory_space<vmem>>, vector<32x128xbf16>,
    return
  }
  func.func @transform_0(%arg0: i32) -> (i32, i32) {
    %c0_i32 = arith.constant 0 : i32
    %c0_i32_0 = arith.constant 0 : i32
    %c0_i32_1 = arith.constant 0 : i32
    return %c0_i32, %c0_i32_0 : i32, i32
  }
  func.func @transform_1(%arg0: i32) -> (i32, i32) {
    %c0_i32 = arith.constant 0 : i32
    %c0_i32_0 = arith.constant 0 : i32
    %c0_i32_1 = arith.constant 0 : i32
    return %c0_i32, %c0_i32_0 : i32, i32
  }
  func.func @transform_2(%arg0: i32) -> (i32, i32) {
    %c0_i32 = arith.constant 0 : i32
    %c0_i32_0 = arith.constant 0 : i32
    %c0_i32_1 = arith.constant 0 : i32
    return %c0_i32, %c0_i32_0 : i32, i32
  }
  func.func @transform_3(%arg0: i32) -> (i32, i32) {
    %c0_i32 = arith.constant 0 : i32
    %c0_i32_0 = arith.constant 0 : i32
    %c0_i32_1 = arith.constant 0 : i32
    return %c0_i32, %c0_i32_0 : i32, i32
  }
  func.func @transform_4(%arg0: i32) -> (i32, i32) {
    %c0_i32 = arith.constant 0 : i32
    %c0_i32_0 = arith.constant 0 : i32
    %c0_i32_1 = arith.constant 0 : i32
    return %c0_i32, %c0_i32_0 : i32, i32
  }
  func.func @transform_5(%arg0: i32) -> (i32, i32) {
    %c0_i32 = arith.constant 0 : i32
    %c0_i32_0 = arith.constant 0 : i32
    %c0_i32_1 = arith.constant 0 : i32
    return %c0_i32, %c0_i32_0 : i32, i32
  }
}

module attributes {stable_mosaic.version = 11 : i64} {
  func.func @_conv_bn_dsres_gate_kernel(%arg0: i32, %arg1: memref<32x384xbf16, #tpu.memory_space<vmem>>, %arg2: memref<384x128xbf16, #tpu.memory_space<vmem>>, %arg3: memref<1x128xf32, #tpu.memory_space<vmem>>, %arg4: memref<1x128xf32, #tpu.memory_space<vmem>>, %arg5: memref<32x128xbf16, #tpu.memory_space<vmem>>, %arg6: memref<128x128xbf16, #tpu.memory_space<vmem>>, %arg7: memref<1x128xf32, #tpu.memory_space<vmem>>, %arg8: memref<32x128xf32, #tpu.memory_space<vmem>>, %arg9: memref<32x128xbf16, #tpu.memory_space<vmem>>) attributes {dimension_semantics = [#tpu.dimension_semantics<arbitrary>], iteration_bounds = array<i64: 1>, scalar_prefetch = 0 : i64, scratch_operands = 0 : i64, tpu.core_type = #tpu.core_type<tc>, window_params = [{pipeline_mode = #tpu.pipeline_mode<synchronous>, transform_indices = @transform_0, window_bounds = array<i64: 32, 384>}, {pipeline_mode = #tpu.pipeline_mode<synchronous>, transform_indices = @transform_1, window_bounds = array<i64: 384, 128>}, {pipeline_mode = #tpu.pipeline_mode<synchronous>, transform_indices = @transform_2, window_bounds = array<i64: 1, 128>}, {pipeline_mode = #tpu.pipeline_mode<synchronous>, transform_indices = @transform_3, window_bounds = array<i64: 1, 128>}, {pipeline_mode = #tpu.pipeline_mode<synchronous>, transform_indices = @transform_4, window_bounds = array<i64: 32, 128>}, {pipeline_mode = #tpu.pipeline_mode<synchronous>, transform_indices = @transform_5, window_bounds = array<i64: 128, 128>}, {pipeline_mode = #tpu.pipeline_mode<synchronous>, transform_indices = @transform_6, window_bounds = array<i64: 1, 128>}, {pipeline_mode = #tpu.pipeline_mode<synchronous>, transform_indices = @transform_7, window_bounds = array<i64: 32, 128>}, {pipeline_mode = #tpu.pipeline_mode<synchronous>, transform_indices = @transform_8, window_bounds = array<i64: 32, 128>}]} {
    %c0 = arith.constant 0 : index
    %c0_0 = arith.constant 0 : index
    %0 = vector.load %arg1[%c0, %c0_0] : memref<32x384xbf16, #tpu.memory_space<vmem>>, vector<32x384xbf16>
    %c0_1 = arith.constant 0 : index
    %c0_2 = arith.constant 0 : index
    %1 = vector.load %arg2[%c0_1, %c0_2] : memref<384x128xbf16, #tpu.memory_space<vmem>>, vector<384x128xbf16>
    %cst = arith.constant dense<0.000000e+00> : vector<32x128xf32>
    %2 = tpu.matmul %0, %1, %cst {dimension_numbers = #tpu.dot_dimension_numbers<[1], [0], [0], [1], [0, 0, 1, 1], [], []>} : vector<32x384xbf16>, vector<384x128xbf16>, vector<32x128xf32> -> vector<32x128xf32>
    %c0_3 = arith.constant 0 : index
    %c0_4 = arith.constant 0 : index
    %3 = vector.load %arg5[%c0_3, %c0_4] : memref<32x128xbf16, #tpu.memory_space<vmem>>, vector<32x128xbf16>
    %c0_5 = arith.constant 0 : index
    %c0_6 = arith.constant 0 : index
    %4 = vector.load %arg6[%c0_5, %c0_6] : memref<128x128xbf16, #tpu.memory_space<vmem>>, vector<128x128xbf16>
    %cst_7 = arith.constant dense<0.000000e+00> : vector<32x128xf32>
    %5 = tpu.matmul %3, %4, %cst_7 {dimension_numbers = #tpu.dot_dimension_numbers<[1], [0], [0], [1], [0, 0, 1, 1], [], []>} : vector<32x128xbf16>, vector<128x128xbf16>, vector<32x128xf32> -> vector<32x128xf32>
    %c0_8 = arith.constant 0 : index
    %c0_9 = arith.constant 0 : index
    %6 = vector.load %arg7[%c0_8, %c0_9] : memref<1x128xf32, #tpu.memory_space<vmem>>, vector<1x128xf32>
    %7 = vector.broadcast %6 : vector<1x128xf32> to vector<32x128xf32>
    %8 = arith.addf %5, %7 : vector<32x128xf32>
    %c0_10 = arith.constant 0 : index
    %c0_11 = arith.constant 0 : index
    %9 = vector.load %arg3[%c0_10, %c0_11] : memref<1x128xf32, #tpu.memory_space<vmem>>, vector<1x128xf32>
    %c0_12 = arith.constant 0 : index
    %c0_13 = arith.constant 0 : index
    %10 = vector.load %arg4[%c0_12, %c0_13] : memref<1x128xf32, #tpu.memory_space<vmem>>, vector<1x128xf32>
    %cst_14 = arith.constant dense<0.000000e+00> : vector<128xf32>
    %11 = vector.multi_reduction <add>, %2, %cst_14 [0] : vector<32x128xf32> to vector<128xf32>
    %12 = vector.shape_cast %11 : vector<128xf32> to vector<1x128xf32>
    %cst_15 = arith.constant 3.125000e-02 : f32
    %13 = vector.broadcast %cst_15 : f32 to vector<1x128xf32>
    %14 = arith.mulf %12, %13 : vector<1x128xf32>
    %15 = arith.mulf %2, %2 : vector<32x128xf32>
    %cst_16 = arith.constant dense<0.000000e+00> : vector<128xf32>
    %16 = vector.multi_reduction <add>, %15, %cst_16 [0] : vector<32x128xf32> to vector<128xf32>
    %17 = vector.shape_cast %16 : vector<128xf32> to vector<1x128xf32>
    %cst_17 = arith.constant 3.125000e-02 : f32
    %18 = vector.broadcast %cst_17 : f32 to vector<1x128xf32>
    %19 = arith.mulf %17, %18 : vector<1x128xf32>
    %20 = arith.mulf %14, %14 : vector<1x128xf32>
    %21 = arith.subf %19, %20 : vector<1x128xf32>
    %cst_18 = arith.constant 0.000000e+00 : f32
    %22 = vector.broadcast %cst_18 : f32 to vector<1x128xf32>
    %23 = arith.maximumf %21, %22 : vector<1x128xf32>
    %cst_19 = arith.constant 9.99999974E-6 : f32
    %24 = vector.broadcast %cst_19 : f32 to vector<1x128xf32>
    %25 = arith.addf %23, %24 : vector<1x128xf32>
    %26 = math.rsqrt %25 : vector<1x128xf32>
    %27 = arith.mulf %9, %26 : vector<1x128xf32>
    %28 = arith.mulf %14, %27 : vector<1x128xf32>
    %29 = arith.subf %10, %28 : vector<1x128xf32>
    %30 = vector.broadcast %27 : vector<1x128xf32> to vector<32x128xf32>
    %31 = arith.mulf %2, %30 : vector<32x128xf32>
    %32 = vector.broadcast %29 : vector<1x128xf32> to vector<32x128xf32>
    %33 = arith.addf %31, %32 : vector<32x128xf32>
    %34 = arith.addf %33, %8 : vector<32x128xf32>
    %cst_20 = arith.constant 0.000000e+00 : f32
    %35 = vector.broadcast %cst_20 : f32 to vector<32x128xf32>
    %36 = arith.maximumf %34, %35 : vector<32x128xf32>
    %c0_21 = arith.constant 0 : index
    %c0_22 = arith.constant 0 : index
    %37 = vector.load %arg8[%c0_21, %c0_22] : memref<32x128xf32, #tpu.memory_space<vmem>>, vector<32x128xf32>
    %38 = arith.mulf %36, %37 : vector<32x128xf32>
    %39 = arith.truncf %38 : vector<32x128xf32> to vector<32x128xbf16>
    %c0_23 = arith.constant 0 : index
    %c0_24 = arith.constant 0 : index
    %40 = vector.load %arg9[%c0_23, %c0_24] : memref<32x128xbf16, #tpu.memory_space<vmem>>, vector<32x128xbf16>
    tpu.vector_store %arg9[%c0_23, %c0_24], %39 {strides = array<i32>} : memref<32x128xbf16, #tpu.memory_space<vmem>>, vector<32x128xbf16>,
    return
  }
  func.func @transform_0(%arg0: i32) -> (i32, i32) {
    %c0_i32 = arith.constant 0 : i32
    %c0_i32_0 = arith.constant 0 : i32
    %c0_i32_1 = arith.constant 0 : i32
    return %c0_i32, %c0_i32_0 : i32, i32
  }
  func.func @transform_1(%arg0: i32) -> (i32, i32) {
    %c0_i32 = arith.constant 0 : i32
    %c0_i32_0 = arith.constant 0 : i32
    %c0_i32_1 = arith.constant 0 : i32
    return %c0_i32, %c0_i32_0 : i32, i32
  }
  func.func @transform_2(%arg0: i32) -> (i32, i32) {
    %c0_i32 = arith.constant 0 : i32
    %c0_i32_0 = arith.constant 0 : i32
    %c0_i32_1 = arith.constant 0 : i32
    return %c0_i32, %c0_i32_0 : i32, i32
  }
  func.func @transform_3(%arg0: i32) -> (i32, i32) {
    %c0_i32 = arith.constant 0 : i32
    %c0_i32_0 = arith.constant 0 : i32
    %c0_i32_1 = arith.constant 0 : i32
    return %c0_i32, %c0_i32_0 : i32, i32
  }
  func.func @transform_4(%arg0: i32) -> (i32, i32) {
    %c0_i32 = arith.constant 0 : i32
    %c0_i32_0 = arith.constant 0 : i32
    %c0_i32_1 = arith.constant 0 : i32
    return %c0_i32, %c0_i32_0 : i32, i32
  }
  func.func @transform_5(%arg0: i32) -> (i32, i32) {
    %c0_i32 = arith.constant 0 : i32
    %c0_i32_0 = arith.constant 0 : i32
    %c0_i32_1 = arith.constant 0 : i32
    return %c0_i32, %c0_i32_0 : i32, i32
  }
  func.func @transform_6(%arg0: i32) -> (i32, i32) {
    %c0_i32 = arith.constant 0 : i32
    %c0_i32_0 = arith.constant 0 : i32
    %c0_i32_1 = arith.constant 0 : i32
    return %c0_i32, %c0_i32_0 : i32, i32
  }
  func.func @transform_7(%arg0: i32) -> (i32, i32) {
    %c0_i32 = arith.constant 0 : i32
    %c0_i32_0 = arith.constant 0 : i32
    %c0_i32_1 = arith.constant 0 : i32
    return %c0_i32, %c0_i32_0 : i32, i32
  }
  func.func @transform_8(%arg0: i32) -> (i32, i32) {
    %c0_i32 = arith.constant 0 : i32
    %c0_i32_0 = arith.constant 0 : i32
    %c0_i32_1 = arith.constant 0 : i32
    return %c0_i32, %c0_i32_0 : i32, i32
  }
}

module attributes {stable_mosaic.version = 11 : i64} {
  func.func @_conv_bn_relu_kernel(%arg0: i32, %arg1: memref<8x384xbf16, #tpu.memory_space<vmem>>, %arg2: memref<384x128xbf16, #tpu.memory_space<vmem>>, %arg3: memref<1x128xf32, #tpu.memory_space<vmem>>, %arg4: memref<1x128xf32, #tpu.memory_space<vmem>>, %arg5: memref<1x128xf32, #tpu.memory_space<vmem>>, %arg6: memref<8x128xbf16, #tpu.memory_space<vmem>>) attributes {dimension_semantics = [#tpu.dimension_semantics<arbitrary>], iteration_bounds = array<i64: 1>, scalar_prefetch = 0 : i64, scratch_operands = 0 : i64, tpu.core_type = #tpu.core_type<tc>, window_params = [{pipeline_mode = #tpu.pipeline_mode<synchronous>, transform_indices = @transform_0, window_bounds = array<i64: 8, 384>}, {pipeline_mode = #tpu.pipeline_mode<synchronous>, transform_indices = @transform_1, window_bounds = array<i64: 384, 128>}, {pipeline_mode = #tpu.pipeline_mode<synchronous>, transform_indices = @transform_2, window_bounds = array<i64: 1, 128>}, {pipeline_mode = #tpu.pipeline_mode<synchronous>, transform_indices = @transform_3, window_bounds = array<i64: 1, 128>}, {pipeline_mode = #tpu.pipeline_mode<synchronous>, transform_indices = @transform_4, window_bounds = array<i64: 1, 128>}, {pipeline_mode = #tpu.pipeline_mode<synchronous>, transform_indices = @transform_5, window_bounds = array<i64: 8, 128>}]} {
    %c0 = arith.constant 0 : index
    %c0_0 = arith.constant 0 : index
    %0 = vector.load %arg1[%c0, %c0_0] : memref<8x384xbf16, #tpu.memory_space<vmem>>, vector<8x384xbf16>
    %c0_1 = arith.constant 0 : index
    %c0_2 = arith.constant 0 : index
    %1 = vector.load %arg2[%c0_1, %c0_2] : memref<384x128xbf16, #tpu.memory_space<vmem>>, vector<384x128xbf16>
    %cst = arith.constant dense<0.000000e+00> : vector<8x128xf32>
    %2 = tpu.matmul %0, %1, %cst {dimension_numbers = #tpu.dot_dimension_numbers<[1], [0], [0], [1], [0, 0, 1, 1], [], []>} : vector<8x384xbf16>, vector<384x128xbf16>, vector<8x128xf32> -> vector<8x128xf32>
    %c0_3 = arith.constant 0 : index
    %c0_4 = arith.constant 0 : index
    %3 = vector.load %arg3[%c0_3, %c0_4] : memref<1x128xf32, #tpu.memory_space<vmem>>, vector<1x128xf32>
    %4 = vector.broadcast %3 : vector<1x128xf32> to vector<8x128xf32>
    %5 = arith.addf %2, %4 : vector<8x128xf32>
    %c0_5 = arith.constant 0 : index
    %c0_6 = arith.constant 0 : index
    %6 = vector.load %arg4[%c0_5, %c0_6] : memref<1x128xf32, #tpu.memory_space<vmem>>, vector<1x128xf32>
    %c0_7 = arith.constant 0 : index
    %c0_8 = arith.constant 0 : index
    %7 = vector.load %arg5[%c0_7, %c0_8] : memref<1x128xf32, #tpu.memory_space<vmem>>, vector<1x128xf32>
    %cst_9 = arith.constant dense<0.000000e+00> : vector<128xf32>
    %8 = vector.multi_reduction <add>, %5, %cst_9 [0] : vector<8x128xf32> to vector<128xf32>
    %9 = vector.shape_cast %8 : vector<128xf32> to vector<1x128xf32>
    %cst_10 = arith.constant 1.250000e-01 : f32
    %10 = vector.broadcast %cst_10 : f32 to vector<1x128xf32>
    %11 = arith.mulf %9, %10 : vector<1x128xf32>
    %12 = arith.mulf %5, %5 : vector<8x128xf32>
    %cst_11 = arith.constant dense<0.000000e+00> : vector<128xf32>
    %13 = vector.multi_reduction <add>, %12, %cst_11 [0] : vector<8x128xf32> to vector<128xf32>
    %14 = vector.shape_cast %13 : vector<128xf32> to vector<1x128xf32>
    %cst_12 = arith.constant 1.250000e-01 : f32
    %15 = vector.broadcast %cst_12 : f32 to vector<1x128xf32>
    %16 = arith.mulf %14, %15 : vector<1x128xf32>
    %17 = arith.mulf %11, %11 : vector<1x128xf32>
    %18 = arith.subf %16, %17 : vector<1x128xf32>
    %cst_13 = arith.constant 0.000000e+00 : f32
    %19 = vector.broadcast %cst_13 : f32 to vector<1x128xf32>
    %20 = arith.maximumf %18, %19 : vector<1x128xf32>
    %cst_14 = arith.constant 9.99999974E-6 : f32
    %21 = vector.broadcast %cst_14 : f32 to vector<1x128xf32>
    %22 = arith.addf %20, %21 : vector<1x128xf32>
    %23 = math.rsqrt %22 : vector<1x128xf32>
    %24 = arith.mulf %6, %23 : vector<1x128xf32>
    %25 = arith.mulf %11, %24 : vector<1x128xf32>
    %26 = arith.subf %7, %25 : vector<1x128xf32>
    %27 = vector.broadcast %24 : vector<1x128xf32> to vector<8x128xf32>
    %28 = arith.mulf %5, %27 : vector<8x128xf32>
    %29 = vector.broadcast %26 : vector<1x128xf32> to vector<8x128xf32>
    %30 = arith.addf %28, %29 : vector<8x128xf32>
    %cst_15 = arith.constant 0.000000e+00 : f32
    %31 = vector.broadcast %cst_15 : f32 to vector<8x128xf32>
    %32 = arith.maximumf %30, %31 : vector<8x128xf32>
    %33 = arith.truncf %32 : vector<8x128xf32> to vector<8x128xbf16>
    %c0_16 = arith.constant 0 : index
    %c0_17 = arith.constant 0 : index
    %34 = vector.load %arg6[%c0_16, %c0_17] : memref<8x128xbf16, #tpu.memory_space<vmem>>, vector<8x128xbf16>
    tpu.vector_store %arg6[%c0_16, %c0_17], %33 {strides = array<i32>} : memref<8x128xbf16, #tpu.memory_space<vmem>>, vector<8x128xbf16>,
    return
  }
  func.func @transform_0(%arg0: i32) -> (i32, i32) {
    %c0_i32 = arith.constant 0 : i32
    %c0_i32_0 = arith.constant 0 : i32
    %c0_i32_1 = arith.constant 0 : i32
    return %c0_i32, %c0_i32_0 : i32, i32
  }
  func.func @transform_1(%arg0: i32) -> (i32, i32) {
    %c0_i32 = arith.constant 0 : i32
    %c0_i32_0 = arith.constant 0 : i32
    %c0_i32_1 = arith.constant 0 : i32
    return %c0_i32, %c0_i32_0 : i32, i32
  }
  func.func @transform_2(%arg0: i32) -> (i32, i32) {
    %c0_i32 = arith.constant 0 : i32
    %c0_i32_0 = arith.constant 0 : i32
    %c0_i32_1 = arith.constant 0 : i32
    return %c0_i32, %c0_i32_0 : i32, i32
  }
  func.func @transform_3(%arg0: i32) -> (i32, i32) {
    %c0_i32 = arith.constant 0 : i32
    %c0_i32_0 = arith.constant 0 : i32
    %c0_i32_1 = arith.constant 0 : i32
    return %c0_i32, %c0_i32_0 : i32, i32
  }
  func.func @transform_4(%arg0: i32) -> (i32, i32) {
    %c0_i32 = arith.constant 0 : i32
    %c0_i32_0 = arith.constant 0 : i32
    %c0_i32_1 = arith.constant 0 : i32
    return %c0_i32, %c0_i32_0 : i32, i32
  }
  func.func @transform_5(%arg0: i32) -> (i32, i32) {
    %c0_i32 = arith.constant 0 : i32
    %c0_i32_0 = arith.constant 0 : i32
    %c0_i32_1 = arith.constant 0 : i32
    return %c0_i32, %c0_i32_0 : i32, i32
  }
}

module attributes {stable_mosaic.version = 11 : i64} {
  func.func @_conv_bn_relu_kernel(%arg0: i32, %arg1: memref<8x640xbf16, #tpu.memory_space<vmem>>, %arg2: memref<640x128xbf16, #tpu.memory_space<vmem>>, %arg3: memref<1x128xf32, #tpu.memory_space<vmem>>, %arg4: memref<1x128xf32, #tpu.memory_space<vmem>>, %arg5: memref<1x128xf32, #tpu.memory_space<vmem>>, %arg6: memref<8x128xbf16, #tpu.memory_space<vmem>>) attributes {dimension_semantics = [#tpu.dimension_semantics<arbitrary>], iteration_bounds = array<i64: 1>, scalar_prefetch = 0 : i64, scratch_operands = 0 : i64, tpu.core_type = #tpu.core_type<tc>, window_params = [{pipeline_mode = #tpu.pipeline_mode<synchronous>, transform_indices = @transform_0, window_bounds = array<i64: 8, 640>}, {pipeline_mode = #tpu.pipeline_mode<synchronous>, transform_indices = @transform_1, window_bounds = array<i64: 640, 128>}, {pipeline_mode = #tpu.pipeline_mode<synchronous>, transform_indices = @transform_2, window_bounds = array<i64: 1, 128>}, {pipeline_mode = #tpu.pipeline_mode<synchronous>, transform_indices = @transform_3, window_bounds = array<i64: 1, 128>}, {pipeline_mode = #tpu.pipeline_mode<synchronous>, transform_indices = @transform_4, window_bounds = array<i64: 1, 128>}, {pipeline_mode = #tpu.pipeline_mode<synchronous>, transform_indices = @transform_5, window_bounds = array<i64: 8, 128>}]} {
    %c0 = arith.constant 0 : index
    %c0_0 = arith.constant 0 : index
    %0 = vector.load %arg1[%c0, %c0_0] : memref<8x640xbf16, #tpu.memory_space<vmem>>, vector<8x640xbf16>
    %c0_1 = arith.constant 0 : index
    %c0_2 = arith.constant 0 : index
    %1 = vector.load %arg2[%c0_1, %c0_2] : memref<640x128xbf16, #tpu.memory_space<vmem>>, vector<640x128xbf16>
    %cst = arith.constant dense<0.000000e+00> : vector<8x128xf32>
    %2 = tpu.matmul %0, %1, %cst {dimension_numbers = #tpu.dot_dimension_numbers<[1], [0], [0], [1], [0, 0, 1, 1], [], []>} : vector<8x640xbf16>, vector<640x128xbf16>, vector<8x128xf32> -> vector<8x128xf32>
    %c0_3 = arith.constant 0 : index
    %c0_4 = arith.constant 0 : index
    %3 = vector.load %arg3[%c0_3, %c0_4] : memref<1x128xf32, #tpu.memory_space<vmem>>, vector<1x128xf32>
    %4 = vector.broadcast %3 : vector<1x128xf32> to vector<8x128xf32>
    %5 = arith.addf %2, %4 : vector<8x128xf32>
    %c0_5 = arith.constant 0 : index
    %c0_6 = arith.constant 0 : index
    %6 = vector.load %arg4[%c0_5, %c0_6] : memref<1x128xf32, #tpu.memory_space<vmem>>, vector<1x128xf32>
    %c0_7 = arith.constant 0 : index
    %c0_8 = arith.constant 0 : index
    %7 = vector.load %arg5[%c0_7, %c0_8] : memref<1x128xf32, #tpu.memory_space<vmem>>, vector<1x128xf32>
    %cst_9 = arith.constant dense<0.000000e+00> : vector<128xf32>
    %8 = vector.multi_reduction <add>, %5, %cst_9 [0] : vector<8x128xf32> to vector<128xf32>
    %9 = vector.shape_cast %8 : vector<128xf32> to vector<1x128xf32>
    %cst_10 = arith.constant 1.250000e-01 : f32
    %10 = vector.broadcast %cst_10 : f32 to vector<1x128xf32>
    %11 = arith.mulf %9, %10 : vector<1x128xf32>
    %12 = arith.mulf %5, %5 : vector<8x128xf32>
    %cst_11 = arith.constant dense<0.000000e+00> : vector<128xf32>
    %13 = vector.multi_reduction <add>, %12, %cst_11 [0] : vector<8x128xf32> to vector<128xf32>
    %14 = vector.shape_cast %13 : vector<128xf32> to vector<1x128xf32>
    %cst_12 = arith.constant 1.250000e-01 : f32
    %15 = vector.broadcast %cst_12 : f32 to vector<1x128xf32>
    %16 = arith.mulf %14, %15 : vector<1x128xf32>
    %17 = arith.mulf %11, %11 : vector<1x128xf32>
    %18 = arith.subf %16, %17 : vector<1x128xf32>
    %cst_13 = arith.constant 0.000000e+00 : f32
    %19 = vector.broadcast %cst_13 : f32 to vector<1x128xf32>
    %20 = arith.maximumf %18, %19 : vector<1x128xf32>
    %cst_14 = arith.constant 9.99999974E-6 : f32
    %21 = vector.broadcast %cst_14 : f32 to vector<1x128xf32>
    %22 = arith.addf %20, %21 : vector<1x128xf32>
    %23 = math.rsqrt %22 : vector<1x128xf32>
    %24 = arith.mulf %6, %23 : vector<1x128xf32>
    %25 = arith.mulf %11, %24 : vector<1x128xf32>
    %26 = arith.subf %7, %25 : vector<1x128xf32>
    %27 = vector.broadcast %24 : vector<1x128xf32> to vector<8x128xf32>
    %28 = arith.mulf %5, %27 : vector<8x128xf32>
    %29 = vector.broadcast %26 : vector<1x128xf32> to vector<8x128xf32>
    %30 = arith.addf %28, %29 : vector<8x128xf32>
    %cst_15 = arith.constant 0.000000e+00 : f32
    %31 = vector.broadcast %cst_15 : f32 to vector<8x128xf32>
    %32 = arith.maximumf %30, %31 : vector<8x128xf32>
    %33 = arith.truncf %32 : vector<8x128xf32> to vector<8x128xbf16>
    %c0_16 = arith.constant 0 : index
    %c0_17 = arith.constant 0 : index
    %34 = vector.load %arg6[%c0_16, %c0_17] : memref<8x128xbf16, #tpu.memory_space<vmem>>, vector<8x128xbf16>
    tpu.vector_store %arg6[%c0_16, %c0_17], %33 {strides = array<i32>} : memref<8x128xbf16, #tpu.memory_space<vmem>>, vector<8x128xbf16>,
    return
  }
  func.func @transform_0(%arg0: i32) -> (i32, i32) {
    %c0_i32 = arith.constant 0 : i32
    %c0_i32_0 = arith.constant 0 : i32
    %c0_i32_1 = arith.constant 0 : i32
    return %c0_i32, %c0_i32_0 : i32, i32
  }
  func.func @transform_1(%arg0: i32) -> (i32, i32) {
    %c0_i32 = arith.constant 0 : i32
    %c0_i32_0 = arith.constant 0 : i32
    %c0_i32_1 = arith.constant 0 : i32
    return %c0_i32, %c0_i32_0 : i32, i32
  }
  func.func @transform_2(%arg0: i32) -> (i32, i32) {
    %c0_i32 = arith.constant 0 : i32
    %c0_i32_0 = arith.constant 0 : i32
    %c0_i32_1 = arith.constant 0 : i32
    return %c0_i32, %c0_i32_0 : i32, i32
  }
  func.func @transform_3(%arg0: i32) -> (i32, i32) {
    %c0_i32 = arith.constant 0 : i32
    %c0_i32_0 = arith.constant 0 : i32
    %c0_i32_1 = arith.constant 0 : i32
    return %c0_i32, %c0_i32_0 : i32, i32
  }
  func.func @transform_4(%arg0: i32) -> (i32, i32) {
    %c0_i32 = arith.constant 0 : i32
    %c0_i32_0 = arith.constant 0 : i32
    %c0_i32_1 = arith.constant 0 : i32
    return %c0_i32, %c0_i32_0 : i32, i32
  }
  func.func @transform_5(%arg0: i32) -> (i32, i32) {
    %c0_i32 = arith.constant 0 : i32
    %c0_i32_0 = arith.constant 0 : i32
    %c0_i32_1 = arith.constant 0 : i32
    return %c0_i32, %c0_i32_0 : i32, i32
  }
}

module attributes {stable_mosaic.version = 11 : i64} {
  func.func @_conv_bn_res_gate_kernel(%arg0: i32, %arg1: memref<8x640xbf16, #tpu.memory_space<vmem>>, %arg2: memref<640x128xbf16, #tpu.memory_space<vmem>>, %arg3: memref<1x128xf32, #tpu.memory_space<vmem>>, %arg4: memref<1x128xf32, #tpu.memory_space<vmem>>, %arg5: memref<8x128xbf16, #tpu.memory_space<vmem>>, %arg6: memref<8x128xf32, #tpu.memory_space<vmem>>, %arg7: memref<8x128xbf16, #tpu.memory_space<vmem>>) attributes {dimension_semantics = [#tpu.dimension_semantics<arbitrary>], iteration_bounds = array<i64: 1>, scalar_prefetch = 0 : i64, scratch_operands = 0 : i64, tpu.core_type = #tpu.core_type<tc>, window_params = [{pipeline_mode = #tpu.pipeline_mode<synchronous>, transform_indices = @transform_0, window_bounds = array<i64: 8, 640>}, {pipeline_mode = #tpu.pipeline_mode<synchronous>, transform_indices = @transform_1, window_bounds = array<i64: 640, 128>}, {pipeline_mode = #tpu.pipeline_mode<synchronous>, transform_indices = @transform_2, window_bounds = array<i64: 1, 128>}, {pipeline_mode = #tpu.pipeline_mode<synchronous>, transform_indices = @transform_3, window_bounds = array<i64: 1, 128>}, {pipeline_mode = #tpu.pipeline_mode<synchronous>, transform_indices = @transform_4, window_bounds = array<i64: 8, 128>}, {pipeline_mode = #tpu.pipeline_mode<synchronous>, transform_indices = @transform_5, window_bounds = array<i64: 8, 128>}, {pipeline_mode = #tpu.pipeline_mode<synchronous>, transform_indices = @transform_6, window_bounds = array<i64: 8, 128>}]} {
    %c0 = arith.constant 0 : index
    %c0_0 = arith.constant 0 : index
    %0 = vector.load %arg1[%c0, %c0_0] : memref<8x640xbf16, #tpu.memory_space<vmem>>, vector<8x640xbf16>
    %c0_1 = arith.constant 0 : index
    %c0_2 = arith.constant 0 : index
    %1 = vector.load %arg2[%c0_1, %c0_2] : memref<640x128xbf16, #tpu.memory_space<vmem>>, vector<640x128xbf16>
    %cst = arith.constant dense<0.000000e+00> : vector<8x128xf32>
    %2 = tpu.matmul %0, %1, %cst {dimension_numbers = #tpu.dot_dimension_numbers<[1], [0], [0], [1], [0, 0, 1, 1], [], []>} : vector<8x640xbf16>, vector<640x128xbf16>, vector<8x128xf32> -> vector<8x128xf32>
    %c0_3 = arith.constant 0 : index
    %c0_4 = arith.constant 0 : index
    %3 = vector.load %arg3[%c0_3, %c0_4] : memref<1x128xf32, #tpu.memory_space<vmem>>, vector<1x128xf32>
    %c0_5 = arith.constant 0 : index
    %c0_6 = arith.constant 0 : index
    %4 = vector.load %arg4[%c0_5, %c0_6] : memref<1x128xf32, #tpu.memory_space<vmem>>, vector<1x128xf32>
    %cst_7 = arith.constant dense<0.000000e+00> : vector<128xf32>
    %5 = vector.multi_reduction <add>, %2, %cst_7 [0] : vector<8x128xf32> to vector<128xf32>
    %6 = vector.shape_cast %5 : vector<128xf32> to vector<1x128xf32>
    %cst_8 = arith.constant 1.250000e-01 : f32
    %7 = vector.broadcast %cst_8 : f32 to vector<1x128xf32>
    %8 = arith.mulf %6, %7 : vector<1x128xf32>
    %9 = arith.mulf %2, %2 : vector<8x128xf32>
    %cst_9 = arith.constant dense<0.000000e+00> : vector<128xf32>
    %10 = vector.multi_reduction <add>, %9, %cst_9 [0] : vector<8x128xf32> to vector<128xf32>
    %11 = vector.shape_cast %10 : vector<128xf32> to vector<1x128xf32>
    %cst_10 = arith.constant 1.250000e-01 : f32
    %12 = vector.broadcast %cst_10 : f32 to vector<1x128xf32>
    %13 = arith.mulf %11, %12 : vector<1x128xf32>
    %14 = arith.mulf %8, %8 : vector<1x128xf32>
    %15 = arith.subf %13, %14 : vector<1x128xf32>
    %cst_11 = arith.constant 0.000000e+00 : f32
    %16 = vector.broadcast %cst_11 : f32 to vector<1x128xf32>
    %17 = arith.maximumf %15, %16 : vector<1x128xf32>
    %cst_12 = arith.constant 9.99999974E-6 : f32
    %18 = vector.broadcast %cst_12 : f32 to vector<1x128xf32>
    %19 = arith.addf %17, %18 : vector<1x128xf32>
    %20 = math.rsqrt %19 : vector<1x128xf32>
    %21 = arith.mulf %3, %20 : vector<1x128xf32>
    %22 = arith.mulf %8, %21 : vector<1x128xf32>
    %23 = arith.subf %4, %22 : vector<1x128xf32>
    %24 = vector.broadcast %21 : vector<1x128xf32> to vector<8x128xf32>
    %25 = arith.mulf %2, %24 : vector<8x128xf32>
    %26 = vector.broadcast %23 : vector<1x128xf32> to vector<8x128xf32>
    %27 = arith.addf %25, %26 : vector<8x128xf32>
    %c0_13 = arith.constant 0 : index
    %c0_14 = arith.constant 0 : index
    %28 = vector.load %arg5[%c0_13, %c0_14] : memref<8x128xbf16, #tpu.memory_space<vmem>>, vector<8x128xbf16>
    %29 = arith.extf %28 : vector<8x128xbf16> to vector<8x128xf32>
    %30 = arith.addf %27, %29 : vector<8x128xf32>
    %cst_15 = arith.constant 0.000000e+00 : f32
    %31 = vector.broadcast %cst_15 : f32 to vector<8x128xf32>
    %32 = arith.maximumf %30, %31 : vector<8x128xf32>
    %c0_16 = arith.constant 0 : index
    %c0_17 = arith.constant 0 : index
    %33 = vector.load %arg6[%c0_16, %c0_17] : memref<8x128xf32, #tpu.memory_space<vmem>>, vector<8x128xf32>
    %34 = arith.mulf %32, %33 : vector<8x128xf32>
    %35 = arith.truncf %34 : vector<8x128xf32> to vector<8x128xbf16>
    %c0_18 = arith.constant 0 : index
    %c0_19 = arith.constant 0 : index
    %36 = vector.load %arg7[%c0_18, %c0_19] : memref<8x128xbf16, #tpu.memory_space<vmem>>, vector<8x128xbf16>
    tpu.vector_store %arg7[%c0_18, %c0_19], %35 {strides = array<i32>} : memref<8x128xbf16, #tpu.memory_space<vmem>>, vector<8x128xbf16>,
    return
  }
  func.func @transform_0(%arg0: i32) -> (i32, i32) {
    %c0_i32 = arith.constant 0 : i32
    %c0_i32_0 = arith.constant 0 : i32
    %c0_i32_1 = arith.constant 0 : i32
    return %c0_i32, %c0_i32_0 : i32, i32
  }
  func.func @transform_1(%arg0: i32) -> (i32, i32) {
    %c0_i32 = arith.constant 0 : i32
    %c0_i32_0 = arith.constant 0 : i32
    %c0_i32_1 = arith.constant 0 : i32
    return %c0_i32, %c0_i32_0 : i32, i32
  }
  func.func @transform_2(%arg0: i32) -> (i32, i32) {
    %c0_i32 = arith.constant 0 : i32
    %c0_i32_0 = arith.constant 0 : i32
    %c0_i32_1 = arith.constant 0 : i32
    return %c0_i32, %c0_i32_0 : i32, i32
  }
  func.func @transform_3(%arg0: i32) -> (i32, i32) {
    %c0_i32 = arith.constant 0 : i32
    %c0_i32_0 = arith.constant 0 : i32
    %c0_i32_1 = arith.constant 0 : i32
    return %c0_i32, %c0_i32_0 : i32, i32
  }
  func.func @transform_4(%arg0: i32) -> (i32, i32) {
    %c0_i32 = arith.constant 0 : i32
    %c0_i32_0 = arith.constant 0 : i32
    %c0_i32_1 = arith.constant 0 : i32
    return %c0_i32, %c0_i32_0 : i32, i32
  }
  func.func @transform_5(%arg0: i32) -> (i32, i32) {
    %c0_i32 = arith.constant 0 : i32
    %c0_i32_0 = arith.constant 0 : i32
    %c0_i32_1 = arith.constant 0 : i32
    return %c0_i32, %c0_i32_0 : i32, i32
  }
  func.func @transform_6(%arg0: i32) -> (i32, i32) {
    %c0_i32 = arith.constant 0 : i32
    %c0_i32_0 = arith.constant 0 : i32
    %c0_i32_1 = arith.constant 0 : i32
    return %c0_i32, %c0_i32_0 : i32, i32
  }
}

module attributes {stable_mosaic.version = 11 : i64} {
  func.func @_conv_bn_dsres_gate_kernel(%arg0: i32, %arg1: memref<8x640xbf16, #tpu.memory_space<vmem>>, %arg2: memref<640x128xbf16, #tpu.memory_space<vmem>>, %arg3: memref<1x128xf32, #tpu.memory_space<vmem>>, %arg4: memref<1x128xf32, #tpu.memory_space<vmem>>, %arg5: memref<8x128xbf16, #tpu.memory_space<vmem>>, %arg6: memref<128x128xbf16, #tpu.memory_space<vmem>>, %arg7: memref<1x128xf32, #tpu.memory_space<vmem>>, %arg8: memref<8x128xf32, #tpu.memory_space<vmem>>, %arg9: memref<8x128xbf16, #tpu.memory_space<vmem>>) attributes {dimension_semantics = [#tpu.dimension_semantics<arbitrary>], iteration_bounds = array<i64: 1>, scalar_prefetch = 0 : i64, scratch_operands = 0 : i64, tpu.core_type = #tpu.core_type<tc>, window_params = [{pipeline_mode = #tpu.pipeline_mode<synchronous>, transform_indices = @transform_0, window_bounds = array<i64: 8, 640>}, {pipeline_mode = #tpu.pipeline_mode<synchronous>, transform_indices = @transform_1, window_bounds = array<i64: 640, 128>}, {pipeline_mode = #tpu.pipeline_mode<synchronous>, transform_indices = @transform_2, window_bounds = array<i64: 1, 128>}, {pipeline_mode = #tpu.pipeline_mode<synchronous>, transform_indices = @transform_3, window_bounds = array<i64: 1, 128>}, {pipeline_mode = #tpu.pipeline_mode<synchronous>, transform_indices = @transform_4, window_bounds = array<i64: 8, 128>}, {pipeline_mode = #tpu.pipeline_mode<synchronous>, transform_indices = @transform_5, window_bounds = array<i64: 128, 128>}, {pipeline_mode = #tpu.pipeline_mode<synchronous>, transform_indices = @transform_6, window_bounds = array<i64: 1, 128>}, {pipeline_mode = #tpu.pipeline_mode<synchronous>, transform_indices = @transform_7, window_bounds = array<i64: 8, 128>}, {pipeline_mode = #tpu.pipeline_mode<synchronous>, transform_indices = @transform_8, window_bounds = array<i64: 8, 128>}]} {
    %c0 = arith.constant 0 : index
    %c0_0 = arith.constant 0 : index
    %0 = vector.load %arg1[%c0, %c0_0] : memref<8x640xbf16, #tpu.memory_space<vmem>>, vector<8x640xbf16>
    %c0_1 = arith.constant 0 : index
    %c0_2 = arith.constant 0 : index
    %1 = vector.load %arg2[%c0_1, %c0_2] : memref<640x128xbf16, #tpu.memory_space<vmem>>, vector<640x128xbf16>
    %cst = arith.constant dense<0.000000e+00> : vector<8x128xf32>
    %2 = tpu.matmul %0, %1, %cst {dimension_numbers = #tpu.dot_dimension_numbers<[1], [0], [0], [1], [0, 0, 1, 1], [], []>} : vector<8x640xbf16>, vector<640x128xbf16>, vector<8x128xf32> -> vector<8x128xf32>
    %c0_3 = arith.constant 0 : index
    %c0_4 = arith.constant 0 : index
    %3 = vector.load %arg5[%c0_3, %c0_4] : memref<8x128xbf16, #tpu.memory_space<vmem>>, vector<8x128xbf16>
    %c0_5 = arith.constant 0 : index
    %c0_6 = arith.constant 0 : index
    %4 = vector.load %arg6[%c0_5, %c0_6] : memref<128x128xbf16, #tpu.memory_space<vmem>>, vector<128x128xbf16>
    %cst_7 = arith.constant dense<0.000000e+00> : vector<8x128xf32>
    %5 = tpu.matmul %3, %4, %cst_7 {dimension_numbers = #tpu.dot_dimension_numbers<[1], [0], [0], [1], [0, 0, 1, 1], [], []>} : vector<8x128xbf16>, vector<128x128xbf16>, vector<8x128xf32> -> vector<8x128xf32>
    %c0_8 = arith.constant 0 : index
    %c0_9 = arith.constant 0 : index
    %6 = vector.load %arg7[%c0_8, %c0_9] : memref<1x128xf32, #tpu.memory_space<vmem>>, vector<1x128xf32>
    %7 = vector.broadcast %6 : vector<1x128xf32> to vector<8x128xf32>
    %8 = arith.addf %5, %7 : vector<8x128xf32>
    %c0_10 = arith.constant 0 : index
    %c0_11 = arith.constant 0 : index
    %9 = vector.load %arg3[%c0_10, %c0_11] : memref<1x128xf32, #tpu.memory_space<vmem>>, vector<1x128xf32>
    %c0_12 = arith.constant 0 : index
    %c0_13 = arith.constant 0 : index
    %10 = vector.load %arg4[%c0_12, %c0_13] : memref<1x128xf32, #tpu.memory_space<vmem>>, vector<1x128xf32>
    %cst_14 = arith.constant dense<0.000000e+00> : vector<128xf32>
    %11 = vector.multi_reduction <add>, %2, %cst_14 [0] : vector<8x128xf32> to vector<128xf32>
    %12 = vector.shape_cast %11 : vector<128xf32> to vector<1x128xf32>
    %cst_15 = arith.constant 1.250000e-01 : f32
    %13 = vector.broadcast %cst_15 : f32 to vector<1x128xf32>
    %14 = arith.mulf %12, %13 : vector<1x128xf32>
    %15 = arith.mulf %2, %2 : vector<8x128xf32>
    %cst_16 = arith.constant dense<0.000000e+00> : vector<128xf32>
    %16 = vector.multi_reduction <add>, %15, %cst_16 [0] : vector<8x128xf32> to vector<128xf32>
    %17 = vector.shape_cast %16 : vector<128xf32> to vector<1x128xf32>
    %cst_17 = arith.constant 1.250000e-01 : f32
    %18 = vector.broadcast %cst_17 : f32 to vector<1x128xf32>
    %19 = arith.mulf %17, %18 : vector<1x128xf32>
    %20 = arith.mulf %14, %14 : vector<1x128xf32>
    %21 = arith.subf %19, %20 : vector<1x128xf32>
    %cst_18 = arith.constant 0.000000e+00 : f32
    %22 = vector.broadcast %cst_18 : f32 to vector<1x128xf32>
    %23 = arith.maximumf %21, %22 : vector<1x128xf32>
    %cst_19 = arith.constant 9.99999974E-6 : f32
    %24 = vector.broadcast %cst_19 : f32 to vector<1x128xf32>
    %25 = arith.addf %23, %24 : vector<1x128xf32>
    %26 = math.rsqrt %25 : vector<1x128xf32>
    %27 = arith.mulf %9, %26 : vector<1x128xf32>
    %28 = arith.mulf %14, %27 : vector<1x128xf32>
    %29 = arith.subf %10, %28 : vector<1x128xf32>
    %30 = vector.broadcast %27 : vector<1x128xf32> to vector<8x128xf32>
    %31 = arith.mulf %2, %30 : vector<8x128xf32>
    %32 = vector.broadcast %29 : vector<1x128xf32> to vector<8x128xf32>
    %33 = arith.addf %31, %32 : vector<8x128xf32>
    %34 = arith.addf %33, %8 : vector<8x128xf32>
    %cst_20 = arith.constant 0.000000e+00 : f32
    %35 = vector.broadcast %cst_20 : f32 to vector<8x128xf32>
    %36 = arith.maximumf %34, %35 : vector<8x128xf32>
    %c0_21 = arith.constant 0 : index
    %c0_22 = arith.constant 0 : index
    %37 = vector.load %arg8[%c0_21, %c0_22] : memref<8x128xf32, #tpu.memory_space<vmem>>, vector<8x128xf32>
    %38 = arith.mulf %36, %37 : vector<8x128xf32>
    %39 = arith.truncf %38 : vector<8x128xf32> to vector<8x128xbf16>
    %c0_23 = arith.constant 0 : index
    %c0_24 = arith.constant 0 : index
    %40 = vector.load %arg9[%c0_23, %c0_24] : memref<8x128xbf16, #tpu.memory_space<vmem>>, vector<8x128xbf16>
    tpu.vector_store %arg9[%c0_23, %c0_24], %39 {strides = array<i32>} : memref<8x128xbf16, #tpu.memory_space<vmem>>, vector<8x128xbf16>,
    return
  }
  func.func @transform_0(%arg0: i32) -> (i32, i32) {
    %c0_i32 = arith.constant 0 : i32
    %c0_i32_0 = arith.constant 0 : i32
    %c0_i32_1 = arith.constant 0 : i32
    return %c0_i32, %c0_i32_0 : i32, i32
  }
  func.func @transform_1(%arg0: i32) -> (i32, i32) {
    %c0_i32 = arith.constant 0 : i32
    %c0_i32_0 = arith.constant 0 : i32
    %c0_i32_1 = arith.constant 0 : i32
    return %c0_i32, %c0_i32_0 : i32, i32
  }
  func.func @transform_2(%arg0: i32) -> (i32, i32) {
    %c0_i32 = arith.constant 0 : i32
    %c0_i32_0 = arith.constant 0 : i32
    %c0_i32_1 = arith.constant 0 : i32
    return %c0_i32, %c0_i32_0 : i32, i32
  }
  func.func @transform_3(%arg0: i32) -> (i32, i32) {
    %c0_i32 = arith.constant 0 : i32
    %c0_i32_0 = arith.constant 0 : i32
    %c0_i32_1 = arith.constant 0 : i32
    return %c0_i32, %c0_i32_0 : i32, i32
  }
  func.func @transform_4(%arg0: i32) -> (i32, i32) {
    %c0_i32 = arith.constant 0 : i32
    %c0_i32_0 = arith.constant 0 : i32
    %c0_i32_1 = arith.constant 0 : i32
    return %c0_i32, %c0_i32_0 : i32, i32
  }
  func.func @transform_5(%arg0: i32) -> (i32, i32) {
    %c0_i32 = arith.constant 0 : i32
    %c0_i32_0 = arith.constant 0 : i32
    %c0_i32_1 = arith.constant 0 : i32
    return %c0_i32, %c0_i32_0 : i32, i32
  }
  func.func @transform_6(%arg0: i32) -> (i32, i32) {
    %c0_i32 = arith.constant 0 : i32
    %c0_i32_0 = arith.constant 0 : i32
    %c0_i32_1 = arith.constant 0 : i32
    return %c0_i32, %c0_i32_0 : i32, i32
  }
  func.func @transform_7(%arg0: i32) -> (i32, i32) {
    %c0_i32 = arith.constant 0 : i32
    %c0_i32_0 = arith.constant 0 : i32
    %c0_i32_1 = arith.constant 0 : i32
    return %c0_i32, %c0_i32_0 : i32, i32
  }
  func.func @transform_8(%arg0: i32) -> (i32, i32) {
    %c0_i32 = arith.constant 0 : i32
    %c0_i32_0 = arith.constant 0 : i32
    %c0_i32_1 = arith.constant 0 : i32
    return %c0_i32, %c0_i32_0 : i32, i32
  }
}

module attributes {stable_mosaic.version = 11 : i64} {
  func.func @_conv_bn_relu_kernel(%arg0: i32, %arg1: memref<8x640xbf16, #tpu.memory_space<vmem>>, %arg2: memref<640x128xbf16, #tpu.memory_space<vmem>>, %arg3: memref<1x128xf32, #tpu.memory_space<vmem>>, %arg4: memref<1x128xf32, #tpu.memory_space<vmem>>, %arg5: memref<1x128xf32, #tpu.memory_space<vmem>>, %arg6: memref<8x128xbf16, #tpu.memory_space<vmem>>) attributes {dimension_semantics = [#tpu.dimension_semantics<arbitrary>], iteration_bounds = array<i64: 1>, scalar_prefetch = 0 : i64, scratch_operands = 0 : i64, tpu.core_type = #tpu.core_type<tc>, window_params = [{pipeline_mode = #tpu.pipeline_mode<synchronous>, transform_indices = @transform_0, window_bounds = array<i64: 8, 640>}, {pipeline_mode = #tpu.pipeline_mode<synchronous>, transform_indices = @transform_1, window_bounds = array<i64: 640, 128>}, {pipeline_mode = #tpu.pipeline_mode<synchronous>, transform_indices = @transform_2, window_bounds = array<i64: 1, 128>}, {pipeline_mode = #tpu.pipeline_mode<synchronous>, transform_indices = @transform_3, window_bounds = array<i64: 1, 128>}, {pipeline_mode = #tpu.pipeline_mode<synchronous>, transform_indices = @transform_4, window_bounds = array<i64: 1, 128>}, {pipeline_mode = #tpu.pipeline_mode<synchronous>, transform_indices = @transform_5, window_bounds = array<i64: 8, 128>}]} {
    %c0 = arith.constant 0 : index
    %c0_0 = arith.constant 0 : index
    %0 = vector.load %arg1[%c0, %c0_0] : memref<8x640xbf16, #tpu.memory_space<vmem>>, vector<8x640xbf16>
    %c0_1 = arith.constant 0 : index
    %c0_2 = arith.constant 0 : index
    %1 = vector.load %arg2[%c0_1, %c0_2] : memref<640x128xbf16, #tpu.memory_space<vmem>>, vector<640x128xbf16>
    %cst = arith.constant dense<0.000000e+00> : vector<8x128xf32>
    %2 = tpu.matmul %0, %1, %cst {dimension_numbers = #tpu.dot_dimension_numbers<[1], [0], [0], [1], [0, 0, 1, 1], [], []>} : vector<8x640xbf16>, vector<640x128xbf16>, vector<8x128xf32> -> vector<8x128xf32>
    %c0_3 = arith.constant 0 : index
    %c0_4 = arith.constant 0 : index
    %3 = vector.load %arg3[%c0_3, %c0_4] : memref<1x128xf32, #tpu.memory_space<vmem>>, vector<1x128xf32>
    %4 = vector.broadcast %3 : vector<1x128xf32> to vector<8x128xf32>
    %5 = arith.addf %2, %4 : vector<8x128xf32>
    %c0_5 = arith.constant 0 : index
    %c0_6 = arith.constant 0 : index
    %6 = vector.load %arg4[%c0_5, %c0_6] : memref<1x128xf32, #tpu.memory_space<vmem>>, vector<1x128xf32>
    %c0_7 = arith.constant 0 : index
    %c0_8 = arith.constant 0 : index
    %7 = vector.load %arg5[%c0_7, %c0_8] : memref<1x128xf32, #tpu.memory_space<vmem>>, vector<1x128xf32>
    %8 = tpu.iota {dimensions = array<i32: 0>} : vector<8x128xi32>
    %c2_i32 = arith.constant 2 : i32
    %9 = vector.broadcast %c2_i32 : i32 to vector<8x128xi32>
    %10 = arith.cmpi slt, %8, %9 : vector<8x128xi32>
    %cst_9 = arith.constant 0.000000e+00 : f32
    %11 = vector.broadcast %cst_9 : f32 to vector<8x128xf32>
    %12 = arith.select %10, %5, %11 : vector<8x128xi1>, vector<8x128xf32>
    %cst_10 = arith.constant dense<0.000000e+00> : vector<128xf32>
    %13 = vector.multi_reduction <add>, %12, %cst_10 [0] : vector<8x128xf32> to vector<128xf32>
    %14 = vector.shape_cast %13 : vector<128xf32> to vector<1x128xf32>
    %cst_11 = arith.constant 5.000000e-01 : f32
    %15 = vector.broadcast %cst_11 : f32 to vector<1x128xf32>
    %16 = arith.mulf %14, %15 : vector<1x128xf32>
    %17 = arith.mulf %12, %12 : vector<8x128xf32>
    %cst_12 = arith.constant dense<0.000000e+00> : vector<128xf32>
    %18 = vector.multi_reduction <add>, %17, %cst_12 [0] : vector<8x128xf32> to vector<128xf32>
    %19 = vector.shape_cast %18 : vector<128xf32> to vector<1x128xf32>
    %cst_13 = arith.constant 5.000000e-01 : f32
    %20 = vector.broadcast %cst_13 : f32 to vector<1x128xf32>
    %21 = arith.mulf %19, %20 : vector<1x128xf32>
    %22 = arith.mulf %16, %16 : vector<1x128xf32>
    %23 = arith.subf %21, %22 : vector<1x128xf32>
    %cst_14 = arith.constant 0.000000e+00 : f32
    %24 = vector.broadcast %cst_14 : f32 to vector<1x128xf32>
    %25 = arith.maximumf %23, %24 : vector<1x128xf32>
    %cst_15 = arith.constant 9.99999974E-6 : f32
    %26 = vector.broadcast %cst_15 : f32 to vector<1x128xf32>
    %27 = arith.addf %25, %26 : vector<1x128xf32>
    %28 = math.rsqrt %27 : vector<1x128xf32>
    %29 = arith.mulf %6, %28 : vector<1x128xf32>
    %30 = arith.mulf %16, %29 : vector<1x128xf32>
    %31 = arith.subf %7, %30 : vector<1x128xf32>
    %32 = vector.broadcast %29 : vector<1x128xf32> to vector<8x128xf32>
    %33 = arith.mulf %5, %32 : vector<8x128xf32>
    %34 = vector.broadcast %31 : vector<1x128xf32> to vector<8x128xf32>
    %35 = arith.addf %33, %34 : vector<8x128xf32>
    %cst_16 = arith.constant 0.000000e+00 : f32
    %36 = vector.broadcast %cst_16 : f32 to vector<8x128xf32>
    %37 = arith.maximumf %35, %36 : vector<8x128xf32>
    %38 = arith.truncf %37 : vector<8x128xf32> to vector<8x128xbf16>
    %c0_17 = arith.constant 0 : index
    %c0_18 = arith.constant 0 : index
    %39 = vector.load %arg6[%c0_17, %c0_18] : memref<8x128xbf16, #tpu.memory_space<vmem>>, vector<8x128xbf16>
    tpu.vector_store %arg6[%c0_17, %c0_18], %38 {strides = array<i32>} : memref<8x128xbf16, #tpu.memory_space<vmem>>, vector<8x128xbf16>,
    return
  }
  func.func @transform_0(%arg0: i32) -> (i32, i32) {
    %c0_i32 = arith.constant 0 : i32
    %c0_i32_0 = arith.constant 0 : i32
    %c0_i32_1 = arith.constant 0 : i32
    return %c0_i32, %c0_i32_0 : i32, i32
  }
  func.func @transform_1(%arg0: i32) -> (i32, i32) {
    %c0_i32 = arith.constant 0 : i32
    %c0_i32_0 = arith.constant 0 : i32
    %c0_i32_1 = arith.constant 0 : i32
    return %c0_i32, %c0_i32_0 : i32, i32
  }
  func.func @transform_2(%arg0: i32) -> (i32, i32) {
    %c0_i32 = arith.constant 0 : i32
    %c0_i32_0 = arith.constant 0 : i32
    %c0_i32_1 = arith.constant 0 : i32
    return %c0_i32, %c0_i32_0 : i32, i32
  }
  func.func @transform_3(%arg0: i32) -> (i32, i32) {
    %c0_i32 = arith.constant 0 : i32
    %c0_i32_0 = arith.constant 0 : i32
    %c0_i32_1 = arith.constant 0 : i32
    return %c0_i32, %c0_i32_0 : i32, i32
  }
  func.func @transform_4(%arg0: i32) -> (i32, i32) {
    %c0_i32 = arith.constant 0 : i32
    %c0_i32_0 = arith.constant 0 : i32
    %c0_i32_1 = arith.constant 0 : i32
    return %c0_i32, %c0_i32_0 : i32, i32
  }
  func.func @transform_5(%arg0: i32) -> (i32, i32) {
    %c0_i32 = arith.constant 0 : i32
    %c0_i32_0 = arith.constant 0 : i32
    %c0_i32_1 = arith.constant 0 : i32
    return %c0_i32, %c0_i32_0 : i32, i32
  }
}

module attributes {stable_mosaic.version = 11 : i64} {
  func.func @_matmul_bias_kernel(%arg0: i32, %arg1: memref<8x128xbf16, #tpu.memory_space<vmem>>, %arg2: memref<128x128xbf16, #tpu.memory_space<vmem>>, %arg3: memref<1x128xf32, #tpu.memory_space<vmem>>, %arg4: memref<8x128xf32, #tpu.memory_space<vmem>>) attributes {dimension_semantics = [#tpu.dimension_semantics<arbitrary>], iteration_bounds = array<i64: 1>, scalar_prefetch = 0 : i64, scratch_operands = 0 : i64, tpu.core_type = #tpu.core_type<tc>, window_params = [{pipeline_mode = #tpu.pipeline_mode<synchronous>, transform_indices = @transform_0, window_bounds = array<i64: 8, 128>}, {pipeline_mode = #tpu.pipeline_mode<synchronous>, transform_indices = @transform_1, window_bounds = array<i64: 128, 128>}, {pipeline_mode = #tpu.pipeline_mode<synchronous>, transform_indices = @transform_2, window_bounds = array<i64: 1, 128>}, {pipeline_mode = #tpu.pipeline_mode<synchronous>, transform_indices = @transform_3, window_bounds = array<i64: 8, 128>}]} {
    %c0 = arith.constant 0 : index
    %c0_0 = arith.constant 0 : index
    %0 = vector.load %arg1[%c0, %c0_0] : memref<8x128xbf16, #tpu.memory_space<vmem>>, vector<8x128xbf16>
    %c0_1 = arith.constant 0 : index
    %c0_2 = arith.constant 0 : index
    %1 = vector.load %arg2[%c0_1, %c0_2] : memref<128x128xbf16, #tpu.memory_space<vmem>>, vector<128x128xbf16>
    %cst = arith.constant dense<0.000000e+00> : vector<8x128xf32>
    %2 = tpu.matmul %0, %1, %cst {dimension_numbers = #tpu.dot_dimension_numbers<[1], [0], [0], [1], [0, 0, 1, 1], [], []>} : vector<8x128xbf16>, vector<128x128xbf16>, vector<8x128xf32> -> vector<8x128xf32>
    %c0_3 = arith.constant 0 : index
    %c0_4 = arith.constant 0 : index
    %3 = vector.load %arg3[%c0_3, %c0_4] : memref<1x128xf32, #tpu.memory_space<vmem>>, vector<1x128xf32>
    %4 = vector.broadcast %3 : vector<1x128xf32> to vector<8x128xf32>
    %5 = arith.addf %2, %4 : vector<8x128xf32>
    %c0_5 = arith.constant 0 : index
    %c0_6 = arith.constant 0 : index
    %6 = vector.load %arg4[%c0_5, %c0_6] : memref<8x128xf32, #tpu.memory_space<vmem>>, vector<8x128xf32>
    tpu.vector_store %arg4[%c0_5, %c0_6], %5 {strides = array<i32>} : memref<8x128xf32, #tpu.memory_space<vmem>>, vector<8x128xf32>,
    return
  }
  func.func @transform_0(%arg0: i32) -> (i32, i32) {
    %c0_i32 = arith.constant 0 : i32
    %c0_i32_0 = arith.constant 0 : i32
    %c0_i32_1 = arith.constant 0 : i32
    return %c0_i32, %c0_i32_0 : i32, i32
  }
  func.func @transform_1(%arg0: i32) -> (i32, i32) {
    %c0_i32 = arith.constant 0 : i32
    %c0_i32_0 = arith.constant 0 : i32
    %c0_i32_1 = arith.constant 0 : i32
    return %c0_i32, %c0_i32_0 : i32, i32
  }
  func.func @transform_2(%arg0: i32) -> (i32, i32) {
    %c0_i32 = arith.constant 0 : i32
    %c0_i32_0 = arith.constant 0 : i32
    %c0_i32_1 = arith.constant 0 : i32
    return %c0_i32, %c0_i32_0 : i32, i32
  }
  func.func @transform_3(%arg0: i32) -> (i32, i32) {
    %c0_i32 = arith.constant 0 : i32
    %c0_i32_0 = arith.constant 0 : i32
    %c0_i32_1 = arith.constant 0 : i32
    return %c0_i32, %c0_i32_0 : i32, i32
  }
}

module attributes {stable_mosaic.version = 11 : i64} {
  func.func @_conv_bn_dsres_gate_kernel(%arg0: i32, %arg1: memref<8x1152xbf16, #tpu.memory_space<vmem>>, %arg2: memref<1152x128xbf16, #tpu.memory_space<vmem>>, %arg3: memref<1x128xf32, #tpu.memory_space<vmem>>, %arg4: memref<1x128xf32, #tpu.memory_space<vmem>>, %arg5: memref<8x256xbf16, #tpu.memory_space<vmem>>, %arg6: memref<256x128xbf16, #tpu.memory_space<vmem>>, %arg7: memref<1x128xf32, #tpu.memory_space<vmem>>, %arg8: memref<8x128xf32, #tpu.memory_space<vmem>>, %arg9: memref<8x128xbf16, #tpu.memory_space<vmem>>) attributes {dimension_semantics = [#tpu.dimension_semantics<arbitrary>], iteration_bounds = array<i64: 1>, scalar_prefetch = 0 : i64, scratch_operands = 0 : i64, tpu.core_type = #tpu.core_type<tc>, window_params = [{pipeline_mode = #tpu.pipeline_mode<synchronous>, transform_indices = @transform_0, window_bounds = array<i64: 8, 1152>}, {pipeline_mode = #tpu.pipeline_mode<synchronous>, transform_indices = @transform_1, window_bounds = array<i64: 1152, 128>}, {pipeline_mode = #tpu.pipeline_mode<synchronous>, transform_indices = @transform_2, window_bounds = array<i64: 1, 128>}, {pipeline_mode = #tpu.pipeline_mode<synchronous>, transform_indices = @transform_3, window_bounds = array<i64: 1, 128>}, {pipeline_mode = #tpu.pipeline_mode<synchronous>, transform_indices = @transform_4, window_bounds = array<i64: 8, 256>}, {pipeline_mode = #tpu.pipeline_mode<synchronous>, transform_indices = @transform_5, window_bounds = array<i64: 256, 128>}, {pipeline_mode = #tpu.pipeline_mode<synchronous>, transform_indices = @transform_6, window_bounds = array<i64: 1, 128>}, {pipeline_mode = #tpu.pipeline_mode<synchronous>, transform_indices = @transform_7, window_bounds = array<i64: 8, 128>}, {pipeline_mode = #tpu.pipeline_mode<synchronous>, transform_indices = @transform_8, window_bounds = array<i64: 8, 128>}]} {
    %c0 = arith.constant 0 : index
    %c0_0 = arith.constant 0 : index
    %0 = vector.load %arg1[%c0, %c0_0] : memref<8x1152xbf16, #tpu.memory_space<vmem>>, vector<8x1152xbf16>
    %c0_1 = arith.constant 0 : index
    %c0_2 = arith.constant 0 : index
    %1 = vector.load %arg2[%c0_1, %c0_2] : memref<1152x128xbf16, #tpu.memory_space<vmem>>, vector<1152x128xbf16>
    %cst = arith.constant dense<0.000000e+00> : vector<8x128xf32>
    %2 = tpu.matmul %0, %1, %cst {dimension_numbers = #tpu.dot_dimension_numbers<[1], [0], [0], [1], [0, 0, 1, 1], [], []>} : vector<8x1152xbf16>, vector<1152x128xbf16>, vector<8x128xf32> -> vector<8x128xf32>
    %c0_3 = arith.constant 0 : index
    %c0_4 = arith.constant 0 : index
    %3 = vector.load %arg5[%c0_3, %c0_4] : memref<8x256xbf16, #tpu.memory_space<vmem>>, vector<8x256xbf16>
    %c0_5 = arith.constant 0 : index
    %c0_6 = arith.constant 0 : index
    %4 = vector.load %arg6[%c0_5, %c0_6] : memref<256x128xbf16, #tpu.memory_space<vmem>>, vector<256x128xbf16>
    %cst_7 = arith.constant dense<0.000000e+00> : vector<8x128xf32>
    %5 = tpu.matmul %3, %4, %cst_7 {dimension_numbers = #tpu.dot_dimension_numbers<[1], [0], [0], [1], [0, 0, 1, 1], [], []>} : vector<8x256xbf16>, vector<256x128xbf16>, vector<8x128xf32> -> vector<8x128xf32>
    %c0_8 = arith.constant 0 : index
    %c0_9 = arith.constant 0 : index
    %6 = vector.load %arg7[%c0_8, %c0_9] : memref<1x128xf32, #tpu.memory_space<vmem>>, vector<1x128xf32>
    %7 = vector.broadcast %6 : vector<1x128xf32> to vector<8x128xf32>
    %8 = arith.addf %5, %7 : vector<8x128xf32>
    %c0_10 = arith.constant 0 : index
    %c0_11 = arith.constant 0 : index
    %9 = vector.load %arg3[%c0_10, %c0_11] : memref<1x128xf32, #tpu.memory_space<vmem>>, vector<1x128xf32>
    %c0_12 = arith.constant 0 : index
    %c0_13 = arith.constant 0 : index
    %10 = vector.load %arg4[%c0_12, %c0_13] : memref<1x128xf32, #tpu.memory_space<vmem>>, vector<1x128xf32>
    %11 = tpu.iota {dimensions = array<i32: 0>} : vector<8x128xi32>
    %c2_i32 = arith.constant 2 : i32
    %12 = vector.broadcast %c2_i32 : i32 to vector<8x128xi32>
    %13 = arith.cmpi slt, %11, %12 : vector<8x128xi32>
    %cst_14 = arith.constant 0.000000e+00 : f32
    %14 = vector.broadcast %cst_14 : f32 to vector<8x128xf32>
    %15 = arith.select %13, %2, %14 : vector<8x128xi1>, vector<8x128xf32>
    %cst_15 = arith.constant dense<0.000000e+00> : vector<128xf32>
    %16 = vector.multi_reduction <add>, %15, %cst_15 [0] : vector<8x128xf32> to vector<128xf32>
    %17 = vector.shape_cast %16 : vector<128xf32> to vector<1x128xf32>
    %cst_16 = arith.constant 5.000000e-01 : f32
    %18 = vector.broadcast %cst_16 : f32 to vector<1x128xf32>
    %19 = arith.mulf %17, %18 : vector<1x128xf32>
    %20 = arith.mulf %15, %15 : vector<8x128xf32>
    %cst_17 = arith.constant dense<0.000000e+00> : vector<128xf32>
    %21 = vector.multi_reduction <add>, %20, %cst_17 [0] : vector<8x128xf32> to vector<128xf32>
    %22 = vector.shape_cast %21 : vector<128xf32> to vector<1x128xf32>
    %cst_18 = arith.constant 5.000000e-01 : f32
    %23 = vector.broadcast %cst_18 : f32 to vector<1x128xf32>
    %24 = arith.mulf %22, %23 : vector<1x128xf32>
    %25 = arith.mulf %19, %19 : vector<1x128xf32>
    %26 = arith.subf %24, %25 : vector<1x128xf32>
    %cst_19 = arith.constant 0.000000e+00 : f32
    %27 = vector.broadcast %cst_19 : f32 to vector<1x128xf32>
    %28 = arith.maximumf %26, %27 : vector<1x128xf32>
    %cst_20 = arith.constant 9.99999974E-6 : f32
    %29 = vector.broadcast %cst_20 : f32 to vector<1x128xf32>
    %30 = arith.addf %28, %29 : vector<1x128xf32>
    %31 = math.rsqrt %30 : vector<1x128xf32>
    %32 = arith.mulf %9, %31 : vector<1x128xf32>
    %33 = arith.mulf %19, %32 : vector<1x128xf32>
    %34 = arith.subf %10, %33 : vector<1x128xf32>
    %35 = vector.broadcast %32 : vector<1x128xf32> to vector<8x128xf32>
    %36 = arith.mulf %2, %35 : vector<8x128xf32>
    %37 = vector.broadcast %34 : vector<1x128xf32> to vector<8x128xf32>
    %38 = arith.addf %36, %37 : vector<8x128xf32>
    %39 = arith.addf %38, %8 : vector<8x128xf32>
    %cst_21 = arith.constant 0.000000e+00 : f32
    %40 = vector.broadcast %cst_21 : f32 to vector<8x128xf32>
    %41 = arith.maximumf %39, %40 : vector<8x128xf32>
    %c0_22 = arith.constant 0 : index
    %c0_23 = arith.constant 0 : index
    %42 = vector.load %arg8[%c0_22, %c0_23] : memref<8x128xf32, #tpu.memory_space<vmem>>, vector<8x128xf32>
    %43 = arith.mulf %41, %42 : vector<8x128xf32>
    %44 = arith.truncf %43 : vector<8x128xf32> to vector<8x128xbf16>
    %c0_24 = arith.constant 0 : index
    %c0_25 = arith.constant 0 : index
    %45 = vector.load %arg9[%c0_24, %c0_25] : memref<8x128xbf16, #tpu.memory_space<vmem>>, vector<8x128xbf16>
    tpu.vector_store %arg9[%c0_24, %c0_25], %44 {strides = array<i32>} : memref<8x128xbf16, #tpu.memory_space<vmem>>, vector<8x128xbf16>,
    return
  }
  func.func @transform_0(%arg0: i32) -> (i32, i32) {
    %c0_i32 = arith.constant 0 : i32
    %c0_i32_0 = arith.constant 0 : i32
    %c0_i32_1 = arith.constant 0 : i32
    return %c0_i32, %c0_i32_0 : i32, i32
  }
  func.func @transform_1(%arg0: i32) -> (i32, i32) {
    %c0_i32 = arith.constant 0 : i32
    %c0_i32_0 = arith.constant 0 : i32
    %c0_i32_1 = arith.constant 0 : i32
    return %c0_i32, %c0_i32_0 : i32, i32
  }
  func.func @transform_2(%arg0: i32) -> (i32, i32) {
    %c0_i32 = arith.constant 0 : i32
    %c0_i32_0 = arith.constant 0 : i32
    %c0_i32_1 = arith.constant 0 : i32
    return %c0_i32, %c0_i32_0 : i32, i32
  }
  func.func @transform_3(%arg0: i32) -> (i32, i32) {
    %c0_i32 = arith.constant 0 : i32
    %c0_i32_0 = arith.constant 0 : i32
    %c0_i32_1 = arith.constant 0 : i32
    return %c0_i32, %c0_i32_0 : i32, i32
  }
  func.func @transform_4(%arg0: i32) -> (i32, i32) {
    %c0_i32 = arith.constant 0 : i32
    %c0_i32_0 = arith.constant 0 : i32
    %c0_i32_1 = arith.constant 0 : i32
    return %c0_i32, %c0_i32_0 : i32, i32
  }
  func.func @transform_5(%arg0: i32) -> (i32, i32) {
    %c0_i32 = arith.constant 0 : i32
    %c0_i32_0 = arith.constant 0 : i32
    %c0_i32_1 = arith.constant 0 : i32
    return %c0_i32, %c0_i32_0 : i32, i32
  }
  func.func @transform_6(%arg0: i32) -> (i32, i32) {
    %c0_i32 = arith.constant 0 : i32
    %c0_i32_0 = arith.constant 0 : i32
    %c0_i32_1 = arith.constant 0 : i32
    return %c0_i32, %c0_i32_0 : i32, i32
  }
  func.func @transform_7(%arg0: i32) -> (i32, i32) {
    %c0_i32 = arith.constant 0 : i32
    %c0_i32_0 = arith.constant 0 : i32
    %c0_i32_1 = arith.constant 0 : i32
    return %c0_i32, %c0_i32_0 : i32, i32
  }
  func.func @transform_8(%arg0: i32) -> (i32, i32) {
    %c0_i32 = arith.constant 0 : i32
    %c0_i32_0 = arith.constant 0 : i32
    %c0_i32_1 = arith.constant 0 : i32
    return %c0_i32, %c0_i32_0 : i32, i32
  }
}

</mosaic_0001>

<bundles_post_ra>
// kernel: _lambda_.20
= control target key start
LH: loop header
LB: loop body
LE: loop exit
PB: predicated region body
PF: predicated region fallthrough
CT: control target
= control target key end

     0   :  { %s3146_s1 = inlined_call_operand.vmem [shape: bf16[128,128], index: 1, kind: input, shape index: {}]   ;;  %s3147_s0 = inlined_call_operand.vmem [shape: bf16[512,128], index: 0, kind: input, shape index: {}]   ;;  %s3148_s2 = inlined_call_operand.vmem [shape: f32[1,128], index: 2, kind: input, shape index: {}, may-alias: {2,4}]   ;;  %s3149_s3 = inlined_call_operand.vmem [shape: f32[1,128], index: 3, kind: input, shape index: {}]   ;;  %s3150_s4 = inlined_call_operand.vmem [shape: f32[1,128], index: 4, kind: input, shape index: {}, may-alias: {2,4}]   ;;  %s3151_s5 = inlined_call_operand.vmem [shape: bf16[512,128], index: 5, kind: output, shape index: {}]  }
   0x1   :  { %v1875_v0 = vld [vmem:[%s3146_s1] sm:$0xff]   ;;  %v1876_v1 = vld [vmem:[%s3146_s1 + $0x8] sm:$0xff]   ;;  %v1877_v2 = vld [vmem:[%s3146_s1 + $0x10] sm:$0xff]  }
   0x2   :  { %1779 = vmatprep.subr.bf16.mxu0 %v1875_v0  ;;  %1859 = vmatprep.subr.bf16.mxu1 %v1875_v0  ;;  %v1878_v3 = vld [vmem:[%s3146_s1 + $0x18] sm:$0xff]   ;;  %v1883_v4 = vld [vmem:[%s3147_s0] sm:$0xff]   ;;  %v1880_v6 = vld [vmem:[%s3146_s1 + $0x28] sm:$0xff]  }
   0x3   :  { %1780 = vmatpush3.bf16.msra.mxu0 %v1875_v0  ;;  %1867 = vmatpush3.bf16.msra.mxu1 %v1875_v0  ;;  %v1879_v5 = vld [vmem:[%s3146_s1 + $0x20] sm:$0xff]   ;;  %v1881_v7 = vld [vmem:[%s3146_s1 + $0x30] sm:$0xff]   ;;  %v1882_v8 = vld [vmem:[%s3146_s1 + $0x38] sm:$0xff]  }
   0x4   :  { %1781 = vmatprep.subr.bf16.mxu0 %v1876_v1  ;;  %1860 = vmatprep.subr.bf16.mxu1 %v1876_v1  ;;  %v1899_v9 = vld [vmem:[%s3147_s0 + $0x80] sm:$0xff]   ;;  %v1884_v10 = vld [vmem:[%s3147_s0 + $0x8] sm:$0xff]   ;;  %v1885_v11 = vld [vmem:[%s3147_s0 + $0x10] sm:$0xff]  }
   0x5   :  { %1795 = vmatprep.mubr.bf16.mxu0 %v1883_v4  ;;  %1827 = vmatprep.mubr.bf16.mxu1 %v1899_v9  ;;  %v1900_v12 = vld [vmem:[%s3147_s0 + $0x88] sm:$0xff]   ;;  %v1901_v13 = vld [vmem:[%s3147_s0 + $0x90] sm:$0xff]   ;;  %v1886_v14 = vld [vmem:[%s3147_s0 + $0x18] sm:$0xff]  }
   0x6   :  { %v1887_v15 = vld [vmem:[%s3147_s0 + $0x20] sm:$0xff]   ;;  %v1902_v16 = vld [vmem:[%s3147_s0 + $0x98] sm:$0xff]   ;;  %v1888_v18 = vld [vmem:[%s3147_s0 + $0x28] sm:$0xff]  }
   0x7   :  { %1782 = vmatpush3.bf16.msra.mxu0 %v1876_v1  ;;  %1868 = vmatpush3.bf16.msra.mxu1 %v1876_v1  ;;  %v1903_v17 = vld [vmem:[%s3147_s0 + $0xa0] sm:$0xff]   ;;  %v1904_v19 = vld [vmem:[%s3147_s0 + $0xa8] sm:$0xff]   ;;  %v1889_v20 = vld [vmem:[%s3147_s0 + $0x30] sm:$0xff]  }
   0x8   :  { %1783 = vmatprep.subr.bf16.mxu0 %v1877_v2  ;;  %1861 = vmatprep.subr.bf16.mxu1 %v1877_v2  ;;  %v1905_v21 = vld [vmem:[%s3147_s0 + $0xb0] sm:$0xff]   ;;  %v1890_v22 = vld [vmem:[%s3147_s0 + $0x38] sm:$0xff]   ;;  %v1891_v24 = vld [vmem:[%s3147_s0 + $0x40] sm:$0xff]  }
   0x9   :  { %v1906_v23 = vld [vmem:[%s3147_s0 + $0xb8] sm:$0xff]   ;;  %v1907_v25 = vld [vmem:[%s3147_s0 + $0xc0] sm:$0xff]   ;;  %v1892_v26 = vld [vmem:[%s3147_s0 + $0x48] sm:$0xff]  }
   0xa   :  { %v1908_v27 = vld [vmem:[%s3147_s0 + $0xc8] sm:$0xff]   ;;  %v1893_v28 = vld [vmem:[%s3147_s0 + $0x50] sm:$0xff]   ;;  %v1894_v30 = vld [vmem:[%s3147_s0 + $0x58] sm:$0xff]  }
   0xb   :  { %1784 = vmatpush3.bf16.msra.mxu0 %v1877_v2  ;;  %1869 = vmatpush3.bf16.msra.mxu1 %v1877_v2  ;;  %v1909_v29 = vld [vmem:[%s3147_s0 + $0xd0] sm:$0xff]   ;;  %v1910_v31 = vld [vmem:[%s3147_s0 + $0xd8] sm:$0xff]   ;;  %v1895_v32 = vld [vmem:[%s3147_s0 + $0x60] sm:$0xff]  }
   0xc   :  { %1785 = vmatprep.subr.bf16.mxu0 %v1878_v3  ;;  %1862 = vmatprep.subr.bf16.mxu1 %v1878_v3  ;;  %v1911_v33 = vld [vmem:[%s3147_s0 + $0xe0] sm:$0xff]   ;;  %v1896_v34 = vld [vmem:[%s3147_s0 + $0x68] sm:$0xff]   ;;  %v1897_v36 = vld [vmem:[%s3147_s0 + $0x70] sm:$0xff]  }
   0xd   :  { %v1912_v35 = vld [vmem:[%s3147_s0 + $0xe8] sm:$0xff]   ;;  %v1913_v37 = vld [vmem:[%s3147_s0 + $0xf0] sm:$0xff]   ;;  %v1898_v38 = vld [vmem:[%s3147_s0 + $0x78] sm:$0xff]  }
   0xe   :  { %v1914_v39 = vld [vmem:[%s3147_s0 + $0xf8] sm:$0xff]   ;;  %v2070_v40 = vld [vmem:[%s3148_s2] ss:$0 sm:$0xff] }
   0xf   :  { %1786 = vmatpush3.bf16.msra.mxu0 %v1878_v3  ;;  %1870 = vmatpush3.bf16.msra.mxu1 %v1878_v3 }
  0x10   :  { %1787 = vmatprep.subr.bf16.mxu0 %v1879_v5  ;;  %1863 = vmatprep.subr.bf16.mxu1 %v1879_v5 }
  0x13   :  { %1788 = vmatpush3.bf16.msra.mxu0 %v1879_v5  ;;  %1871 = vmatpush3.bf16.msra.mxu1 %v1879_v5 }
  0x14   :  { %1789 = vmatprep.subr.bf16.mxu0 %v1880_v6  ;;  %1864 = vmatprep.subr.bf16.mxu1 %v1880_v6 }
  0x17   :  { %1790 = vmatpush3.bf16.msra.mxu0 %v1880_v6  ;;  %1872 = vmatpush3.bf16.msra.mxu1 %v1880_v6 }
  0x18   :  { %1791 = vmatprep.subr.bf16.mxu0 %v1881_v7  ;;  %1865 = vmatprep.subr.bf16.mxu1 %v1881_v7 }
  0x1b   :  { %1792 = vmatpush3.bf16.msra.mxu0 %v1881_v7  ;;  %1873 = vmatpush3.bf16.msra.mxu1 %v1881_v7 }
  0x1c   :  { %1793 = vmatprep.subr.bf16.mxu0 %v1882_v8  ;;  %1866 = vmatprep.subr.bf16.mxu1 %v1882_v8 }
  0x1f   :  { %1794 = vmatpush3.bf16.msra.mxu0 %v1882_v8  ;;  %1874 = vmatpush3.bf16.msra.mxu1 %v1882_v8 }
  0x22   :  { %1796 = vmatmul.mubr.bf16.vlgmr.msra.gmra.mrb[0].mxu0 %v1884_v10  ;;  %1828 = vmatmul.mubr.bf16.vlgmr.msra.gmra.mrb[0].mxu1 %v1900_v12 }
  0x23   :  { %1799 = vmatprep.mubr.bf16.mxu0 %v1885_v11  ;;  %1831 = vmatprep.mubr.bf16.mxu1 %v1901_v13 }
  0x2a   :  { %1800 = vmatmul.mubr.bf16.gmra.mrb[4].mxu0 %v1886_v14  ;;  %1832 = vmatmul.mubr.bf16.gmra.mrb[4].mxu1 %v1902_v16 }
  0x2b   :  { %1803 = vmatprep.mubr.bf16.mxu0 %v1887_v15  ;;  %1835 = vmatprep.mubr.bf16.mxu1 %v1903_v17 }
  0x32   :  { %1804 = vmatmul.mubr.bf16.gmra.mrb[8].mxu0 %v1888_v18  ;;  %1836 = vmatmul.mubr.bf16.gmra.mrb[8].mxu1 %v1904_v19 }
  0x33   :  { %1807 = vmatprep.mubr.bf16.mxu0 %v1889_v20  ;;  %1839 = vmatprep.mubr.bf16.mxu1 %v1905_v21 }
  0x3a   :  { %1808 = vmatmul.mubr.bf16.gmra.mrb[12].mxu0 %v1890_v22  ;;  %1840 = vmatmul.mubr.bf16.gmra.mrb[12].mxu1 %v1906_v23 }
  0x3b   :  { %1811 = vmatprep.mubr.bf16.mxu0 %v1891_v24  ;;  %1843 = vmatprep.mubr.bf16.mxu1 %v1907_v25 }
  0x42   :  { %1812 = vmatmul.mubr.bf16.gmra.mrb[16].mxu0 %v1892_v26  ;;  %1844 = vmatmul.mubr.bf16.gmra.mrb[16].mxu1 %v1908_v27 }
  0x43   :  { %1815 = vmatprep.mubr.bf16.mxu0 %v1893_v28  ;;  %1847 = vmatprep.mubr.bf16.mxu1 %v1909_v29 }
  0x4a   :  { %1816 = vmatmul.mubr.bf16.gmra.mrb[20].mxu0 %v1894_v30  ;;  %1848 = vmatmul.mubr.bf16.gmra.mrb[20].mxu1 %v1910_v31 }
  0x4b   :  { %1819 = vmatprep.mubr.bf16.mxu0 %v1895_v32  ;;  %1851 = vmatprep.mubr.bf16.mxu1 %v1911_v33 }
  0x52   :  { %1820 = vmatmul.mubr.bf16.gmra.mrb[24].mxu0 %v1896_v34  ;;  %1852 = vmatmul.mubr.bf16.gmra.mrb[24].mxu1 %v1912_v35 }
  0x53   :  { %1823 = vmatprep.mubr.bf16.mxu0 %v1897_v36  ;;  %1855 = vmatprep.mubr.bf16.mxu1 %v1913_v37 }
  0x5a   :  { %1824 = vmatmul.mubr.bf16.gmra.mrb[28].mxu0 %v1898_v38  ;;  %1856 = vmatmul.mubr.bf16.gmra.mrb[28].mxu1 %v1914_v39 }
  0xf5   :  { %v1797_v41 = vpop.f32.mrb[0].mxu0  ;;  %v1829_v42 = vpop.f32.mrb[0].mxu1 }
  0xf6   :  { %v382_v43 = vpop.f32.mrb[1].mxu0  ;;  %v2073_v44 = vadd.f32 %v1829_v42, %v2070_v40  ;;  %v2075_v45 = vpop.f32.mrb[1].mxu1  ;;  %v2084_v52 = vadd.f32 %v1797_v41, %v2070_v40 }
  0xf7   :  { %v2078_v46 = vadd.f32 %v2070_v40, %v382_v43  ;;  %v1798_v47 = vpop.f32.mrb[2].mxu0  ;;  %v1830_v48 = vpop.f32.mrb[2].mxu1 }
  0xf8   :  { %v385_v49 = vpop.f32.mrb[3].mxu0  ;;  %v2081_v50 = vadd.f32 %v1830_v48, %v2070_v40  ;;  %v513_v51 = vpop.f32.mrb[3].mxu1  ;;  %v2093_v55 = vadd.f32 %v1798_v47, %v2070_v40  ;;  %v711_v59 = vmul.f32 %v2084_v52, %v2084_v52 }
  0xf9   :  { %v2087_v53 = vadd.f32 %v2070_v40, %v385_v49  ;;  %v2090_v54 = vadd.f32 %v2070_v40, %v513_v51  ;;  %v709_v56 = vmul.f32 %v2078_v46, %v2078_v46 }
  0xfa   :  { %v712_v0 = vmul.f32 %v2093_v55, %v2093_v55 }
  0xfb   :  { %v639_v57 = vadd.f32 %v2087_v53, %v2078_v46  ;;  %v710_v58 = vmul.f32 %v2087_v53, %v2087_v53 }
  0xfd   :  { %v640_v60 = vadd.f32 %v639_v57, %v2084_v52  ;;  %v773_v61 = vadd.f32 %v710_v58, %v709_v56  ;;  %v1801_v62 = vpop.f32.mrb[4].mxu0  ;;  %v1833_v63 = vpop.f32.mrb[4].mxu1 }
  0xfe   :  { %v398_v1 = vpop.f32.mrb[5].mxu0  ;;  %v2107_v2 = vadd.f32 %v1833_v63, %v2070_v40  ;;  %v526_v3 = vpop.f32.mrb[5].mxu1  ;;  %v2117_v10 = vadd.f32 %v1801_v62, %v2070_v40 }
  0xff   :  { %v774_v4 = vadd.f32 %v773_v61, %v711_v59  ;;  %v2110_v5 = vadd.f32 %v2070_v40, %v398_v1  ;;  %v641_v6 = vadd.f32 %v640_v60, %v2093_v55  ;;  %v1802_v7 = vpop.f32.mrb[6].mxu0  ;;  %v2114_v8 = vadd.f32 %v2070_v40, %v526_v3  ;;  %v1834_v9 = vpop.f32.mrb[6].mxu1 }
 0x100   :  { %v401_v11 = vpop.f32.mrb[7].mxu0  ;;  %v2120_v12 = vadd.f32 %v1834_v9, %v2070_v40  ;;  %v529_v13 = vpop.f32.mrb[7].mxu1  ;;  %v2129_v18 = vadd.f32 %v1802_v7, %v2070_v40  ;;  %v715_v23 = vmul.f32 %v2117_v10, %v2117_v10 }
 0x101   :  { %v642_v14 = vadd.f32 %v641_v6, %v2110_v5  ;;  %v713_v15 = vmul.f32 %v2110_v5, %v2110_v5  ;;  %v775_v16 = vadd.f32 %v774_v4, %v712_v0  ;;  %v2126_v17 = vadd.f32 %v2070_v40, %v401_v11 }
 0x102   :  { %v2132_v19 = vadd.f32 %v2070_v40, %v529_v13  ;;  %v716_v28 = vmul.f32 %v2129_v18, %v2129_v18 }
 0x103   :  { %v776_v20 = vadd.f32 %v775_v16, %v713_v15  ;;  %v643_v21 = vadd.f32 %v642_v14, %v2126_v17  ;;  %v714_v22 = vmul.f32 %v2126_v17, %v2126_v17 }
 0x105   :  { %v644_v24 = vadd.f32 %v643_v21, %v2117_v10  ;;  %v777_v25 = vadd.f32 %v776_v20, %v714_v22  ;;  %v1805_v26 = vpop.f32.mrb[8].mxu0  ;;  %v1837_v27 = vpop.f32.mrb[8].mxu1 }
 0x106   :  { %v414_v29 = vpop.f32.mrb[9].mxu0  ;;  %v2143_v30 = vadd.f32 %v1837_v27, %v2070_v40  ;;  %v542_v31 = vpop.f32.mrb[9].mxu1  ;;  %v2153_v38 = vadd.f32 %v1805_v26, %v2070_v40 }
 0x107   :  { %v778_v32 = vadd.f32 %v777_v25, %v715_v23  ;;  %v2146_v33 = vadd.f32 %v2070_v40, %v414_v29  ;;  %v645_v34 = vadd.f32 %v644_v24, %v2129_v18  ;;  %v1806_v35 = vpop.f32.mrb[10].mxu0  ;;  %v2150_v36 = vadd.f32 %v2070_v40, %v542_v31  ;;  %v1838_v37 = vpop.f32.mrb[10].mxu1 }
 0x108   :  { %v417_v39 = vpop.f32.mrb[11].mxu0  ;;  %v2156_v41 = vadd.f32 %v1838_v37, %v2070_v40  ;;  %v545_v42 = vpop.f32.mrb[11].mxu1  ;;  %v2165_v51 = vadd.f32 %v1806_v35, %v2070_v40  ;;  %v719_v60 = vmul.f32 %v2153_v38, %v2153_v38 }
 0x109   :  { %v646_v43 = vadd.f32 %v645_v34, %v2146_v33  ;;  %v717_v47 = vmul.f32 %v2146_v33, %v2146_v33  ;;  %v779_v48 = vadd.f32 %v778_v32, %v716_v28  ;;  %v2162_v49 = vadd.f32 %v2070_v40, %v417_v39 }
 0x10a   :  { %v2168_v56 = vadd.f32 %v2070_v40, %v545_v42  ;;  %v720_v1 = vmul.f32 %v2165_v51, %v2165_v51 }
 0x10b   :  { %v780_v57 = vadd.f32 %v779_v48, %v717_v47  ;;  %v647_v58 = vadd.f32 %v646_v43, %v2162_v49  ;;  %v718_v59 = vmul.f32 %v2162_v49, %v2162_v49 }
 0x10d   :  { %v648_v61 = vadd.f32 %v647_v58, %v2153_v38  ;;  %v781_v62 = vadd.f32 %v780_v57, %v718_v59  ;;  %v1809_v63 = vpop.f32.mrb[12].mxu0  ;;  %v1841_v0 = vpop.f32.mrb[12].mxu1 }
 0x10e   :  { %v430_v3 = vpop.f32.mrb[13].mxu0  ;;  %v2179_v4 = vadd.f32 %v1841_v0, %v2070_v40  ;;  %v558_v6 = vpop.f32.mrb[13].mxu1  ;;  %v2189_v16 = vadd.f32 %v1809_v63, %v2070_v40 }
 0x10f   :  { %v782_v7 = vadd.f32 %v781_v62, %v719_v60  ;;  %v2182_v9 = vadd.f32 %v2070_v40, %v430_v3  ;;  %v649_v11 = vadd.f32 %v648_v61, %v2165_v51  ;;  %v1810_v13 = vpop.f32.mrb[14].mxu0  ;;  %v2186_v14 = vadd.f32 %v2070_v40, %v558_v6  ;;  %v1842_v15 = vpop.f32.mrb[14].mxu1 }
 0x110   :  { %v433_v20 = vpop.f32.mrb[15].mxu0  ;;  %v2192_v21 = vadd.f32 %v1842_v15, %v2070_v40  ;;  %v561_v22 = vpop.f32.mrb[15].mxu1  ;;  %v2201_v27 = vadd.f32 %v1810_v13, %v2070_v40  ;;  %v723_v34 = vmul.f32 %v2189_v16, %v2189_v16 }
 0x111   :  { %v650_v23 = vadd.f32 %v649_v11, %v2182_v9  ;;  %v721_v24 = vmul.f32 %v2182_v9, %v2182_v9  ;;  %v783_v25 = vadd.f32 %v782_v7, %v720_v1  ;;  %v2198_v26 = vadd.f32 %v2070_v40, %v433_v20 }
 0x112   :  { %3182 = vst [vmem:[#allocation2_spill] sm:$0xff] %v2201_v27  ;;  %v2204_v28 = vadd.f32 %v2070_v40, %v561_v22  ;;  %v724_v43 = vmul.f32 %v2201_v27, %v2201_v27 }
 0x113   :  { %v784_v29 = vadd.f32 %v783_v25, %v721_v24  ;;  %v651_v31 = vadd.f32 %v650_v23, %v2198_v26  ;;  %v722_v32 = vmul.f32 %v2198_v26, %v2198_v26 }
 0x115   :  { %v652_v35 = vadd.f32 %v651_v31, %v2189_v16  ;;  %v785_v37 = vadd.f32 %v784_v29, %v722_v32  ;;  %v1813_v39 = vpop.f32.mrb[16].mxu0  ;;  %v1845_v42 = vpop.f32.mrb[16].mxu1 }
 0x116   :  { %v446_v47 = vpop.f32.mrb[17].mxu0  ;;  %v2215_v48 = vadd.f32 %v1845_v42, %v2070_v40  ;;  %v574_v57 = vpop.f32.mrb[17].mxu1  ;;  %v2225_v0 = vadd.f32 %v1813_v39, %v2070_v40 }
 0x117   :  { %v786_v58 = vadd.f32 %v785_v37, %v723_v34  ;;  %v2218_v59 = vadd.f32 %v2070_v40, %v446_v47  ;;  %v653_v60 = vadd.f32 %v652_v35, %v2201_v27  ;;  %v1814_v61 = vpop.f32.mrb[18].mxu0  ;;  %v2222_v62 = vadd.f32 %v2070_v40, %v574_v57  ;;  %v1846_v63 = vpop.f32.mrb[18].mxu1 }
 0x118   :  { %3183 = vst [vmem:[#allocation3_spill] sm:$0xff] %v2215_v48  ;;  %3185 = vst [vmem:[#allocation5_spill] sm:$0xff] %v2225_v0  ;;  %v449_v1 = vpop.f32.mrb[19].mxu0  ;;  %v2228_v3 = vadd.f32 %v1846_v63, %v2070_v40  ;;  %v577_v6 = vpop.f32.mrb[19].mxu1  ;;  %v2237_v20 = vadd.f32 %v1814_v61, %v2070_v40  ;;  %v727_v29 = vmul.f32 %v2225_v0, %v2225_v0 }
 0x119   :  { %3184 = vst [vmem:[#allocation4_spill] sm:$0xff] %v2218_v59  ;;  %v654_v7 = vadd.f32 %v653_v60, %v2218_v59  ;;  %v725_v11 = vmul.f32 %v2218_v59, %v2218_v59  ;;  %v787_v13 = vadd.f32 %v786_v58, %v724_v43  ;;  %v2234_v15 = vadd.f32 %v2070_v40, %v449_v1 }
 0x11a   :  { %3186 = vst [vmem:[#allocation6_spill] sm:$0xff] %v2228_v3  ;;  %3188 = vst [vmem:[#allocation8_spill] sm:$0xff] %v2237_v20  ;;  %v2240_v22 = vadd.f32 %v2070_v40, %v577_v6  ;;  %v728_v37 = vmul.f32 %v2237_v20, %v2237_v20  ;;  %v742_v27 = vmul.f32 %v2090_v54, %v2090_v54 }
 0x11b   :  { %3187 = vst [vmem:[#allocation7_spill] sm:$0xff] %v2234_v15  ;;  %v788_v23 = vadd.f32 %v787_v13, %v725_v11  ;;  %v655_v24 = vadd.f32 %v654_v7, %v2234_v15  ;;  %v726_v25 = vmul.f32 %v2234_v15, %v2234_v15 }
 0x11c   :  { %3189 = vst [vmem:[#allocation9_spill] sm:$0xff] %v2240_v22 }
 0x11d   :  { %v656_v31 = vadd.f32 %v655_v24, %v2225_v0  ;;  %v789_v32 = vadd.f32 %v788_v23, %v726_v25  ;;  %v1817_v34 = vpop.f32.mrb[20].mxu0  ;;  %v1849_v35 = vpop.f32.mrb[20].mxu1 }
 0x11e   :  { %v462_v39 = vpop.f32.mrb[21].mxu0  ;;  %v2251_v42 = vadd.f32 %v1849_v35, %v2070_v40  ;;  %v590_v43 = vpop.f32.mrb[21].mxu1  ;;  %v2261_v1 = vadd.f32 %v1817_v34, %v2070_v40 }
 0x11f   :  { %v790_v47 = vadd.f32 %v789_v32, %v727_v29  ;;  %v2254_v57 = vadd.f32 %v2070_v40, %v462_v39  ;;  %v657_v58 = vadd.f32 %v656_v31, %v2237_v20  ;;  %v1818_v60 = vpop.f32.mrb[22].mxu0  ;;  %v2258_v61 = vadd.f32 %v2070_v40, %v590_v43  ;;  %v1850_v63 = vpop.f32.mrb[22].mxu1 }
 0x120   :  { %3190 = vst [vmem:[#allocation10_spill] sm:$0xff] %v2251_v42  ;;  %3193 = vst [vmem:[#allocation13_spill] sm:$0xff] %v2261_v1  ;;  %v465_v6 = vpop.f32.mrb[23].mxu0  ;;  %v2264_v7 = vadd.f32 %v1850_v63, %v2070_v40  ;;  %v593_v11 = vpop.f32.mrb[23].mxu1  ;;  %v2273_v29 = vadd.f32 %v1818_v60, %v2070_v40  ;;  %v731_v39 = vmul.f32 %v2261_v1, %v2261_v1 }
 0x121   :  { %3191 = vst [vmem:[#allocation11_spill] sm:$0xff] %v2254_v57  ;;  %3192 = vst [vmem:[#allocation12_spill] sm:$0xff] %v2258_v61  ;;  %v658_v13 = vadd.f32 %v657_v58, %v2254_v57  ;;  %v729_v23 = vmul.f32 %v2254_v57, %v2254_v57  ;;  %v791_v24 = vadd.f32 %v790_v47, %v728_v37 }
 0x122   :  { %v2270_v25 = vadd.f32 %v2070_v40, %v465_v6  ;;  %3195 = vst [vmem:[#allocation15_spill] sm:$0xff] %v2273_v29  ;;  %v2276_v31 = vadd.f32 %v2070_v40, %v593_v11  ;;  %v732_v60 = vmul.f32 %v2273_v29, %v2273_v29 }
 0x123   :  { %v792_v32 = vadd.f32 %v791_v24, %v729_v23 }
 0x124   :  { %3194 = vst [vmem:[#allocation14_spill] sm:$0xff] %v2270_v25  ;;  %3196 = vst [vmem:[#allocation16_spill] sm:$0xff] %v2276_v31  ;;  %v659_v34 = vadd.f32 %v658_v13, %v2270_v25  ;;  %v730_v35 = vmul.f32 %v2270_v25, %v2270_v25 }
 0x125   :  { %v1821_v47 = vpop.f32.mrb[24].mxu0  ;;  %v1853_v58 = vpop.f32.mrb[24].mxu1 }
 0x126   :  { %v660_v37 = vadd.f32 %v659_v34, %v2261_v1  ;;  %v793_v43 = vadd.f32 %v792_v32, %v730_v35  ;;  %v478_v63 = vpop.f32.mrb[25].mxu0  ;;  %v2287_v6 = vadd.f32 %v1853_v58, %v2070_v40  ;;  %v606_v11 = vpop.f32.mrb[25].mxu1  ;;  %v2297_v35 = vadd.f32 %v1821_v47, %v2070_v40 }
 0x127   :  { %v2290_v23 = vadd.f32 %v2070_v40, %v478_v63  ;;  %v1822_v25 = vpop.f32.mrb[26].mxu0  ;;  %v2294_v34 = vadd.f32 %v2070_v40, %v606_v11  ;;  %v1854_v32 = vpop.f32.mrb[26].mxu1 }
 0x128   :  { %v794_v13 = vadd.f32 %v793_v43, %v731_v39  ;;  %v661_v24 = vadd.f32 %v660_v37, %v2273_v29  ;;  %3198 = vst [vmem:[#allocation18_spill] sm:$0xff] %v2297_v35  ;;  %v481_v1 = vpop.f32.mrb[27].mxu0  ;;  %v2300_v57 = vadd.f32 %v1854_v32, %v2070_v40  ;;  %v609_v58 = vpop.f32.mrb[27].mxu1  ;;  %v2309_v11 = vadd.f32 %v1822_v25, %v2070_v40 }
 0x129   :  { %3197 = vst [vmem:[#allocation17_spill] sm:$0xff] %v2290_v23  ;;  %v733_v43 = vmul.f32 %v2290_v23, %v2290_v23  ;;  %v2306_v37 = vadd.f32 %v2070_v40, %v481_v1  ;;  %v2312_v47 = vadd.f32 %v2070_v40, %v609_v58 }
 0x12a   :  { %v662_v39 = vadd.f32 %v661_v24, %v2290_v23  ;;  %v795_v63 = vadd.f32 %v794_v13, %v732_v60  ;;  %3200 = vst [vmem:[#allocation20_spill] sm:$0xff] %v2309_v11  ;;  %v735_v24 = vmul.f32 %v2297_v35, %v2297_v35  ;;  %v736_v25 = vmul.f32 %v2309_v11, %v2309_v11 }
 0x12b   :  { %3199 = vst [vmem:[#allocation19_spill] sm:$0xff] %v2306_v37  ;;  %v734_v20 = vmul.f32 %v2306_v37, %v2306_v37 }
 0x12c   :  { %v796_v29 = vadd.f32 %v795_v63, %v733_v43  ;;  %v663_v32 = vadd.f32 %v662_v39, %v2306_v37 }
 0x12d   :  { %v1825_v1 = vpop.f32.mrb[28].mxu0  ;;  %v1857_v23 = vpop.f32.mrb[28].mxu1 }
 0x12e   :  { %v664_v60 = vadd.f32 %v663_v32, %v2297_v35  ;;  %v797_v13 = vadd.f32 %v796_v29, %v734_v20  ;;  %v494_v0 = vpop.f32.mrb[29].mxu0  ;;  %v2323_v58 = vadd.f32 %v1857_v23, %v2070_v40  ;;  %v622_v43 = vpop.f32.mrb[29].mxu1  ;;  %v2333_v29 = vadd.f32 %v1825_v1, %v2070_v40 }
 0x12f   :  { %v2326_v63 = vadd.f32 %v2070_v40, %v494_v0  ;;  %v1826_v15 = vpop.f32.mrb[30].mxu0  ;;  %v2330_v32 = vadd.f32 %v2070_v40, %v622_v43  ;;  %v1858_v20 = vpop.f32.mrb[30].mxu1  ;;  %v2346_v43 = vadd.f32 %v2070_v40, %v2075_v45 }
 0x130   :  { %3201 = vst [vmem:[#allocation21_spill] sm:$0xff] %v2323_v58  ;;  %v798_v39 = vadd.f32 %v797_v13, %v735_v24  ;;  %v665_v37 = vadd.f32 %v664_v60, %v2309_v11  ;;  %v497_v35 = vpop.f32.mrb[31].mxu0  ;;  %v2336_v59 = vadd.f32 %v1858_v20, %v2070_v40  ;;  %v625_v23 = vpop.f32.mrb[31].mxu1  ;;  %v2352_v20 = vadd.f32 %v1826_v15, %v2070_v40 }
 0x131   :  { %3202 = vst [vmem:[#allocation22_spill] sm:$0xff] %v2326_v63  ;;  %3203 = vst [vmem:[#allocation23_spill] sm:$0xff] %v2330_v32  ;;  %v737_v0 = vmul.f32 %v2326_v63, %v2326_v63  ;;  %v2342_v60 = vadd.f32 %v2070_v40, %v497_v35  ;;  %v2349_v1 = vadd.f32 %v2070_v40, %v625_v23 }
 0x132   :  { %v666_v24 = vadd.f32 %v665_v37, %v2326_v63  ;;  %v799_v13 = vadd.f32 %v798_v39, %v736_v25  ;;  %v739_v35 = vmul.f32 %v2333_v29, %v2333_v29  ;;  %v740_v45 = vmul.f32 %v2352_v20, %v2352_v20 }
 0x133   :  { %3204 = vst [vmem:[#allocation24_spill] sm:$0xff] %v2342_v60  ;;  %3205 = vst [vmem:[#allocation25_spill] sm:$0xff] %v2349_v1  ;;  %v738_v63 = vmul.f32 %v2342_v60, %v2342_v60  ;;  %v741_v40 = vmul.f32 %v2346_v43, %v2346_v43 }
 0x134   :  { %v800_v11 = vadd.f32 %v799_v13, %v737_v0  ;;  %v667_v37 = vadd.f32 %v666_v24, %v2342_v60 }
 0x136   :  { %v668_v25 = vadd.f32 %v667_v37, %v2333_v29  ;;  %v801_v39 = vadd.f32 %v800_v11, %v738_v63  ;;  %v743_v11 = vmul.f32 %v2073_v44, %v2073_v44 }
 0x138   :  { %v802_v23 = vadd.f32 %v801_v39, %v739_v35  ;;  %v669_v0 = vadd.f32 %v668_v25, %v2352_v20  ;;  %v744_v35 = vmul.f32 %v2081_v50, %v2081_v50 }
 0x13a   :  { %v670_v15 = vadd.f32 %v669_v0, %v2346_v43  ;;  %v803_v24 = vadd.f32 %v802_v23, %v740_v45  ;;  %v745_v45 = vmul.f32 %v2114_v8, %v2114_v8 }
 0x13c   :  { %v804_v13 = vadd.f32 %v803_v24, %v741_v40  ;;  %v671_v60 = vadd.f32 %v670_v15, %v2090_v54  ;;  %v746_v24 = vmul.f32 %v2132_v19, %v2132_v19 }
 0x13e   :  { %v672_v63 = vadd.f32 %v671_v60, %v2073_v44  ;;  %v805_v37 = vadd.f32 %v804_v13, %v742_v27  ;;  %v747_v27 = vmul.f32 %v2107_v2, %v2107_v2 }
 0x140   :  { %v806_v25 = vadd.f32 %v805_v37, %v743_v11  ;;  %v673_v39 = vadd.f32 %v672_v63, %v2081_v50  ;;  %v748_v11 = vmul.f32 %v2120_v12, %v2120_v12 }
 0x142   :  { %v674_v23 = vadd.f32 %v673_v39, %v2114_v8  ;;  %v807_v0 = vadd.f32 %v806_v25, %v744_v35  ;;  %v749_v35 = vmul.f32 %v2150_v36, %v2150_v36 }
 0x144   :  { %v808_v40 = vadd.f32 %v807_v0, %v745_v45  ;;  %v675_v15 = vadd.f32 %v674_v23, %v2132_v19  ;;  %v750_v0 = vmul.f32 %v2168_v56, %v2168_v56 }
 0x146   :  { %v676_v60 = vadd.f32 %v675_v15, %v2107_v2  ;;  %v809_v13 = vadd.f32 %v808_v40, %v746_v24  ;;  %v751_v40 = vmul.f32 %v2143_v30, %v2143_v30 }
 0x148   :  { %v810_v63 = vadd.f32 %v809_v13, %v747_v27  ;;  %v677_v37 = vadd.f32 %v676_v60, %v2120_v12  ;;  %v752_v27 = vmul.f32 %v2156_v41, %v2156_v41 }
 0x14a   :  { %v678_v25 = vadd.f32 %v677_v37, %v2150_v36  ;;  %v811_v39 = vadd.f32 %v810_v63, %v748_v11  ;;  %v753_v11 = vmul.f32 %v2186_v14, %v2186_v14 }
 0x14c   :  { %v812_v45 = vadd.f32 %v811_v39, %v749_v35  ;;  %v679_v23 = vadd.f32 %v678_v25, %v2168_v56  ;;  %v754_v39 = vmul.f32 %v2204_v28, %v2204_v28 }
 0x14e   :  { %v680_v15 = vadd.f32 %v679_v23, %v2143_v30  ;;  %v813_v24 = vadd.f32 %v812_v45, %v750_v0  ;;  %v755_v45 = vmul.f32 %v2179_v4, %v2179_v4 }
 0x150   :  { %v814_v60 = vadd.f32 %v813_v24, %v751_v40  ;;  %v681_v13 = vadd.f32 %v680_v15, %v2156_v41  ;;  %v756_v40 = vmul.f32 %v2192_v21, %v2192_v21 }
 0x152   :  { %v682_v63 = vadd.f32 %v681_v13, %v2186_v14  ;;  %v815_v37 = vadd.f32 %v814_v60, %v752_v27  ;;  %v757_v27 = vmul.f32 %v2222_v62, %v2222_v62 }
 0x154   :  { %v816_v35 = vadd.f32 %v815_v37, %v753_v11  ;;  %v683_v25 = vadd.f32 %v682_v63, %v2204_v28  ;;  %v758_v37 = vmul.f32 %v2240_v22, %v2240_v22 }
 0x156   :  { %v684_v23 = vadd.f32 %v683_v25, %v2179_v4  ;;  %v817_v0 = vadd.f32 %v816_v35, %v754_v39  ;;  %v759_v35 = vmul.f32 %v2215_v48, %v2215_v48 }
 0x158   :  { %v818_v15 = vadd.f32 %v817_v0, %v755_v45  ;;  %v685_v24 = vadd.f32 %v684_v23, %v2192_v21  ;;  %v760_v45 = vmul.f32 %v2228_v3, %v2228_v3 }
 0x15a   :  { %v686_v60 = vadd.f32 %v685_v24, %v2222_v62  ;;  %v819_v13 = vadd.f32 %v818_v15, %v756_v40  ;;  %v761_v40 = vmul.f32 %v2258_v61, %v2258_v61 }
 0x15c   :  { %v820_v11 = vadd.f32 %v819_v13, %v757_v27  ;;  %v687_v63 = vadd.f32 %v686_v60, %v2240_v22  ;;  %v762_v13 = vmul.f32 %v2276_v31, %v2276_v31 }
 0x15e   :  { %v688_v25 = vadd.f32 %v687_v63, %v2215_v48  ;;  %v821_v39 = vadd.f32 %v820_v11, %v758_v37  ;;  %v763_v11 = vmul.f32 %v2251_v42, %v2251_v42 }
 0x160   :  { %v822_v23 = vadd.f32 %v821_v39, %v759_v35  ;;  %v689_v0 = vadd.f32 %v688_v25, %v2228_v3  ;;  %v764_v35 = vmul.f32 %v2264_v7, %v2264_v7 }
 0x162   :  { %v690_v15 = vadd.f32 %v689_v0, %v2258_v61  ;;  %v823_v24 = vadd.f32 %v822_v23, %v760_v45  ;;  %v765_v45 = vmul.f32 %v2294_v34, %v2294_v34 }
 0x164   :  { %v824_v27 = vadd.f32 %v823_v24, %v761_v40  ;;  %v691_v60 = vadd.f32 %v690_v15, %v2276_v31  ;;  %v766_v24 = vmul.f32 %v2312_v47, %v2312_v47 }
 0x166   :  { %v692_v63 = vadd.f32 %v691_v60, %v2251_v42  ;;  %v825_v37 = vadd.f32 %v824_v27, %v762_v13  ;;  %v767_v27 = vmul.f32 %v2287_v6, %v2287_v6 }
 0x168   :  { %v826_v25 = vadd.f32 %v825_v37, %v763_v11  ;;  %v693_v39 = vadd.f32 %v692_v63, %v2264_v7  ;;  %v768_v11 = vmul.f32 %v2300_v57, %v2300_v57 }
 0x16a   :  { %v694_v23 = vadd.f32 %v693_v39, %v2294_v34  ;;  %v827_v0 = vadd.f32 %v826_v25, %v764_v35  ;;  %v769_v35 = vmul.f32 %v2330_v32, %v2330_v32 }
 0x16c   :  { %v828_v40 = vadd.f32 %v827_v0, %v765_v45  ;;  %v695_v15 = vadd.f32 %v694_v23, %v2312_v47  ;;  %v770_v0 = vmul.f32 %v2349_v1, %v2349_v1 }
 0x16e   :  { %v696_v60 = vadd.f32 %v695_v15, %v2287_v6  ;;  %v829_v13 = vadd.f32 %v828_v40, %v766_v24  ;;  %v771_v40 = vmul.f32 %v2323_v58, %v2323_v58 }
 0x170   :  { %v830_v63 = vadd.f32 %v829_v13, %v767_v27  ;;  %v697_v37 = vadd.f32 %v696_v60, %v2300_v57  ;;  %v772_v27 = vmul.f32 %v2336_v59, %v2336_v59 }
 0x172   :  { %v698_v25 = vadd.f32 %v697_v37, %v2330_v32  ;;  %v831_v39 = vadd.f32 %v830_v63, %v768_v11 }
 0x174   :  { %v832_v45 = vadd.f32 %v831_v39, %v769_v35  ;;  %v699_v23 = vadd.f32 %v698_v25, %v2349_v1 }
 0x176   :  { %v700_v15 = vadd.f32 %v699_v23, %v2323_v58  ;;  %v833_v24 = vadd.f32 %v832_v45, %v770_v0 }
 0x178   :  { %v701_v60 = vadd.f32 %v700_v15, %v2336_v59  ;;  %v834_v13 = vadd.f32 %v833_v24, %v771_v40  ;;  %v852_v40 = vlaneseq }
 0x17a   :  { %v702_v37 = vrot.slane %v701_v60, 4  ;;  %v835_v11 = vadd.f32 %v834_v13, %v772_v27  ;;  %v2459_v24 = vshrl.u32 %v852_v40, 7  ;;  %v637_v27 = vld [vmem:[%s3149_s3] sm:$0x1]  ;;  %v3213_v40 = vld [vmem:[#allocation13_spill] sm:$0xff] }
 0x17c   :  { %v703_v63 = vadd.f32 %v702_v37, %v701_v60  ;;  %v836_v35 = vrot.slane %v835_v11, 4  ;;  %v3176_v60 = vsub.s32 0, %v2459_v24 }
 0x17e   :  { %v704_v25 = vrot.slane %v703_v63, 2  ;;  %v837_v39 = vadd.f32 %v836_v35, %v835_v11  ;;  %v3206_v11 = vld [vmem:[#allocation2_spill] sm:$0xff]  ;;  %v3208_v35 = vld [vmem:[#allocation7_spill] sm:$0xff] }
 0x180   :  { %v705_v42 = vadd.f32 %v704_v25, %v703_v63  ;;  %v838_v31 = vrot.slane %v837_v39, 2  ;;  %v3207_v63 = vld [vmem:[#allocation4_spill] sm:$0xff]  ;;  %v3209_v25 = vld [vmem:[#allocation5_spill] sm:$0xff] }
 0x182   :  { %v706_v61 = vrot.slane %v705_v42, 1  ;;  %v839_v3 = vadd.f32 %v838_v31, %v837_v39  ;;  %v3210_v39 = vld [vmem:[#allocation8_spill] sm:$0xff] }
 0x184   :  { %v707_v48 = vadd.f32 %v706_v61, %v705_v42  ;;  %v840_v22 = vrot.slane %v839_v3, 1 }
 0x186   :  { %v708_v23 = vmul.f32 0.001953125, %v707_v48  ;;  %v841_v45 = vadd.f32 %v840_v22, %v839_v3  ;;  %v2468_v48 = vld [vmem:[%s3150_s4] sm:$0x1] }
 0x188   :  { %v842_v0 = vmul.f32 0.001953125, %v841_v45  ;;  %v843_v58 = vmul.f32 %v708_v23, %v708_v23 }
 0x18a   :  { %v844_v1 = vsub.f32 %v842_v0, %v843_v58  ;;  %v3212_v0 = vld [vmem:[#allocation14_spill] sm:$0xff] }
 0x18c   :  { %v845_v32 = vmax.f32 %v844_v1, 0.0 }
 0x18e   :  { %v846_v15 = vadd.f32 1e-05, %v845_v32 }
 0x190   :  { %1915 = vrsqrt.f32 %v846_v15 }
 0x19a   :  { %v1916_v31 = vpop.eup %1915 }
 0x19b   :  { %v848_v42 = vmul.f32 %v1916_v31, %v637_v27  ;;  %v3214_v31 = vld [vmem:[#allocation15_spill] sm:$0xff] }
 0x19d   :  { %v2470_v3 = vmul.f32 %v848_v42, %v708_v23  ;;  %v2474_v22 = vrot.slane %v848_v42, %v3176_v60  ;;  %v3211_v23 = vld [vmem:[#allocation11_spill] sm:$0xff] }
 0x19e   :  { %v3228_v60 = vld [vmem:[#allocation23_spill] sm:$0xff] }
 0x19f   :  { %v850_v61 = vsub.f32 %v2468_v48, %v2470_v3  ;;  %v2480_v58 = vmul.f32 %v2474_v22, %v2078_v46  ;;  %v2484_v32 = vmul.f32 %v2474_v22, %v2087_v53  ;;  %v2488_v1 = vmul.f32 %v2474_v22, %v2084_v52  ;;  %v3215_v48 = vld [vmem:[#allocation17_spill] sm:$0xff] }
 0x1a0   :  { %v2492_v13 = vmul.f32 %v2474_v22, %v2093_v55  ;;  %v2496_v37 = vmul.f32 %v2474_v22, %v2110_v5  ;;  %v2500_v46 = vmul.f32 %v2474_v22, %v2126_v17  ;;  %v2504_v53 = vmul.f32 %v2474_v22, %v2117_v10 }
 0x1a1   :  { %v2508_v52 = vmul.f32 %v2474_v22, %v2129_v18  ;;  %v2512_v55 = vmul.f32 %v2474_v22, %v2146_v33  ;;  %v2516_v5 = vmul.f32 %v2474_v22, %v2162_v49  ;;  %v2520_v17 = vmul.f32 %v2474_v22, %v2153_v38 }
 0x1a2   :  { %v2524_v10 = vmul.f32 %v2474_v22, %v2165_v51  ;;  %v2528_v18 = vmul.f32 %v2474_v22, %v2182_v9  ;;  %v2532_v33 = vmul.f32 %v2474_v22, %v2198_v26  ;;  %v2536_v49 = vmul.f32 %v2474_v22, %v2189_v16 }
 0x1a3   :  { %v2540_v38 = vmul.f32 %v2474_v22, %v3206_v11  ;;  %v2544_v51 = vmul.f32 %v2474_v22, %v3207_v63  ;;  %v2548_v9 = vmul.f32 %v2474_v22, %v3208_v35  ;;  %v2552_v26 = vmul.f32 %v2474_v22, %v3209_v25  ;;  %v3216_v11 = vld [vmem:[#allocation19_spill] sm:$0xff]  ;;  %v3217_v35 = vld [vmem:[#allocation18_spill] sm:$0xff] }
 0x1a4   :  { %v2556_v16 = vmul.f32 %v2474_v22, %v3210_v39  ;;  %v2560_v45 = vmul.f32 %v2474_v22, %v3211_v23  ;;  %v2564_v15 = vmul.f32 %v2474_v22, %v3212_v0  ;;  %v2568_v27 = vmul.f32 %v2474_v22, %v3213_v40  ;;  %v3218_v39 = vld [vmem:[#allocation20_spill] sm:$0xff]  ;;  %v3219_v0 = vld [vmem:[#allocation22_spill] sm:$0xff] }
 0x1a5   :  { %v2572_v42 = vmul.f32 %v2474_v22, %v3214_v31  ;;  %v2576_v3 = vmul.f32 %v2474_v22, %v3215_v48  ;;  %v2580_v63 = vmul.f32 %v2474_v22, %v3216_v11  ;;  %v2584_v25 = vmul.f32 %v2474_v22, %v3217_v35  ;;  %v3220_v31 = vld [vmem:[#allocation24_spill] sm:$0xff] }
 0x1a6   :  { %v2588_v23 = vmul.f32 %v2474_v22, %v3218_v39  ;;  %v2592_v40 = vmul.f32 %v2474_v22, %v3219_v0  ;;  %v2596_v48 = vmul.f32 %v2474_v22, %v3220_v31  ;;  %v2600_v11 = vmul.f32 %v2474_v22, %v2333_v29 }
 0x1a7   :  { %v2604_v35 = vmul.f32 %v2474_v22, %v2352_v20  ;;  %v2608_v39 = vmul.f32 %v2474_v22, %v2346_v43  ;;  %v2612_v0 = vmul.f32 %v2474_v22, %v2090_v54  ;;  %v2616_v31 = vmul.f32 %v2474_v22, %v2073_v44 }
 0x1a8   :  { %v2620_v29 = vmul.f32 %v2474_v22, %v2081_v50  ;;  %v2624_v20 = vmul.f32 %v2474_v22, %v2114_v8  ;;  %v2628_v43 = vmul.f32 %v2474_v22, %v2132_v19  ;;  %v2632_v54 = vmul.f32 %v2474_v22, %v2107_v2 }
 0x1a9   :  { %v2636_v44 = vmul.f32 %v2474_v22, %v2120_v12  ;;  %v2640_v50 = vmul.f32 %v2474_v22, %v2150_v36  ;;  %v2644_v8 = vmul.f32 %v2474_v22, %v2168_v56  ;;  %v2648_v19 = vmul.f32 %v2474_v22, %v2143_v30 }
 0x1aa   :  { %v2652_v2 = vmul.f32 %v2474_v22, %v2156_v41  ;;  %v2656_v12 = vmul.f32 %v2474_v22, %v2186_v14  ;;  %v2660_v36 = vmul.f32 %v2474_v22, %v2204_v28  ;;  %v2664_v56 = vmul.f32 %v2474_v22, %v2179_v4 }
 0x1ab   :  { %v2668_v30 = vmul.f32 %v2474_v22, %v2192_v21  ;;  %v2672_v41 = vmul.f32 %v2474_v22, %v2222_v62  ;;  %v2676_v14 = vmul.f32 %v2474_v22, %v2264_v7  ;;  %v2680_v28 = vmul.f32 %v2474_v22, %v2294_v34 }
 0x1ac   :  { %v2684_v4 = vmul.f32 %v2474_v22, %v2312_v47  ;;  %v2688_v21 = vmul.f32 %v2474_v22, %v2287_v6  ;;  %v2692_v62 = vmul.f32 %v2474_v22, %v2300_v57  ;;  %v2696_v7 = vmul.f32 %v2474_v22, %v3228_v60 }
 0x1ad   :  { %3221 = vst [vmem:[#allocation2_spill] sm:$0xff] %v2668_v30  ;;  %3222 = vst [vmem:[#allocation4_spill] sm:$0xff] %v2672_v41  ;;  %v2712_v57 = vmul.f32 %v2474_v22, %v2336_v59  ;;  %v3236_v60 = vsub.s32 0, %v2459_v24  ;;  %v3240_v30 = vld [vmem:[#allocation10_spill] sm:$0xff] }
 0x1ae   :  { %3223 = vst [vmem:[#allocation7_spill] sm:$0xff] %v2676_v14  ;;  %3224 = vst [vmem:[#allocation5_spill] sm:$0xff] %v2680_v28  ;;  %v3230_v14 = vld [vmem:[#allocation25_spill] sm:$0xff] }
 0x1af   :  { %3225 = vst [vmem:[#allocation8_spill] sm:$0xff] %v2684_v4  ;;  %3226 = vst [vmem:[#allocation11_spill] sm:$0xff] %v2688_v21  ;;  %v2700_v34 = vmul.f32 %v2474_v22, %v3230_v14  ;;  %v3232_v28 = vld [vmem:[#allocation21_spill] sm:$0xff]  ;;  %v3235_v21 = vld [vmem:[#allocation3_spill] sm:$0xff] }
 0x1b0   :  { %3227 = vst [vmem:[#allocation14_spill] sm:$0xff] %v2692_v62  ;;  %3229 = vst [vmem:[#allocation13_spill] sm:$0xff] %v2696_v7  ;;  %v2704_v47 = vmul.f32 %v2474_v22, %v3232_v28  ;;  %v3234_v4 = vld [vmem:[#allocation9_spill] sm:$0xff]  ;;  %v907_v41 = vmul.f32 %v2474_v22, %v3235_v21  ;;  %v2716_v7 = vrot.slane %v850_v61, %v3236_v60  ;;  %v3237_v14 = vld [vmem:[#allocation6_spill] sm:$0xff] }
 0x1b1   :  { %3231 = vst [vmem:[#allocation15_spill] sm:$0xff] %v2700_v34  ;;  %v906_v6 = vmul.f32 %v2474_v22, %v3234_v4  ;;  %v908_v34 = vmul.f32 %v2474_v22, %v3237_v14  ;;  %v3238_v62 = vld [vmem:[#allocation12_spill] sm:$0xff]  ;;  %v911_v21 = vmul.f32 %v2474_v22, %v3240_v30 }
 0x1b2   :  { %3233 = vst [vmem:[#allocation17_spill] sm:$0xff] %v2704_v47  ;;  %v909_v28 = vmul.f32 %v2474_v22, %v3238_v62  ;;  %v3239_v47 = vld [vmem:[#allocation16_spill] sm:$0xff]  ;;  %v2728_v59 = vadd.f32 %v2716_v7, %v2480_v58  ;;  %v2732_v24 = vadd.f32 %v2716_v7, %v2484_v32  ;;  %v2736_v61 = vadd.f32 %v2716_v7, %v2488_v1 }
 0x1b3   :  { %v910_v4 = vmul.f32 %v2474_v22, %v3239_v47  ;;  %v2740_v62 = vadd.f32 %v2716_v7, %v2492_v13  ;;  %v2744_v47 = vadd.f32 %v2716_v7, %v2496_v37  ;;  %v2748_v22 = vadd.f32 %v2716_v7, %v2500_v46 }
 0x1b4   :  { %3241 = vst [vmem:[#allocation19_spill] sm:$0xff] %v2728_v59  ;;  %3242 = vst [vmem:[#allocation18_spill] sm:$0xff] %v2732_v24  ;;  %v2752_v58 = vadd.f32 %v2716_v7, %v2504_v53  ;;  %v2756_v32 = vadd.f32 %v2716_v7, %v2508_v52  ;;  %v2760_v1 = vadd.f32 %v2716_v7, %v2512_v55  ;;  %v3247_v30 = vld [vmem:[#allocation4_spill] sm:$0xff] }
 0x1b5   :  { %3243 = vst [vmem:[#allocation20_spill] sm:$0xff] %v2736_v61  ;;  %3244 = vst [vmem:[#allocation22_spill] sm:$0xff] %v2740_v62  ;;  %v2764_v13 = vadd.f32 %v2716_v7, %v2516_v5  ;;  %v2768_v37 = vadd.f32 %v2716_v7, %v2520_v17  ;;  %v2772_v46 = vadd.f32 %v2716_v7, %v2524_v10 }
 0x1b6   :  { %3245 = vst [vmem:[#allocation24_spill] sm:$0xff] %v2744_v47  ;;  %v2776_v53 = vadd.f32 %v2716_v7, %v2528_v18  ;;  %v2780_v52 = vadd.f32 %v2716_v7, %v2532_v33  ;;  %v2784_v55 = vadd.f32 %v2716_v7, %v2536_v49  ;;  %v2788_v5 = vadd.f32 %v2716_v7, %v2540_v38 }
 0x1b7   :  { %v2792_v17 = vadd.f32 %v2716_v7, %v2544_v51  ;;  %v2796_v10 = vadd.f32 %v2716_v7, %v2548_v9  ;;  %v2800_v18 = vadd.f32 %v2716_v7, %v2552_v26  ;;  %v2804_v33 = vadd.f32 %v2716_v7, %v2556_v16 }
 0x1b8   :  { %v2808_v49 = vadd.f32 %v2716_v7, %v2560_v45  ;;  %v2812_v38 = vadd.f32 %v2716_v7, %v2564_v15  ;;  %v2816_v51 = vadd.f32 %v2716_v7, %v2568_v27  ;;  %v2820_v9 = vadd.f32 %v2716_v7, %v2572_v42 }
 0x1b9   :  { %v2824_v26 = vadd.f32 %v2716_v7, %v2576_v3  ;;  %v2828_v16 = vadd.f32 %v2716_v7, %v2580_v63  ;;  %v2832_v45 = vadd.f32 %v2716_v7, %v2584_v25  ;;  %v2836_v15 = vadd.f32 %v2716_v7, %v2588_v23 }
 0x1ba   :  { %v2840_v27 = vadd.f32 %v2716_v7, %v2592_v40  ;;  %v2844_v42 = vadd.f32 %v2716_v7, %v2596_v48  ;;  %v2848_v3 = vadd.f32 %v2716_v7, %v2600_v11  ;;  %v2852_v63 = vadd.f32 %v2716_v7, %v2604_v35 }
 0x1bb   :  { %v2856_v25 = vadd.f32 %v2716_v7, %v2608_v39  ;;  %v2860_v23 = vadd.f32 %v2716_v7, %v2612_v0  ;;  %v2864_v40 = vadd.f32 %v2716_v7, %v2616_v31  ;;  %v2868_v48 = vadd.f32 %v2716_v7, %v2620_v29 }
 0x1bc   :  { %v2872_v11 = vadd.f32 %v2716_v7, %v2624_v20  ;;  %v2876_v35 = vadd.f32 %v2716_v7, %v2628_v43  ;;  %v2880_v39 = vadd.f32 %v2716_v7, %v2632_v54  ;;  %v2884_v0 = vadd.f32 %v2716_v7, %v2636_v44 }
 0x1bd   :  { %v2888_v31 = vadd.f32 %v2716_v7, %v2640_v50  ;;  %v2892_v29 = vadd.f32 %v2716_v7, %v2644_v8  ;;  %v2896_v20 = vadd.f32 %v2716_v7, %v2648_v19  ;;  %v2900_v43 = vadd.f32 %v2716_v7, %v2652_v2  ;;  %v3246_v8 = vld [vmem:[#allocation2_spill] sm:$0xff] }
 0x1be   :  { %v2904_v54 = vadd.f32 %v2716_v7, %v2656_v12  ;;  %v2908_v44 = vadd.f32 %v2716_v7, %v2660_v36  ;;  %v2912_v50 = vadd.f32 %v2716_v7, %v2664_v56  ;;  %v2916_v19 = vadd.f32 %v2716_v7, %v3246_v8 }
 0x1bf   :  { %v2920_v2 = vadd.f32 %v2716_v7, %v3247_v30  ;;  %v2923_v60 = vadd.f32 %v2716_v7, %v906_v6  ;;  %v2926_v12 = vadd.f32 %v2716_v7, %v907_v41  ;;  %v2929_v36 = vadd.f32 %v2716_v7, %v908_v34  ;;  %v3252_v30 = vld [vmem:[#allocation7_spill] sm:$0xff]  ;;  %v3254_v6 = vld [vmem:[#allocation5_spill] sm:$0xff] }
 0x1c0   :  { %v2932_v56 = vadd.f32 %v2716_v7, %v909_v28  ;;  %v2935_v14 = vadd.f32 %v2716_v7, %v910_v4  ;;  %v2938_v8 = vadd.f32 %v2716_v7, %v911_v21  ;;  %v2946_v41 = vadd.f32 %v2716_v7, %v3254_v6  ;;  %v3257_v28 = vld [vmem:[#allocation11_spill] sm:$0xff]  ;;  %v3259_v4 = vld [vmem:[#allocation14_spill] sm:$0xff] }
 0x1c1   :  { %3248 = vst [vmem:[#allocation23_spill] sm:$0xff] %v2920_v2  ;;  %3249 = vst [vmem:[#allocation25_spill] sm:$0xff] %v2926_v12  ;;  %v2942_v2 = vadd.f32 %v2716_v7, %v3252_v30  ;;  %v3256_v12 = vld [vmem:[#allocation8_spill] sm:$0xff]  ;;  %v2958_v21 = vadd.f32 %v2716_v7, %v3259_v4  ;;  %v1002_v4 = vmax.f32 %v2772_v46, 0.0  ;;  %v1012_v46 = vmax.f32 %v2812_v38, 0.0 }
 0x1c2   :  { %3250 = vst [vmem:[#allocation21_spill] sm:$0xff] %v2932_v56  ;;  %3251 = vst [vmem:[#allocation9_spill] sm:$0xff] %v2938_v8  ;;  %v2950_v34 = vadd.f32 %v2716_v7, %v3256_v12  ;;  %v2954_v56 = vadd.f32 %v2716_v7, %v3257_v28  ;;  %v3261_v8 = vld [vmem:[#allocation13_spill] sm:$0xff]  ;;  %v2974_v28 = vadd.f32 %v2716_v7, %v2712_v57  ;;  %v1001_v57 = vmax.f32 %v2768_v37, 0.0 }
 0x1c3   :  { %3253 = vst [vmem:[#allocation3_spill] sm:$0xff] %v2942_v2  ;;  %3255 = vst [vmem:[#allocation6_spill] sm:$0xff] %v2946_v41  ;;  %v2962_v30 = vadd.f32 %v2716_v7, %v3261_v8  ;;  %v3263_v2 = vld [vmem:[#allocation15_spill] sm:$0xff]  ;;  %v3265_v41 = vld [vmem:[#allocation17_spill] sm:$0xff]  ;;  %v1004_v8 = vmax.f32 %v2780_v52, 0.0  ;;  %v1011_v37 = vmax.f32 %v2808_v49, 0.0 }
 0x1c4   :  { %3258 = vst [vmem:[#allocation12_spill] sm:$0xff] %v2954_v56  ;;  %3260 = vst [vmem:[#allocation16_spill] sm:$0xff] %v2958_v21  ;;  %v2966_v6 = vadd.f32 %v2716_v7, %v3263_v2  ;;  %v2970_v12 = vadd.f32 %v2716_v7, %v3265_v41  ;;  %v996_v2 = vmax.f32 %v2748_v22, 0.0  ;;  %v998_v41 = vmax.f32 %v2756_v32, 0.0 }
 0x1c5   :  { %3262 = vst [vmem:[#allocation10_spill] sm:$0xff] %v2962_v30  ;;  %3267 = vst [vmem:[#allocation7_spill] sm:$0xff] %v2974_v28  ;;  %v1000_v7 = vmax.f32 %v2764_v13, 0.0  ;;  %v1003_v21 = vmax.f32 %v2776_v53, 0.0  ;;  %v1005_v30 = vmax.f32 %v2784_v55, 0.0  ;;  %v1006_v22 = vmax.f32 %v2788_v5, 0.0 }
 0x1c6   :  { %3264 = vst [vmem:[#allocation2_spill] sm:$0xff] %v2966_v6  ;;  %3266 = vst [vmem:[#allocation4_spill] sm:$0xff] %v2970_v12  ;;  %v997_v6 = vmax.f32 %v2752_v58, 0.0  ;;  %v999_v12 = vmax.f32 %v2760_v1, 0.0  ;;  %v1007_v58 = vmax.f32 %v2792_v17, 0.0  ;;  %v1008_v32 = vmax.f32 %v2796_v10, 0.0 }
 0x1c7   :  { %v1009_v1 = vmax.f32 %v2800_v18, 0.0  ;;  %v1010_v13 = vmax.f32 %v2804_v33, 0.0  ;;  %v1013_v53 = vmax.f32 %v2816_v51, 0.0  ;;  %v1014_v52 = vmax.f32 %v2820_v9, 0.0 }
 0x1c8   :  { %v1015_v55 = vmax.f32 %v2824_v26, 0.0  ;;  %v1016_v5 = vmax.f32 %v2828_v16, 0.0  ;;  %v1017_v17 = vmax.f32 %v2832_v45, 0.0  ;;  %v1018_v10 = vmax.f32 %v2836_v15, 0.0  ;;  %v3268_v56 = vld [vmem:[#allocation23_spill] sm:$0xff]  ;;  %v3269_v47 = vld [vmem:[#allocation25_spill] sm:$0xff] }
 0x1c9   :  { %v1019_v18 = vmax.f32 %v2840_v27, 0.0  ;;  %v1020_v33 = vmax.f32 %v2844_v42, 0.0  ;;  %v1021_v49 = vmax.f32 %v2848_v3, 0.0  ;;  %v1022_v38 = vmax.f32 %v2852_v63, 0.0  ;;  %v3270_v62 = vld [vmem:[#allocation21_spill] sm:$0xff] }
 0x1ca   :  { %v1023_v51 = vmax.f32 %v2856_v25, 0.0  ;;  %v1024_v9 = vmax.f32 %v2860_v23, 0.0  ;;  %v1025_v26 = vmax.f32 %v2864_v40, 0.0  ;;  %v1026_v16 = vmax.f32 %v2868_v48, 0.0  ;;  %v3271_v61 = vld [vmem:[#allocation9_spill] sm:$0xff]  ;;  %v3272_v24 = vld [vmem:[#allocation3_spill] sm:$0xff] }
 0x1cb   :  { %v1027_v45 = vmax.f32 %v2872_v11, 0.0  ;;  %v1028_v15 = vmax.f32 %v2876_v35, 0.0  ;;  %v1029_v27 = vmax.f32 %v2880_v39, 0.0  ;;  %v1030_v42 = vmax.f32 %v2884_v0, 0.0  ;;  %v3273_v59 = vld [vmem:[#allocation6_spill] sm:$0xff]  ;;  %v3274_v28 = vld [vmem:[#allocation12_spill] sm:$0xff] }
 0x1cc   :  { %v1031_v3 = vmax.f32 %v2888_v31, 0.0  ;;  %v1032_v63 = vmax.f32 %v2892_v29, 0.0  ;;  %v1033_v25 = vmax.f32 %v2896_v20, 0.0  ;;  %v1034_v23 = vmax.f32 %v2900_v43, 0.0 }
 0x1cd   :  { %v1035_v40 = vmax.f32 %v2904_v54, 0.0  ;;  %v1036_v48 = vmax.f32 %v2908_v44, 0.0  ;;  %v1037_v11 = vmax.f32 %v2912_v50, 0.0  ;;  %v1038_v35 = vmax.f32 %v2916_v19, 0.0 }
 0x1ce   :  { %v1039_v39 = vmax.f32 %v3268_v56, 0.0  ;;  %v1040_v0 = vmax.f32 %v2923_v60, 0.0  ;;  %v1041_v31 = vmax.f32 %v3269_v47, 0.0  ;;  %v1042_v29 = vmax.f32 %v2929_v36, 0.0  ;;  %v3275_v60 = vld [vmem:[#allocation16_spill] sm:$0xff]  ;;  %v3276_v36 = vld [vmem:[#allocation10_spill] sm:$0xff] }
 0x1cf   :  { %v1043_v20 = vmax.f32 %v3270_v62, 0.0  ;;  %v1044_v43 = vmax.f32 %v2935_v14, 0.0  ;;  %v1045_v54 = vmax.f32 %v3271_v61, 0.0  ;;  %v1046_v44 = vmax.f32 %v3272_v24, 0.0  ;;  %v3277_v14 = vld [vmem:[#allocation2_spill] sm:$0xff]  ;;  %v3278_v24 = vld [vmem:[#allocation4_spill] sm:$0xff] }
 0x1d0   :  { %v1047_v50 = vmax.f32 %v3273_v59, 0.0  ;;  %v1048_v19 = vmax.f32 %v2950_v34, 0.0  ;;  %v1049_v56 = vmax.f32 %v3274_v28, 0.0  ;;  %v1050_v47 = vmax.f32 %v3275_v60, 0.0  ;;  %v3279_v34 = vld [vmem:[#allocation7_spill] sm:$0xff] }
 0x1d1   :  { %v1051_v62 = vmax.f32 %v3276_v36, 0.0  ;;  %v1052_v61 = vmax.f32 %v3277_v14, 0.0  ;;  %v1053_v59 = vmax.f32 %v3278_v24, 0.0  ;;  %v1054_v28 = vmax.f32 %v3279_v34, 0.0  ;;  %v3280_v60 = vld [vmem:[#allocation19_spill] sm:$0xff]  ;;  %v3282_v14 = vld [vmem:[#allocation18_spill] sm:$0xff] }
 0x1d2   :  { %v3281_v36 = vmax.f32 %v3280_v60, 0.0  ;;  %v3283_v24 = vmax.f32 %v3282_v14, 0.0  ;;  %v3284_v60 = vld [vmem:[#allocation20_spill] sm:$0xff] }
 0x1d3   :  { %v3285_v14 = vmax.f32 %v3284_v60, 0.0 }
 0x1d4   :  { %v1551_v34 = vpack.c.bf16 %v3283_v24, %v3281_v36  ;;  %v3286_v24 = vld [vmem:[#allocation22_spill] sm:$0xff] }
 0x1d5   :  { %v3287_v36 = vmax.f32 %v3286_v24, 0.0  ;;  %v3288_v24 = vld [vmem:[#allocation24_spill] sm:$0xff] }
 0x1d6   :  { %1552 = vst [vmem:[%s3151_s5] sm:$0xff] %v1551_v34  }
 0x1d7   :  { %v1556_v60 = vpack.c.bf16 %v3287_v36, %v3285_v14  ;;  %v3289_v14 = vmax.f32 %v3288_v24, 0.0  ;;  %v1566_v24 = vpack.c.bf16 %v998_v41, %v997_v6  ;;  %v1581_v6 = vpack.c.bf16 %v1004_v8, %v1003_v21 }
 0x1d8   :  { %v1586_v41 = vpack.c.bf16 %v1006_v22, %v1005_v30  ;;  %v1601_v21 = vpack.c.bf16 %v1012_v46, %v1011_v37  ;;  %v1606_v30 = vpack.c.bf16 %v1014_v52, %v1013_v53  ;;  %v1611_v8 = vpack.c.bf16 %v1016_v5, %v1015_v55 }
 0x1d9   :  { %v1561_v36 = vpack.c.bf16 %v996_v2, %v3289_v14  ;;  %v1571_v2 = vpack.c.bf16 %v1000_v7, %v999_v12  ;;  %v1576_v14 = vpack.c.bf16 %v1002_v4, %v1001_v57  ;;  %1708 = vst [vmem:[%s3151_s5 + $0x8] sm:$0xff] %v1556_v60   ;;  %1710 = vst [vmem:[%s3151_s5 + $0x18] sm:$0xff] %v1566_v24  }
 0x1da   :  { %v1591_v12 = vpack.c.bf16 %v1008_v32, %v1007_v58  ;;  %v1596_v4 = vpack.c.bf16 %v1010_v13, %v1009_v1  ;;  %1713 = vst [vmem:[%s3151_s5 + $0x30] sm:$0xff] %v1581_v6   ;;  %1714 = vst [vmem:[%s3151_s5 + $0x38] sm:$0xff] %v1586_v41   ;;  %v1616_v7 = vpack.c.bf16 %v1018_v10, %v1017_v17 }
 0x1db   :  { %1709 = vst [vmem:[%s3151_s5 + $0x10] sm:$0xff] %v1561_v36   ;;  %1711 = vst [vmem:[%s3151_s5 + $0x20] sm:$0xff] %v1571_v2   ;;  %v1621_v57 = vpack.c.bf16 %v1020_v33, %v1019_v18  ;;  %v1626_v22 = vpack.c.bf16 %v1022_v38, %v1021_v49  ;;  %v1631_v58 = vpack.c.bf16 %v1024_v9, %v1023_v51 }
 0x1dc   :  { %1712 = vst [vmem:[%s3151_s5 + $0x28] sm:$0xff] %v1576_v14   ;;  %1715 = vst [vmem:[%s3151_s5 + $0x40] sm:$0xff] %v1591_v12   ;;  %v1636_v32 = vpack.c.bf16 %v1026_v16, %v1025_v26  ;;  %v1641_v1 = vpack.c.bf16 %v1028_v15, %v1027_v45  ;;  %v1646_v13 = vpack.c.bf16 %v1030_v42, %v1029_v27 }
 0x1dd   :  { %1716 = vst [vmem:[%s3151_s5 + $0x48] sm:$0xff] %v1596_v4   ;;  %1717 = vst [vmem:[%s3151_s5 + $0x50] sm:$0xff] %v1601_v21   ;;  %v1651_v37 = vpack.c.bf16 %v1032_v63, %v1031_v3  ;;  %v1656_v46 = vpack.c.bf16 %v1034_v23, %v1033_v25  ;;  %v1661_v53 = vpack.c.bf16 %v1036_v48, %v1035_v40 }
 0x1de   :  { %1718 = vst [vmem:[%s3151_s5 + $0x58] sm:$0xff] %v1606_v30   ;;  %1719 = vst [vmem:[%s3151_s5 + $0x60] sm:$0xff] %v1611_v8   ;;  %v1666_v52 = vpack.c.bf16 %v1038_v35, %v1037_v11  ;;  %v1671_v55 = vpack.c.bf16 %v1040_v0, %v1039_v39  ;;  %v1676_v5 = vpack.c.bf16 %v1042_v29, %v1041_v31 }
 0x1df   :  { %1720 = vst [vmem:[%s3151_s5 + $0x68] sm:$0xff] %v1616_v7   ;;  %1721 = vst [vmem:[%s3151_s5 + $0x70] sm:$0xff] %v1621_v57   ;;  %v1681_v17 = vpack.c.bf16 %v1044_v43, %v1043_v20  ;;  %v1686_v10 = vpack.c.bf16 %v1046_v44, %v1045_v54  ;;  %v1691_v18 = vpack.c.bf16 %v1048_v19, %v1047_v50 }
 0x1e0   :  { %1722 = vst [vmem:[%s3151_s5 + $0x78] sm:$0xff] %v1626_v22   ;;  %1723 = vst [vmem:[%s3151_s5 + $0x80] sm:$0xff] %v1631_v58   ;;  %v1696_v33 = vpack.c.bf16 %v1050_v47, %v1049_v56  ;;  %v1701_v49 = vpack.c.bf16 %v1052_v61, %v1051_v62  ;;  %v1706_v38 = vpack.c.bf16 %v1054_v28, %v1053_v59 }
 0x1e1   :  { %1724 = vst [vmem:[%s3151_s5 + $0x88] sm:$0xff] %v1636_v32   ;;  %1725 = vst [vmem:[%s3151_s5 + $0x90] sm:$0xff] %v1641_v1  }
 0x1e2   :  { %1726 = vst [vmem:[%s3151_s5 + $0x98] sm:$0xff] %v1646_v13   ;;  %1727 = vst [vmem:[%s3151_s5 + $0xa0] sm:$0xff] %v1651_v37  }
 0x1e3   :  { %1728 = vst [vmem:[%s3151_s5 + $0xa8] sm:$0xff] %v1656_v46   ;;  %1729 = vst [vmem:[%s3151_s5 + $0xb0] sm:$0xff] %v1661_v53  }
 0x1e4   :  { %1730 = vst [vmem:[%s3151_s5 + $0xb8] sm:$0xff] %v1666_v52   ;;  %1731 = vst [vmem:[%s3151_s5 + $0xc0] sm:$0xff] %v1671_v55  }
 0x1e5   :  { %1732 = vst [vmem:[%s3151_s5 + $0xc8] sm:$0xff] %v1676_v5   ;;  %1733 = vst [vmem:[%s3151_s5 + $0xd0] sm:$0xff] %v1681_v17  }
 0x1e6   :  { %1734 = vst [vmem:[%s3151_s5 + $0xd8] sm:$0xff] %v1686_v10   ;;  %1735 = vst [vmem:[%s3151_s5 + $0xe0] sm:$0xff] %v1691_v18  }
 0x1e7   :  { %1736 = vst [vmem:[%s3151_s5 + $0xe8] sm:$0xff] %v1696_v33   ;;  %1737 = vst [vmem:[%s3151_s5 + $0xf0] sm:$0xff] %v1701_v49  }
 0x1e8   :  { %1738 = vst [vmem:[%s3151_s5 + $0xf8] sm:$0xff] %v1706_v38  }

// kernel: _lambda_.19
= control target key start
LH: loop header
LB: loop body
LE: loop exit
PB: predicated region body
PF: predicated region fallthrough
CT: control target
= control target key end

     0   :  { %v82_v51 = vlaneseq  ;;  %s765_s1 = inlined_call_operand.vmem [shape: bf16[256,384], index: 1, kind: input, shape index: {}]   ;;  %s766_s0 = inlined_call_operand.vmem [shape: bf16[8,256], index: 0, kind: input, shape index: {}]   ;;  %s767_s2 = inlined_call_operand.vmem [shape: f32[1,384], index: 2, kind: input, shape index: {}]   ;;  %s768_s3 = inlined_call_operand.vmem [shape: f32[8,384], index: 3, kind: output, shape index: {}]  }
   0x1   :  { %v520_v0 = vld [vmem:[%s765_s1 + $0x4] ss:$12 sps:$4 sm:$0xff]   ;;  %v522_v1 = vld [vmem:[%s765_s1] ss:$12 sps:$4 sm:$0xff]   ;;  %v523_v2 = vld [vmem:[%s765_s1 + $0x1c] ss:$12 sps:$4 sm:$0xff]  }
   0x2   :  { %360 = vmatprep.subr.bf16.mxu0 %v520_v0  ;;  %v525_v3 = vld [vmem:[%s765_s1 + $0x18] ss:$12 sps:$4 sm:$0xff]   ;;  %v526_v4 = vld [vmem:[%s765_s1 + $0x34] ss:$12 sps:$4 sm:$0xff]   ;;  %v528_v5 = vld [vmem:[%s765_s1 + $0x30] ss:$12 sps:$4 sm:$0xff]  }
   0x3   :  { %361 = vmatpush1.bf16.msra.mxu0 %v522_v1  ;;  %v529_v6 = vld [vmem:[%s765_s1 + $0x4c] ss:$12 sps:$4 sm:$0xff]   ;;  %v541_v7 = vld [vmem:[%s765_s1 + $0xc8] ss:$12 sps:$4 sm:$0xff]   ;;  %v532_v9 = vld [vmem:[%s765_s1 + $0x64] ss:$12 sps:$4 sm:$0xff]  }
   0x4   :  { %362 = vmatprep.subr.bf16.mxu0 %v523_v2  ;;  %v531_v8 = vld [vmem:[%s765_s1 + $0x48] ss:$12 sps:$4 sm:$0xff]   ;;  %498 = vmatprep.subr.bf16.mxu1 %v541_v7  ;;  %v546_v11 = vld [vmem:[%s765_s1 + $0xe0] ss:$12 sps:$4 sm:$0xff]   ;;  %v551_v15 = vld [vmem:[%s765_s1 + $0xf8] ss:$12 sps:$4 sm:$0xff]  }
   0x5   :  { %v544_v10 = vld [vmem:[%s765_s1 + $0x8] ss:$12 sps:$4 sm:$0xff]   ;;  %v534_v12 = vld [vmem:[%s765_s1 + $0x60] ss:$12 sps:$4 sm:$0xff]   ;;  %v537_v16 = vld [vmem:[%s765_s1 + $0x78] ss:$12 sps:$4 sm:$0xff]  }
   0x6   :  { %499 = vmatpush3.bf16.msra.mxu1 %v544_v10  ;;  %v535_v13 = vld [vmem:[%s765_s1 + $0x7c] ss:$12 sps:$4 sm:$0xff]   ;;  %v549_v14 = vld [vmem:[%s765_s1 + $0x20] ss:$12 sps:$4 sm:$0xff]   ;;  %v554_v17 = vld [vmem:[%s765_s1 + $0x38] ss:$12 sps:$4 sm:$0xff]  }
   0x7   :  { %363 = vmatpush1.bf16.msra.mxu0 %v525_v3  ;;  %500 = vmatprep.subr.bf16.mxu1 %v546_v11  ;;  %v538_v18 = vld [vmem:[%s765_s1 + $0x94] ss:$12 sps:$4 sm:$0xff]   ;;  %v556_v19 = vld [vmem:[%s765_s1 + $0x110] ss:$12 sps:$4 sm:$0xff]   ;;  %v542_v23 = vld [vmem:[%s765_s1 + $0xac] ss:$12 sps:$4 sm:$0xff]  }
   0x8   :  { %364 = vmatprep.subr.bf16.mxu0 %v526_v4  ;;  %v540_v20 = vld [vmem:[%s765_s1 + $0x90] ss:$12 sps:$4 sm:$0xff]   ;;  %v561_v22 = vld [vmem:[%s765_s1 + $0x128] ss:$12 sps:$4 sm:$0xff]   ;;  %v566_v26 = vld [vmem:[%s765_s1 + $0x140] ss:$12 sps:$4 sm:$0xff]  }
   0x9   :  { %v559_v21 = vld [vmem:[%s765_s1 + $0x50] ss:$12 sps:$4 sm:$0xff]   ;;  %v545_v24 = vld [vmem:[%s765_s1 + $0xa8] ss:$12 sps:$4 sm:$0xff]   ;;  %v550_v28 = vld [vmem:[%s765_s1 + $0xc0] ss:$12 sps:$4 sm:$0xff]  }
   0xa   :  { %501 = vmatpush3.bf16.msra.mxu1 %v549_v14  ;;  %v564_v25 = vld [vmem:[%s765_s1 + $0x68] ss:$12 sps:$4 sm:$0xff]   ;;  %v547_v27 = vld [vmem:[%s765_s1 + $0xc4] ss:$12 sps:$4 sm:$0xff]   ;;  %v569_v29 = vld [vmem:[%s765_s1 + $0x80] ss:$12 sps:$4 sm:$0xff]  }
   0xb   :  { %365 = vmatpush1.bf16.msra.mxu0 %v528_v5  ;;  %502 = vmatprep.subr.bf16.mxu1 %v551_v15  ;;  %v571_v30 = vld [vmem:[%s765_s1 + $0x158] ss:$12 sps:$4 sm:$0xff]   ;;  %v552_v31 = vld [vmem:[%s765_s1 + $0xdc] ss:$12 sps:$4 sm:$0xff]   ;;  %v557_v34 = vld [vmem:[%s765_s1 + $0xf4] ss:$12 sps:$4 sm:$0xff]  }
   0xc   :  { %366 = vmatprep.subr.bf16.mxu0 %v529_v6  ;;  %v555_v32 = vld [vmem:[%s765_s1 + $0xd8] ss:$12 sps:$4 sm:$0xff]   ;;  %v576_v35 = vld [vmem:[%s765_s1 + $0x170] ss:$12 sps:$4 sm:$0xff]   ;;  %v565_v42 = vld [vmem:[%s765_s1 + $0x108] ss:$12 sps:$4 sm:$0xff]  }
   0xd   :  { %v574_v33 = vld [vmem:[%s765_s1 + $0x98] ss:$12 sps:$4 sm:$0xff]   ;;  %v579_v38 = vld [vmem:[%s765_s1 + $0xb0] ss:$12 sps:$4 sm:$0xff]   ;;  %v570_v44 = vld [vmem:[%s765_s1 + $0x120] ss:$12 sps:$4 sm:$0xff]  }
   0xe   :  { %503 = vmatpush3.bf16.msra.mxu1 %v554_v17  ;;  %v15_v36 = vld [vmem:[%s766_s0] sm:$0xff]  ;;  %v560_v39 = vld [vmem:[%s765_s1 + $0xf0] ss:$12 sps:$4 sm:$0xff]   ;;  %v562_v40 = vld [vmem:[%s765_s1 + $0x10c] ss:$12 sps:$4 sm:$0xff]   ;;  %v83_v52 = vshrl.u32 %v82_v51, 7 }
   0xf   :  { %367 = vmatpush1.bf16.msra.mxu0 %v531_v8  ;;  %504 = vmatprep.subr.bf16.mxu1 %v556_v19  ;;  %v449_v37 = vcombine.high %v15_v36, %v15_v36  ;;  %v448_v41 = vcombine.low %v15_v36, %v15_v36  ;;  %v567_v43 = vld [vmem:[%s765_s1 + $0x124] ss:$12 sps:$4 sm:$0xff]   ;;  %v572_v45 = vld [vmem:[%s765_s1 + $0x13c] ss:$12 sps:$4 sm:$0xff]   ;;  %v577_v47 = vld [vmem:[%s765_s1 + $0x154] ss:$12 sps:$4 sm:$0xff]  }
  0x10   :  { %368 = vmatprep.subr.bf16.mxu0 %v532_v9  ;;  %v575_v46 = vld [vmem:[%s765_s1 + $0x138] ss:$12 sps:$4 sm:$0xff]   ;;  %v580_v48 = vld [vmem:[%s765_s1 + $0x150] ss:$12 sps:$4 sm:$0xff]   ;;  %v585_v50 = vld [vmem:[%s765_s1 + $0x168] ss:$12 sps:$4 sm:$0xff]  }
  0x11   :  { %433 = vmatprep.mubr.bf16.mxu1 %v449_v37  ;;  %392 = vmatprep.mubr.bf16.mxu0 %v449_v37  ;;  %v583_v49 = vld [vmem:[%s765_s1 + $0x16c] ss:$12 sps:$4 sm:$0xff]   ;;  %v92_v53 = vsub.s32 2, %v83_v52  ;;  %v80_v54 = vld [vmem:[%s767_s2] sm:$0x7]  ;;  %v84_v62 = vsub.s32 0, %v83_v52 }
  0x12   :  { %505 = vmatpush3.bf16.msra.mxu1 %v559_v21  ;;  %v88_v63 = vsub.s32 1, %v83_v52 }
  0x13   :  { %369 = vmatpush1.bf16.msra.mxu0 %v534_v12  ;;  %506 = vmatprep.subr.bf16.mxu1 %v561_v22  ;;  %v93_v56 = vrot.slane %v80_v54, %v92_v53  ;;  %v85_v0 = vrot.slane %v80_v54, %v84_v62 }
  0x14   :  { %370 = vmatprep.subr.bf16.mxu0 %v535_v13  ;;  %v89_v1 = vrot.slane %v80_v54, %v88_v63 }
  0x16   :  { %507 = vmatpush3.bf16.msra.mxu1 %v564_v25 }
  0x17   :  { %371 = vmatpush1.bf16.msra.mxu0 %v537_v16  ;;  %508 = vmatprep.subr.bf16.mxu1 %v566_v26 }
  0x18   :  { %372 = vmatprep.subr.bf16.mxu0 %v538_v18 }
  0x1a   :  { %509 = vmatpush3.bf16.msra.mxu1 %v569_v29 }
  0x1b   :  { %373 = vmatpush1.bf16.msra.mxu0 %v540_v20  ;;  %510 = vmatprep.subr.bf16.mxu1 %v571_v30 }
  0x1c   :  { %374 = vmatprep.subr.bf16.mxu0 %v542_v23 }
  0x1e   :  { %511 = vmatpush3.bf16.msra.mxu1 %v574_v33 }
  0x1f   :  { %375 = vmatpush1.bf16.msra.mxu0 %v545_v24  ;;  %512 = vmatprep.subr.bf16.mxu1 %v576_v35 }
  0x20   :  { %376 = vmatprep.subr.bf16.mxu0 %v547_v27 }
  0x22   :  { %513 = vmatpush3.bf16.msra.mxu1 %v579_v38 }
  0x23   :  { %377 = vmatpush1.bf16.msra.mxu0 %v550_v28 }
  0x24   :  { %378 = vmatprep.subr.bf16.mxu0 %v552_v31 }
  0x25   :  { %434 = vmatmul.mubr.bf16.vlgmr.msra.gmra.mrb[0].mxu1 %v448_v41 }
  0x27   :  { %379 = vmatpush1.bf16.msra.mxu0 %v555_v32 }
  0x28   :  { %380 = vmatprep.subr.bf16.mxu0 %v557_v34 }
  0x2b   :  { %381 = vmatpush1.bf16.msra.mxu0 %v560_v39 }
  0x2c   :  { %382 = vmatprep.subr.bf16.mxu0 %v562_v40 }
  0x2f   :  { %383 = vmatpush1.bf16.msra.mxu0 %v565_v42 }
  0x30   :  { %384 = vmatprep.subr.bf16.mxu0 %v567_v43 }
  0x33   :  { %385 = vmatpush1.bf16.msra.mxu0 %v570_v44 }
  0x34   :  { %386 = vmatprep.subr.bf16.mxu0 %v572_v45 }
  0x37   :  { %387 = vmatpush1.bf16.msra.mxu0 %v575_v46 }
  0x38   :  { %388 = vmatprep.subr.bf16.mxu0 %v577_v47 }
  0x3b   :  { %389 = vmatpush1.bf16.msra.mxu0 %v580_v48 }
  0x3c   :  { %390 = vmatprep.subr.bf16.mxu0 %v583_v49 }
  0x3f   :  { %391 = vmatpush1.bf16.msra.mxu0 %v585_v50 }
  0x42   :  { %393 = vmatmul.mubr.bf16.vlgmr.msra.gmra.mrb[0].mxu0 %v448_v41 }
  0xf8   :  { %v514_v55 = vpop.f32.mrb[0].mxu1 }
  0xf9   :  { %v515_v57 = vpop.f32.mrb[1].mxu1 }
  0xfa   :  { %v516_v58 = vadd.f32 %v515_v57, %v514_v55  ;;  %v517_v59 = vpop.f32.mrb[2].mxu1 }
  0xfb   :  { %v518_v60 = vpop.f32.mrb[3].mxu1 }
  0xfc   :  { %v436_v61 = vadd.f32 %v516_v58, %v93_v56 }
  0xfe   :  { %443 = vst [vmem:[%s768_s3 + $0x10] sm:$0xff] %v436_v61 }
 0x115   :  { %v394_v2 = vpop.f32.mrb[0].mxu0 }
 0x116   :  { %v395_v3 = vadd.f32 %v394_v2, %v85_v0  ;;  %v396_v4 = vpop.f32.mrb[1].mxu0 }
 0x117   :  { %v397_v5 = vadd.f32 %v396_v4, %v89_v1  ;;  %v398_v6 = vpop.f32.mrb[2].mxu0 }
 0x118   :  { %441 = vst [vmem:[%s768_s3] sm:$0xff] %v395_v3  ;;  %v399_v7 = vpop.f32.mrb[3].mxu0 }
 0x119   :  { %442 = vst [vmem:[%s768_s3 + $0x8] sm:$0xff] %v397_v5 }

// kernel: _lambda_.22
= control target key start
LH: loop header
LB: loop body
LE: loop exit
PB: predicated region body
PF: predicated region fallthrough
CT: control target
= control target key end

     0   :  { %s4625_s1 = inlined_call_operand.vmem [shape: bf16[128,128], index: 1, kind: input, shape index: {}]   ;;  %s4626_s0 = inlined_call_operand.vmem [shape: bf16[512,128], index: 0, kind: input, shape index: {}]   ;;  %s4627_s4 = inlined_call_operand.vmem [shape: bf16[512,128], index: 4, kind: input, shape index: {}]   ;;  %s4628_s2 = inlined_call_operand.vmem [shape: f32[1,128], index: 2, kind: input, shape index: {}]   ;;  %s4629_s3 = inlined_call_operand.vmem [shape: f32[1,128], index: 3, kind: input, shape index: {}]   ;;  %s4630_s5 = inlined_call_operand.vmem [shape: f32[512,128], index: 5, kind: input, shape index: {}]   ;;  %s4631_s6 = inlined_call_operand.vmem [shape: bf16[512,128], index: 6, kind: output, shape index: {}]  }
   0x1   :  { %v2349_v0 = vld [vmem:[%s4625_s1] sm:$0xff]   ;;  %v2350_v1 = vld [vmem:[%s4625_s1 + $0x8] sm:$0xff]   ;;  %v2351_v2 = vld [vmem:[%s4625_s1 + $0x10] sm:$0xff]  }
   0x2   :  { %2253 = vmatprep.subr.bf16.mxu0 %v2349_v0  ;;  %2333 = vmatprep.subr.bf16.mxu1 %v2349_v0  ;;  %v2352_v3 = vld [vmem:[%s4625_s1 + $0x18] sm:$0xff]   ;;  %v2357_v4 = vld [vmem:[%s4626_s0] sm:$0xff]   ;;  %v2354_v6 = vld [vmem:[%s4625_s1 + $0x28] sm:$0xff]  }
   0x3   :  { %2254 = vmatpush3.bf16.msra.mxu0 %v2349_v0  ;;  %2341 = vmatpush3.bf16.msra.mxu1 %v2349_v0  ;;  %v2353_v5 = vld [vmem:[%s4625_s1 + $0x20] sm:$0xff]   ;;  %v2355_v7 = vld [vmem:[%s4625_s1 + $0x30] sm:$0xff]   ;;  %v2356_v8 = vld [vmem:[%s4625_s1 + $0x38] sm:$0xff]  }
   0x4   :  { %2255 = vmatprep.subr.bf16.mxu0 %v2350_v1  ;;  %2334 = vmatprep.subr.bf16.mxu1 %v2350_v1  ;;  %v2373_v9 = vld [vmem:[%s4626_s0 + $0x80] sm:$0xff]   ;;  %v2358_v10 = vld [vmem:[%s4626_s0 + $0x8] sm:$0xff]   ;;  %v2359_v11 = vld [vmem:[%s4626_s0 + $0x10] sm:$0xff]  }
   0x5   :  { %2269 = vmatprep.mubr.bf16.mxu0 %v2357_v4  ;;  %2301 = vmatprep.mubr.bf16.mxu1 %v2373_v9  ;;  %v2374_v12 = vld [vmem:[%s4626_s0 + $0x88] sm:$0xff]   ;;  %v2375_v13 = vld [vmem:[%s4626_s0 + $0x90] sm:$0xff]   ;;  %v2360_v14 = vld [vmem:[%s4626_s0 + $0x18] sm:$0xff]  }
   0x6   :  { %v2361_v15 = vld [vmem:[%s4626_s0 + $0x20] sm:$0xff]   ;;  %v2376_v16 = vld [vmem:[%s4626_s0 + $0x98] sm:$0xff]   ;;  %v2362_v18 = vld [vmem:[%s4626_s0 + $0x28] sm:$0xff]  }
   0x7   :  { %2256 = vmatpush3.bf16.msra.mxu0 %v2350_v1  ;;  %2342 = vmatpush3.bf16.msra.mxu1 %v2350_v1  ;;  %v2377_v17 = vld [vmem:[%s4626_s0 + $0xa0] sm:$0xff]   ;;  %v2378_v19 = vld [vmem:[%s4626_s0 + $0xa8] sm:$0xff]   ;;  %v2363_v20 = vld [vmem:[%s4626_s0 + $0x30] sm:$0xff]  }
   0x8   :  { %2257 = vmatprep.subr.bf16.mxu0 %v2351_v2  ;;  %2335 = vmatprep.subr.bf16.mxu1 %v2351_v2  ;;  %v2379_v21 = vld [vmem:[%s4626_s0 + $0xb0] sm:$0xff]   ;;  %v2364_v22 = vld [vmem:[%s4626_s0 + $0x38] sm:$0xff]   ;;  %v2365_v24 = vld [vmem:[%s4626_s0 + $0x40] sm:$0xff]  }
   0x9   :  { %v2380_v23 = vld [vmem:[%s4626_s0 + $0xb8] sm:$0xff]   ;;  %v2381_v25 = vld [vmem:[%s4626_s0 + $0xc0] sm:$0xff]   ;;  %v2366_v26 = vld [vmem:[%s4626_s0 + $0x48] sm:$0xff]  }
   0xa   :  { %v2382_v27 = vld [vmem:[%s4626_s0 + $0xc8] sm:$0xff]   ;;  %v2367_v28 = vld [vmem:[%s4626_s0 + $0x50] sm:$0xff]   ;;  %v2368_v30 = vld [vmem:[%s4626_s0 + $0x58] sm:$0xff]  }
   0xb   :  { %2258 = vmatpush3.bf16.msra.mxu0 %v2351_v2  ;;  %2343 = vmatpush3.bf16.msra.mxu1 %v2351_v2  ;;  %v2383_v29 = vld [vmem:[%s4626_s0 + $0xd0] sm:$0xff]   ;;  %v2384_v31 = vld [vmem:[%s4626_s0 + $0xd8] sm:$0xff]   ;;  %v2369_v32 = vld [vmem:[%s4626_s0 + $0x60] sm:$0xff]  }
   0xc   :  { %2259 = vmatprep.subr.bf16.mxu0 %v2352_v3  ;;  %2336 = vmatprep.subr.bf16.mxu1 %v2352_v3  ;;  %v2385_v33 = vld [vmem:[%s4626_s0 + $0xe0] sm:$0xff]   ;;  %v2370_v34 = vld [vmem:[%s4626_s0 + $0x68] sm:$0xff]   ;;  %v2371_v36 = vld [vmem:[%s4626_s0 + $0x70] sm:$0xff]  }
   0xd   :  { %v2386_v35 = vld [vmem:[%s4626_s0 + $0xe8] sm:$0xff]   ;;  %v2387_v37 = vld [vmem:[%s4626_s0 + $0xf0] sm:$0xff]   ;;  %v2372_v38 = vld [vmem:[%s4626_s0 + $0x78] sm:$0xff]  }
   0xe   :  { %v2388_v39 = vld [vmem:[%s4626_s0 + $0xf8] sm:$0xff]  }
   0xf   :  { %2260 = vmatpush3.bf16.msra.mxu0 %v2352_v3  ;;  %2344 = vmatpush3.bf16.msra.mxu1 %v2352_v3 }
  0x10   :  { %2261 = vmatprep.subr.bf16.mxu0 %v2353_v5  ;;  %2337 = vmatprep.subr.bf16.mxu1 %v2353_v5 }
  0x13   :  { %2262 = vmatpush3.bf16.msra.mxu0 %v2353_v5  ;;  %2345 = vmatpush3.bf16.msra.mxu1 %v2353_v5 }
  0x14   :  { %2263 = vmatprep.subr.bf16.mxu0 %v2354_v6  ;;  %2338 = vmatprep.subr.bf16.mxu1 %v2354_v6 }
  0x17   :  { %2264 = vmatpush3.bf16.msra.mxu0 %v2354_v6  ;;  %2346 = vmatpush3.bf16.msra.mxu1 %v2354_v6 }
  0x18   :  { %2265 = vmatprep.subr.bf16.mxu0 %v2355_v7  ;;  %2339 = vmatprep.subr.bf16.mxu1 %v2355_v7 }
  0x1b   :  { %2266 = vmatpush3.bf16.msra.mxu0 %v2355_v7  ;;  %2347 = vmatpush3.bf16.msra.mxu1 %v2355_v7 }
  0x1c   :  { %2267 = vmatprep.subr.bf16.mxu0 %v2356_v8  ;;  %2340 = vmatprep.subr.bf16.mxu1 %v2356_v8 }
  0x1f   :  { %2268 = vmatpush3.bf16.msra.mxu0 %v2356_v8  ;;  %2348 = vmatpush3.bf16.msra.mxu1 %v2356_v8 }
  0x22   :  { %2270 = vmatmul.mubr.bf16.vlgmr.msra.gmra.mrb[0].mxu0 %v2358_v10  ;;  %2302 = vmatmul.mubr.bf16.vlgmr.msra.gmra.mrb[0].mxu1 %v2374_v12 }
  0x23   :  { %2273 = vmatprep.mubr.bf16.mxu0 %v2359_v11  ;;  %2305 = vmatprep.mubr.bf16.mxu1 %v2375_v13 }
  0x2a   :  { %2274 = vmatmul.mubr.bf16.gmra.mrb[4].mxu0 %v2360_v14  ;;  %2306 = vmatmul.mubr.bf16.gmra.mrb[4].mxu1 %v2376_v16 }
  0x2b   :  { %2277 = vmatprep.mubr.bf16.mxu0 %v2361_v15  ;;  %2309 = vmatprep.mubr.bf16.mxu1 %v2377_v17 }
  0x32   :  { %2278 = vmatmul.mubr.bf16.gmra.mrb[8].mxu0 %v2362_v18  ;;  %2310 = vmatmul.mubr.bf16.gmra.mrb[8].mxu1 %v2378_v19 }
  0x33   :  { %2281 = vmatprep.mubr.bf16.mxu0 %v2363_v20  ;;  %2313 = vmatprep.mubr.bf16.mxu1 %v2379_v21 }
  0x3a   :  { %2282 = vmatmul.mubr.bf16.gmra.mrb[12].mxu0 %v2364_v22  ;;  %2314 = vmatmul.mubr.bf16.gmra.mrb[12].mxu1 %v2380_v23 }
  0x3b   :  { %2285 = vmatprep.mubr.bf16.mxu0 %v2365_v24  ;;  %2317 = vmatprep.mubr.bf16.mxu1 %v2381_v25 }
  0x42   :  { %2286 = vmatmul.mubr.bf16.gmra.mrb[16].mxu0 %v2366_v26  ;;  %2318 = vmatmul.mubr.bf16.gmra.mrb[16].mxu1 %v2382_v27 }
  0x43   :  { %2289 = vmatprep.mubr.bf16.mxu0 %v2367_v28  ;;  %2321 = vmatprep.mubr.bf16.mxu1 %v2383_v29 }
  0x4a   :  { %2290 = vmatmul.mubr.bf16.gmra.mrb[20].mxu0 %v2368_v30  ;;  %2322 = vmatmul.mubr.bf16.gmra.mrb[20].mxu1 %v2384_v31 }
  0x4b   :  { %2293 = vmatprep.mubr.bf16.mxu0 %v2369_v32  ;;  %2325 = vmatprep.mubr.bf16.mxu1 %v2385_v33 }
  0x52   :  { %2294 = vmatmul.mubr.bf16.gmra.mrb[24].mxu0 %v2370_v34  ;;  %2326 = vmatmul.mubr.bf16.gmra.mrb[24].mxu1 %v2386_v35 }
  0x53   :  { %2297 = vmatprep.mubr.bf16.mxu0 %v2371_v36  ;;  %2329 = vmatprep.mubr.bf16.mxu1 %v2387_v37 }
  0x5a   :  { %2298 = vmatmul.mubr.bf16.gmra.mrb[28].mxu0 %v2372_v38  ;;  %2330 = vmatmul.mubr.bf16.gmra.mrb[28].mxu1 %v2388_v39 }
  0xf5   :  { %v2546_v40 = vpop.f32.mrb[0].mxu0  ;;  %v2548_v41 = vpop.f32.mrb[0].mxu1 }
  0xf6   :  { %v2550_v42 = vpop.f32.mrb[1].mxu0  ;;  %v2552_v43 = vpop.f32.mrb[1].mxu1  ;;  %v707_v51 = vmul.f32 %v2546_v40, %v2546_v40 }
  0xf7   :  { %v2554_v44 = vpop.f32.mrb[2].mxu0  ;;  %v2556_v45 = vpop.f32.mrb[2].mxu1  ;;  %v705_v48 = vmul.f32 %v2550_v42, %v2550_v42 }
  0xf8   :  { %v2558_v46 = vpop.f32.mrb[3].mxu0  ;;  %v2560_v47 = vpop.f32.mrb[3].mxu1  ;;  %v708_v54 = vmul.f32 %v2554_v44, %v2554_v44 }
  0xf9   :  { %v635_v49 = vadd.f32 %v2558_v46, %v2550_v42  ;;  %v706_v50 = vmul.f32 %v2558_v46, %v2558_v46 }
  0xfb   :  { %v636_v52 = vadd.f32 %v2546_v40, %v635_v49  ;;  %v769_v53 = vadd.f32 %v706_v50, %v705_v48 }
  0xfd   :  { %v770_v55 = vadd.f32 %v769_v53, %v707_v51  ;;  %v2573_v56 = vpop.f32.mrb[4].mxu0  ;;  %v637_v57 = vadd.f32 %v2554_v44, %v636_v52  ;;  %v2576_v58 = vpop.f32.mrb[4].mxu1 }
  0xfe   :  { %v2578_v59 = vpop.f32.mrb[5].mxu0  ;;  %v2580_v60 = vpop.f32.mrb[5].mxu1  ;;  %v711_v7 = vmul.f32 %v2573_v56, %v2573_v56 }
  0xff   :  { %v638_v61 = vadd.f32 %v637_v57, %v2578_v59  ;;  %v709_v62 = vmul.f32 %v2578_v59, %v2578_v59  ;;  %v771_v63 = vadd.f32 %v770_v55, %v708_v54  ;;  %v2585_v0 = vpop.f32.mrb[6].mxu0  ;;  %v2587_v1 = vpop.f32.mrb[6].mxu1 }
 0x100   :  { %v2589_v2 = vpop.f32.mrb[7].mxu0  ;;  %v2591_v3 = vpop.f32.mrb[7].mxu1  ;;  %v712_v10 = vmul.f32 %v2585_v0, %v2585_v0 }
 0x101   :  { %v772_v4 = vadd.f32 %v771_v63, %v709_v62  ;;  %v639_v5 = vadd.f32 %v638_v61, %v2589_v2  ;;  %v710_v6 = vmul.f32 %v2589_v2, %v2589_v2 }
 0x103   :  { %v640_v8 = vadd.f32 %v2573_v56, %v639_v5  ;;  %v773_v9 = vadd.f32 %v772_v4, %v710_v6 }
 0x105   :  { %v774_v11 = vadd.f32 %v773_v9, %v711_v7  ;;  %v2601_v12 = vpop.f32.mrb[8].mxu0  ;;  %v641_v13 = vadd.f32 %v2585_v0, %v640_v8  ;;  %v2604_v14 = vpop.f32.mrb[8].mxu1 }
 0x106   :  { %v2606_v15 = vpop.f32.mrb[9].mxu0  ;;  %v2608_v16 = vpop.f32.mrb[9].mxu1  ;;  %v715_v27 = vmul.f32 %v2601_v12, %v2601_v12 }
 0x107   :  { %v642_v17 = vadd.f32 %v641_v13, %v2606_v15  ;;  %v713_v18 = vmul.f32 %v2606_v15, %v2606_v15  ;;  %v775_v19 = vadd.f32 %v774_v11, %v712_v10  ;;  %v2613_v20 = vpop.f32.mrb[10].mxu0  ;;  %v2615_v21 = vpop.f32.mrb[10].mxu1 }
 0x108   :  { %v2617_v22 = vpop.f32.mrb[11].mxu0  ;;  %v2619_v23 = vpop.f32.mrb[11].mxu1  ;;  %v716_v30 = vmul.f32 %v2613_v20, %v2613_v20 }
 0x109   :  { %v776_v24 = vadd.f32 %v775_v19, %v713_v18  ;;  %v643_v25 = vadd.f32 %v642_v17, %v2617_v22  ;;  %v714_v26 = vmul.f32 %v2617_v22, %v2617_v22 }
 0x10b   :  { %v644_v28 = vadd.f32 %v2601_v12, %v643_v25  ;;  %v777_v29 = vadd.f32 %v776_v24, %v714_v26 }
 0x10d   :  { %v778_v31 = vadd.f32 %v777_v29, %v715_v27  ;;  %v2629_v32 = vpop.f32.mrb[12].mxu0  ;;  %v645_v33 = vadd.f32 %v2613_v20, %v644_v28  ;;  %v2632_v34 = vpop.f32.mrb[12].mxu1 }
 0x10e   :  { %v2634_v35 = vpop.f32.mrb[13].mxu0  ;;  %v2636_v36 = vpop.f32.mrb[13].mxu1  ;;  %v719_v55 = vmul.f32 %v2629_v32, %v2629_v32 }
 0x10f   :  { %v646_v37 = vadd.f32 %v645_v33, %v2634_v35  ;;  %v717_v38 = vmul.f32 %v2634_v35, %v2634_v35  ;;  %v779_v39 = vadd.f32 %v778_v31, %v716_v30  ;;  %v2641_v48 = vpop.f32.mrb[14].mxu0  ;;  %v2643_v49 = vpop.f32.mrb[14].mxu1 }
 0x110   :  { %4751 = vst [vmem:[#allocation2_spill] sm:$0xff] %v2641_v48  ;;  %v2645_v50 = vpop.f32.mrb[15].mxu0  ;;  %v2647_v51 = vpop.f32.mrb[15].mxu1  ;;  %v720_v62 = vmul.f32 %v2641_v48, %v2641_v48 }
 0x111   :  { %v780_v52 = vadd.f32 %v779_v39, %v717_v38  ;;  %v647_v53 = vadd.f32 %v646_v37, %v2645_v50  ;;  %v718_v54 = vmul.f32 %v2645_v50, %v2645_v50 }
 0x113   :  { %v648_v57 = vadd.f32 %v2629_v32, %v647_v53  ;;  %v781_v61 = vadd.f32 %v780_v52, %v718_v54 }
 0x115   :  { %v782_v63 = vadd.f32 %v781_v61, %v719_v55  ;;  %v2657_v4 = vpop.f32.mrb[16].mxu0  ;;  %v649_v5 = vadd.f32 %v2641_v48, %v648_v57  ;;  %v2660_v6 = vpop.f32.mrb[16].mxu1  ;;  %v738_v48 = vmul.f32 %v2560_v47, %v2560_v47 }
 0x116   :  { %4752 = vst [vmem:[#allocation3_spill] sm:$0xff] %v2657_v4  ;;  %v2662_v7 = vpop.f32.mrb[17].mxu0  ;;  %v2664_v8 = vpop.f32.mrb[17].mxu1  ;;  %v723_v27 = vmul.f32 %v2657_v4, %v2657_v4 }
 0x117   :  { %4753 = vst [vmem:[#allocation4_spill] sm:$0xff] %v2662_v7  ;;  %v650_v9 = vadd.f32 %v649_v5, %v2662_v7  ;;  %v721_v10 = vmul.f32 %v2662_v7, %v2662_v7  ;;  %v783_v11 = vadd.f32 %v782_v63, %v720_v62  ;;  %v2669_v13 = vpop.f32.mrb[18].mxu0  ;;  %v2671_v17 = vpop.f32.mrb[18].mxu1 }
 0x118   :  { %4754 = vst [vmem:[#allocation5_spill] sm:$0xff] %v2669_v13  ;;  %v2673_v18 = vpop.f32.mrb[19].mxu0  ;;  %v2675_v19 = vpop.f32.mrb[19].mxu1  ;;  %v724_v30 = vmul.f32 %v2669_v13, %v2669_v13 }
 0x119   :  { %4755 = vst [vmem:[#allocation6_spill] sm:$0xff] %v2673_v18  ;;  %v784_v24 = vadd.f32 %v783_v11, %v721_v10  ;;  %v651_v25 = vadd.f32 %v650_v9, %v2673_v18  ;;  %v722_v26 = vmul.f32 %v2673_v18, %v2673_v18 }
 0x11b   :  { %v652_v28 = vadd.f32 %v2657_v4, %v651_v25  ;;  %v785_v29 = vadd.f32 %v784_v24, %v722_v26 }
 0x11d   :  { %v786_v31 = vadd.f32 %v785_v29, %v723_v27  ;;  %v2685_v33 = vpop.f32.mrb[20].mxu0  ;;  %v653_v37 = vadd.f32 %v2669_v13, %v652_v28  ;;  %v2688_v38 = vpop.f32.mrb[20].mxu1 }
 0x11e   :  { %4756 = vst [vmem:[#allocation7_spill] sm:$0xff] %v2685_v33  ;;  %v2690_v39 = vpop.f32.mrb[21].mxu0  ;;  %v2692_v52 = vpop.f32.mrb[21].mxu1  ;;  %v727_v11 = vmul.f32 %v2685_v33, %v2685_v33 }
 0x11f   :  { %4757 = vst [vmem:[#allocation8_spill] sm:$0xff] %v2690_v39  ;;  %v654_v53 = vadd.f32 %v653_v37, %v2690_v39  ;;  %v725_v54 = vmul.f32 %v2690_v39, %v2690_v39  ;;  %v787_v55 = vadd.f32 %v786_v31, %v724_v30  ;;  %v2697_v57 = vpop.f32.mrb[22].mxu0  ;;  %v2699_v61 = vpop.f32.mrb[22].mxu1 }
 0x120   :  { %4758 = vst [vmem:[#allocation9_spill] sm:$0xff] %v2697_v57  ;;  %v2701_v62 = vpop.f32.mrb[23].mxu0  ;;  %v2703_v63 = vpop.f32.mrb[23].mxu1  ;;  %v728_v26 = vmul.f32 %v2697_v57, %v2697_v57 }
 0x121   :  { %4759 = vst [vmem:[#allocation10_spill] sm:$0xff] %v2701_v62  ;;  %v788_v5 = vadd.f32 %v787_v55, %v725_v54  ;;  %v655_v9 = vadd.f32 %v654_v53, %v2701_v62  ;;  %v726_v10 = vmul.f32 %v2701_v62, %v2701_v62 }
 0x123   :  { %v656_v24 = vadd.f32 %v2685_v33, %v655_v9  ;;  %v789_v25 = vadd.f32 %v788_v5, %v726_v10 }
 0x125   :  { %v790_v27 = vadd.f32 %v789_v25, %v727_v11  ;;  %v2713_v28 = vpop.f32.mrb[24].mxu0  ;;  %v657_v29 = vadd.f32 %v2697_v57, %v656_v24  ;;  %v2716_v30 = vpop.f32.mrb[24].mxu1 }
 0x126   :  { %4760 = vst [vmem:[#allocation11_spill] sm:$0xff] %v2713_v28  ;;  %4761 = vst [vmem:[#allocation12_spill] sm:$0xff] %v2716_v30  ;;  %v2718_v31 = vpop.f32.mrb[25].mxu0  ;;  %v2720_v37 = vpop.f32.mrb[25].mxu1 }
 0x127   :  { %4762 = vst [vmem:[#allocation13_spill] sm:$0xff] %v2718_v31  ;;  %4763 = vst [vmem:[#allocation14_spill] sm:$0xff] %v2720_v37  ;;  %v658_v53 = vadd.f32 %v657_v29, %v2718_v31  ;;  %v729_v54 = vmul.f32 %v2718_v31, %v2718_v31  ;;  %v791_v55 = vadd.f32 %v790_v27, %v728_v26  ;;  %v2725_v5 = vpop.f32.mrb[26].mxu0  ;;  %v2727_v9 = vpop.f32.mrb[26].mxu1 }
 0x128   :  { %4764 = vst [vmem:[#allocation15_spill] sm:$0xff] %v2725_v5  ;;  %4765 = vst [vmem:[#allocation16_spill] sm:$0xff] %v2727_v9  ;;  %v2729_v10 = vpop.f32.mrb[27].mxu0  ;;  %v2731_v11 = vpop.f32.mrb[27].mxu1  ;;  %v731_v29 = vmul.f32 %v2713_v28, %v2713_v28  ;;  %v732_v27 = vmul.f32 %v2725_v5, %v2725_v5 }
 0x129   :  { %4766 = vst [vmem:[#allocation17_spill] sm:$0xff] %v2729_v10  ;;  %4767 = vst [vmem:[#allocation18_spill] sm:$0xff] %v2731_v11  ;;  %v792_v24 = vadd.f32 %v791_v55, %v729_v54  ;;  %v659_v25 = vadd.f32 %v658_v53, %v2729_v10  ;;  %v730_v57 = vmul.f32 %v2729_v10, %v2729_v10 }
 0x12b   :  { %v660_v31 = vadd.f32 %v2713_v28, %v659_v25  ;;  %v793_v26 = vadd.f32 %v792_v24, %v730_v57 }
 0x12d   :  { %v794_v33 = vadd.f32 %v793_v26, %v731_v29  ;;  %v2741_v62 = vpop.f32.mrb[28].mxu0  ;;  %v661_v39 = vadd.f32 %v2725_v5, %v660_v31  ;;  %v2744_v54 = vpop.f32.mrb[28].mxu1 }
 0x12e   :  { %4768 = vst [vmem:[#allocation19_spill] sm:$0xff] %v2744_v54  ;;  %v2746_v53 = vpop.f32.mrb[29].mxu0  ;;  %v2748_v55 = vpop.f32.mrb[29].mxu1 }
 0x12f   :  { %4769 = vst [vmem:[#allocation20_spill] sm:$0xff] %v2746_v53  ;;  %4770 = vst [vmem:[#allocation21_spill] sm:$0xff] %v2748_v55  ;;  %v662_v10 = vadd.f32 %v661_v39, %v2746_v53  ;;  %v733_v25 = vmul.f32 %v2746_v53, %v2746_v53  ;;  %v795_v57 = vadd.f32 %v794_v33, %v732_v27  ;;  %v2753_v24 = vpop.f32.mrb[30].mxu0  ;;  %v2755_v28 = vpop.f32.mrb[30].mxu1 }
 0x130   :  { %v2757_v29 = vpop.f32.mrb[31].mxu0  ;;  %v2759_v26 = vpop.f32.mrb[31].mxu1  ;;  %v735_v39 = vmul.f32 %v2741_v62, %v2741_v62  ;;  %v736_v27 = vmul.f32 %v2753_v24, %v2753_v24 }
 0x131   :  { %4771 = vst [vmem:[#allocation22_spill] sm:$0xff] %v2757_v29  ;;  %4772 = vst [vmem:[#allocation23_spill] sm:$0xff] %v2759_v26  ;;  %v796_v31 = vadd.f32 %v795_v57, %v733_v25  ;;  %v663_v5 = vadd.f32 %v662_v10, %v2757_v29  ;;  %v734_v13 = vmul.f32 %v2757_v29, %v2757_v29 }
 0x132   :  { %v737_v25 = vmul.f32 %v2552_v43, %v2552_v43 }
 0x133   :  { %v664_v53 = vadd.f32 %v2741_v62, %v663_v5  ;;  %v797_v33 = vadd.f32 %v796_v31, %v734_v13  ;;  %v739_v13 = vmul.f32 %v2548_v41, %v2548_v41 }
 0x135   :  { %v798_v4 = vadd.f32 %v797_v33, %v735_v39  ;;  %v665_v18 = vadd.f32 %v2753_v24, %v664_v53  ;;  %v740_v53 = vmul.f32 %v2556_v45, %v2556_v45 }
 0x137   :  { %v666_v10 = vadd.f32 %v665_v18, %v2552_v43  ;;  %v799_v57 = vadd.f32 %v798_v4, %v736_v27  ;;  %v741_v4 = vmul.f32 %v2580_v60, %v2580_v60 }
 0x139   :  { %v800_v7 = vadd.f32 %v799_v57, %v737_v25  ;;  %v667_v29 = vadd.f32 %v666_v10, %v2560_v47  ;;  %v742_v57 = vmul.f32 %v2591_v3, %v2591_v3 }
 0x13b   :  { %v668_v5 = vadd.f32 %v2548_v41, %v667_v29  ;;  %v801_v31 = vadd.f32 %v800_v7, %v738_v48  ;;  %v743_v48 = vmul.f32 %v2576_v58, %v2576_v58 }
 0x13d   :  { %v802_v39 = vadd.f32 %v801_v31, %v739_v13  ;;  %v669_v33 = vadd.f32 %v2556_v45, %v668_v5  ;;  %v744_v13 = vmul.f32 %v2587_v1, %v2587_v1 }
 0x13f   :  { %v670_v18 = vadd.f32 %v669_v33, %v2580_v60  ;;  %v803_v27 = vadd.f32 %v802_v39, %v740_v53  ;;  %v745_v53 = vmul.f32 %v2608_v16, %v2608_v16 }
 0x141   :  { %v804_v25 = vadd.f32 %v803_v27, %v741_v4  ;;  %v671_v10 = vadd.f32 %v670_v18, %v2591_v3  ;;  %v746_v27 = vmul.f32 %v2619_v23, %v2619_v23 }
 0x143   :  { %v672_v7 = vadd.f32 %v2576_v58, %v671_v10  ;;  %v805_v29 = vadd.f32 %v804_v25, %v742_v57  ;;  %v747_v25 = vmul.f32 %v2604_v14, %v2604_v14 }
 0x145   :  { %v806_v5 = vadd.f32 %v805_v29, %v743_v48  ;;  %v673_v31 = vadd.f32 %v2587_v1, %v672_v7  ;;  %v748_v48 = vmul.f32 %v2615_v21, %v2615_v21 }
 0x147   :  { %v674_v39 = vadd.f32 %v673_v31, %v2608_v16  ;;  %v807_v33 = vadd.f32 %v806_v5, %v744_v13  ;;  %v749_v13 = vmul.f32 %v2636_v36, %v2636_v36 }
 0x149   :  { %v808_v4 = vadd.f32 %v807_v33, %v745_v53  ;;  %v675_v18 = vadd.f32 %v674_v39, %v2619_v23  ;;  %v750_v33 = vmul.f32 %v2647_v51, %v2647_v51 }
 0x14b   :  { %v676_v10 = vadd.f32 %v2604_v14, %v675_v18  ;;  %v809_v57 = vadd.f32 %v808_v4, %v746_v27  ;;  %v751_v4 = vmul.f32 %v2632_v34, %v2632_v34 }
 0x14d   :  { %v810_v7 = vadd.f32 %v809_v57, %v747_v25  ;;  %v677_v29 = vadd.f32 %v2615_v21, %v676_v10  ;;  %v752_v25 = vmul.f32 %v2643_v49, %v2643_v49 }
 0x14f   :  { %v678_v5 = vadd.f32 %v677_v29, %v2636_v36  ;;  %v811_v31 = vadd.f32 %v810_v7, %v748_v48  ;;  %v753_v48 = vmul.f32 %v2664_v8, %v2664_v8 }
 0x151   :  { %v812_v53 = vadd.f32 %v811_v31, %v749_v13  ;;  %v679_v39 = vadd.f32 %v678_v5, %v2647_v51  ;;  %v754_v31 = vmul.f32 %v2675_v19, %v2675_v19 }
 0x153   :  { %v680_v18 = vadd.f32 %v2632_v34, %v679_v39  ;;  %v813_v27 = vadd.f32 %v812_v53, %v750_v33  ;;  %v755_v53 = vmul.f32 %v2660_v6, %v2660_v6 }
 0x155   :  { %v814_v10 = vadd.f32 %v813_v27, %v751_v4  ;;  %v681_v57 = vadd.f32 %v2643_v49, %v680_v18  ;;  %v756_v4 = vmul.f32 %v2671_v17, %v2671_v17 }
 0x157   :  { %v682_v7 = vadd.f32 %v681_v57, %v2664_v8  ;;  %v815_v29 = vadd.f32 %v814_v10, %v752_v25  ;;  %v757_v25 = vmul.f32 %v2692_v52, %v2692_v52 }
 0x159   :  { %v816_v13 = vadd.f32 %v815_v29, %v753_v48  ;;  %v683_v5 = vadd.f32 %v682_v7, %v2675_v19  ;;  %v758_v29 = vmul.f32 %v2703_v63, %v2703_v63 }
 0x15b   :  { %v684_v39 = vadd.f32 %v2660_v6, %v683_v5  ;;  %v817_v33 = vadd.f32 %v816_v13, %v754_v31  ;;  %v759_v13 = vmul.f32 %v2688_v38, %v2688_v38 }
 0x15d   :  { %v818_v18 = vadd.f32 %v817_v33, %v755_v53  ;;  %v685_v27 = vadd.f32 %v2671_v17, %v684_v39  ;;  %v760_v53 = vmul.f32 %v2699_v61, %v2699_v61 }
 0x15f   :  { %v686_v10 = vadd.f32 %v685_v27, %v2692_v52  ;;  %v819_v57 = vadd.f32 %v818_v18, %v756_v4  ;;  %v761_v4 = vmul.f32 %v2720_v37, %v2720_v37 }
 0x161   :  { %v820_v48 = vadd.f32 %v819_v57, %v757_v25  ;;  %v687_v7 = vadd.f32 %v686_v10, %v2703_v63  ;;  %v762_v57 = vmul.f32 %v2731_v11, %v2731_v11 }
 0x163   :  { %v688_v5 = vadd.f32 %v2688_v38, %v687_v7  ;;  %v821_v31 = vadd.f32 %v820_v48, %v758_v29  ;;  %v763_v48 = vmul.f32 %v2716_v30, %v2716_v30 }
 0x165   :  { %v822_v39 = vadd.f32 %v821_v31, %v759_v13  ;;  %v689_v33 = vadd.f32 %v2699_v61, %v688_v5  ;;  %v764_v13 = vmul.f32 %v2727_v9, %v2727_v9 }
 0x167   :  { %v690_v18 = vadd.f32 %v689_v33, %v2720_v37  ;;  %v823_v27 = vadd.f32 %v822_v39, %v760_v53  ;;  %v765_v53 = vmul.f32 %v2748_v55, %v2748_v55 }
 0x169   :  { %v824_v25 = vadd.f32 %v823_v27, %v761_v4  ;;  %v691_v10 = vadd.f32 %v690_v18, %v2731_v11  ;;  %v766_v27 = vmul.f32 %v2759_v26, %v2759_v26 }
 0x16b   :  { %v692_v7 = vadd.f32 %v2716_v30, %v691_v10  ;;  %v825_v29 = vadd.f32 %v824_v25, %v762_v57  ;;  %v767_v25 = vmul.f32 %v2744_v54, %v2744_v54 }
 0x16d   :  { %v826_v5 = vadd.f32 %v825_v29, %v763_v48  ;;  %v693_v31 = vadd.f32 %v2727_v9, %v692_v7  ;;  %v768_v48 = vmul.f32 %v2755_v28, %v2755_v28 }
 0x16f   :  { %v694_v39 = vadd.f32 %v693_v31, %v2748_v55  ;;  %v827_v33 = vadd.f32 %v826_v5, %v764_v13 }
 0x171   :  { %v828_v4 = vadd.f32 %v827_v33, %v765_v53  ;;  %v695_v18 = vadd.f32 %v694_v39, %v2759_v26 }
 0x173   :  { %v696_v10 = vadd.f32 %v2744_v54, %v695_v18  ;;  %v829_v57 = vadd.f32 %v828_v4, %v766_v27  ;;  %v848_v27 = vlaneseq }
 0x175   :  { %v697_v7 = vadd.f32 %v2755_v28, %v696_v10  ;;  %v830_v29 = vadd.f32 %v829_v57, %v767_v25  ;;  %v2870_v57 = vshrl.u32 %v848_v27, 7  ;;  %v2986_v27 = vld [vmem:[%s4627_s4 + $0x88] sm:$0xff]  }
 0x176   :  { %4790 = vst [vmem:[#allocation41_spill] sm:$0xff] %v2986_v27 }
 0x177   :  { %v698_v31 = vrot.slane %v697_v7, 4  ;;  %v831_v13 = vadd.f32 %v830_v29, %v768_v48  ;;  %v3014_v29 = vld [vmem:[%s4627_s4 + $0xa8] sm:$0xff]  }
 0x178   :  { %4794 = vst [vmem:[#allocation45_spill] sm:$0xff] %v3014_v29  ;;  %v4805_v29 = vld [vmem:[#allocation6_spill] sm:$0xff] }
 0x179   :  { %v699_v5 = vadd.f32 %v698_v31, %v697_v7  ;;  %v832_v53 = vrot.slane %v831_v13, 4  ;;  %v2875_v7 = vld [vmem:[%s4627_s4] sm:$0xff]   ;;  %v2903_v31 = vld [vmem:[%s4627_s4 + $0x28] sm:$0xff]  }
 0x17a   :  { %4773 = vst [vmem:[#allocation24_spill] sm:$0xff] %v2875_v7  ;;  %4778 = vst [vmem:[#allocation29_spill] sm:$0xff] %v2903_v31  ;;  %v4817_v7 = vld [vmem:[#allocation15_spill] sm:$0xff] }
 0x17b   :  { %v700_v39 = vrot.slane %v699_v5, 2  ;;  %v833_v33 = vadd.f32 %v832_v53, %v831_v13  ;;  %v2908_v13 = vld [vmem:[%s4627_s4 + $0x30] sm:$0xff]   ;;  %v3000_v53 = vld [vmem:[%s4627_s4 + $0x98] sm:$0xff]  }
 0x17c   :  { %4779 = vst [vmem:[#allocation30_spill] sm:$0xff] %v2908_v13  ;;  %4792 = vst [vmem:[#allocation43_spill] sm:$0xff] %v3000_v53  ;;  %v3040_v13 = vld [vmem:[%s4627_s4 + $0xc0] sm:$0xff]  }
 0x17d   :  { %v701_v55 = vadd.f32 %v700_v39, %v699_v5  ;;  %v834_v26 = vrot.slane %v833_v33, 2  ;;  %v2935_v39 = vld [vmem:[%s4627_s4 + $0x50] sm:$0xff]   ;;  %v2949_v5 = vld [vmem:[%s4627_s4 + $0x60] sm:$0xff]   ;;  %4797 = vst [vmem:[#allocation48_spill] sm:$0xff] %v3040_v13  ;;  %v4814_v13 = vld [vmem:[#allocation13_spill] sm:$0xff] }
 0x17e   :  { %4783 = vst [vmem:[#allocation34_spill] sm:$0xff] %v2935_v39  ;;  %4785 = vst [vmem:[#allocation36_spill] sm:$0xff] %v2949_v5  ;;  %v633_v39 = vld [vmem:[%s4628_s2] sm:$0x1]  ;;  %v3062_v5 = vld [vmem:[%s4627_s4 + $0xd8] sm:$0xff]  }
 0x17f   :  { %v702_v9 = vrot.slane %v701_v55, 1  ;;  %v835_v30 = vadd.f32 %v834_v26, %v833_v33  ;;  %v2916_v33 = vld [vmem:[%s4627_s4 + $0x38] sm:$0xff]   ;;  %v2963_v26 = vld [vmem:[%s4627_s4 + $0x70] sm:$0xff]   ;;  %4800 = vst [vmem:[#allocation51_spill] sm:$0xff] %v3062_v5  ;;  %v4809_v5 = vld [vmem:[#allocation10_spill] sm:$0xff] }
 0x180   :  { %4780 = vst [vmem:[#allocation31_spill] sm:$0xff] %v2916_v33  ;;  %4787 = vst [vmem:[#allocation38_spill] sm:$0xff] %v2963_v26  ;;  %v2977_v33 = vld [vmem:[%s4627_s4 + $0x80] sm:$0xff]   ;;  %v3031_v26 = vld [vmem:[%s4627_s4 + $0xb8] sm:$0xff]  }
 0x181   :  { %v703_v11 = vadd.f32 %v702_v9, %v701_v55  ;;  %v836_v37 = vrot.slane %v835_v30, 1  ;;  %v2880_v9 = vld [vmem:[%s4627_s4 + $0x8] sm:$0xff]   ;;  %4789 = vst [vmem:[#allocation40_spill] sm:$0xff] %v2977_v33  ;;  %4796 = vst [vmem:[#allocation47_spill] sm:$0xff] %v3031_v26 }
 0x182   :  { %4774 = vst [vmem:[#allocation25_spill] sm:$0xff] %v2880_v9  ;;  %v4816_v9 = vld [vmem:[#allocation11_spill] sm:$0xff] }
 0x183   :  { %v2866_v18 = vmul.f32 0.001953125, %v703_v11  ;;  %v837_v4 = vadd.f32 %v836_v37, %v835_v30  ;;  %v2885_v30 = vld [vmem:[%s4627_s4 + $0x10] sm:$0xff]   ;;  %v2890_v11 = vld [vmem:[%s4627_s4 + $0x18] sm:$0xff]  }
 0x184   :  { %4775 = vst [vmem:[#allocation26_spill] sm:$0xff] %v2885_v30  ;;  %4776 = vst [vmem:[#allocation27_spill] sm:$0xff] %v2890_v11  ;;  %v3054_v11 = vld [vmem:[%s4627_s4 + $0xd0] sm:$0xff]   ;;  %v4815_v30 = vld [vmem:[#allocation17_spill] sm:$0xff] }
 0x185   :  { %v838_v54 = vmul.f32 0.001953125, %v837_v4  ;;  %v839_v25 = vmul.f32 %v2866_v18, %v2866_v18  ;;  %v2921_v4 = vld [vmem:[%s4627_s4 + $0x40] sm:$0xff]   ;;  %4799 = vst [vmem:[#allocation50_spill] sm:$0xff] %v3054_v11  ;;  %v4810_v11 = vld [vmem:[#allocation7_spill] sm:$0xff] }
 0x186   :  { %4781 = vst [vmem:[#allocation32_spill] sm:$0xff] %v2921_v4  ;;  %v4802_v4 = vsub.s32 0, %v2870_v57 }
 0x187   :  { %v840_v10 = vsub.f32 %v838_v54, %v839_v25  ;;  %v2895_v54 = vld [vmem:[%s4627_s4 + $0x20] sm:$0xff]   ;;  %v2972_v25 = vld [vmem:[%s4627_s4 + $0x78] sm:$0xff]  }
 0x188   :  { %4777 = vst [vmem:[#allocation28_spill] sm:$0xff] %v2895_v54  ;;  %4788 = vst [vmem:[#allocation39_spill] sm:$0xff] %v2972_v25  ;;  %v3045_v25 = vld [vmem:[%s4627_s4 + $0xc8] sm:$0xff]   ;;  %v3067_v54 = vld [vmem:[%s4627_s4 + $0xe0] sm:$0xff]  }
 0x189   :  { %v841_v48 = vmax.f32 %v840_v10, 0.0  ;;  %v2958_v10 = vld [vmem:[%s4627_s4 + $0x68] sm:$0xff]   ;;  %4798 = vst [vmem:[#allocation49_spill] sm:$0xff] %v3045_v25  ;;  %4801 = vst [vmem:[#allocation52_spill] sm:$0xff] %v3067_v54  ;;  %v4808_v54 = vld [vmem:[#allocation8_spill] sm:$0xff] }
 0x18a   :  { %4786 = vst [vmem:[#allocation37_spill] sm:$0xff] %v2958_v10  ;;  %v3019_v10 = vld [vmem:[%s4627_s4 + $0xb0] sm:$0xff]   ;;  %v4812_v25 = vld [vmem:[#allocation9_spill] sm:$0xff] }
 0x18b   :  { %v842_v37 = vadd.f32 1e-05, %v841_v48  ;;  %v2944_v48 = vld [vmem:[%s4627_s4 + $0x58] sm:$0xff]   ;;  %4795 = vst [vmem:[#allocation46_spill] sm:$0xff] %v3019_v10  ;;  %v4806_v10 = vld [vmem:[#allocation3_spill] sm:$0xff] }
 0x18c   :  { %4784 = vst [vmem:[#allocation35_spill] sm:$0xff] %v2944_v48  ;;  %v3005_v48 = vld [vmem:[%s4627_s4 + $0xa0] sm:$0xff]  }
 0x18d   :  { %2389 = vrsqrt.f32 %v842_v37  ;;  %v2930_v37 = vld [vmem:[%s4627_s4 + $0x48] sm:$0xff]   ;;  %4793 = vst [vmem:[#allocation44_spill] sm:$0xff] %v3005_v48  ;;  %v4804_v48 = vld [vmem:[#allocation4_spill] sm:$0xff] }
 0x18e   :  { %4782 = vst [vmem:[#allocation33_spill] sm:$0xff] %v2930_v37  ;;  %v2991_v37 = vld [vmem:[%s4627_s4 + $0x90] sm:$0xff]  }
 0x18f   :  { %4791 = vst [vmem:[#allocation42_spill] sm:$0xff] %v2991_v37 }
 0x197   :  { %v2390_v55 = vpop.eup %2389 }
 0x198   :  { %v844_v53 = vmul.f32 %v2390_v55, %v633_v39  ;;  %v3072_v55 = vld [vmem:[%s4629_s3] sm:$0x1] }
 0x199   :  { %v4803_v39 = vld [vmem:[#allocation2_spill] sm:$0xff] }
 0x19a   :  { %v3079_v31 = vmul.f32 %v844_v53, %v2866_v18  ;;  %v3083_v26 = vrot.slane %v844_v53, %v4802_v4  ;;  %v4807_v18 = vld [vmem:[#allocation5_spill] sm:$0xff] }
 0x19c   :  { %v3095_v37 = vmul.f32 %v3083_v26, %v2550_v42  ;;  %v3099_v53 = vmul.f32 %v3083_v26, %v2558_v46  ;;  %v3103_v4 = vmul.f32 %v2546_v40, %v3083_v26  ;;  %v3107_v27 = vmul.f32 %v2554_v44, %v3083_v26 }
 0x19d   :  { %v3111_v33 = vmul.f32 %v3083_v26, %v2578_v59  ;;  %v3115_v42 = vmul.f32 %v3083_v26, %v2589_v2  ;;  %v3119_v46 = vmul.f32 %v2573_v56, %v3083_v26  ;;  %v3123_v40 = vmul.f32 %v2585_v0, %v3083_v26 }
 0x19e   :  { %v3127_v44 = vmul.f32 %v3083_v26, %v2606_v15  ;;  %v3131_v59 = vmul.f32 %v3083_v26, %v2617_v22  ;;  %v3135_v2 = vmul.f32 %v2601_v12, %v3083_v26  ;;  %v3139_v56 = vmul.f32 %v2613_v20, %v3083_v26 }
 0x19f   :  { %v3143_v0 = vmul.f32 %v3083_v26, %v2634_v35  ;;  %v3147_v15 = vmul.f32 %v3083_v26, %v2645_v50  ;;  %v3151_v22 = vmul.f32 %v2629_v32, %v3083_v26  ;;  %v3155_v12 = vmul.f32 %v4803_v39, %v3083_v26 }
 0x1a0   :  { %v3159_v20 = vmul.f32 %v3083_v26, %v4804_v48  ;;  %v3163_v35 = vmul.f32 %v3083_v26, %v4805_v29  ;;  %v3167_v50 = vmul.f32 %v4806_v10, %v3083_v26  ;;  %v3171_v32 = vmul.f32 %v4807_v18, %v3083_v26 }
 0x1a1   :  { %v3175_v39 = vmul.f32 %v3083_v26, %v4808_v54  ;;  %v3179_v48 = vmul.f32 %v3083_v26, %v4809_v5  ;;  %v3183_v29 = vmul.f32 %v4810_v11, %v3083_v26  ;;  %v3187_v10 = vmul.f32 %v4812_v25, %v3083_v26 }
 0x1a2   :  { %v3191_v18 = vmul.f32 %v3083_v26, %v4814_v13  ;;  %v3195_v54 = vmul.f32 %v3083_v26, %v4815_v30  ;;  %v3199_v5 = vmul.f32 %v4816_v9, %v3083_v26  ;;  %v3203_v11 = vmul.f32 %v4817_v7, %v3083_v26 }
 0x1a3   :  { %4811 = vst [vmem:[#allocation2_spill] sm:$0xff] %v3183_v29  ;;  %4813 = vst [vmem:[#allocation4_spill] sm:$0xff] %v3187_v10  ;;  %v4818_v29 = vld [vmem:[#allocation20_spill] sm:$0xff]  ;;  %v4819_v10 = vld [vmem:[#allocation22_spill] sm:$0xff]  ;;  %v3215_v30 = vmul.f32 %v2741_v62, %v3083_v26  ;;  %v3219_v9 = vmul.f32 %v2753_v24, %v3083_v26  ;;  %v3223_v7 = vmul.f32 %v3083_v26, %v2552_v43 }
 0x1a4   :  { %v3207_v25 = vmul.f32 %v3083_v26, %v4818_v29  ;;  %v3211_v13 = vmul.f32 %v3083_v26, %v4819_v10  ;;  %v3227_v29 = vmul.f32 %v3083_v26, %v2560_v47  ;;  %v3231_v10 = vmul.f32 %v2548_v41, %v3083_v26 }
 0x1a5   :  { %v3235_v62 = vmul.f32 %v2556_v45, %v3083_v26  ;;  %v3239_v24 = vmul.f32 %v3083_v26, %v2580_v60  ;;  %v3243_v43 = vmul.f32 %v3083_v26, %v2591_v3  ;;  %v3247_v47 = vmul.f32 %v2576_v58, %v3083_v26 }
 0x1a6   :  { %v3251_v41 = vmul.f32 %v2587_v1, %v3083_v26  ;;  %v3255_v45 = vmul.f32 %v3083_v26, %v2608_v16  ;;  %v3259_v60 = vmul.f32 %v3083_v26, %v2619_v23  ;;  %v3263_v3 = vmul.f32 %v2604_v14, %v3083_v26 }
 0x1a7   :  { %v3267_v58 = vmul.f32 %v2615_v21, %v3083_v26  ;;  %v3271_v1 = vmul.f32 %v3083_v26, %v2636_v36  ;;  %v3275_v16 = vmul.f32 %v3083_v26, %v2647_v51  ;;  %v3279_v23 = vmul.f32 %v2632_v34, %v3083_v26 }
 0x1a8   :  { %v3283_v14 = vmul.f32 %v2643_v49, %v3083_v26  ;;  %v3287_v21 = vmul.f32 %v3083_v26, %v2664_v8  ;;  %v3291_v36 = vmul.f32 %v3083_v26, %v2675_v19  ;;  %v3295_v51 = vmul.f32 %v2660_v6, %v3083_v26  ;;  %v3316_v6 = vld [vmem:[%s4627_s4 + $0xe8] sm:$0xff]  }
 0x1a9   :  { %v3299_v34 = vmul.f32 %v2671_v17, %v3083_v26  ;;  %v3303_v49 = vmul.f32 %v3083_v26, %v2692_v52  ;;  %v3307_v8 = vmul.f32 %v3083_v26, %v2703_v63  ;;  %v3311_v19 = vmul.f32 %v2688_v38, %v3083_v26  ;;  %4827 = vst [vmem:[#allocation13_spill] sm:$0xff] %v3316_v6  ;;  %v4833_v38 = vld [vmem:[#allocation12_spill] sm:$0xff] }
 0x1aa   :  { %4820 = vst [vmem:[#allocation6_spill] sm:$0xff] %v3287_v21  ;;  %4821 = vst [vmem:[#allocation3_spill] sm:$0xff] %v3291_v36  ;;  %v3320_v17 = vmul.f32 %v2699_v61, %v3083_v26  ;;  %v3342_v61 = vld [vmem:[%s4627_s4 + $0xf8] sm:$0xff]   ;;  %v3362_v36 = vmul.f32 %v2755_v28, %v3083_v26  ;;  %v4844_v21 = vsub.s32 0, %v2870_v57  ;;  %v4847_v28 = vld [vmem:[#allocation4_spill] sm:$0xff] }
 0x1ab   :  { %4822 = vst [vmem:[#allocation5_spill] sm:$0xff] %v3295_v51  ;;  %4823 = vst [vmem:[#allocation8_spill] sm:$0xff] %v3299_v34  ;;  %v4829_v34 = vld [vmem:[#allocation14_spill] sm:$0xff] }
 0x1ac   :  { %4824 = vst [vmem:[#allocation10_spill] sm:$0xff] %v3303_v49  ;;  %4825 = vst [vmem:[#allocation7_spill] sm:$0xff] %v3307_v8  ;;  %v3324_v52 = vmul.f32 %v3083_v26, %v4829_v34  ;;  %v4831_v49 = vld [vmem:[#allocation18_spill] sm:$0xff]  ;;  %v3337_v8 = vld [vmem:[%s4627_s4 + $0xf0] sm:$0xff]  }
 0x1ad   :  { %4826 = vst [vmem:[#allocation9_spill] sm:$0xff] %v3311_v19  ;;  %4828 = vst [vmem:[#allocation17_spill] sm:$0xff] %v3320_v17  ;;  %v3328_v63 = vmul.f32 %v3083_v26, %v4831_v49  ;;  %v3332_v19 = vmul.f32 %v4833_v38, %v3083_v26  ;;  %v4837_v34 = vld [vmem:[#allocation16_spill] sm:$0xff]  ;;  %v4839_v49 = vld [vmem:[#allocation21_spill] sm:$0xff] }
 0x1ae   :  { %4830 = vst [vmem:[#allocation11_spill] sm:$0xff] %v3324_v52  ;;  %4835 = vst [vmem:[#allocation22_spill] sm:$0xff] %v3337_v8  ;;  %v3346_v52 = vmul.f32 %v4837_v34, %v3083_v26  ;;  %v4840_v38 = vld [vmem:[#allocation23_spill] sm:$0xff]  ;;  %v4845_v34 = vsub.f32 %v3072_v55, %v3079_v31 }
 0x1af   :  { %4832 = vst [vmem:[#allocation15_spill] sm:$0xff] %v3328_v63  ;;  %4834 = vst [vmem:[#allocation20_spill] sm:$0xff] %v3332_v19  ;;  %v3350_v63 = vmul.f32 %v3083_v26, %v4839_v49  ;;  %v3354_v19 = vmul.f32 %v3083_v26, %v4840_v38  ;;  %v4842_v17 = vld [vmem:[#allocation19_spill] sm:$0xff] }
 0x1b0   :  { %4836 = vst [vmem:[#allocation14_spill] sm:$0xff] %v3342_v61  ;;  %4838 = vst [vmem:[#allocation18_spill] sm:$0xff] %v3346_v52  ;;  %v3358_v51 = vmul.f32 %v4842_v17, %v3083_v26  ;;  %v3369_v52 = vrot.slane %v4845_v34, %v4844_v21  ;;  %v4846_v34 = vld [vmem:[#allocation2_spill] sm:$0xff] }
 0x1b1   :  { %4841 = vst [vmem:[#allocation12_spill] sm:$0xff] %v3354_v19  ;;  %v4849_v17 = vld [vmem:[#allocation3_spill] sm:$0xff] }
 0x1b2   :  { %4843 = vst [vmem:[#allocation16_spill] sm:$0xff] %v3358_v51  ;;  %v3379_v57 = vadd.f32 %v3369_v52, %v3095_v37  ;;  %v3383_v26 = vadd.f32 %v3369_v52, %v3099_v53  ;;  %v3387_v31 = vadd.f32 %v3369_v52, %v3103_v4  ;;  %v3391_v55 = vadd.f32 %v3369_v52, %v3107_v27  ;;  %v4848_v51 = vld [vmem:[#allocation6_spill] sm:$0xff]  ;;  %v4850_v19 = vld [vmem:[#allocation5_spill] sm:$0xff]  ;;  %v4852_v38 = vld [vmem:[#allocation8_spill] sm:$0xff] }
 0x1b3   :  { %v3395_v21 = vadd.f32 %v3369_v52, %v3111_v33  ;;  %v3399_v37 = vadd.f32 %v3369_v52, %v3115_v42  ;;  %v3403_v53 = vadd.f32 %v3369_v52, %v3119_v46  ;;  %v3407_v4 = vadd.f32 %v3369_v52, %v3123_v40  ;;  %v4854_v49 = vld [vmem:[#allocation10_spill] sm:$0xff]  ;;  %v4856_v61 = vld [vmem:[#allocation7_spill] sm:$0xff] }
 0x1b4   :  { %v3411_v27 = vadd.f32 %v3369_v52, %v3127_v44  ;;  %v3415_v33 = vadd.f32 %v3369_v52, %v3131_v59  ;;  %v3419_v42 = vadd.f32 %v3369_v52, %v3135_v2  ;;  %v3423_v46 = vadd.f32 %v3369_v52, %v3139_v56  ;;  %v4858_v8 = vld [vmem:[#allocation9_spill] sm:$0xff] }
 0x1b5   :  { %v3427_v40 = vadd.f32 %v3369_v52, %v3143_v0  ;;  %v3431_v44 = vadd.f32 %v3369_v52, %v3147_v15  ;;  %v3435_v59 = vadd.f32 %v3369_v52, %v3151_v22  ;;  %v3439_v2 = vadd.f32 %v3369_v52, %v3155_v12  ;;  %v4859_v6 = vld [vmem:[#allocation17_spill] sm:$0xff] }
 0x1b6   :  { %v3443_v56 = vadd.f32 %v3369_v52, %v3159_v20  ;;  %v3447_v0 = vadd.f32 %v3369_v52, %v3163_v35  ;;  %v3451_v15 = vadd.f32 %v3369_v52, %v3167_v50  ;;  %v3455_v22 = vadd.f32 %v3369_v52, %v3171_v32 }
 0x1b7   :  { %v3459_v12 = vadd.f32 %v3369_v52, %v3175_v39  ;;  %v3463_v20 = vadd.f32 %v3369_v52, %v3179_v48  ;;  %v3467_v35 = vadd.f32 %v3369_v52, %v4846_v34  ;;  %v3471_v50 = vadd.f32 %v3369_v52, %v4847_v28 }
 0x1b8   :  { %v3475_v32 = vadd.f32 %v3369_v52, %v3191_v18  ;;  %v3479_v39 = vadd.f32 %v3369_v52, %v3195_v54  ;;  %v3483_v48 = vadd.f32 %v3369_v52, %v3199_v5  ;;  %v3487_v34 = vadd.f32 %v3369_v52, %v3203_v11 }
 0x1b9   :  { %v3491_v28 = vadd.f32 %v3369_v52, %v3207_v25  ;;  %v3495_v18 = vadd.f32 %v3369_v52, %v3211_v13  ;;  %v3499_v54 = vadd.f32 %v3369_v52, %v3215_v30  ;;  %v3503_v5 = vadd.f32 %v3369_v52, %v3219_v9 }
 0x1ba   :  { %v3507_v11 = vadd.f32 %v3369_v52, %v3223_v7  ;;  %v3511_v25 = vadd.f32 %v3369_v52, %v3227_v29  ;;  %v3515_v13 = vadd.f32 %v3369_v52, %v3231_v10  ;;  %v3519_v30 = vadd.f32 %v3369_v52, %v3235_v62 }
 0x1bb   :  { %v3523_v9 = vadd.f32 %v3369_v52, %v3239_v24  ;;  %v3527_v7 = vadd.f32 %v3369_v52, %v3243_v43  ;;  %v3531_v29 = vadd.f32 %v3369_v52, %v3247_v47  ;;  %v3535_v10 = vadd.f32 %v3369_v52, %v3251_v41 }
 0x1bc   :  { %v3539_v62 = vadd.f32 %v3369_v52, %v3255_v45  ;;  %v3543_v24 = vadd.f32 %v3369_v52, %v3259_v60  ;;  %v3547_v43 = vadd.f32 %v3369_v52, %v3263_v3  ;;  %v3551_v47 = vadd.f32 %v3369_v52, %v3267_v58 }
 0x1bd   :  { %v3555_v41 = vadd.f32 %v3369_v52, %v3271_v1  ;;  %v3559_v45 = vadd.f32 %v3369_v52, %v3275_v16  ;;  %v3563_v60 = vadd.f32 %v3369_v52, %v3279_v23  ;;  %v3567_v3 = vadd.f32 %v3369_v52, %v3283_v14 }
 0x1be   :  { %v3571_v58 = vadd.f32 %v3369_v52, %v4848_v51  ;;  %v3575_v1 = vadd.f32 %v3369_v52, %v4849_v17  ;;  %v3579_v16 = vadd.f32 %v3369_v52, %v4850_v19  ;;  %v3583_v23 = vadd.f32 %v3369_v52, %v4852_v38 }
 0x1bf   :  { %v3587_v14 = vadd.f32 %v3369_v52, %v4854_v49  ;;  %v3591_v51 = vadd.f32 %v3369_v52, %v4856_v61  ;;  %v3595_v17 = vadd.f32 %v3369_v52, %v4858_v8  ;;  %v3599_v19 = vadd.f32 %v3369_v52, %v4859_v6 }
 0x1c0   :  { %4851 = vst [vmem:[#allocation21_spill] sm:$0xff] %v3579_v16  ;;  %4853 = vst [vmem:[#allocation23_spill] sm:$0xff] %v3583_v23  ;;  %v4861_v16 = vld [vmem:[#allocation11_spill] sm:$0xff]  ;;  %v3619_v6 = vadd.f32 %v3369_v52, %v3350_v63 }
 0x1c1   :  { %4855 = vst [vmem:[#allocation19_spill] sm:$0xff] %v3587_v14  ;;  %4857 = vst [vmem:[#allocation2_spill] sm:$0xff] %v3591_v51  ;;  %v3603_v38 = vadd.f32 %v3369_v52, %v4861_v16  ;;  %v4863_v23 = vld [vmem:[#allocation15_spill] sm:$0xff]  ;;  %v4865_v14 = vld [vmem:[#allocation20_spill] sm:$0xff] }
 0x1c2   :  { %4860 = vst [vmem:[#allocation4_spill] sm:$0xff] %v3599_v19  ;;  %v3607_v49 = vadd.f32 %v3369_v52, %v4863_v23  ;;  %v3611_v61 = vadd.f32 %v3369_v52, %v4865_v14  ;;  %v4867_v51 = vld [vmem:[#allocation18_spill] sm:$0xff]  ;;  %4869 = vst [vmem:[#allocation10_spill] sm:$0xff] %v3619_v6  ;;  %v4870_v19 = vld [vmem:[#allocation12_spill] sm:$0xff]  ;;  %v3631_v14 = vadd.f32 %v3369_v52, %v3362_v36 }
 0x1c3   :  { %4862 = vst [vmem:[#allocation6_spill] sm:$0xff] %v3603_v38  ;;  %v3615_v8 = vadd.f32 %v3369_v52, %v4867_v51  ;;  %v3623_v16 = vadd.f32 %v3369_v52, %v4870_v19  ;;  %v4872_v38 = vld [vmem:[#allocation16_spill] sm:$0xff]  ;;  %v4877_v19 = vld [vmem:[#allocation25_spill] sm:$0xff] }
 0x1c4   :  { %4864 = vst [vmem:[#allocation3_spill] sm:$0xff] %v3607_v49  ;;  %4866 = vst [vmem:[#allocation5_spill] sm:$0xff] %v3611_v61  ;;  %v3627_v23 = vadd.f32 %v3369_v52, %v4872_v38  ;;  %v4874_v61 = vld [vmem:[#allocation24_spill] sm:$0xff]  ;;  %v4879_v38 = vunpack.c.h.bf16 %v4877_v19  ;;  %v4880_v52 = vld [vmem:[#allocation26_spill] sm:$0xff] }
 0x1c5   :  { %4868 = vst [vmem:[#allocation8_spill] sm:$0xff] %v3615_v8  ;;  %4871 = vst [vmem:[#allocation7_spill] sm:$0xff] %v3623_v16  ;;  %v4875_v51 = vunpack.c.l.bf16 %v4874_v61  ;;  %v4876_v63 = vunpack.c.h.bf16 %v4874_v61  ;;  %v4878_v16 = vunpack.c.l.bf16 %v4877_v19  ;;  %v4882_v61 = vunpack.c.h.bf16 %v4880_v52  ;;  %v4886_v19 = vld [vmem:[#allocation28_spill] sm:$0xff] }
 0x1c6   :  { %4873 = vst [vmem:[#allocation9_spill] sm:$0xff] %v3631_v14  ;;  %v3651_v36 = vadd.f32 %v4879_v38, %v3391_v55  ;;  %v4881_v14 = vunpack.c.l.bf16 %v4880_v52  ;;  %v4887_v38 = vunpack.c.l.bf16 %v4886_v19  ;;  %v4889_v52 = vld [vmem:[#allocation29_spill] sm:$0xff] }
 0x1c7   :  { %v3636_v8 = vadd.f32 %v4875_v51, %v3379_v57  ;;  %v3641_v6 = vadd.f32 %v4876_v63, %v3383_v26  ;;  %v3646_v49 = vadd.f32 %v4878_v16, %v3387_v31  ;;  %v3661_v26 = vadd.f32 %v4882_v61, %v3399_v37  ;;  %v4883_v51 = vld [vmem:[#allocation27_spill] sm:$0xff] }
 0x1c8   :  { %v3656_v57 = vadd.f32 %v4881_v14, %v3395_v21  ;;  %v4884_v63 = vunpack.c.l.bf16 %v4883_v51  ;;  %v4885_v16 = vunpack.c.h.bf16 %v4883_v51  ;;  %v3676_v21 = vadd.f32 %v4887_v38, %v3411_v27  ;;  %v4895_v38 = vld [vmem:[#allocation31_spill] sm:$0xff] }
 0x1c9   :  { %v4888_v14 = vunpack.c.h.bf16 %v4886_v19  ;;  %v4890_v61 = vunpack.c.l.bf16 %v4889_v52  ;;  %v4891_v51 = vunpack.c.h.bf16 %v4889_v52  ;;  %v4897_v52 = vunpack.c.h.bf16 %v4895_v38 }
 0x1ca   :  { %v3666_v31 = vadd.f32 %v4884_v63, %v3403_v53  ;;  %v3671_v55 = vadd.f32 %v4885_v16, %v3407_v4  ;;  %v4892_v63 = vld [vmem:[#allocation30_spill] sm:$0xff] }
 0x1cb   :  { %v3681_v37 = vadd.f32 %v4888_v14, %v3415_v33  ;;  %v3686_v53 = vadd.f32 %v4890_v61, %v3419_v42  ;;  %v3691_v4 = vadd.f32 %v4891_v51, %v3423_v46  ;;  %v4893_v16 = vunpack.c.l.bf16 %v4892_v63  ;;  %v4898_v61 = vld [vmem:[#allocation32_spill] sm:$0xff] }
 0x1cc   :  { %v4894_v19 = vunpack.c.h.bf16 %v4892_v63  ;;  %v4896_v14 = vunpack.c.l.bf16 %v4895_v38  ;;  %v3711_v46 = vadd.f32 %v4897_v52, %v3439_v2  ;;  %v4899_v51 = vunpack.c.l.bf16 %v4898_v61 }
 0x1cd   :  { %v3696_v27 = vadd.f32 %v4893_v16, %v3427_v40  ;;  %v4900_v63 = vunpack.c.h.bf16 %v4898_v61  ;;  %v4901_v16 = vld [vmem:[#allocation33_spill] sm:$0xff] }
 0x1ce   :  { %v3701_v33 = vadd.f32 %v4894_v19, %v3431_v44  ;;  %v3706_v42 = vadd.f32 %v4896_v14, %v3435_v59  ;;  %v3716_v40 = vadd.f32 %v4899_v51, %v3443_v56  ;;  %v4902_v19 = vunpack.c.l.bf16 %v4901_v16  ;;  %v4904_v14 = vld [vmem:[#allocation34_spill] sm:$0xff]  ;;  %v4907_v51 = vld [vmem:[#allocation35_spill] sm:$0xff] }
 0x1cf   :  { %v3721_v44 = vadd.f32 %v4900_v63, %v3447_v0  ;;  %v4903_v38 = vunpack.c.h.bf16 %v4901_v16  ;;  %v4905_v52 = vunpack.c.l.bf16 %v4904_v14  ;;  %v4906_v61 = vunpack.c.h.bf16 %v4904_v14 }
 0x1d0   :  { %v3726_v59 = vadd.f32 %v4902_v19, %v3451_v15  ;;  %v4908_v63 = vunpack.c.l.bf16 %v4907_v51  ;;  %v4909_v16 = vunpack.c.h.bf16 %v4907_v51  ;;  %v4910_v19 = vld [vmem:[#allocation36_spill] sm:$0xff] }
 0x1d1   :  { %v3731_v2 = vadd.f32 %v4903_v38, %v3455_v22  ;;  %v3736_v56 = vadd.f32 %v4905_v52, %v3459_v12  ;;  %v3741_v0 = vadd.f32 %v4906_v61, %v3463_v20  ;;  %v4911_v38 = vunpack.c.l.bf16 %v4910_v19  ;;  %v4913_v52 = vld [vmem:[#allocation37_spill] sm:$0xff] }
 0x1d2   :  { %v3746_v15 = vadd.f32 %v4908_v63, %v3467_v35  ;;  %v3751_v22 = vadd.f32 %v4909_v16, %v3471_v50  ;;  %v4912_v14 = vunpack.c.h.bf16 %v4910_v19  ;;  %v4914_v61 = vunpack.c.l.bf16 %v4913_v52  ;;  %v4916_v63 = vld [vmem:[#allocation38_spill] sm:$0xff] }
 0x1d3   :  { %v3756_v12 = vadd.f32 %v4911_v38, %v3475_v32  ;;  %v4915_v51 = vunpack.c.h.bf16 %v4913_v52  ;;  %v4917_v16 = vunpack.c.l.bf16 %v4916_v63  ;;  %v4918_v19 = vunpack.c.h.bf16 %v4916_v63  ;;  %v4919_v38 = vld [vmem:[#allocation39_spill] sm:$0xff] }
 0x1d4   :  { %v3761_v20 = vadd.f32 %v4912_v14, %v3479_v39  ;;  %v3766_v35 = vadd.f32 %v4914_v61, %v3483_v48  ;;  %v4920_v14 = vunpack.c.l.bf16 %v4919_v38  ;;  %v4921_v52 = vunpack.c.h.bf16 %v4919_v38  ;;  %v4923_v61 = vld [vmem:[#allocation40_spill] sm:$0xff] }
 0x1d5   :  { %v3771_v50 = vadd.f32 %v4915_v51, %v3487_v34  ;;  %v3776_v32 = vadd.f32 %v4917_v16, %v3491_v28  ;;  %v3781_v39 = vadd.f32 %v4918_v19, %v3495_v18  ;;  %v4924_v51 = vunpack.c.l.bf16 %v4923_v61  ;;  %v4928_v16 = vld [vmem:[#allocation41_spill] sm:$0xff] }
 0x1d6   :  { %v3786_v48 = vadd.f32 %v4920_v14, %v3499_v54  ;;  %v3791_v34 = vadd.f32 %v4921_v52, %v3503_v5  ;;  %v4926_v63 = vunpack.c.h.bf16 %v4923_v61  ;;  %v4929_v19 = vunpack.c.l.bf16 %v4928_v16  ;;  %v4933_v14 = vld [vmem:[#allocation42_spill] sm:$0xff] }
 0x1d7   :  { %v3796_v28 = vadd.f32 %v4924_v51, %v3507_v11  ;;  %v4931_v38 = vunpack.c.h.bf16 %v4928_v16  ;;  %v4934_v52 = vunpack.c.l.bf16 %v4933_v14  ;;  %v4936_v61 = vunpack.c.h.bf16 %v4933_v14  ;;  %v4938_v51 = vld [vmem:[#allocation43_spill] sm:$0xff] }
 0x1d8   :  { %4922 = vst [vmem:[#allocation17_spill] sm:$0xff] %v3791_v34  ;;  %v3801_v18 = vadd.f32 %v4926_v63, %v3511_v25  ;;  %v3806_v54 = vadd.f32 %v4929_v19, %v3515_v13  ;;  %v4939_v63 = vunpack.c.l.bf16 %v4938_v51  ;;  %v4941_v16 = vunpack.c.h.bf16 %v4938_v51  ;;  %v4943_v19 = vld [vmem:[#allocation44_spill] sm:$0xff]  ;;  %v1267_v34 = vld [vmem:[%s4630_s5 + $0xc0] sm:$0xff] }
 0x1d9   :  { %4925 = vst [vmem:[#allocation11_spill] sm:$0xff] %v3796_v28  ;;  %v3811_v5 = vadd.f32 %v4931_v38, %v3519_v30  ;;  %v3816_v11 = vadd.f32 %v4934_v52, %v3523_v9  ;;  %v3821_v25 = vadd.f32 %v4936_v61, %v3527_v7  ;;  %v4944_v38 = vunpack.c.l.bf16 %v4943_v19  ;;  %v4948_v52 = vld [vmem:[#allocation45_spill] sm:$0xff] }
 0x1da   :  { %4927 = vst [vmem:[#allocation15_spill] sm:$0xff] %v3801_v18  ;;  %4930 = vst [vmem:[#allocation20_spill] sm:$0xff] %v3806_v54  ;;  %v3826_v13 = vadd.f32 %v4939_v63, %v3531_v29  ;;  %v3831_v30 = vadd.f32 %v4941_v16, %v3535_v10  ;;  %v4946_v14 = vunpack.c.h.bf16 %v4943_v19  ;;  %v4949_v61 = vunpack.c.l.bf16 %v4948_v52  ;;  %v4953_v63 = vld [vmem:[#allocation46_spill] sm:$0xff] }
 0x1db   :  { %4932 = vst [vmem:[#allocation18_spill] sm:$0xff] %v3811_v5  ;;  %4935 = vst [vmem:[#allocation12_spill] sm:$0xff] %v3816_v11  ;;  %v3836_v9 = vadd.f32 %v4944_v38, %v3539_v62  ;;  %v4951_v51 = vunpack.c.h.bf16 %v4948_v52  ;;  %v4954_v16 = vunpack.c.l.bf16 %v4953_v63  ;;  %v4956_v19 = vunpack.c.h.bf16 %v4953_v63  ;;  %v4958_v38 = vld [vmem:[#allocation47_spill] sm:$0xff]  ;;  %v1247_v5 = vld [vmem:[%s4630_s5 + $0x20] sm:$0xff] }
 0x1dc   :  { %4937 = vst [vmem:[#allocation16_spill] sm:$0xff] %v3821_v25  ;;  %4940 = vst [vmem:[#allocation24_spill] sm:$0xff] %v3826_v13  ;;  %v3841_v7 = vadd.f32 %v4946_v14, %v3543_v24  ;;  %v3846_v29 = vadd.f32 %v4949_v61, %v3547_v43  ;;  %v4959_v14 = vunpack.c.l.bf16 %v4958_v38  ;;  %v4961_v52 = vunpack.c.h.bf16 %v4958_v38  ;;  %v4963_v61 = vld [vmem:[#allocation48_spill] sm:$0xff]  ;;  %v1254_v11 = vld [vmem:[%s4630_s5 + $0x58] sm:$0xff] }
 0x1dd   :  { %4942 = vst [vmem:[#allocation25_spill] sm:$0xff] %v3831_v30  ;;  %4945 = vst [vmem:[#allocation26_spill] sm:$0xff] %v3836_v9  ;;  %v3851_v10 = vadd.f32 %v4951_v51, %v3551_v47  ;;  %v3856_v62 = vadd.f32 %v4954_v16, %v3555_v41  ;;  %v3861_v24 = vadd.f32 %v4956_v19, %v3559_v45  ;;  %v4964_v51 = vunpack.c.l.bf16 %v4963_v61  ;;  %v4968_v16 = vld [vmem:[#allocation21_spill] sm:$0xff]  ;;  %v1253_v9 = vld [vmem:[%s4630_s5 + $0x50] sm:$0xff] }
 0x1de   :  { %4947 = vst [vmem:[#allocation27_spill] sm:$0xff] %v3841_v7  ;;  %4950 = vst [vmem:[#allocation28_spill] sm:$0xff] %v3846_v29  ;;  %v3866_v43 = vadd.f32 %v4959_v14, %v3563_v60  ;;  %v3871_v47 = vadd.f32 %v4961_v52, %v3567_v3  ;;  %v4966_v63 = vunpack.c.h.bf16 %v4963_v61  ;;  %v4969_v19 = vld [vmem:[#allocation49_spill] sm:$0xff]  ;;  %v4972_v14 = vld [vmem:[#allocation23_spill] sm:$0xff]  ;;  %v5028_v25 = vmax.f32 %v3646_v49, 0.0 }
 0x1df   :  { %4952 = vst [vmem:[#allocation29_spill] sm:$0xff] %v3851_v10  ;;  %4955 = vst [vmem:[#allocation30_spill] sm:$0xff] %v3856_v62  ;;  %v3876_v41 = vadd.f32 %v4964_v51, %v3571_v58  ;;  %v4973_v38 = vunpack.c.h.bf16 %v4969_v19  ;;  %v4975_v52 = vld [vmem:[#allocation19_spill] sm:$0xff]  ;;  %v4979_v51 = vld [vmem:[#allocation2_spill] sm:$0xff]  ;;  %v5029_v18 = vmax.f32 %v3651_v36, 0.0  ;;  %v5030_v36 = vmax.f32 %v3656_v57, 0.0 }
 0x1e0   :  { %4957 = vst [vmem:[#allocation31_spill] sm:$0xff] %v3861_v24  ;;  %4960 = vst [vmem:[#allocation32_spill] sm:$0xff] %v3866_v43  ;;  %v3881_v45 = vadd.f32 %v4966_v63, %v3575_v1  ;;  %v4970_v24 = vunpack.c.l.bf16 %v4969_v19  ;;  %v4982_v63 = vld [vmem:[#allocation51_spill] sm:$0xff]  ;;  %v1249_v62 = vld [vmem:[%s4630_s5 + $0x30] sm:$0xff] }
 0x1e1   :  { %4962 = vst [vmem:[#allocation33_spill] sm:$0xff] %v3871_v47  ;;  %4965 = vst [vmem:[#allocation34_spill] sm:$0xff] %v3876_v41  ;;  %v3891_v3 = vadd.f32 %v4973_v38, %v4972_v14  ;;  %v4976_v47 = vld [vmem:[#allocation50_spill] sm:$0xff]  ;;  %v4986_v19 = vunpack.c.h.bf16 %v4982_v63  ;;  %v1252_v7 = vld [vmem:[%s4630_s5 + $0x48] sm:$0xff] }
 0x1e2   :  { %4967 = vst [vmem:[#allocation35_spill] sm:$0xff] %v3881_v45  ;;  %v3886_v60 = vadd.f32 %v4970_v24, %v4968_v16  ;;  %v4977_v43 = vunpack.c.l.bf16 %v4976_v47  ;;  %v4980_v61 = vunpack.c.h.bf16 %v4976_v47  ;;  %v4983_v45 = vunpack.c.l.bf16 %v4982_v63  ;;  %v4985_v16 = vld [vmem:[#allocation4_spill] sm:$0xff]  ;;  %v4988_v38 = vld [vmem:[#allocation6_spill] sm:$0xff]  ;;  %v1258_v10 = vld [vmem:[%s4630_s5 + $0x78] sm:$0xff] }
 0x1e3   :  { %4974 = vst [vmem:[#allocation37_spill] sm:$0xff] %v3891_v3  ;;  %v3911_v14 = vadd.f32 %v4986_v19, %v4985_v16  ;;  %v4989_v3 = vld [vmem:[#allocation52_spill] sm:$0xff]  ;;  %v5002_v19 = vld [vmem:[#allocation10_spill] sm:$0xff]  ;;  %v1270_v49 = vld [vmem:[%s4630_s5 + $0xd8] sm:$0xff] }
 0x1e4   :  { %4971 = vst [vmem:[#allocation36_spill] sm:$0xff] %v3886_v60  ;;  %v3896_v58 = vadd.f32 %v4977_v43, %v4975_v52  ;;  %v3901_v1 = vadd.f32 %v4980_v61, %v4979_v51  ;;  %v3906_v24 = vadd.f32 %v4983_v45, %v3595_v17  ;;  %v4990_v60 = vunpack.c.l.bf16 %v4989_v3  ;;  %v4992_v52 = vld [vmem:[#allocation3_spill] sm:$0xff]  ;;  %v4995_v61 = vld [vmem:[#allocation5_spill] sm:$0xff]  ;;  %v4999_v45 = vld [vmem:[#allocation8_spill] sm:$0xff] }
 0x1e5   :  { %4987 = vst [vmem:[#allocation41_spill] sm:$0xff] %v3911_v14  ;;  %v4993_v47 = vunpack.c.h.bf16 %v4989_v3  ;;  %v5003_v14 = vld [vmem:[#allocation22_spill] sm:$0xff]  ;;  %v1257_v30 = vld [vmem:[%s4630_s5 + $0x70] sm:$0xff]  ;;  %v1272_v57 = vld [vmem:[%s4630_s5 + $0xe8] sm:$0xff] }
 0x1e6   :  { %4978 = vst [vmem:[#allocation38_spill] sm:$0xff] %v3896_v58  ;;  %4981 = vst [vmem:[#allocation39_spill] sm:$0xff] %v3901_v1  ;;  %v3916_v43 = vadd.f32 %v4990_v60, %v4988_v38  ;;  %v4996_v1 = vld [vmem:[#allocation13_spill] sm:$0xff]  ;;  %v5006_v38 = vld [vmem:[#allocation7_spill] sm:$0xff]  ;;  %v5007_v3 = vunpack.c.h.bf16 %v5003_v14 }
 0x1e7   :  { %4984 = vst [vmem:[#allocation40_spill] sm:$0xff] %v3906_v24  ;;  %v3921_v51 = vadd.f32 %v4993_v47, %v4992_v52  ;;  %v4997_v58 = vunpack.c.l.bf16 %v4996_v1  ;;  %v5000_v63 = vunpack.c.h.bf16 %v4996_v1  ;;  %v5004_v24 = vunpack.c.l.bf16 %v5003_v14  ;;  %v5009_v47 = vld [vmem:[#allocation14_spill] sm:$0xff]  ;;  %v1245_v14 = vld [vmem:[%s4630_s5 + $0x10] sm:$0xff] }
 0x1e8   :  { %4991 = vst [vmem:[#allocation42_spill] sm:$0xff] %v3916_v43  ;;  %v3941_v52 = vadd.f32 %v5007_v3, %v5006_v38  ;;  %v5013_v1 = vunpack.c.h.bf16 %v5009_v47  ;;  %v1246_v3 = vld [vmem:[%s4630_s5 + $0x18] sm:$0xff]  ;;  %v1251_v29 = vld [vmem:[%s4630_s5 + $0x40] sm:$0xff]  ;;  %v1261_v43 = vld [vmem:[%s4630_s5 + $0x90] sm:$0xff]  ;;  %v4099_v54 = vmul.f32 %v1245_v14, %v5028_v25  ;;  %v5031_v25 = vmax.f32 %v3661_v26, 0.0 }
 0x1e9   :  { %4994 = vst [vmem:[#allocation43_spill] sm:$0xff] %v3921_v51  ;;  %v3926_v17 = vadd.f32 %v4997_v58, %v4995_v61  ;;  %v3931_v16 = vadd.f32 %v5000_v63, %v4999_v45  ;;  %v3936_v60 = vadd.f32 %v5004_v24, %v5002_v19  ;;  %v5010_v51 = vunpack.c.l.bf16 %v5009_v47  ;;  %v5012_v61 = vld [vmem:[#allocation9_spill] sm:$0xff]  ;;  %v1244_v24 = vld [vmem:[%s4630_s5 + $0x8] sm:$0xff]  ;;  %v1255_v19 = vld [vmem:[%s4630_s5 + $0x60] sm:$0xff] }
 0x1ea   :  { %5008 = vst [vmem:[#allocation47_spill] sm:$0xff] %v3941_v52  ;;  %v3951_v45 = vadd.f32 %v5013_v1, %v5012_v61  ;;  %v1243_v61 = vld [vmem:[%s4630_s5] sm:$0xff]  ;;  %v1248_v63 = vld [vmem:[%s4630_s5 + $0x28] sm:$0xff]  ;;  %v1262_v47 = vld [vmem:[%s4630_s5 + $0x98] sm:$0xff]  ;;  %v4103_v28 = vmul.f32 %v1246_v3, %v5029_v18  ;;  %v4119_v18 = vmul.f32 %v1247_v5, %v5030_v36  ;;  %v5033_v14 = vmax.f32 %v3671_v55, 0.0 }
 0x1eb   :  { %4998 = vst [vmem:[#allocation44_spill] sm:$0xff] %v3926_v17  ;;  %5001 = vst [vmem:[#allocation45_spill] sm:$0xff] %v3931_v16  ;;  %v3946_v58 = vadd.f32 %v5010_v51, %v3627_v23  ;;  %v1250_v51 = vld [vmem:[%s4630_s5 + $0x38] sm:$0xff]  ;;  %v1256_v23 = vld [vmem:[%s4630_s5 + $0x68] sm:$0xff]  ;;  %v5034_v55 = vmax.f32 %v3676_v21, 0.0 }
 0x1ec   :  { %5005 = vst [vmem:[#allocation46_spill] sm:$0xff] %v3936_v60  ;;  %5014 = vst [vmem:[#allocation21_spill] sm:$0xff] %v3951_v45  ;;  %v1259_v17 = vld [vmem:[%s4630_s5 + $0x80] sm:$0xff]  ;;  %v1260_v1 = vld [vmem:[%s4630_s5 + $0x88] sm:$0xff]  ;;  %v5027_v60 = vmax.f32 %v3641_v6, 0.0  ;;  %v4131_v3 = vmul.f32 %v1250_v51, %v5033_v14  ;;  %v5036_v51 = vmax.f32 %v3686_v53, 0.0 }
 0x1ed   :  { %5011 = vst [vmem:[#allocation48_spill] sm:$0xff] %v3946_v58  ;;  %v1263_v16 = vld [vmem:[%s4630_s5 + $0xa0] sm:$0xff]  ;;  %v1264_v38 = vld [vmem:[%s4630_s5 + $0xa8] sm:$0xff]  ;;  %v1265_v41 = vld [vmem:[%s4630_s5 + $0xb0] sm:$0xff]  ;;  %v5026_v58 = vmax.f32 %v3636_v8, 0.0  ;;  %v4147_v5 = vmul.f32 %v1251_v29, %v5034_v55  ;;  %v5040_v29 = vmax.f32 %v3706_v42, 0.0 }
 0x1ee   :  { %v1266_v45 = vld [vmem:[%s4630_s5 + $0xb8] sm:$0xff]  ;;  %v4095_v13 = vmul.f32 %v1244_v24, %v5027_v60  ;;  %v1268_v8 = vld [vmem:[%s4630_s5 + $0xc8] sm:$0xff]  ;;  %v1269_v6 = vld [vmem:[%s4630_s5 + $0xd0] sm:$0xff]  ;;  %v4123_v60 = vmul.f32 %v1248_v63, %v5031_v25  ;;  %v4155_v36 = vmul.f32 %v1253_v9, %v5036_v51  ;;  %v5037_v25 = vmax.f32 %v3691_v4, 0.0 }
 0x1ef   :  { %v4091_v52 = vmul.f32 %v1243_v61, %v5026_v58  ;;  %v5032_v58 = vmax.f32 %v3666_v31, 0.0  ;;  %v1271_v61 = vld [vmem:[%s4630_s5 + $0xe0] sm:$0xff]  ;;  %v1273_v26 = vld [vmem:[%s4630_s5 + $0xf0] sm:$0xff]  ;;  %v1274_v31 = vld [vmem:[%s4630_s5 + $0xf8] sm:$0xff]  ;;  %v5038_v4 = vmax.f32 %v3696_v27, 0.0  ;;  %v5039_v9 = vmax.f32 %v3701_v33, 0.0 }
 0x1f0   :  { %v1275_v14 = vld [vmem:[%s4630_s5 + $0x100] sm:$0xff]  ;;  %v1276_v21 = vld [vmem:[%s4630_s5 + $0x108] sm:$0xff]  ;;  %v1278_v53 = vld [vmem:[%s4630_s5 + $0x118] sm:$0xff]  ;;  %v4183_v55 = vmul.f32 %v1257_v30, %v5040_v29 }
 0x1f1   :  { %v4127_v24 = vmul.f32 %v1249_v62, %v5032_v58  ;;  %v5035_v62 = vmax.f32 %v3681_v37, 0.0  ;;  %v4159_v58 = vmul.f32 %v1254_v11, %v5037_v25  ;;  %v1277_v37 = vld [vmem:[%s4630_s5 + $0x110] sm:$0xff]  ;;  %v4175_v11 = vmul.f32 %v1255_v19, %v5038_v4  ;;  %v1279_v25 = vld [vmem:[%s4630_s5 + $0x120] sm:$0xff]  ;;  %v1280_v27 = vld [vmem:[%s4630_s5 + $0x128] sm:$0xff] }
 0x1f2   :  { %v1281_v33 = vld [vmem:[%s4630_s5 + $0x130] sm:$0xff]  ;;  %v1282_v42 = vld [vmem:[%s4630_s5 + $0x138] sm:$0xff] }
 0x1f3   :  { %v4151_v63 = vmul.f32 %v1252_v7, %v5035_v62  ;;  %v4179_v7 = vmul.f32 %v1256_v23, %v5039_v9  ;;  %v5041_v62 = vmax.f32 %v3711_v46, 0.0  ;;  %v5042_v46 = vmax.f32 %v3716_v40, 0.0  ;;  %v1284_v40 = vld [vmem:[%s4630_s5 + $0x148] sm:$0xff] }
 0x1f4   :  { %v5044_v23 = vmax.f32 %v3726_v59, 0.0  ;;  %v5045_v9 = vmax.f32 %v3731_v2, 0.0  ;;  %v5046_v59 = vmax.f32 %v3736_v56, 0.0  ;;  %v5047_v2 = vmax.f32 %v3741_v0, 0.0  ;;  %v1287_v56 = vld [vmem:[%s4630_s5 + $0x160] sm:$0xff]  ;;  %v1288_v0 = vld [vmem:[%s4630_s5 + $0x168] sm:$0xff] }
 0x1f5   :  { %v4187_v51 = vmul.f32 %v1258_v10, %v5041_v62  ;;  %v4203_v30 = vmul.f32 %v1259_v17, %v5042_v46  ;;  %v5043_v10 = vmax.f32 %v3721_v44, 0.0  ;;  %v1283_v62 = vld [vmem:[%s4630_s5 + $0x140] sm:$0xff]  ;;  %v1285_v44 = vld [vmem:[%s4630_s5 + $0x150] sm:$0xff]  ;;  %v5049_v46 = vmax.f32 %v3751_v22, 0.0 }
 0x1f6   :  { %v4211_v4 = vmul.f32 %v1261_v43, %v5044_v23  ;;  %v4215_v29 = vmul.f32 %v1262_v47, %v5045_v9  ;;  %v4228_v43 = vmul.f32 %v1263_v16, %v5046_v59  ;;  %v4232_v17 = vmul.f32 %v1264_v38, %v5047_v2  ;;  %v1286_v23 = vld [vmem:[%s4630_s5 + $0x158] sm:$0xff]  ;;  %v1289_v2 = vld [vmem:[%s4630_s5 + $0x170] sm:$0xff] }
 0x1f7   :  { %v4207_v19 = vmul.f32 %v1260_v1, %v5043_v10  ;;  %v5048_v47 = vmax.f32 %v3746_v15, 0.0  ;;  %v4240_v10 = vmul.f32 %v1266_v45, %v5049_v46  ;;  %v5050_v15 = vmax.f32 %v3756_v12, 0.0  ;;  %v1290_v12 = vld [vmem:[%s4630_s5 + $0x178] sm:$0xff] }
 0x1f8   :  { %v5051_v22 = vmax.f32 %v3761_v20, 0.0  ;;  %v5052_v45 = vmax.f32 %v3766_v35, 0.0  ;;  %v5053_v9 = vmax.f32 %v3771_v50, 0.0  ;;  %v1291_v20 = vld [vmem:[%s4630_s5 + $0x180] sm:$0xff]  ;;  %v5054_v35 = vmax.f32 %v3776_v32, 0.0  ;;  %v1293_v32 = vld [vmem:[%s4630_s5 + $0x190] sm:$0xff] }
 0x1f9   :  { %v4236_v1 = vmul.f32 %v1265_v41, %v5048_v47  ;;  %v4253_v41 = vmul.f32 %v1267_v34, %v5050_v15  ;;  %v5055_v50 = vmax.f32 %v3781_v39, 0.0  ;;  %v5057_v47 = vld [vmem:[#allocation17_spill] sm:$0xff] }
 0x1fa   :  { %v4257_v16 = vmul.f32 %v1268_v8, %v5051_v22  ;;  %v4261_v38 = vmul.f32 %v1269_v6, %v5052_v45  ;;  %v4265_v59 = vmul.f32 %v1270_v49, %v5053_v9  ;;  %v4278_v34 = vmul.f32 %v1271_v61, %v5054_v35  ;;  %v1292_v22 = vld [vmem:[%s4630_s5 + $0x188] sm:$0xff]  ;;  %v1294_v39 = vld [vmem:[%s4630_s5 + $0x198] sm:$0xff]  ;;  %v5065_v9 = vld [vmem:[#allocation20_spill] sm:$0xff] }
 0x1fb   :  { %v4282_v8 = vmul.f32 %v1272_v57, %v5055_v50  ;;  %v5056_v6 = vmax.f32 %v3786_v48, 0.0  ;;  %v5058_v46 = vmax.f32 %v5057_v47, 0.0  ;;  %v5060_v61 = vld [vmem:[#allocation11_spill] sm:$0xff]  ;;  %v5066_v35 = vmax.f32 %v5065_v9, 0.0  ;;  %v5077_v9 = vld [vmem:[#allocation24_spill] sm:$0xff] }
 0x1fc   :  { %v5061_v48 = vmax.f32 %v5060_v61, 0.0  ;;  %v5071_v61 = vld [vmem:[#allocation12_spill] sm:$0xff] }
 0x1fd   :  { %v4286_v49 = vmul.f32 %v1273_v26, %v5056_v6  ;;  %v4290_v15 = vmul.f32 %v1274_v31, %v5058_v46  ;;  %v5062_v26 = vld [vmem:[#allocation15_spill] sm:$0xff]  ;;  %v4311_v50 = vmul.f32 %v1277_v37, %v5066_v35  ;;  %v5068_v6 = vld [vmem:[#allocation18_spill] sm:$0xff]  ;;  %v5078_v35 = vmax.f32 %v5077_v9, 0.0 }
 0x1fe   :  { %v4303_v57 = vmul.f32 %v1275_v14, %v5061_v48  ;;  %v5063_v45 = vmax.f32 %v5062_v26, 0.0  ;;  %v5069_v47 = vmax.f32 %v5068_v6, 0.0  ;;  %v1296_v14 = vld [vmem:[%s4630_s5 + $0x1a8] sm:$0xff]  ;;  %v5072_v48 = vmax.f32 %v5071_v61, 0.0  ;;  %v5074_v26 = vld [vmem:[#allocation16_spill] sm:$0xff]  ;;  %v5083_v61 = vld [vmem:[#allocation26_spill] sm:$0xff] }
 0x1ff   :  { %5059 = vst [vmem:[#allocation49_spill] sm:$0xff] %v4290_v15  ;;  %5067 = vst [vmem:[#allocation19_spill] sm:$0xff] %v4311_v50  ;;  %v1295_v15 = vld [vmem:[%s4630_s5 + $0x1a0] sm:$0xff]  ;;  %v4336_v6 = vmul.f32 %v1281_v33, %v5078_v35 }
 0x200   :  { %v4307_v31 = vmul.f32 %v1276_v21, %v5063_v45  ;;  %v4315_v46 = vmul.f32 %v1278_v53, %v5069_v47  ;;  %v1297_v21 = vld [vmem:[%s4630_s5 + $0x1b0] sm:$0xff]  ;;  %v4328_v37 = vmul.f32 %v1279_v25, %v5072_v48  ;;  %v5075_v45 = vmax.f32 %v5074_v26, 0.0  ;;  %v5080_v47 = vld [vmem:[#allocation25_spill] sm:$0xff]  ;;  %v1299_v25 = vld [vmem:[%s4630_s5 + $0x1c0] sm:$0xff] }
 0x201   :  { %5079 = vst [vmem:[#allocation4_spill] sm:$0xff] %v4336_v6  ;;  %v5084_v48 = vmax.f32 %v5083_v61, 0.0  ;;  %v5086_v26 = vld [vmem:[#allocation27_spill] sm:$0xff]  ;;  %v5095_v61 = vld [vmem:[#allocation30_spill] sm:$0xff] }
 0x202   :  { %5064 = vst [vmem:[#allocation23_spill] sm:$0xff] %v4307_v31  ;;  %5070 = vst [vmem:[#allocation50_spill] sm:$0xff] %v4315_v46  ;;  %v4332_v53 = vmul.f32 %v1280_v27, %v5075_v45  ;;  %v5081_v46 = vmax.f32 %v5080_v47, 0.0  ;;  %v1298_v31 = vld [vmem:[%s4630_s5 + $0x1b8] sm:$0xff]  ;;  %v1300_v27 = vld [vmem:[%s4630_s5 + $0x1c8] sm:$0xff]  ;;  %v5087_v45 = vmax.f32 %v5086_v26, 0.0 }
 0x203   :  { %5073 = vst [vmem:[#allocation2_spill] sm:$0xff] %v4328_v37  ;;  %v4353_v33 = vmul.f32 %v1283_v62, %v5084_v48  ;;  %v5092_v47 = vld [vmem:[#allocation29_spill] sm:$0xff]  ;;  %v5096_v48 = vmax.f32 %v5095_v61, 0.0  ;;  %v5098_v26 = vld [vmem:[#allocation31_spill] sm:$0xff]  ;;  %v5107_v61 = vld [vmem:[#allocation34_spill] sm:$0xff] }
 0x204   :  { %5076 = vst [vmem:[#allocation51_spill] sm:$0xff] %v4332_v53  ;;  %v4340_v50 = vmul.f32 %v1282_v42, %v5081_v46  ;;  %v4357_v42 = vmul.f32 %v1284_v40, %v5087_v45  ;;  %v5089_v46 = vld [vmem:[#allocation28_spill] sm:$0xff]  ;;  %v1302_v62 = vld [vmem:[%s4630_s5 + $0x1d8] sm:$0xff]  ;;  %v1303_v40 = vld [vmem:[%s4630_s5 + $0x1e0] sm:$0xff]  ;;  %v5099_v45 = vmax.f32 %v5098_v26, 0.0 }
 0x205   :  { %5085 = vst [vmem:[#allocation52_spill] sm:$0xff] %v4353_v33  ;;  %v5090_v9 = vmax.f32 %v5089_v46, 0.0  ;;  %v1301_v53 = vld [vmem:[%s4630_s5 + $0x1d0] sm:$0xff]  ;;  %v5109_v26 = vld [vmem:[#allocation35_spill] sm:$0xff] }
 0x206   :  { %5082 = vst [vmem:[#allocation6_spill] sm:$0xff] %v4340_v50  ;;  %5088 = vst [vmem:[#allocation3_spill] sm:$0xff] %v4357_v42  ;;  %v5093_v50 = vmax.f32 %v5092_v47, 0.0  ;;  %v5104_v47 = vld [vmem:[#allocation33_spill] sm:$0xff]  ;;  %v1304_v42 = vld [vmem:[%s4630_s5 + $0x1e8] sm:$0xff] }
 0x207   :  { %v4361_v35 = vmul.f32 %v1285_v44, %v5090_v9  ;;  %v4378_v44 = vmul.f32 %v1287_v56, %v5096_v48  ;;  %v1305_v56 = vld [vmem:[%s4630_s5 + $0x1f0] sm:$0xff]  ;;  %v5108_v48 = vmax.f32 %v5107_v61, 0.0  ;;  %v5117_v37 = vld [vmem:[#allocation39_spill] sm:$0xff] }
 0x208   :  { %v4365_v6 = vmul.f32 %v1286_v23, %v5093_v50  ;;  %v4382_v23 = vmul.f32 %v1288_v0, %v5099_v45  ;;  %v5101_v50 = vld [vmem:[#allocation32_spill] sm:$0xff]  ;;  %v1306_v0 = vld [vmem:[%s4630_s5 + $0x1f8] sm:$0xff]  ;;  %v5110_v45 = vmax.f32 %v5109_v26, 0.0  ;;  %v5118_v61 = vmax.f32 %v5117_v37, 0.0 }
 0x209   :  { %5091 = vst [vmem:[#allocation5_spill] sm:$0xff] %v4361_v35  ;;  %5097 = vst [vmem:[#allocation8_spill] sm:$0xff] %v4378_v44  ;;  %v5102_v46 = vmax.f32 %v5101_v50, 0.0 }
 0x20a   :  { %5094 = vst [vmem:[#allocation13_spill] sm:$0xff] %v4365_v6  ;;  %5100 = vst [vmem:[#allocation10_spill] sm:$0xff] %v4382_v23  ;;  %v5105_v6 = vmax.f32 %v5104_v47, 0.0  ;;  %v5113_v47 = vld [vmem:[#allocation37_spill] sm:$0xff]  ;;  %v5115_v23 = vld [vmem:[#allocation38_spill] sm:$0xff] }
 0x20b   :  { %v4386_v9 = vmul.f32 %v1289_v2, %v5102_v46  ;;  %v4403_v2 = vmul.f32 %v1291_v20, %v5108_v48  ;;  %v5116_v44 = vmax.f32 %v5115_v23, 0.0  ;;  %v4423_v20 = vmul.f32 %v1296_v14, %v5118_v61  ;;  %v5119_v48 = vld [vmem:[#allocation40_spill] sm:$0xff]  ;;  %v5129_v61 = vld [vmem:[#allocation45_spill] sm:$0xff] }
 0x20c   :  { %v4390_v35 = vmul.f32 %v1290_v12, %v5105_v6  ;;  %v4407_v12 = vmul.f32 %v1292_v22, %v5110_v45  ;;  %v5111_v6 = vld [vmem:[#allocation36_spill] sm:$0xff]  ;;  %v5120_v26 = vmax.f32 %v5119_v48, 0.0  ;;  %v5121_v45 = vld [vmem:[#allocation41_spill] sm:$0xff]  ;;  %v5130_v48 = vmax.f32 %v5129_v61, 0.0 }
 0x20d   :  { %5103 = vst [vmem:[#allocation22_spill] sm:$0xff] %v4386_v9  ;;  %v5112_v50 = vmax.f32 %v5111_v6, 0.0  ;;  %v4419_v33 = vmul.f32 %v1295_v15, %v5116_v44  ;;  %v5122_v6 = vmax.f32 %v5121_v45, 0.0  ;;  %v5127_v44 = vld [vmem:[#allocation44_spill] sm:$0xff]  ;;  %v2019_v61 = vpack.c.bf16 %v4159_v58, %v4155_v36  ;;  %v5140_v36 = vld [vmem:[#allocation23_spill] sm:$0xff] }
 0x20e   :  { %5106 = vst [vmem:[#allocation7_spill] sm:$0xff] %v4390_v35  ;;  %v5114_v35 = vmax.f32 %v5113_v47, 0.0  ;;  %v4427_v22 = vmul.f32 %v1297_v21, %v5120_v26  ;;  %v5128_v37 = vmax.f32 %v5127_v44, 0.0  ;;  %v4447_v21 = vmul.f32 %v1302_v62, %v5130_v48  ;;  %v5131_v26 = vld [vmem:[#allocation46_spill] sm:$0xff] }
 0x20f   :  { %v4411_v46 = vmul.f32 %v1293_v32, %v5112_v50  ;;  %v4431_v32 = vmul.f32 %v1298_v31, %v5122_v6  ;;  %v5123_v50 = vld [vmem:[#allocation42_spill] sm:$0xff]  ;;  %v5132_v45 = vmax.f32 %v5131_v26, 0.0  ;;  %v5133_v6 = vld [vmem:[#allocation47_spill] sm:$0xff]  ;;  %v1994_v62 = vpack.c.bf16 %v4095_v13, %v4091_v52  ;;  %2186 = vst [vmem:[%s4631_s6 + $0x28] sm:$0xff] %v2019_v61  }
 0x210   :  { %v4415_v9 = vmul.f32 %v1294_v39, %v5114_v35  ;;  %v5124_v47 = vmax.f32 %v5123_v50, 0.0  ;;  %v5125_v35 = vld [vmem:[#allocation43_spill] sm:$0xff]  ;;  %v4443_v14 = vmul.f32 %v1301_v53, %v5128_v37  ;;  %v5134_v50 = vmax.f32 %v5133_v6, 0.0 }
 0x211   :  { %v5126_v23 = vmax.f32 %v5125_v35, 0.0  ;;  %v4451_v31 = vmul.f32 %v1303_v40, %v5132_v45  ;;  %v1999_v37 = vpack.c.bf16 %v4103_v28, %v4099_v54  ;;  %v2004_v40 = vpack.c.bf16 %v4123_v60, %v4119_v18  ;;  %1995 = vst [vmem:[%s4631_s6] sm:$0xff] %v1994_v62  }
 0x212   :  { %v4435_v39 = vmul.f32 %v1299_v25, %v5124_v47  ;;  %v4455_v25 = vmul.f32 %v1304_v42, %v5134_v50  ;;  %v5135_v47 = vld [vmem:[#allocation48_spill] sm:$0xff]  ;;  %v2009_v42 = vpack.c.bf16 %v4131_v3, %v4127_v24  ;;  %v2029_v13 = vpack.c.bf16 %v4187_v51, %v4183_v55  ;;  %v5143_v51 = vld [vmem:[#allocation2_spill] sm:$0xff] }
 0x213   :  { %v4439_v15 = vmul.f32 %v1300_v27, %v5126_v23  ;;  %v5136_v35 = vmax.f32 %v5135_v47, 0.0  ;;  %v5137_v23 = vld [vmem:[#allocation21_spill] sm:$0xff]  ;;  %2182 = vst [vmem:[%s4631_s6 + $0x8] sm:$0xff] %v1999_v37   ;;  %2183 = vst [vmem:[%s4631_s6 + $0x10] sm:$0xff] %v2004_v40   ;;  %v2034_v28 = vpack.c.bf16 %v4207_v19, %v4203_v30  ;;  %v2039_v54 = vpack.c.bf16 %v4215_v29, %v4211_v4  ;;  %v5144_v30 = vld [vmem:[#allocation51_spill] sm:$0xff] }
 0x214   :  { %v5138_v44 = vmax.f32 %v5137_v23, 0.0  ;;  %2184 = vst [vmem:[%s4631_s6 + $0x18] sm:$0xff] %v2009_v42   ;;  %v2044_v52 = vpack.c.bf16 %v4232_v17, %v4228_v43  ;;  %v2049_v18 = vpack.c.bf16 %v4240_v10, %v4236_v1  ;;  %2188 = vst [vmem:[%s4631_s6 + $0x38] sm:$0xff] %v2029_v13   ;;  %v2054_v60 = vpack.c.bf16 %v4257_v16, %v4253_v41  ;;  %v5145_v4 = vld [vmem:[#allocation4_spill] sm:$0xff]  ;;  %v5146_v29 = vld [vmem:[#allocation6_spill] sm:$0xff] }
 0x215   :  { %v4459_v27 = vmul.f32 %v1305_v56, %v5136_v35  ;;  %v2014_v56 = vpack.c.bf16 %v4151_v63, %v4147_v5  ;;  %v2059_v24 = vpack.c.bf16 %v4265_v59, %v4261_v38  ;;  %v2064_v3 = vpack.c.bf16 %v4282_v8, %v4278_v34  ;;  %v5139_v5 = vld [vmem:[#allocation49_spill] sm:$0xff]  ;;  %2189 = vst [vmem:[%s4631_s6 + $0x40] sm:$0xff] %v2034_v28   ;;  %v5147_v17 = vld [vmem:[#allocation52_spill] sm:$0xff]  ;;  %v5148_v1 = vld [vmem:[#allocation3_spill] sm:$0xff] }
 0x216   :  { %v4463_v53 = vmul.f32 %v1306_v0, %v5138_v44  ;;  %v2024_v0 = vpack.c.bf16 %v4179_v7, %v4175_v11  ;;  %v2069_v63 = vpack.c.bf16 %v5139_v5, %v4286_v49  ;;  %2190 = vst [vmem:[%s4631_s6 + $0x48] sm:$0xff] %v2039_v54   ;;  %2191 = vst [vmem:[%s4631_s6 + $0x50] sm:$0xff] %v2044_v52   ;;  %v5141_v11 = vld [vmem:[#allocation19_spill] sm:$0xff]  ;;  %v5142_v7 = vld [vmem:[#allocation50_spill] sm:$0xff] }
 0x217   :  { %2185 = vst [vmem:[%s4631_s6 + $0x20] sm:$0xff] %v2014_v56   ;;  %2192 = vst [vmem:[%s4631_s6 + $0x58] sm:$0xff] %v2049_v18   ;;  %v2074_v58 = vpack.c.bf16 %v5140_v36, %v4303_v57  ;;  %v2079_v55 = vpack.c.bf16 %v5142_v7, %v5141_v11  ;;  %v2084_v19 = vpack.c.bf16 %v5144_v30, %v5143_v51  ;;  %v5149_v41 = vld [vmem:[#allocation5_spill] sm:$0xff]  ;;  %v5151_v59 = vld [vmem:[#allocation8_spill] sm:$0xff] }
 0x218   :  { %2187 = vst [vmem:[%s4631_s6 + $0x30] sm:$0xff] %v2024_v0   ;;  %v2089_v43 = vpack.c.bf16 %v5146_v29, %v5145_v4  ;;  %2193 = vst [vmem:[%s4631_s6 + $0x60] sm:$0xff] %v2054_v60   ;;  %v2094_v10 = vpack.c.bf16 %v5148_v1, %v5147_v17  ;;  %v5150_v16 = vld [vmem:[#allocation13_spill] sm:$0xff]  ;;  %v5152_v34 = vld [vmem:[#allocation10_spill] sm:$0xff]  ;;  %v2114_v26 = vpack.c.bf16 %v4407_v12, %v4403_v2 }
 0x219   :  { %2194 = vst [vmem:[%s4631_s6 + $0x68] sm:$0xff] %v2059_v24   ;;  %2195 = vst [vmem:[%s4631_s6 + $0x70] sm:$0xff] %v2064_v3   ;;  %v2099_v38 = vpack.c.bf16 %v5150_v16, %v5149_v41  ;;  %v2104_v8 = vpack.c.bf16 %v5152_v34, %v5151_v59  ;;  %v5153_v49 = vld [vmem:[#allocation22_spill] sm:$0xff]  ;;  %v5154_v57 = vld [vmem:[#allocation7_spill] sm:$0xff]  ;;  %v2119_v45 = vpack.c.bf16 %v4415_v9, %v4411_v46 }
 0x21a   :  { %2196 = vst [vmem:[%s4631_s6 + $0x78] sm:$0xff] %v2069_v63   ;;  %v2109_v48 = vpack.c.bf16 %v5154_v57, %v5153_v49  ;;  %2197 = vst [vmem:[%s4631_s6 + $0x80] sm:$0xff] %v2074_v58   ;;  %v2124_v6 = vpack.c.bf16 %v4423_v20, %v4419_v33  ;;  %v2129_v50 = vpack.c.bf16 %v4431_v32, %v4427_v22 }
 0x21b   :  { %2198 = vst [vmem:[%s4631_s6 + $0x88] sm:$0xff] %v2079_v55   ;;  %2199 = vst [vmem:[%s4631_s6 + $0x90] sm:$0xff] %v2084_v19   ;;  %v2134_v33 = vpack.c.bf16 %v4439_v15, %v4435_v39  ;;  %v2139_v9 = vpack.c.bf16 %v4447_v21, %v4443_v14  ;;  %v2144_v2 = vpack.c.bf16 %v4455_v25, %v4451_v31 }
 0x21c   :  { %2200 = vst [vmem:[%s4631_s6 + $0x98] sm:$0xff] %v2089_v43   ;;  %2201 = vst [vmem:[%s4631_s6 + $0xa0] sm:$0xff] %v2094_v10   ;;  %v2149_v12 = vpack.c.bf16 %v4463_v53, %v4459_v27 }
 0x21d   :  { %2202 = vst [vmem:[%s4631_s6 + $0xa8] sm:$0xff] %v2099_v38   ;;  %2203 = vst [vmem:[%s4631_s6 + $0xb0] sm:$0xff] %v2104_v8  }
 0x21e   :  { %2204 = vst [vmem:[%s4631_s6 + $0xb8] sm:$0xff] %v2109_v48   ;;  %2205 = vst [vmem:[%s4631_s6 + $0xc0] sm:$0xff] %v2114_v26  }
 0x21f   :  { %2206 = vst [vmem:[%s4631_s6 + $0xc8] sm:$0xff] %v2119_v45   ;;  %2207 = vst [vmem:[%s4631_s6 + $0xd0] sm:$0xff] %v2124_v6  }
 0x220   :  { %2208 = vst [vmem:[%s4631_s6 + $0xd8] sm:$0xff] %v2129_v50   ;;  %2209 = vst [vmem:[%s4631_s6 + $0xe0] sm:$0xff] %v2134_v33  }
 0x221   :  { %2210 = vst [vmem:[%s4631_s6 + $0xe8] sm:$0xff] %v2139_v9   ;;  %2211 = vst [vmem:[%s4631_s6 + $0xf0] sm:$0xff] %v2144_v2  }
 0x222   :  { %2212 = vst [vmem:[%s4631_s6 + $0xf8] sm:$0xff] %v2149_v12  }

// kernel: _lambda_.23
= control target key start
LH: loop header
LB: loop body
LE: loop exit
PB: predicated region body
PF: predicated region fallthrough
CT: control target
= control target key end

     0   :  { %s852_s1 = inlined_call_operand.vmem [shape: bf16[128,128], index: 1, kind: input, shape index: {}]   ;;  %s853_s0 = inlined_call_operand.vmem [shape: bf16[128,128], index: 0, kind: input, shape index: {}]   ;;  %s854_s2 = inlined_call_operand.vmem [shape: f32[1,128], index: 2, kind: input, shape index: {}, may-alias: {2,4}]   ;;  %s855_s3 = inlined_call_operand.vmem [shape: f32[1,128], index: 3, kind: input, shape index: {}]   ;;  %s856_s4 = inlined_call_operand.vmem [shape: f32[1,128], index: 4, kind: input, shape index: {}, may-alias: {2,4}]   ;;  %s857_s5 = inlined_call_operand.vmem [shape: bf16[128,128], index: 5, kind: output, shape index: {}]  }
   0x1   :  { %v627_v0 = vld [vmem:[%s852_s1] sm:$0xff]   ;;  %v628_v1 = vld [vmem:[%s852_s1 + $0x8] sm:$0xff]   ;;  %v629_v2 = vld [vmem:[%s852_s1 + $0x10] sm:$0xff]  }
   0x2   :  { %579 = vmatprep.subr.bf16.mxu0 %v627_v0  ;;  %611 = vmatprep.subr.bf16.mxu1 %v627_v0  ;;  %v630_v3 = vld [vmem:[%s852_s1 + $0x18] sm:$0xff]   ;;  %v635_v4 = vld [vmem:[%s853_s0] sm:$0xff]   ;;  %v632_v7 = vld [vmem:[%s852_s1 + $0x28] sm:$0xff]  }
   0x3   :  { %580 = vmatpush3.bf16.msra.mxu0 %v627_v0  ;;  %619 = vmatpush3.bf16.msra.mxu1 %v627_v0  ;;  %v631_v5 = vld [vmem:[%s852_s1 + $0x20] sm:$0xff]   ;;  %v633_v8 = vld [vmem:[%s852_s1 + $0x30] sm:$0xff]   ;;  %v634_v9 = vld [vmem:[%s852_s1 + $0x38] sm:$0xff]  }
   0x4   :  { %581 = vmatprep.subr.bf16.mxu0 %v628_v1  ;;  %612 = vmatprep.subr.bf16.mxu1 %v628_v1  ;;  %v639_v6 = vld [vmem:[%s853_s0 + $0x20] sm:$0xff]   ;;  %v636_v10 = vld [vmem:[%s853_s0 + $0x8] sm:$0xff]   ;;  %v637_v12 = vld [vmem:[%s853_s0 + $0x10] sm:$0xff]  }
   0x5   :  { %595 = vmatprep.mubr.bf16.mxu0 %v635_v4  ;;  %603 = vmatprep.mubr.bf16.mxu1 %v639_v6  ;;  %v640_v11 = vld [vmem:[%s853_s0 + $0x28] sm:$0xff]   ;;  %v641_v13 = vld [vmem:[%s853_s0 + $0x30] sm:$0xff]   ;;  %v638_v14 = vld [vmem:[%s853_s0 + $0x18] sm:$0xff]  }
   0x6   :  { %v642_v15 = vld [vmem:[%s853_s0 + $0x38] sm:$0xff]   ;;  %v726_v16 = vld [vmem:[%s854_s2] ss:$0 sm:$0xff] }
   0x7   :  { %582 = vmatpush3.bf16.msra.mxu0 %v628_v1  ;;  %620 = vmatpush3.bf16.msra.mxu1 %v628_v1 }
   0x8   :  { %583 = vmatprep.subr.bf16.mxu0 %v629_v2  ;;  %613 = vmatprep.subr.bf16.mxu1 %v629_v2 }
   0xb   :  { %584 = vmatpush3.bf16.msra.mxu0 %v629_v2  ;;  %621 = vmatpush3.bf16.msra.mxu1 %v629_v2 }
   0xc   :  { %585 = vmatprep.subr.bf16.mxu0 %v630_v3  ;;  %614 = vmatprep.subr.bf16.mxu1 %v630_v3 }
   0xf   :  { %586 = vmatpush3.bf16.msra.mxu0 %v630_v3  ;;  %622 = vmatpush3.bf16.msra.mxu1 %v630_v3 }
  0x10   :  { %587 = vmatprep.subr.bf16.mxu0 %v631_v5  ;;  %615 = vmatprep.subr.bf16.mxu1 %v631_v5 }
  0x13   :  { %588 = vmatpush3.bf16.msra.mxu0 %v631_v5  ;;  %623 = vmatpush3.bf16.msra.mxu1 %v631_v5 }
  0x14   :  { %589 = vmatprep.subr.bf16.mxu0 %v632_v7  ;;  %616 = vmatprep.subr.bf16.mxu1 %v632_v7 }
  0x17   :  { %590 = vmatpush3.bf16.msra.mxu0 %v632_v7  ;;  %624 = vmatpush3.bf16.msra.mxu1 %v632_v7 }
  0x18   :  { %591 = vmatprep.subr.bf16.mxu0 %v633_v8  ;;  %617 = vmatprep.subr.bf16.mxu1 %v633_v8 }
  0x1b   :  { %592 = vmatpush3.bf16.msra.mxu0 %v633_v8  ;;  %625 = vmatpush3.bf16.msra.mxu1 %v633_v8 }
  0x1c   :  { %593 = vmatprep.subr.bf16.mxu0 %v634_v9  ;;  %618 = vmatprep.subr.bf16.mxu1 %v634_v9 }
  0x1f   :  { %594 = vmatpush3.bf16.msra.mxu0 %v634_v9  ;;  %626 = vmatpush3.bf16.msra.mxu1 %v634_v9 }
  0x22   :  { %596 = vmatmul.mubr.bf16.vlgmr.msra.gmra.mrb[0].mxu0 %v636_v10  ;;  %604 = vmatmul.mubr.bf16.vlgmr.msra.gmra.mrb[0].mxu1 %v640_v11 }
  0x23   :  { %599 = vmatprep.mubr.bf16.mxu0 %v637_v12  ;;  %607 = vmatprep.mubr.bf16.mxu1 %v641_v13 }
  0x2a   :  { %600 = vmatmul.mubr.bf16.gmra.mrb[4].mxu0 %v638_v14  ;;  %608 = vmatmul.mubr.bf16.gmra.mrb[4].mxu1 %v642_v15 }
  0xf5   :  { %v597_v17 = vpop.f32.mrb[0].mxu0  ;;  %v605_v18 = vpop.f32.mrb[0].mxu1 }
  0xf6   :  { %v190_v19 = vpop.f32.mrb[1].mxu0  ;;  %v222_v20 = vpop.f32.mrb[1].mxu1  ;;  %v732_v26 = vadd.f32 %v597_v17, %v726_v16  ;;  %v785_v1 = vadd.f32 %v605_v18, %v726_v16 }
  0xf7   :  { %v729_v21 = vadd.f32 %v726_v16, %v190_v19  ;;  %v598_v22 = vpop.f32.mrb[2].mxu0  ;;  %v606_v23 = vpop.f32.mrb[2].mxu1  ;;  %v765_v52 = vadd.f32 %v726_v16, %v222_v20 }
  0xf8   :  { %v193_v24 = vpop.f32.mrb[3].mxu0  ;;  %v225_v25 = vpop.f32.mrb[3].mxu1  ;;  %v740_v29 = vadd.f32 %v598_v22, %v726_v16  ;;  %v279_v32 = vmul.f32 %v732_v26, %v732_v26  ;;  %v789_v4 = vadd.f32 %v606_v23, %v726_v16  ;;  %v287_v9 = vmul.f32 %v785_v1, %v785_v1 }
  0xf9   :  { %v735_v27 = vadd.f32 %v726_v16, %v193_v24  ;;  %v277_v28 = vmul.f32 %v729_v21, %v729_v21  ;;  %v285_v60 = vmul.f32 %v765_v52, %v765_v52  ;;  %v782_v0 = vadd.f32 %v726_v16, %v225_v25 }
  0xfa   :  { %v280_v39 = vmul.f32 %v740_v29, %v740_v29  ;;  %v288_v12 = vmul.f32 %v789_v4, %v789_v4 }
  0xfb   :  { %v255_v30 = vadd.f32 %v735_v27, %v729_v21  ;;  %v278_v31 = vmul.f32 %v735_v27, %v735_v27  ;;  %v286_v7 = vmul.f32 %v782_v0, %v782_v0 }
  0xfd   :  { %v256_v33 = vadd.f32 %v255_v30, %v732_v26  ;;  %v293_v34 = vadd.f32 %v278_v31, %v277_v28  ;;  %v601_v35 = vpop.f32.mrb[4].mxu0  ;;  %v609_v36 = vpop.f32.mrb[4].mxu1 }
  0xfe   :  { %v206_v37 = vpop.f32.mrb[5].mxu0  ;;  %v238_v38 = vpop.f32.mrb[5].mxu1  ;;  %v756_v45 = vadd.f32 %v601_v35, %v726_v16  ;;  %v247_v18 = vadd.f32 %v609_v36, %v726_v16 }
  0xff   :  { %v294_v40 = vadd.f32 %v293_v34, %v279_v32  ;;  %v752_v41 = vadd.f32 %v726_v16, %v206_v37  ;;  %v257_v42 = vadd.f32 %v256_v33, %v740_v29  ;;  %v602_v43 = vpop.f32.mrb[6].mxu0  ;;  %v610_v44 = vpop.f32.mrb[6].mxu1  ;;  %v795_v8 = vadd.f32 %v726_v16, %v238_v38 }
 0x100   :  { %v209_v46 = vpop.f32.mrb[7].mxu0  ;;  %v241_v47 = vpop.f32.mrb[7].mxu1  ;;  %v768_v54 = vadd.f32 %v602_v43, %v726_v16  ;;  %v283_v57 = vmul.f32 %v756_v45, %v756_v45  ;;  %v250_v23 = vadd.f32 %v610_v44, %v726_v16  ;;  %v291_v28 = vmul.f32 %v247_v18, %v247_v18 }
 0x101   :  { %v258_v48 = vadd.f32 %v257_v42, %v752_v41  ;;  %v281_v49 = vmul.f32 %v752_v41, %v752_v41  ;;  %v295_v50 = vadd.f32 %v294_v40, %v280_v39  ;;  %v762_v51 = vadd.f32 %v726_v16, %v209_v46 }
 0x102   :  { %v284_v61 = vmul.f32 %v768_v54, %v768_v54  ;;  %v289_v15 = vmul.f32 %v795_v8, %v795_v8  ;;  %v242_v17 = vadd.f32 %v726_v16, %v241_v47  ;;  %v292_v32 = vmul.f32 %v250_v23, %v250_v23 }
 0x103   :  { %v296_v53 = vadd.f32 %v295_v50, %v281_v49  ;;  %v259_v55 = vadd.f32 %v258_v48, %v762_v51  ;;  %v282_v56 = vmul.f32 %v762_v51, %v762_v51 }
 0x104   :  { %v290_v25 = vmul.f32 %v242_v17, %v242_v17 }
 0x105   :  { %v260_v58 = vadd.f32 %v259_v55, %v756_v45  ;;  %v297_v59 = vadd.f32 %v296_v53, %v282_v56 }
 0x107   :  { %v298_v62 = vadd.f32 %v297_v59, %v283_v57  ;;  %v261_v63 = vadd.f32 %v260_v58, %v768_v54  ;;  %v324_v58 = vlaneseq }
 0x109   :  { %v262_v2 = vadd.f32 %v261_v63, %v765_v52  ;;  %v299_v3 = vadd.f32 %v298_v62, %v284_v61  ;;  %v325_v59 = vshrl.u32 %v324_v58, 7 }
 0x10b   :  { %v300_v5 = vadd.f32 %v299_v3, %v285_v60  ;;  %v263_v6 = vadd.f32 %v262_v2, %v782_v0  ;;  %v253_v60 = vld [vmem:[%s855_s3] sm:$0x1]  ;;  %v326_v61 = vsub.s32 0, %v325_v59 }
 0x10c   :  { %v254_v2 = vld [vmem:[%s856_s4] sm:$0x1] }
 0x10d   :  { %v264_v10 = vadd.f32 %v263_v6, %v785_v1  ;;  %v301_v11 = vadd.f32 %v300_v5, %v286_v7 }
 0x10f   :  { %v302_v13 = vadd.f32 %v301_v11, %v287_v9  ;;  %v265_v14 = vadd.f32 %v264_v10, %v789_v4 }
 0x111   :  { %v266_v19 = vadd.f32 %v265_v14, %v795_v8  ;;  %v303_v20 = vadd.f32 %v302_v13, %v288_v12 }
 0x113   :  { %v304_v22 = vadd.f32 %v303_v20, %v289_v15  ;;  %v267_v24 = vadd.f32 %v266_v19, %v242_v17 }
 0x115   :  { %v268_v30 = vadd.f32 %v267_v24, %v247_v18  ;;  %v305_v31 = vadd.f32 %v304_v22, %v290_v25 }
 0x117   :  { %v269_v33 = vadd.f32 %v268_v30, %v250_v23  ;;  %v306_v34 = vadd.f32 %v305_v31, %v291_v28 }
 0x119   :  { %v270_v35 = vrot.slane %v269_v33, 4  ;;  %v307_v37 = vadd.f32 %v306_v34, %v292_v32 }
 0x11b   :  { %v271_v38 = vadd.f32 %v270_v35, %v269_v33  ;;  %v308_v39 = vrot.slane %v307_v37, 4 }
 0x11d   :  { %v272_v40 = vrot.slane %v271_v38, 2  ;;  %v309_v36 = vadd.f32 %v308_v39, %v307_v37 }
 0x11f   :  { %v273_v42 = vadd.f32 %v272_v40, %v271_v38  ;;  %v310_v43 = vrot.slane %v309_v36, 2 }
 0x121   :  { %v274_v46 = vrot.slane %v273_v42, 1  ;;  %v311_v47 = vadd.f32 %v310_v43, %v309_v36 }
 0x123   :  { %v275_v48 = vadd.f32 %v274_v46, %v273_v42  ;;  %v312_v16 = vrot.slane %v311_v47, 1 }
 0x125   :  { %v276_v44 = vmul.f32 0.0078125, %v275_v48  ;;  %v313_v49 = vadd.f32 %v312_v16, %v311_v47 }
 0x127   :  { %v314_v50 = vmul.f32 0.0078125, %v313_v49  ;;  %v315_v53 = vmul.f32 %v276_v44, %v276_v44 }
 0x129   :  { %v316_v55 = vsub.f32 %v314_v50, %v315_v53 }
 0x12b   :  { %v317_v56 = vmax.f32 %v316_v55, 0.0 }
 0x12d   :  { %v318_v57 = vadd.f32 1e-05, %v317_v56 }
 0x12f   :  { %643 = vrsqrt.f32 %v318_v57 }
 0x139   :  { %v644_v62 = vpop.eup %643 }
 0x13a   :  { %v320_v63 = vmul.f32 %v644_v62, %v253_v60 }
 0x13c   :  { %v321_v3 = vmul.f32 %v320_v63, %v276_v44  ;;  %v327_v5 = vrot.slane %v320_v63, %v326_v61 }
 0x13e   :  { %v322_v6 = vsub.f32 %v254_v2, %v321_v3  ;;  %v329_v7 = vmul.f32 %v327_v5, %v729_v21  ;;  %v330_v9 = vmul.f32 %v327_v5, %v735_v27  ;;  %v333_v10 = vmul.f32 %v327_v5, %v752_v41 }
 0x13f   :  { %v334_v11 = vmul.f32 %v327_v5, %v762_v51  ;;  %v335_v12 = vmul.f32 %v327_v5, %v756_v45  ;;  %v336_v13 = vmul.f32 %v327_v5, %v768_v54  ;;  %v337_v14 = vmul.f32 %v327_v5, %v765_v52 }
 0x140   :  { %v338_v15 = vmul.f32 %v327_v5, %v782_v0  ;;  %v339_v19 = vmul.f32 %v327_v5, %v785_v1  ;;  %v340_v20 = vmul.f32 %v327_v5, %v789_v4  ;;  %v341_v21 = vmul.f32 %v327_v5, %v795_v8 }
 0x141   :  { %v342_v22 = vmul.f32 %v327_v5, %v242_v17  ;;  %v343_v27 = vmul.f32 %v327_v5, %v247_v18  ;;  %v331_v41 = vmul.f32 %v327_v5, %v732_v26  ;;  %v332_v51 = vmul.f32 %v327_v5, %v740_v29 }
 0x142   :  { %v344_v24 = vmul.f32 %v327_v5, %v250_v23  ;;  %v349_v45 = vrot.slane %v322_v6, %v326_v61 }
 0x144   :  { %v351_v25 = vadd.f32 %v349_v45, %v329_v7  ;;  %v352_v54 = vadd.f32 %v349_v45, %v330_v9  ;;  %v353_v28 = vadd.f32 %v349_v45, %v331_v41  ;;  %v354_v52 = vadd.f32 %v349_v45, %v332_v51 }
 0x145   :  { %v355_v30 = vadd.f32 %v349_v45, %v333_v10  ;;  %v356_v0 = vadd.f32 %v349_v45, %v334_v11  ;;  %v357_v31 = vadd.f32 %v349_v45, %v335_v12  ;;  %v358_v1 = vadd.f32 %v349_v45, %v336_v13 }
 0x146   :  { %v359_v32 = vadd.f32 %v349_v45, %v337_v14  ;;  %v360_v4 = vadd.f32 %v349_v45, %v338_v15  ;;  %v361_v33 = vadd.f32 %v349_v45, %v339_v19  ;;  %v362_v8 = vadd.f32 %v349_v45, %v340_v20 }
 0x147   :  { %v363_v17 = vadd.f32 %v349_v45, %v341_v21  ;;  %v364_v18 = vadd.f32 %v349_v45, %v342_v22  ;;  %v365_v34 = vadd.f32 %v349_v45, %v343_v27  ;;  %v366_v26 = vadd.f32 %v349_v45, %v344_v24 }
 0x148   :  { %v367_v35 = vmax.f32 %v351_v25, 0.0  ;;  %v368_v29 = vmax.f32 %v352_v54, 0.0  ;;  %v369_v23 = vmax.f32 %v353_v28, 0.0  ;;  %v370_v37 = vmax.f32 %v354_v52, 0.0 }
 0x149   :  { %v371_v38 = vmax.f32 %v355_v30, 0.0  ;;  %v372_v39 = vmax.f32 %v356_v0, 0.0  ;;  %v373_v40 = vmax.f32 %v357_v31, 0.0  ;;  %v374_v36 = vmax.f32 %v358_v1, 0.0 }
 0x14a   :  { %v375_v42 = vmax.f32 %v359_v32, 0.0  ;;  %v376_v43 = vmax.f32 %v360_v4, 0.0  ;;  %v377_v46 = vmax.f32 %v361_v33, 0.0  ;;  %v378_v47 = vmax.f32 %v362_v8, 0.0 }
 0x14b   :  { %v379_v48 = vmax.f32 %v363_v17, 0.0  ;;  %v380_v16 = vmax.f32 %v364_v18, 0.0  ;;  %v381_v44 = vmax.f32 %v365_v34, 0.0  ;;  %v382_v49 = vmax.f32 %v366_v26, 0.0 }
 0x14c   :  { %v519_v50 = vpack.c.bf16 %v368_v29, %v367_v35  ;;  %v524_v53 = vpack.c.bf16 %v370_v37, %v369_v23  ;;  %v529_v55 = vpack.c.bf16 %v372_v39, %v371_v38  ;;  %v534_v56 = vpack.c.bf16 %v374_v36, %v373_v40 }
 0x14d   :  { %v539_v57 = vpack.c.bf16 %v376_v43, %v375_v42  ;;  %v544_v58 = vpack.c.bf16 %v378_v47, %v377_v46  ;;  %v549_v59 = vpack.c.bf16 %v380_v16, %v379_v48  ;;  %v554_v60 = vpack.c.bf16 %v382_v49, %v381_v44 }
 0x14e   :  { %520 = vst [vmem:[%s857_s5] sm:$0xff] %v519_v50   ;;  %556 = vst [vmem:[%s857_s5 + $0x8] sm:$0xff] %v524_v53  }
 0x14f   :  { %557 = vst [vmem:[%s857_s5 + $0x10] sm:$0xff] %v529_v55   ;;  %558 = vst [vmem:[%s857_s5 + $0x18] sm:$0xff] %v534_v56  }
 0x150   :  { %559 = vst [vmem:[%s857_s5 + $0x20] sm:$0xff] %v539_v57   ;;  %560 = vst [vmem:[%s857_s5 + $0x28] sm:$0xff] %v544_v58  }
 0x151   :  { %561 = vst [vmem:[%s857_s5 + $0x30] sm:$0xff] %v549_v59   ;;  %562 = vst [vmem:[%s857_s5 + $0x38] sm:$0xff] %v554_v60  }

// kernel: _lambda_.24
= control target key start
LH: loop header
LB: loop body
LE: loop exit
PB: predicated region body
PF: predicated region fallthrough
CT: control target
= control target key end

     0   :  { %s1614_s1 = inlined_call_operand.vmem [shape: bf16[256,128], index: 1, kind: input, shape index: {}]   ;;  %s1615_s0 = inlined_call_operand.vmem [shape: bf16[128,256], index: 0, kind: input, shape index: {}]   ;;  %s1616_s5 = inlined_call_operand.vmem [shape: bf16[128,128], index: 5, kind: input, shape index: {}]   ;;  %s1617_s4 = inlined_call_operand.vmem [shape: bf16[128,128], index: 4, kind: input, shape index: {}]   ;;  %s1618_s6 = inlined_call_operand.vmem [shape: f32[1,128], index: 6, kind: input, shape index: {}]   ;;  %s1619_s2 = inlined_call_operand.vmem [shape: f32[1,128], index: 2, kind: input, shape index: {}]   ;;  %s1620_s3 = inlined_call_operand.vmem [shape: f32[1,128], index: 3, kind: input, shape index: {}]   ;;  %s1621_s7 = inlined_call_operand.vmem [shape: f32[128,128], index: 7, kind: input, shape index: {}]   ;;  %s1622_s8 = inlined_call_operand.vmem [shape: bf16[128,128], index: 8, kind: output, shape index: {}]  }
   0x1   :  { %v1085_v0 = vld [vmem:[%s1614_s1 + $0x40] sm:$0xff]   ;;  %v1087_v2 = vld [vmem:[%s1614_s1 + $0x48] sm:$0xff]   ;;  %v1089_v4 = vld [vmem:[%s1614_s1 + $0x50] sm:$0xff]  }
   0x2   :  { %v1086_v1 = vld [vmem:[%s1614_s1] sm:$0xff]   ;;  %973 = vmatprep.subr.bf16.mxu0 %v1085_v0  ;;  %v1088_v3 = vld [vmem:[%s1614_s1 + $0x8] sm:$0xff]   ;;  %v1090_v5 = vld [vmem:[%s1614_s1 + $0x10] sm:$0xff]  }
   0x3   :  { %974 = vmatpush3.bf16.msra.mxu0 %v1086_v1  ;;  %v1091_v6 = vld [vmem:[%s1614_s1 + $0x58] sm:$0xff]   ;;  %v1093_v8 = vld [vmem:[%s1614_s1 + $0x60] sm:$0xff]   ;;  %v1095_v10 = vld [vmem:[%s1614_s1 + $0x68] sm:$0xff]  }
   0x4   :  { %975 = vmatprep.subr.bf16.mxu0 %v1087_v2  ;;  %v1092_v7 = vld [vmem:[%s1614_s1 + $0x18] sm:$0xff]   ;;  %v1094_v9 = vld [vmem:[%s1614_s1 + $0x20] sm:$0xff]   ;;  %v1096_v12 = vld [vmem:[%s1614_s1 + $0x28] sm:$0xff]  }
   0x5   :  { %v1103_v11 = vld [vmem:[%s1615_s0 + $0x4] ss:$8 sps:$4 sm:$0xff]   ;;  %v1097_v13 = vld [vmem:[%s1614_s1 + $0x70] sm:$0xff]   ;;  %v1099_v15 = vld [vmem:[%s1614_s1 + $0x78] sm:$0xff]  }
   0x6   :  { %286 = vmatprep.mubr.bf16.mxu0 %v1103_v11  ;;  %v1098_v14 = vld [vmem:[%s1614_s1 + $0x30] sm:$0xff]   ;;  %v1119_v16 = vld [vmem:[%s1616_s5] sm:$0xff]   ;;  %v1120_v17 = vld [vmem:[%s1616_s5 + $0x8] sm:$0xff]  }
   0x7   :  { %976 = vmatpush3.bf16.msra.mxu0 %v1088_v3  ;;  %1053 = vmatprep.subr.bf16.mxu1 %v1119_v16  ;;  %v1100_v18 = vld [vmem:[%s1614_s1 + $0x38] sm:$0xff]   ;;  %v1124_v19 = vld [vmem:[%s1616_s5 + $0x10] sm:$0xff]   ;;  %v1101_v20 = vld [vmem:[%s1615_s0] ss:$8 sps:$4 sm:$0xff]  }
   0x8   :  { %977 = vmatprep.subr.bf16.mxu0 %v1089_v4  ;;  %1054 = vmatpush3.bf16.msra.mxu1 %v1119_v16  ;;  %v1104_v21 = vld [vmem:[%s1615_s0 + $0x14] ss:$8 sps:$4 sm:$0xff]   ;;  %v1133_v23 = vld [vmem:[%s1617_s4] sm:$0xff]   ;;  %v1106_v25 = vld [vmem:[%s1615_s0 + $0x10] ss:$8 sps:$4 sm:$0xff]  }
   0x9   :  { %1055 = vmatprep.subr.bf16.mxu1 %v1120_v17  ;;  %v1125_v22 = vld [vmem:[%s1616_s5 + $0x18] sm:$0xff]   ;;  %v1129_v24 = vld [vmem:[%s1616_s5 + $0x20] sm:$0xff]   ;;  %1069 = vmatprep.mubr.bf16.mxu1 %v1133_v23  ;;  %v1130_v27 = vld [vmem:[%s1616_s5 + $0x28] sm:$0xff]  }
   0xa   :  { %v1107_v26 = vld [vmem:[%s1615_s0 + $0x24] ss:$8 sps:$4 sm:$0xff]   ;;  %v1131_v28 = vld [vmem:[%s1616_s5 + $0x30] sm:$0xff]   ;;  %v1109_v29 = vld [vmem:[%s1615_s0 + $0x20] ss:$8 sps:$4 sm:$0xff]  }
   0xb   :  { %978 = vmatpush3.bf16.msra.mxu0 %v1090_v5  ;;  %v1110_v30 = vld [vmem:[%s1615_s0 + $0x34] ss:$8 sps:$4 sm:$0xff]   ;;  %v1112_v32 = vld [vmem:[%s1615_s0 + $0x30] ss:$8 sps:$4 sm:$0xff]   ;;  %v1134_v33 = vld [vmem:[%s1617_s4 + $0x8] sm:$0xff]  }
   0xc   :  { %979 = vmatprep.subr.bf16.mxu0 %v1091_v6  ;;  %1056 = vmatpush3.bf16.msra.mxu1 %v1120_v17  ;;  %v1132_v31 = vld [vmem:[%s1616_s5 + $0x38] sm:$0xff]   ;;  %v1113_v34 = vld [vmem:[%s1615_s0 + $0x44] ss:$8 sps:$4 sm:$0xff]   ;;  %v1135_v35 = vld [vmem:[%s1617_s4 + $0x10] sm:$0xff]  }
   0xd   :  { %1057 = vmatprep.subr.bf16.mxu1 %v1124_v19  ;;  %v1115_v36 = vld [vmem:[%s1615_s0 + $0x40] ss:$8 sps:$4 sm:$0xff]   ;;  %v1136_v37 = vld [vmem:[%s1617_s4 + $0x18] sm:$0xff]   ;;  %v1121_v42 = vld [vmem:[%s1615_s0 + $0x64] ss:$8 sps:$4 sm:$0xff]  }
   0xe   :  { %v1116_v38 = vld [vmem:[%s1615_s0 + $0x54] ss:$8 sps:$4 sm:$0xff]   ;;  %v1137_v39 = vld [vmem:[%s1617_s4 + $0x20] sm:$0xff]   ;;  %v1118_v40 = vld [vmem:[%s1615_s0 + $0x50] ss:$8 sps:$4 sm:$0xff]  }
   0xf   :  { %980 = vmatpush3.bf16.msra.mxu0 %v1092_v7  ;;  %v1138_v41 = vld [vmem:[%s1617_s4 + $0x28] sm:$0xff]   ;;  %v1139_v43 = vld [vmem:[%s1617_s4 + $0x30] sm:$0xff]   ;;  %v1140_v45 = vld [vmem:[%s1617_s4 + $0x38] sm:$0xff]  }
  0x10   :  { %981 = vmatprep.subr.bf16.mxu0 %v1093_v8  ;;  %1058 = vmatpush3.bf16.msra.mxu1 %v1124_v19  ;;  %v1123_v44 = vld [vmem:[%s1615_s0 + $0x60] ss:$8 sps:$4 sm:$0xff]   ;;  %v1126_v46 = vld [vmem:[%s1615_s0 + $0x74] ss:$8 sps:$4 sm:$0xff]   ;;  %v1128_v47 = vld [vmem:[%s1615_s0 + $0x70] ss:$8 sps:$4 sm:$0xff]  }
  0x11   :  { %1059 = vmatprep.subr.bf16.mxu1 %v1125_v22 }
  0x13   :  { %982 = vmatpush3.bf16.msra.mxu0 %v1094_v9 }
  0x14   :  { %983 = vmatprep.subr.bf16.mxu0 %v1095_v10  ;;  %1060 = vmatpush3.bf16.msra.mxu1 %v1125_v22 }
  0x15   :  { %1061 = vmatprep.subr.bf16.mxu1 %v1129_v24 }
  0x17   :  { %984 = vmatpush3.bf16.msra.mxu0 %v1096_v12 }
  0x18   :  { %985 = vmatprep.subr.bf16.mxu0 %v1097_v13  ;;  %1062 = vmatpush3.bf16.msra.mxu1 %v1129_v24 }
  0x19   :  { %1063 = vmatprep.subr.bf16.mxu1 %v1130_v27 }
  0x1b   :  { %986 = vmatpush3.bf16.msra.mxu0 %v1098_v14 }
  0x1c   :  { %987 = vmatprep.subr.bf16.mxu0 %v1099_v15  ;;  %1064 = vmatpush3.bf16.msra.mxu1 %v1130_v27 }
  0x1d   :  { %1065 = vmatprep.subr.bf16.mxu1 %v1131_v28 }
  0x1f   :  { %988 = vmatpush3.bf16.msra.mxu0 %v1100_v18 }
  0x20   :  { %1066 = vmatpush3.bf16.msra.mxu1 %v1131_v28 }
  0x21   :  { %1067 = vmatprep.subr.bf16.mxu1 %v1132_v31 }
  0x22   :  { %287 = vmatmul.mubr.bf16.vlgmr.msra.gmra.mrb[0].mxu0 %v1101_v20 }
  0x23   :  { %294 = vmatprep.mubr.bf16.mxu0 %v1104_v21 }
  0x24   :  { %1068 = vmatpush3.bf16.msra.mxu1 %v1132_v31 }
  0x27   :  { %1070 = vmatmul.mubr.bf16.vlgmr.msra.gmra.mrb[0].mxu1 %v1134_v33 }
  0x28   :  { %1073 = vmatprep.mubr.bf16.mxu1 %v1135_v35 }
  0x2a   :  { %295 = vmatmul.mubr.bf16.gmra.mrb[4].mxu0 %v1106_v25 }
  0x2b   :  { %302 = vmatprep.mubr.bf16.mxu0 %v1107_v26 }
  0x2f   :  { %1074 = vmatmul.mubr.bf16.gmra.mrb[4].mxu1 %v1136_v37 }
  0x30   :  { %1077 = vmatprep.mubr.bf16.mxu1 %v1137_v39 }
  0x32   :  { %303 = vmatmul.mubr.bf16.gmra.mrb[8].mxu0 %v1109_v29 }
  0x33   :  { %310 = vmatprep.mubr.bf16.mxu0 %v1110_v30 }
  0x37   :  { %1078 = vmatmul.mubr.bf16.gmra.mrb[8].mxu1 %v1138_v41 }
  0x38   :  { %1081 = vmatprep.mubr.bf16.mxu1 %v1139_v43 }
  0x3a   :  { %311 = vmatmul.mubr.bf16.gmra.mrb[12].mxu0 %v1112_v32 }
  0x3b   :  { %318 = vmatprep.mubr.bf16.mxu0 %v1113_v34 }
  0x3f   :  { %1082 = vmatmul.mubr.bf16.gmra.mrb[12].mxu1 %v1140_v45 }
  0x42   :  { %319 = vmatmul.mubr.bf16.gmra.mrb[16].mxu0 %v1115_v36 }
  0x43   :  { %326 = vmatprep.mubr.bf16.mxu0 %v1116_v38 }
  0x4a   :  { %327 = vmatmul.mubr.bf16.gmra.mrb[20].mxu0 %v1118_v40 }
  0x4b   :  { %334 = vmatprep.mubr.bf16.mxu0 %v1121_v42 }
  0x52   :  { %335 = vmatmul.mubr.bf16.gmra.mrb[24].mxu0 %v1123_v44 }
  0x53   :  { %342 = vmatprep.mubr.bf16.mxu0 %v1126_v46 }
  0x5a   :  { %343 = vmatmul.mubr.bf16.gmra.mrb[28].mxu0 %v1128_v47 }
  0xf5   :  { %v989_v48 = vpop.f32.mrb[0].mxu0 }
  0xf6   :  { %v990_v49 = vpop.f32.mrb[1].mxu0 }
  0xf7   :  { %v1332_v50 = vadd.f32 %v990_v49, %v989_v48  ;;  %v992_v51 = vpop.f32.mrb[2].mxu0 }
  0xf8   :  { %v993_v52 = vpop.f32.mrb[3].mxu0 }
  0xf9   :  { %v1334_v53 = vadd.f32 %v993_v52, %v992_v51  ;;  %v607_v60 = vmul.f32 %v1332_v50, %v1332_v50 }
  0xfa   :  { %v1362_v19 = vpop.f32.mrb[0].mxu1 }
  0xfb   :  { %v608_v56 = vmul.f32 %v1334_v53, %v1334_v53  ;;  %v585_v61 = vadd.f32 %v1334_v53, %v1332_v50  ;;  %v1364_v21 = vpop.f32.mrb[1].mxu1 }
  0xfc   :  { %v1368_v24 = vpop.f32.mrb[2].mxu1 }
  0xfd   :  { %v995_v54 = vpop.f32.mrb[4].mxu0  ;;  %v623_v0 = vadd.f32 %v608_v56, %v607_v60  ;;  %v1370_v26 = vpop.f32.mrb[3].mxu1 }
  0xfe   :  { %v996_v55 = vpop.f32.mrb[5].mxu0 }
  0xff   :  { %v1338_v57 = vadd.f32 %v996_v55, %v995_v54  ;;  %v998_v58 = vpop.f32.mrb[6].mxu0 }
 0x100   :  { %v999_v59 = vpop.f32.mrb[7].mxu0 }
 0x101   :  { %v609_v62 = vmul.f32 %v1338_v57, %v1338_v57  ;;  %v1346_v63 = vadd.f32 %v999_v59, %v998_v58  ;;  %v586_v1 = vadd.f32 %v1338_v57, %v585_v61 }
 0x102   :  { %v1380_v35 = vpop.f32.mrb[4].mxu1 }
 0x103   :  { %v624_v2 = vadd.f32 %v623_v0, %v609_v62  ;;  %v610_v3 = vmul.f32 %v1346_v63, %v1346_v63  ;;  %v587_v6 = vadd.f32 %v1346_v63, %v586_v1  ;;  %v1382_v37 = vpop.f32.mrb[5].mxu1 }
 0x104   :  { %v1386_v40 = vpop.f32.mrb[6].mxu1 }
 0x105   :  { %v1001_v4 = vpop.f32.mrb[8].mxu0  ;;  %v625_v10 = vadd.f32 %v624_v2, %v610_v3  ;;  %v1388_v42 = vpop.f32.mrb[7].mxu1 }
 0x106   :  { %v1002_v5 = vpop.f32.mrb[9].mxu0 }
 0x107   :  { %v1352_v7 = vadd.f32 %v1002_v5, %v1001_v4  ;;  %v1004_v8 = vpop.f32.mrb[10].mxu0 }
 0x108   :  { %v1005_v9 = vpop.f32.mrb[11].mxu0 }
 0x109   :  { %v588_v11 = vadd.f32 %v1352_v7, %v587_v6  ;;  %v611_v12 = vmul.f32 %v1352_v7, %v1352_v7  ;;  %v1357_v13 = vadd.f32 %v1005_v9, %v1004_v8 }
 0x10a   :  { %v1398_v52 = vpop.f32.mrb[8].mxu1 }
 0x10b   :  { %v626_v14 = vadd.f32 %v625_v10, %v611_v12  ;;  %v589_v15 = vadd.f32 %v1357_v13, %v588_v11  ;;  %v612_v16 = vmul.f32 %v1357_v13, %v1357_v13  ;;  %v1400_v55 = vpop.f32.mrb[9].mxu1 }
 0x10c   :  { %v1404_v59 = vpop.f32.mrb[10].mxu1 }
 0x10d   :  { %v627_v17 = vadd.f32 %v626_v14, %v612_v16  ;;  %v1007_v18 = vpop.f32.mrb[12].mxu0  ;;  %v1406_v61 = vpop.f32.mrb[11].mxu1 }
 0x10e   :  { %v1008_v20 = vpop.f32.mrb[13].mxu0 }
 0x10f   :  { %v1366_v22 = vadd.f32 %v1008_v20, %v1007_v18  ;;  %v1010_v23 = vpop.f32.mrb[14].mxu0 }
 0x110   :  { %v1011_v25 = vpop.f32.mrb[15].mxu0 }
 0x111   :  { %v590_v27 = vadd.f32 %v1366_v22, %v589_v15  ;;  %v613_v28 = vmul.f32 %v1366_v22, %v1366_v22  ;;  %v1375_v29 = vadd.f32 %v1011_v25, %v1010_v23 }
 0x112   :  { %v1416_v8 = vpop.f32.mrb[12].mxu1 }
 0x113   :  { %v628_v30 = vadd.f32 %v627_v17, %v613_v28  ;;  %v591_v31 = vadd.f32 %v1375_v29, %v590_v27  ;;  %v614_v32 = vmul.f32 %v1375_v29, %v1375_v29  ;;  %v1418_v10 = vpop.f32.mrb[13].mxu1 }
 0x114   :  { %v1422_v14 = vpop.f32.mrb[14].mxu1 }
 0x115   :  { %v629_v33 = vadd.f32 %v628_v30, %v614_v32  ;;  %v1013_v34 = vpop.f32.mrb[16].mxu0  ;;  %v1424_v16 = vpop.f32.mrb[15].mxu1 }
 0x116   :  { %v1014_v36 = vpop.f32.mrb[17].mxu0 }
 0x117   :  { %v1384_v38 = vadd.f32 %v1014_v36, %v1013_v34  ;;  %v1016_v39 = vpop.f32.mrb[18].mxu0 }
 0x118   :  { %v1017_v41 = vpop.f32.mrb[19].mxu0 }
 0x119   :  { %v592_v43 = vadd.f32 %v1384_v38, %v591_v31  ;;  %v615_v44 = vmul.f32 %v1384_v38, %v1384_v38  ;;  %v1393_v45 = vadd.f32 %v1017_v41, %v1016_v39 }
 0x11b   :  { %v630_v46 = vadd.f32 %v629_v33, %v615_v44  ;;  %v593_v47 = vadd.f32 %v1393_v45, %v592_v43  ;;  %v616_v48 = vmul.f32 %v1393_v45, %v1393_v45 }
 0x11d   :  { %v631_v49 = vadd.f32 %v630_v46, %v616_v48  ;;  %v1019_v51 = vpop.f32.mrb[20].mxu0 }
 0x11e   :  { %v1020_v54 = vpop.f32.mrb[21].mxu0 }
 0x11f   :  { %v1402_v56 = vadd.f32 %v1020_v54, %v1019_v51  ;;  %v1022_v58 = vpop.f32.mrb[22].mxu0 }
 0x120   :  { %v1023_v60 = vpop.f32.mrb[23].mxu0 }
 0x121   :  { %v594_v62 = vadd.f32 %v1402_v56, %v593_v47  ;;  %v617_v0 = vmul.f32 %v1402_v56, %v1402_v56  ;;  %v1411_v1 = vadd.f32 %v1023_v60, %v1022_v58 }
 0x123   :  { %v632_v2 = vadd.f32 %v631_v49, %v617_v0  ;;  %v595_v3 = vadd.f32 %v1411_v1, %v594_v62  ;;  %v618_v4 = vmul.f32 %v1411_v1, %v1411_v1 }
 0x125   :  { %v633_v5 = vadd.f32 %v632_v2, %v618_v4  ;;  %v1025_v6 = vpop.f32.mrb[24].mxu0 }
 0x126   :  { %v1026_v9 = vpop.f32.mrb[25].mxu0 }
 0x127   :  { %v1420_v11 = vadd.f32 %v1026_v9, %v1025_v6  ;;  %v1028_v12 = vpop.f32.mrb[26].mxu0 }
 0x128   :  { %v1029_v15 = vpop.f32.mrb[27].mxu0 }
 0x129   :  { %v596_v17 = vadd.f32 %v1420_v11, %v595_v3  ;;  %v619_v18 = vmul.f32 %v1420_v11, %v1420_v11  ;;  %v1429_v20 = vadd.f32 %v1029_v15, %v1028_v12 }
 0x12b   :  { %v634_v23 = vadd.f32 %v633_v5, %v619_v18  ;;  %v597_v25 = vadd.f32 %v1429_v20, %v596_v17  ;;  %v620_v27 = vmul.f32 %v1429_v20, %v1429_v20 }
 0x12d   :  { %v635_v28 = vadd.f32 %v634_v23, %v620_v27  ;;  %v1031_v30 = vpop.f32.mrb[28].mxu0  ;;  %v654_v23 = vlaneseq  ;;  %v877_v27 = vld [vmem:[%s1618_s6] ss:$0 sm:$0xff] }
 0x12e   :  { %v1032_v31 = vpop.f32.mrb[29].mxu0 }
 0x12f   :  { %v1434_v32 = vadd.f32 %v1032_v31, %v1031_v30  ;;  %v1034_v33 = vpop.f32.mrb[30].mxu0 }
 0x130   :  { %v1035_v34 = vpop.f32.mrb[31].mxu0 }
 0x131   :  { %v598_v36 = vadd.f32 %v1434_v32, %v597_v25  ;;  %v621_v39 = vmul.f32 %v1434_v32, %v1434_v32  ;;  %v1036_v41 = vadd.f32 %v1035_v34, %v1034_v33  ;;  %v655_v25 = vshrl.u32 %v654_v23, 7 }
 0x132   :  { %v529_v33 = vadd.f32 %v1362_v19, %v877_v27  ;;  %v521_v34 = vadd.f32 %v877_v27, %v1364_v21  ;;  %v1457_v19 = vadd.f32 %v1398_v52, %v877_v27  ;;  %v1460_v21 = vadd.f32 %v877_v27, %v1400_v55 }
 0x133   :  { %v636_v43 = vadd.f32 %v635_v28, %v621_v39  ;;  %v599_v44 = vadd.f32 %v1036_v41, %v598_v36  ;;  %v622_v46 = vmul.f32 %v1036_v41, %v1036_v41  ;;  %v583_v28 = vld [vmem:[%s1619_s2] sm:$0x1]  ;;  %v656_v30 = vsub.s32 0, %v655_v25 }
 0x134   :  { %v532_v36 = vadd.f32 %v1368_v24, %v877_v27  ;;  %v1480_v52 = vadd.f32 %v877_v27, %v1424_v16 }
 0x135   :  { %v600_v47 = vrot.slane %v599_v44, 4  ;;  %v637_v48 = vadd.f32 %v636_v43, %v622_v46  ;;  %v524_v43 = vadd.f32 %v877_v27, %v1370_v26  ;;  %v537_v46 = vadd.f32 %v877_v27, %v1382_v37 }
 0x136   :  { %v1468_v37 = vadd.f32 %v877_v27, %v1406_v61 }
 0x137   :  { %v601_v49 = vadd.f32 %v600_v47, %v599_v44  ;;  %v638_v51 = vrot.slane %v637_v48, 4  ;;  %v545_v44 = vadd.f32 %v1380_v35, %v877_v27  ;;  %v584_v47 = vld [vmem:[%s1620_s3] sm:$0x1]  ;;  %v1465_v35 = vadd.f32 %v1404_v59, %v877_v27 }
 0x139   :  { %v602_v54 = vrot.slane %v601_v49, 2  ;;  %v639_v58 = vadd.f32 %v638_v51, %v637_v48  ;;  %v548_v48 = vadd.f32 %v1386_v40, %v877_v27  ;;  %v1471_v51 = vadd.f32 %v1416_v8, %v877_v27 }
 0x13a   :  { %v1474_v40 = vadd.f32 %v877_v27, %v1418_v10 }
 0x13b   :  { %v603_v60 = vadd.f32 %v602_v54, %v601_v49  ;;  %v640_v62 = vrot.slane %v639_v58, 2  ;;  %v540_v49 = vadd.f32 %v877_v27, %v1388_v42  ;;  %v1477_v42 = vadd.f32 %v1422_v14, %v877_v27 }
 0x13d   :  { %v604_v0 = vrot.slane %v603_v60, 1  ;;  %v641_v2 = vadd.f32 %v640_v62, %v639_v58 }
 0x13f   :  { %v605_v3 = vadd.f32 %v604_v0, %v603_v60  ;;  %v642_v4 = vrot.slane %v641_v2, 1 }
 0x141   :  { %v606_v5 = vmul.f32 0.0078125, %v605_v3  ;;  %v643_v6 = vadd.f32 %v642_v4, %v641_v2  ;;  %v729_v3 = vld [vmem:[%s1621_s7] sm:$0xff] }
 0x143   :  { %v644_v9 = vmul.f32 0.0078125, %v643_v6  ;;  %v645_v12 = vmul.f32 %v606_v5, %v606_v5 }
 0x145   :  { %v646_v15 = vsub.f32 %v644_v9, %v645_v12  ;;  %v730_v9 = vld [vmem:[%s1621_s7 + $0x8] sm:$0xff] }
 0x147   :  { %v647_v17 = vmax.f32 %v646_v15, 0.0  ;;  %v735_v15 = vld [vmem:[%s1621_s7 + $0x30] sm:$0xff] }
 0x149   :  { %v648_v18 = vadd.f32 1e-05, %v647_v17 }
 0x14b   :  { %1141 = vrsqrt.f32 %v648_v18  ;;  %v733_v18 = vld [vmem:[%s1621_s7 + $0x20] sm:$0xff] }
 0x155   :  { %v1142_v31 = vpop.eup %1141 }
 0x156   :  { %v650_v39 = vmul.f32 %v1142_v31, %v583_v28 }
 0x158   :  { %v651_v24 = vmul.f32 %v650_v39, %v606_v5  ;;  %v1462_v26 = vrot.slane %v650_v39, %v656_v30  ;;  %v732_v5 = vld [vmem:[%s1621_s7 + $0x18] sm:$0xff] }
 0x15a   :  { %v652_v55 = vsub.f32 %v584_v47, %v651_v24  ;;  %v1483_v54 = vmul.f32 %v1036_v41, %v1462_v26  ;;  %v661_v59 = vmul.f32 %v1338_v57, %v1462_v26  ;;  %v659_v61 = vmul.f32 %v1332_v50, %v1462_v26 }
 0x15b   :  { %v662_v8 = vmul.f32 %v1346_v63, %v1462_v26  ;;  %v660_v10 = vmul.f32 %v1334_v53, %v1462_v26  ;;  %v665_v14 = vmul.f32 %v1366_v22, %v1462_v26  ;;  %v663_v16 = vmul.f32 %v1352_v7, %v1462_v26 }
 0x15c   :  { %v1497_v41 = vrot.slane %v652_v55, %v656_v30  ;;  %v666_v57 = vmul.f32 %v1375_v29, %v1462_v26  ;;  %v664_v50 = vmul.f32 %v1357_v13, %v1462_v26  ;;  %v669_v63 = vmul.f32 %v1402_v56, %v1462_v26 }
 0x15d   :  { %v667_v53 = vmul.f32 %v1384_v38, %v1462_v26  ;;  %v670_v22 = vmul.f32 %v1411_v1, %v1462_v26  ;;  %v668_v7 = vmul.f32 %v1393_v45, %v1462_v26  ;;  %v673_v58 = vmul.f32 %v1434_v32, %v1462_v26  ;;  %v731_v32 = vld [vmem:[%s1621_s7 + $0x10] sm:$0xff] }
 0x15e   :  { %v683_v29 = vadd.f32 %v1497_v41, %v661_v59  ;;  %v681_v60 = vadd.f32 %v1497_v41, %v659_v61  ;;  %v684_v13 = vadd.f32 %v1497_v41, %v662_v8  ;;  %v682_v56 = vadd.f32 %v1497_v41, %v660_v10 }
 0x15f   :  { %v687_v62 = vadd.f32 %v1497_v41, %v665_v14  ;;  %v685_v38 = vadd.f32 %v1497_v41, %v663_v16  ;;  %v688_v1 = vadd.f32 %v1497_v41, %v666_v57  ;;  %v686_v0 = vadd.f32 %v1497_v41, %v664_v50 }
 0x160   :  { %v699_v45 = vadd.f32 %v683_v29, %v529_v33  ;;  %v697_v2 = vadd.f32 %v681_v60, %v521_v34  ;;  %v700_v4 = vadd.f32 %v684_v13, %v532_v36  ;;  %v698_v6 = vadd.f32 %v682_v56, %v524_v43  ;;  %v736_v33 = vld [vmem:[%s1621_s7 + $0x38] sm:$0xff]  ;;  %v734_v34 = vld [vmem:[%s1621_s7 + $0x28] sm:$0xff] }
 0x161   :  { %v703_v12 = vadd.f32 %v687_v62, %v545_v44  ;;  %v701_v17 = vadd.f32 %v685_v38, %v537_v46  ;;  %v704_v23 = vadd.f32 %v688_v1, %v548_v48  ;;  %v702_v25 = vadd.f32 %v686_v0, %v540_v49  ;;  %v740_v1 = vld [vmem:[%s1621_s7 + $0x58] sm:$0xff]  ;;  %v738_v0 = vld [vmem:[%s1621_s7 + $0x48] sm:$0xff] }
 0x162   :  { %v715_v27 = vmax.f32 %v699_v45, 0.0  ;;  %v713_v28 = vmax.f32 %v697_v2, 0.0  ;;  %v716_v30 = vmax.f32 %v700_v4, 0.0  ;;  %v714_v31 = vmax.f32 %v698_v6, 0.0 }
 0x163   :  { %v719_v36 = vmax.f32 %v703_v12, 0.0  ;;  %v717_v39 = vmax.f32 %v701_v17, 0.0  ;;  %v720_v43 = vmax.f32 %v704_v23, 0.0  ;;  %v718_v44 = vmax.f32 %v702_v25, 0.0  ;;  %v741_v12 = vld [vmem:[%s1621_s7 + $0x60] sm:$0xff] }
 0x164   :  { %v747_v46 = vmul.f32 %v731_v32, %v715_v27  ;;  %v745_v47 = vmul.f32 %v729_v3, %v713_v28  ;;  %v748_v48 = vmul.f32 %v732_v5, %v716_v30  ;;  %v746_v49 = vmul.f32 %v730_v9, %v714_v31 }
 0x165   :  { %v751_v24 = vmul.f32 %v735_v15, %v719_v36  ;;  %v749_v55 = vmul.f32 %v733_v18, %v717_v39  ;;  %v752_v59 = vmul.f32 %v736_v33, %v720_v43  ;;  %v750_v61 = vmul.f32 %v734_v34, %v718_v44  ;;  %v742_v18 = vld [vmem:[%s1621_s7 + $0x68] sm:$0xff] }
 0x166   :  { %v934_v8 = vpack.c.bf16 %v748_v48, %v747_v46  ;;  %v929_v10 = vpack.c.bf16 %v746_v49, %v745_v47  ;;  %v691_v14 = vadd.f32 %v1497_v41, %v669_v63  ;;  %v689_v16 = vadd.f32 %v1497_v41, %v667_v53 }
 0x167   :  { %v944_v57 = vpack.c.bf16 %v752_v59, %v751_v24  ;;  %v939_v50 = vpack.c.bf16 %v750_v61, %v749_v55  ;;  %v692_v29 = vadd.f32 %v1497_v41, %v670_v22  ;;  %v690_v60 = vadd.f32 %v1497_v41, %v668_v7  ;;  %v739_v22 = vld [vmem:[%s1621_s7 + $0x50] sm:$0xff] }
 0x168   :  { %966 = vst [vmem:[%s1622_s8 + $0x8] sm:$0xff] %v934_v8   ;;  %930 = vst [vmem:[%s1622_s8] sm:$0xff] %v929_v10   ;;  %v707_v13 = vadd.f32 %v691_v14, %v1457_v19  ;;  %v705_v63 = vadd.f32 %v689_v16, %v1460_v21  ;;  %v695_v53 = vadd.f32 %v1497_v41, %v673_v58  ;;  %v737_v19 = vld [vmem:[%s1621_s7 + $0x40] sm:$0xff] }
 0x169   :  { %v671_v56 = vmul.f32 %v1420_v11, %v1462_v26  ;;  %968 = vst [vmem:[%s1622_s8 + $0x18] sm:$0xff] %v944_v57   ;;  %967 = vst [vmem:[%s1622_s8 + $0x10] sm:$0xff] %v939_v50   ;;  %v708_v21 = vadd.f32 %v692_v29, %v1465_v35  ;;  %v706_v11 = vadd.f32 %v690_v60, %v1468_v37 }
 0x16a   :  { %v696_v7 = vadd.f32 %v1497_v41, %v1483_v54  ;;  %v672_v58 = vmul.f32 %v1429_v20, %v1462_v26  ;;  %v723_v62 = vmax.f32 %v707_v13, 0.0  ;;  %v721_v38 = vmax.f32 %v705_v63, 0.0  ;;  %v743_v20 = vld [vmem:[%s1621_s7 + $0x70] sm:$0xff] }
 0x16b   :  { %v711_v35 = vadd.f32 %v695_v53, %v1471_v51  ;;  %v693_v37 = vadd.f32 %v1497_v41, %v671_v56  ;;  %v724_v45 = vmax.f32 %v708_v21, 0.0  ;;  %v722_v32 = vmax.f32 %v706_v11, 0.0  ;;  %v744_v51 = vld [vmem:[%s1621_s7 + $0x78] sm:$0xff] }
 0x16c   :  { %v712_v26 = vadd.f32 %v696_v7, %v1477_v42  ;;  %v694_v54 = vadd.f32 %v1497_v41, %v672_v58  ;;  %v755_v2 = vmul.f32 %v739_v22, %v723_v62  ;;  %v753_v3 = vmul.f32 %v737_v19, %v721_v38 }
 0x16d   :  { %v727_v4 = vmax.f32 %v711_v35, 0.0  ;;  %v709_v5 = vadd.f32 %v693_v37, %v1474_v40  ;;  %v756_v6 = vmul.f32 %v740_v1, %v724_v45  ;;  %v754_v9 = vmul.f32 %v738_v0, %v722_v32 }
 0x16e   :  { %v728_v15 = vmax.f32 %v712_v26, 0.0  ;;  %v710_v42 = vadd.f32 %v694_v54, %v1480_v52 }
 0x16f   :  { %v759_v17 = vmul.f32 %v743_v20, %v727_v4  ;;  %v725_v41 = vmax.f32 %v709_v5, 0.0  ;;  %v954_v40 = vpack.c.bf16 %v756_v6, %v755_v2  ;;  %v949_v23 = vpack.c.bf16 %v754_v9, %v753_v3 }
 0x170   :  { %v760_v25 = vmul.f32 %v744_v51, %v728_v15  ;;  %v726_v27 = vmax.f32 %v710_v42, 0.0 }
 0x171   :  { %v757_v28 = vmul.f32 %v741_v12, %v725_v41  ;;  %970 = vst [vmem:[%s1622_s8 + $0x28] sm:$0xff] %v954_v40   ;;  %969 = vst [vmem:[%s1622_s8 + $0x20] sm:$0xff] %v949_v23  }
 0x172   :  { %v964_v52 = vpack.c.bf16 %v760_v25, %v759_v17  ;;  %v758_v30 = vmul.f32 %v742_v18, %v726_v27 }
 0x174   :  { %972 = vst [vmem:[%s1622_s8 + $0x38] sm:$0xff] %v964_v52   ;;  %v959_v31 = vpack.c.bf16 %v758_v30, %v757_v28 }
 0x176   :  { %971 = vst [vmem:[%s1622_s8 + $0x30] sm:$0xff] %v959_v31  }

// kernel: _lambda_.25
= control target key start
LH: loop header
LB: loop body
LE: loop exit
PB: predicated region body
PF: predicated region fallthrough
CT: control target
= control target key end

     0   :  { %s1052_s1 = inlined_call_operand.vmem [shape: bf16[256,128], index: 1, kind: input, shape index: {}]   ;;  %s1053_s0 = inlined_call_operand.vmem [shape: bf16[128,256], index: 0, kind: input, shape index: {}]   ;;  %s1054_s2 = inlined_call_operand.vmem [shape: f32[1,128], index: 2, kind: input, shape index: {}, may-alias: {2,4}]   ;;  %s1055_s3 = inlined_call_operand.vmem [shape: f32[1,128], index: 3, kind: input, shape index: {}]   ;;  %s1056_s4 = inlined_call_operand.vmem [shape: f32[1,128], index: 4, kind: input, shape index: {}, may-alias: {2,4}]   ;;  %s1057_s5 = inlined_call_operand.vmem [shape: bf16[128,128], index: 5, kind: output, shape index: {}]  }
   0x1   :  { %v755_v0 = vld [vmem:[%s1052_s1 + $0x40] sm:$0xff]   ;;  %v757_v2 = vld [vmem:[%s1052_s1 + $0x48] sm:$0xff]   ;;  %v759_v4 = vld [vmem:[%s1052_s1 + $0x50] sm:$0xff]  }
   0x2   :  { %v756_v1 = vld [vmem:[%s1052_s1] sm:$0xff]   ;;  %675 = vmatprep.subr.bf16.mxu0 %v755_v0  ;;  %739 = vmatprep.subr.bf16.mxu1 %v755_v0  ;;  %v758_v3 = vld [vmem:[%s1052_s1 + $0x8] sm:$0xff]   ;;  %v760_v5 = vld [vmem:[%s1052_s1 + $0x10] sm:$0xff]  }
   0x3   :  { %676 = vmatpush3.bf16.msra.mxu0 %v756_v1  ;;  %747 = vmatpush3.bf16.msra.mxu1 %v756_v1  ;;  %v761_v6 = vld [vmem:[%s1052_s1 + $0x58] sm:$0xff]   ;;  %v763_v8 = vld [vmem:[%s1052_s1 + $0x60] sm:$0xff]   ;;  %v765_v10 = vld [vmem:[%s1052_s1 + $0x68] sm:$0xff]  }
   0x4   :  { %677 = vmatprep.subr.bf16.mxu0 %v757_v2  ;;  %740 = vmatprep.subr.bf16.mxu1 %v757_v2  ;;  %v762_v7 = vld [vmem:[%s1052_s1 + $0x18] sm:$0xff]   ;;  %v764_v9 = vld [vmem:[%s1052_s1 + $0x20] sm:$0xff]   ;;  %v766_v12 = vld [vmem:[%s1052_s1 + $0x28] sm:$0xff]  }
   0x5   :  { %v773_v11 = vld [vmem:[%s1053_s0 + $0x4] ss:$8 sps:$4 sm:$0xff]   ;;  %v767_v14 = vld [vmem:[%s1052_s1 + $0x70] sm:$0xff]   ;;  %v769_v16 = vld [vmem:[%s1052_s1 + $0x78] sm:$0xff]  }
   0x6   :  { %v779_v13 = vld [vmem:[%s1053_s0 + $0x44] ss:$8 sps:$4 sm:$0xff]   ;;  %284 = vmatprep.mubr.bf16.mxu0 %v773_v11  ;;  %v768_v15 = vld [vmem:[%s1052_s1 + $0x30] sm:$0xff]   ;;  %v770_v17 = vld [vmem:[%s1052_s1 + $0x38] sm:$0xff]  }
   0x7   :  { %678 = vmatpush3.bf16.msra.mxu0 %v758_v3  ;;  %748 = vmatpush3.bf16.msra.mxu1 %v758_v3  ;;  %v771_v18 = vld [vmem:[%s1053_s0] ss:$8 sps:$4 sm:$0xff]   ;;  %v774_v20 = vld [vmem:[%s1053_s0 + $0x14] ss:$8 sps:$4 sm:$0xff]   ;;  %v776_v22 = vld [vmem:[%s1053_s0 + $0x10] ss:$8 sps:$4 sm:$0xff]  }
   0x8   :  { %679 = vmatprep.subr.bf16.mxu0 %v759_v4  ;;  %741 = vmatprep.subr.bf16.mxu1 %v759_v4  ;;  %v777_v19 = vld [vmem:[%s1053_s0 + $0x40] ss:$8 sps:$4 sm:$0xff]   ;;  %v783_v21 = vld [vmem:[%s1053_s0 + $0x54] ss:$8 sps:$4 sm:$0xff]   ;;  %v785_v23 = vld [vmem:[%s1053_s0 + $0x50] ss:$8 sps:$4 sm:$0xff]  }
   0x9   :  { %316 = vmatprep.mubr.bf16.mxu1 %v779_v13  ;;  %v780_v24 = vld [vmem:[%s1053_s0 + $0x24] ss:$8 sps:$4 sm:$0xff]   ;;  %v782_v26 = vld [vmem:[%s1053_s0 + $0x20] ss:$8 sps:$4 sm:$0xff]   ;;  %v786_v28 = vld [vmem:[%s1053_s0 + $0x34] ss:$8 sps:$4 sm:$0xff]  }
   0xa   :  { %v789_v25 = vld [vmem:[%s1053_s0 + $0x64] ss:$8 sps:$4 sm:$0xff]   ;;  %v791_v27 = vld [vmem:[%s1053_s0 + $0x60] ss:$8 sps:$4 sm:$0xff]   ;;  %v792_v29 = vld [vmem:[%s1053_s0 + $0x74] ss:$8 sps:$4 sm:$0xff]  }
   0xb   :  { %680 = vmatpush3.bf16.msra.mxu0 %v760_v5  ;;  %749 = vmatpush3.bf16.msra.mxu1 %v760_v5  ;;  %v788_v30 = vld [vmem:[%s1053_s0 + $0x30] ss:$8 sps:$4 sm:$0xff]   ;;  %v930_v44 = vld [vmem:[%s1054_s2] ss:$0 sm:$0xff] }
   0xc   :  { %681 = vmatprep.subr.bf16.mxu0 %v761_v6  ;;  %742 = vmatprep.subr.bf16.mxu1 %v761_v6  ;;  %v794_v31 = vld [vmem:[%s1053_s0 + $0x70] ss:$8 sps:$4 sm:$0xff]  }
   0xf   :  { %682 = vmatpush3.bf16.msra.mxu0 %v762_v7  ;;  %750 = vmatpush3.bf16.msra.mxu1 %v762_v7 }
  0x10   :  { %683 = vmatprep.subr.bf16.mxu0 %v763_v8  ;;  %743 = vmatprep.subr.bf16.mxu1 %v763_v8 }
  0x13   :  { %684 = vmatpush3.bf16.msra.mxu0 %v764_v9  ;;  %751 = vmatpush3.bf16.msra.mxu1 %v764_v9 }
  0x14   :  { %685 = vmatprep.subr.bf16.mxu0 %v765_v10  ;;  %744 = vmatprep.subr.bf16.mxu1 %v765_v10 }
  0x17   :  { %686 = vmatpush3.bf16.msra.mxu0 %v766_v12  ;;  %752 = vmatpush3.bf16.msra.mxu1 %v766_v12 }
  0x18   :  { %687 = vmatprep.subr.bf16.mxu0 %v767_v14  ;;  %745 = vmatprep.subr.bf16.mxu1 %v767_v14 }
  0x1b   :  { %688 = vmatpush3.bf16.msra.mxu0 %v768_v15  ;;  %753 = vmatpush3.bf16.msra.mxu1 %v768_v15 }
  0x1c   :  { %689 = vmatprep.subr.bf16.mxu0 %v769_v16  ;;  %746 = vmatprep.subr.bf16.mxu1 %v769_v16 }
  0x1f   :  { %690 = vmatpush3.bf16.msra.mxu0 %v770_v17  ;;  %754 = vmatpush3.bf16.msra.mxu1 %v770_v17 }
  0x22   :  { %285 = vmatmul.mubr.bf16.vlgmr.msra.gmra.mrb[0].mxu0 %v771_v18  ;;  %317 = vmatmul.mubr.bf16.vlgmr.msra.gmra.mrb[0].mxu1 %v777_v19 }
  0x23   :  { %292 = vmatprep.mubr.bf16.mxu0 %v774_v20  ;;  %324 = vmatprep.mubr.bf16.mxu1 %v783_v21 }
  0x2a   :  { %293 = vmatmul.mubr.bf16.gmra.mrb[4].mxu0 %v776_v22  ;;  %325 = vmatmul.mubr.bf16.gmra.mrb[4].mxu1 %v785_v23 }
  0x2b   :  { %300 = vmatprep.mubr.bf16.mxu0 %v780_v24  ;;  %332 = vmatprep.mubr.bf16.mxu1 %v789_v25 }
  0x32   :  { %301 = vmatmul.mubr.bf16.gmra.mrb[8].mxu0 %v782_v26  ;;  %333 = vmatmul.mubr.bf16.gmra.mrb[8].mxu1 %v791_v27 }
  0x33   :  { %308 = vmatprep.mubr.bf16.mxu0 %v786_v28  ;;  %340 = vmatprep.mubr.bf16.mxu1 %v792_v29 }
  0x3a   :  { %309 = vmatmul.mubr.bf16.gmra.mrb[12].mxu0 %v788_v30  ;;  %341 = vmatmul.mubr.bf16.gmra.mrb[12].mxu1 %v794_v31 }
  0xf5   :  { %v691_v32 = vpop.f32.mrb[0].mxu0  ;;  %v715_v33 = vpop.f32.mrb[0].mxu1 }
  0xf6   :  { %v692_v34 = vpop.f32.mrb[1].mxu0  ;;  %v716_v35 = vpop.f32.mrb[1].mxu1 }
  0xf7   :  { %v693_v36 = vadd.f32 %v692_v34, %v691_v32  ;;  %v694_v37 = vpop.f32.mrb[2].mxu0  ;;  %v923_v38 = vadd.f32 %v716_v35, %v715_v33  ;;  %v718_v39 = vpop.f32.mrb[2].mxu1 }
  0xf8   :  { %v695_v40 = vpop.f32.mrb[3].mxu0  ;;  %v719_v41 = vpop.f32.mrb[3].mxu1 }
  0xf9   :  { %v696_v42 = vadd.f32 %v695_v40, %v694_v37  ;;  %v925_v43 = vadd.f32 %v719_v41, %v718_v39  ;;  %v936_v50 = vadd.f32 %v693_v36, %v930_v44  ;;  %v973_v41 = vadd.f32 %v923_v38, %v930_v44 }
  0xfb   :  { %v933_v45 = vadd.f32 %v696_v42, %v930_v44  ;;  %v373_v61 = vmul.f32 %v936_v50, %v936_v50  ;;  %v381_v38 = vmul.f32 %v973_v41, %v973_v41 }
  0xfd   :  { %v697_v46 = vpop.f32.mrb[4].mxu0  ;;  %v721_v47 = vpop.f32.mrb[4].mxu1  ;;  %v374_v57 = vmul.f32 %v933_v45, %v933_v45  ;;  %v351_v62 = vadd.f32 %v933_v45, %v936_v50 }
  0xfe   :  { %v698_v48 = vpop.f32.mrb[5].mxu0  ;;  %v722_v49 = vpop.f32.mrb[5].mxu1 }
  0xff   :  { %v699_v51 = vadd.f32 %v698_v48, %v697_v46  ;;  %v700_v52 = vpop.f32.mrb[6].mxu0  ;;  %v723_v53 = vadd.f32 %v722_v49, %v721_v47  ;;  %v724_v54 = vpop.f32.mrb[6].mxu1  ;;  %v389_v1 = vadd.f32 %v374_v57, %v373_v61  ;;  %v983_v48 = vadd.f32 %v925_v43, %v930_v44 }
 0x100   :  { %v701_v55 = vpop.f32.mrb[7].mxu0  ;;  %v725_v56 = vpop.f32.mrb[7].mxu1 }
 0x101   :  { %v941_v58 = vadd.f32 %v699_v51, %v930_v44  ;;  %v702_v59 = vadd.f32 %v701_v55, %v700_v52  ;;  %v726_v60 = vadd.f32 %v725_v56, %v724_v54  ;;  %v991_v54 = vadd.f32 %v723_v53, %v930_v44 }
 0x102   :  { %v382_v57 = vmul.f32 %v983_v48, %v983_v48 }
 0x103   :  { %v375_v63 = vmul.f32 %v941_v58, %v941_v58  ;;  %v950_v0 = vadd.f32 %v702_v59, %v930_v44  ;;  %v352_v2 = vadd.f32 %v351_v62, %v941_v58  ;;  %v997_v43 = vadd.f32 %v726_v60, %v930_v44 }
 0x104   :  { %v383_v62 = vmul.f32 %v991_v54, %v991_v54 }
 0x105   :  { %v703_v3 = vpop.f32.mrb[8].mxu0  ;;  %v727_v4 = vpop.f32.mrb[8].mxu1  ;;  %v390_v7 = vadd.f32 %v389_v1, %v375_v63  ;;  %v376_v8 = vmul.f32 %v950_v0, %v950_v0  ;;  %v353_v15 = vadd.f32 %v352_v2, %v950_v0 }
 0x106   :  { %v704_v5 = vpop.f32.mrb[9].mxu0  ;;  %v728_v6 = vpop.f32.mrb[9].mxu1 }
 0x107   :  { %v705_v9 = vadd.f32 %v704_v5, %v703_v3  ;;  %v706_v10 = vpop.f32.mrb[10].mxu0  ;;  %v729_v11 = vadd.f32 %v728_v6, %v727_v4  ;;  %v730_v12 = vpop.f32.mrb[10].mxu1  ;;  %v391_v19 = vadd.f32 %v390_v7, %v376_v8  ;;  %v384_v3 = vmul.f32 %v997_v43, %v997_v43 }
 0x108   :  { %v707_v13 = vpop.f32.mrb[11].mxu0  ;;  %v731_v14 = vpop.f32.mrb[11].mxu1 }
 0x109   :  { %v957_v16 = vadd.f32 %v705_v9, %v930_v44  ;;  %v708_v17 = vadd.f32 %v707_v13, %v706_v10  ;;  %v732_v18 = vadd.f32 %v731_v14, %v730_v12  ;;  %v335_v1 = vadd.f32 %v729_v11, %v930_v44 }
 0x10b   :  { %v354_v20 = vadd.f32 %v353_v15, %v957_v16  ;;  %v377_v21 = vmul.f32 %v957_v16, %v957_v16  ;;  %v963_v22 = vadd.f32 %v708_v17, %v930_v44  ;;  %v338_v2 = vadd.f32 %v732_v18, %v930_v44 }
 0x10c   :  { %v385_v7 = vmul.f32 %v335_v1, %v335_v1 }
 0x10d   :  { %v392_v23 = vadd.f32 %v391_v19, %v377_v21  ;;  %v355_v24 = vadd.f32 %v354_v20, %v963_v22  ;;  %v378_v25 = vmul.f32 %v963_v22, %v963_v22  ;;  %v709_v26 = vpop.f32.mrb[12].mxu0  ;;  %v733_v27 = vpop.f32.mrb[12].mxu1  ;;  %v386_v9 = vmul.f32 %v338_v2, %v338_v2 }
 0x10e   :  { %v710_v28 = vpop.f32.mrb[13].mxu0  ;;  %v734_v29 = vpop.f32.mrb[13].mxu1 }
 0x10f   :  { %v393_v30 = vadd.f32 %v392_v23, %v378_v25  ;;  %v711_v31 = vadd.f32 %v710_v28, %v709_v26  ;;  %v712_v32 = vpop.f32.mrb[14].mxu0  ;;  %v735_v33 = vadd.f32 %v734_v29, %v733_v27  ;;  %v736_v34 = vpop.f32.mrb[14].mxu1 }
 0x110   :  { %v713_v35 = vpop.f32.mrb[15].mxu0  ;;  %v737_v36 = vpop.f32.mrb[15].mxu1 }
 0x111   :  { %v969_v37 = vadd.f32 %v711_v31, %v930_v44  ;;  %v714_v39 = vadd.f32 %v713_v35, %v712_v32  ;;  %v738_v40 = vadd.f32 %v737_v36, %v736_v34  ;;  %v343_v5 = vadd.f32 %v735_v33, %v930_v44 }
 0x113   :  { %v356_v42 = vadd.f32 %v355_v24, %v969_v37  ;;  %v379_v46 = vmul.f32 %v969_v37, %v969_v37  ;;  %v979_v47 = vadd.f32 %v714_v39, %v930_v44  ;;  %v387_v13 = vmul.f32 %v343_v5, %v343_v5 }
 0x114   :  { %v346_v11 = vadd.f32 %v738_v40, %v930_v44 }
 0x115   :  { %v394_v49 = vadd.f32 %v393_v30, %v379_v46  ;;  %v357_v51 = vadd.f32 %v356_v42, %v979_v47  ;;  %v380_v52 = vmul.f32 %v979_v47, %v979_v47  ;;  %v420_v42 = vlaneseq }
 0x116   :  { %v388_v19 = vmul.f32 %v346_v11, %v346_v11 }
 0x117   :  { %v358_v55 = vadd.f32 %v357_v51, %v973_v41  ;;  %v395_v56 = vadd.f32 %v394_v49, %v380_v52  ;;  %v421_v46 = vshrl.u32 %v420_v42, 7  ;;  %v349_v49 = vld [vmem:[%s1055_s3] sm:$0x1] }
 0x119   :  { %v359_v59 = vadd.f32 %v358_v55, %v983_v48  ;;  %v396_v61 = vadd.f32 %v395_v56, %v381_v38  ;;  %v422_v51 = vsub.s32 0, %v421_v46  ;;  %v350_v55 = vld [vmem:[%s1056_s4] sm:$0x1] }
 0x11b   :  { %v397_v63 = vadd.f32 %v396_v61, %v382_v57  ;;  %v360_v53 = vadd.f32 %v359_v59, %v991_v54 }
 0x11d   :  { %v361_v4 = vadd.f32 %v360_v53, %v997_v43  ;;  %v398_v60 = vadd.f32 %v397_v63, %v383_v62 }
 0x11f   :  { %v362_v6 = vadd.f32 %v361_v4, %v335_v1  ;;  %v399_v8 = vadd.f32 %v398_v60, %v384_v3 }
 0x121   :  { %v400_v10 = vadd.f32 %v399_v8, %v385_v7  ;;  %v363_v12 = vadd.f32 %v362_v6, %v338_v2 }
 0x123   :  { %v401_v14 = vadd.f32 %v400_v10, %v386_v9  ;;  %v364_v15 = vadd.f32 %v363_v12, %v343_v5 }
 0x125   :  { %v402_v17 = vadd.f32 %v401_v14, %v387_v13  ;;  %v365_v18 = vadd.f32 %v364_v15, %v346_v11 }
 0x127   :  { %v366_v20 = vrot.slane %v365_v18, 4  ;;  %v403_v21 = vadd.f32 %v402_v17, %v388_v19 }
 0x129   :  { %v367_v23 = vadd.f32 %v366_v20, %v365_v18  ;;  %v404_v24 = vrot.slane %v403_v21, 4 }
 0x12b   :  { %v368_v25 = vrot.slane %v367_v23, 2  ;;  %v405_v26 = vadd.f32 %v404_v24, %v403_v21 }
 0x12d   :  { %v369_v27 = vadd.f32 %v368_v25, %v367_v23  ;;  %v406_v28 = vrot.slane %v405_v26, 2 }
 0x12f   :  { %v370_v29 = vrot.slane %v369_v27, 1  ;;  %v407_v30 = vadd.f32 %v406_v28, %v405_v26 }
 0x131   :  { %v371_v31 = vadd.f32 %v370_v29, %v369_v27  ;;  %v408_v32 = vrot.slane %v407_v30, 1 }
 0x133   :  { %v372_v33 = vmul.f32 0.0078125, %v371_v31  ;;  %v409_v34 = vadd.f32 %v408_v32, %v407_v30 }
 0x135   :  { %v410_v44 = vmul.f32 0.0078125, %v409_v34  ;;  %v411_v35 = vmul.f32 %v372_v33, %v372_v33 }
 0x137   :  { %v412_v36 = vsub.f32 %v410_v44, %v411_v35 }
 0x139   :  { %v413_v39 = vmax.f32 %v412_v36, 0.0 }
 0x13b   :  { %v414_v40 = vadd.f32 1e-05, %v413_v39 }
 0x13d   :  { %795 = vrsqrt.f32 %v414_v40 }
 0x147   :  { %v796_v52 = vpop.eup %795 }
 0x148   :  { %v416_v38 = vmul.f32 %v796_v52, %v349_v49 }
 0x14a   :  { %v417_v56 = vmul.f32 %v416_v38, %v372_v33  ;;  %v423_v57 = vrot.slane %v416_v38, %v422_v51 }
 0x14c   :  { %v418_v59 = vsub.f32 %v350_v55, %v417_v56  ;;  %v425_v61 = vmul.f32 %v423_v57, %v936_v50  ;;  %v426_v62 = vmul.f32 %v423_v57, %v933_v45  ;;  %v429_v63 = vmul.f32 %v423_v57, %v957_v16 }
 0x14d   :  { %v430_v53 = vmul.f32 %v423_v57, %v963_v22  ;;  %v431_v3 = vmul.f32 %v423_v57, %v969_v37  ;;  %v432_v4 = vmul.f32 %v423_v57, %v979_v47  ;;  %v433_v60 = vmul.f32 %v423_v57, %v973_v41 }
 0x14e   :  { %v434_v6 = vmul.f32 %v423_v57, %v983_v48  ;;  %v435_v7 = vmul.f32 %v423_v57, %v991_v54  ;;  %v436_v8 = vmul.f32 %v423_v57, %v997_v43  ;;  %v437_v9 = vmul.f32 %v423_v57, %v335_v1 }
 0x14f   :  { %v438_v50 = vmul.f32 %v423_v57, %v338_v2  ;;  %v439_v10 = vmul.f32 %v423_v57, %v343_v5  ;;  %v427_v45 = vmul.f32 %v423_v57, %v941_v58  ;;  %v428_v16 = vmul.f32 %v423_v57, %v950_v0 }
 0x150   :  { %v440_v22 = vmul.f32 %v423_v57, %v346_v11  ;;  %v445_v12 = vrot.slane %v418_v59, %v422_v51 }
 0x152   :  { %v447_v37 = vadd.f32 %v445_v12, %v425_v61  ;;  %v448_v13 = vadd.f32 %v445_v12, %v426_v62  ;;  %v449_v47 = vadd.f32 %v445_v12, %v427_v45  ;;  %v450_v14 = vadd.f32 %v445_v12, %v428_v16 }
 0x153   :  { %v451_v41 = vadd.f32 %v445_v12, %v429_v63  ;;  %v452_v15 = vadd.f32 %v445_v12, %v430_v53  ;;  %v453_v48 = vadd.f32 %v445_v12, %v431_v3  ;;  %v454_v17 = vadd.f32 %v445_v12, %v432_v4 }
 0x154   :  { %v455_v54 = vadd.f32 %v445_v12, %v433_v60  ;;  %v456_v18 = vadd.f32 %v445_v12, %v434_v6  ;;  %v457_v43 = vadd.f32 %v445_v12, %v435_v7  ;;  %v458_v1 = vadd.f32 %v445_v12, %v436_v8 }
 0x155   :  { %v459_v2 = vadd.f32 %v445_v12, %v437_v9  ;;  %v460_v5 = vadd.f32 %v445_v12, %v438_v50  ;;  %v461_v19 = vadd.f32 %v445_v12, %v439_v10  ;;  %v462_v58 = vadd.f32 %v445_v12, %v440_v22 }
 0x156   :  { %v463_v20 = vmax.f32 %v447_v37, 0.0  ;;  %v464_v0 = vmax.f32 %v448_v13, 0.0  ;;  %v465_v11 = vmax.f32 %v449_v47, 0.0  ;;  %v466_v21 = vmax.f32 %v450_v14, 0.0 }
 0x157   :  { %v467_v23 = vmax.f32 %v451_v41, 0.0  ;;  %v468_v24 = vmax.f32 %v452_v15, 0.0  ;;  %v469_v25 = vmax.f32 %v453_v48, 0.0  ;;  %v470_v26 = vmax.f32 %v454_v17, 0.0 }
 0x158   :  { %v471_v27 = vmax.f32 %v455_v54, 0.0  ;;  %v472_v28 = vmax.f32 %v456_v18, 0.0  ;;  %v473_v29 = vmax.f32 %v457_v43, 0.0  ;;  %v474_v30 = vmax.f32 %v458_v1, 0.0 }
 0x159   :  { %v475_v31 = vmax.f32 %v459_v2, 0.0  ;;  %v476_v32 = vmax.f32 %v460_v5, 0.0  ;;  %v477_v33 = vmax.f32 %v461_v19, 0.0  ;;  %v478_v34 = vmax.f32 %v462_v58, 0.0 }
 0x15a   :  { %v631_v44 = vpack.c.bf16 %v464_v0, %v463_v20  ;;  %v636_v35 = vpack.c.bf16 %v466_v21, %v465_v11  ;;  %v641_v36 = vpack.c.bf16 %v468_v24, %v467_v23  ;;  %v646_v39 = vpack.c.bf16 %v470_v26, %v469_v25 }
 0x15b   :  { %v651_v40 = vpack.c.bf16 %v472_v28, %v471_v27  ;;  %v656_v42 = vpack.c.bf16 %v474_v30, %v473_v29  ;;  %v661_v46 = vpack.c.bf16 %v476_v32, %v475_v31  ;;  %v666_v49 = vpack.c.bf16 %v478_v34, %v477_v33 }
 0x15c   :  { %632 = vst [vmem:[%s1057_s5] sm:$0xff] %v631_v44   ;;  %668 = vst [vmem:[%s1057_s5 + $0x8] sm:$0xff] %v636_v35  }
 0x15d   :  { %669 = vst [vmem:[%s1057_s5 + $0x10] sm:$0xff] %v641_v36   ;;  %670 = vst [vmem:[%s1057_s5 + $0x18] sm:$0xff] %v646_v39  }
 0x15e   :  { %671 = vst [vmem:[%s1057_s5 + $0x20] sm:$0xff] %v651_v40   ;;  %672 = vst [vmem:[%s1057_s5 + $0x28] sm:$0xff] %v656_v42  }
 0x15f   :  { %673 = vst [vmem:[%s1057_s5 + $0x30] sm:$0xff] %v661_v46   ;;  %674 = vst [vmem:[%s1057_s5 + $0x38] sm:$0xff] %v666_v49  }

// kernel: _lambda_.26
= control target key start
LH: loop header
LB: loop body
LE: loop exit
PB: predicated region body
PF: predicated region fallthrough
CT: control target
= control target key end

     0   :  { %s1264_s1 = inlined_call_operand.vmem [shape: bf16[256,128], index: 1, kind: input, shape index: {}]   ;;  %s1265_s0 = inlined_call_operand.vmem [shape: bf16[128,256], index: 0, kind: input, shape index: {}]   ;;  %s1266_s2 = inlined_call_operand.vmem [shape: f32[1,128], index: 2, kind: input, shape index: {}]   ;;  %s1267_s4 = inlined_call_operand.vmem [shape: bf16[128,128], index: 4, kind: input, shape index: {}]   ;;  %s1268_s3 = inlined_call_operand.vmem [shape: f32[1,128], index: 3, kind: input, shape index: {}]   ;;  %s1269_s5 = inlined_call_operand.vmem [shape: f32[128,128], index: 5, kind: input, shape index: {}]   ;;  %s1270_s6 = inlined_call_operand.vmem [shape: bf16[128,128], index: 6, kind: output, shape index: {}]  }
   0x1   :  { %v869_v0 = vld [vmem:[%s1264_s1 + $0x40] sm:$0xff]   ;;  %v871_v2 = vld [vmem:[%s1264_s1 + $0x48] sm:$0xff]   ;;  %v873_v4 = vld [vmem:[%s1264_s1 + $0x50] sm:$0xff]  }
   0x2   :  { %v870_v1 = vld [vmem:[%s1264_s1] sm:$0xff]   ;;  %789 = vmatprep.subr.bf16.mxu0 %v869_v0  ;;  %853 = vmatprep.subr.bf16.mxu1 %v869_v0  ;;  %v872_v3 = vld [vmem:[%s1264_s1 + $0x8] sm:$0xff]   ;;  %v874_v5 = vld [vmem:[%s1264_s1 + $0x10] sm:$0xff]  }
   0x3   :  { %790 = vmatpush3.bf16.msra.mxu0 %v870_v1  ;;  %861 = vmatpush3.bf16.msra.mxu1 %v870_v1  ;;  %v875_v6 = vld [vmem:[%s1264_s1 + $0x58] sm:$0xff]   ;;  %v877_v8 = vld [vmem:[%s1264_s1 + $0x60] sm:$0xff]   ;;  %v879_v10 = vld [vmem:[%s1264_s1 + $0x68] sm:$0xff]  }
   0x4   :  { %791 = vmatprep.subr.bf16.mxu0 %v871_v2  ;;  %854 = vmatprep.subr.bf16.mxu1 %v871_v2  ;;  %v876_v7 = vld [vmem:[%s1264_s1 + $0x18] sm:$0xff]   ;;  %v878_v9 = vld [vmem:[%s1264_s1 + $0x20] sm:$0xff]   ;;  %v880_v12 = vld [vmem:[%s1264_s1 + $0x28] sm:$0xff]  }
   0x5   :  { %v887_v11 = vld [vmem:[%s1265_s0 + $0x4] ss:$8 sps:$4 sm:$0xff]   ;;  %v881_v14 = vld [vmem:[%s1264_s1 + $0x70] sm:$0xff]   ;;  %v883_v16 = vld [vmem:[%s1264_s1 + $0x78] sm:$0xff]  }
   0x6   :  { %v893_v13 = vld [vmem:[%s1265_s0 + $0x44] ss:$8 sps:$4 sm:$0xff]   ;;  %280 = vmatprep.mubr.bf16.mxu0 %v887_v11  ;;  %v882_v15 = vld [vmem:[%s1264_s1 + $0x30] sm:$0xff]   ;;  %v884_v17 = vld [vmem:[%s1264_s1 + $0x38] sm:$0xff]  }
   0x7   :  { %792 = vmatpush3.bf16.msra.mxu0 %v872_v3  ;;  %862 = vmatpush3.bf16.msra.mxu1 %v872_v3  ;;  %v885_v18 = vld [vmem:[%s1265_s0] ss:$8 sps:$4 sm:$0xff]   ;;  %v888_v20 = vld [vmem:[%s1265_s0 + $0x14] ss:$8 sps:$4 sm:$0xff]   ;;  %v890_v22 = vld [vmem:[%s1265_s0 + $0x10] ss:$8 sps:$4 sm:$0xff]  }
   0x8   :  { %793 = vmatprep.subr.bf16.mxu0 %v873_v4  ;;  %855 = vmatprep.subr.bf16.mxu1 %v873_v4  ;;  %v891_v19 = vld [vmem:[%s1265_s0 + $0x40] ss:$8 sps:$4 sm:$0xff]   ;;  %v897_v21 = vld [vmem:[%s1265_s0 + $0x54] ss:$8 sps:$4 sm:$0xff]   ;;  %v899_v23 = vld [vmem:[%s1265_s0 + $0x50] ss:$8 sps:$4 sm:$0xff]  }
   0x9   :  { %312 = vmatprep.mubr.bf16.mxu1 %v893_v13  ;;  %v894_v24 = vld [vmem:[%s1265_s0 + $0x24] ss:$8 sps:$4 sm:$0xff]   ;;  %v896_v26 = vld [vmem:[%s1265_s0 + $0x20] ss:$8 sps:$4 sm:$0xff]   ;;  %v900_v28 = vld [vmem:[%s1265_s0 + $0x34] ss:$8 sps:$4 sm:$0xff]  }
   0xa   :  { %v903_v25 = vld [vmem:[%s1265_s0 + $0x64] ss:$8 sps:$4 sm:$0xff]   ;;  %v905_v27 = vld [vmem:[%s1265_s0 + $0x60] ss:$8 sps:$4 sm:$0xff]   ;;  %v906_v29 = vld [vmem:[%s1265_s0 + $0x74] ss:$8 sps:$4 sm:$0xff]  }
   0xb   :  { %794 = vmatpush3.bf16.msra.mxu0 %v874_v5  ;;  %863 = vmatpush3.bf16.msra.mxu1 %v874_v5  ;;  %v902_v30 = vld [vmem:[%s1265_s0 + $0x30] ss:$8 sps:$4 sm:$0xff]  }
   0xc   :  { %795 = vmatprep.subr.bf16.mxu0 %v875_v6  ;;  %856 = vmatprep.subr.bf16.mxu1 %v875_v6  ;;  %v908_v31 = vld [vmem:[%s1265_s0 + $0x70] ss:$8 sps:$4 sm:$0xff]  }
   0xf   :  { %796 = vmatpush3.bf16.msra.mxu0 %v876_v7  ;;  %864 = vmatpush3.bf16.msra.mxu1 %v876_v7 }
  0x10   :  { %797 = vmatprep.subr.bf16.mxu0 %v877_v8  ;;  %857 = vmatprep.subr.bf16.mxu1 %v877_v8 }
  0x13   :  { %798 = vmatpush3.bf16.msra.mxu0 %v878_v9  ;;  %865 = vmatpush3.bf16.msra.mxu1 %v878_v9 }
  0x14   :  { %799 = vmatprep.subr.bf16.mxu0 %v879_v10  ;;  %858 = vmatprep.subr.bf16.mxu1 %v879_v10 }
  0x17   :  { %800 = vmatpush3.bf16.msra.mxu0 %v880_v12  ;;  %866 = vmatpush3.bf16.msra.mxu1 %v880_v12 }
  0x18   :  { %801 = vmatprep.subr.bf16.mxu0 %v881_v14  ;;  %859 = vmatprep.subr.bf16.mxu1 %v881_v14 }
  0x1b   :  { %802 = vmatpush3.bf16.msra.mxu0 %v882_v15  ;;  %867 = vmatpush3.bf16.msra.mxu1 %v882_v15 }
  0x1c   :  { %803 = vmatprep.subr.bf16.mxu0 %v883_v16  ;;  %860 = vmatprep.subr.bf16.mxu1 %v883_v16 }
  0x1f   :  { %804 = vmatpush3.bf16.msra.mxu0 %v884_v17  ;;  %868 = vmatpush3.bf16.msra.mxu1 %v884_v17 }
  0x22   :  { %281 = vmatmul.mubr.bf16.vlgmr.msra.gmra.mrb[0].mxu0 %v885_v18  ;;  %313 = vmatmul.mubr.bf16.vlgmr.msra.gmra.mrb[0].mxu1 %v891_v19 }
  0x23   :  { %288 = vmatprep.mubr.bf16.mxu0 %v888_v20  ;;  %320 = vmatprep.mubr.bf16.mxu1 %v897_v21 }
  0x2a   :  { %289 = vmatmul.mubr.bf16.gmra.mrb[4].mxu0 %v890_v22  ;;  %321 = vmatmul.mubr.bf16.gmra.mrb[4].mxu1 %v899_v23 }
  0x2b   :  { %296 = vmatprep.mubr.bf16.mxu0 %v894_v24  ;;  %328 = vmatprep.mubr.bf16.mxu1 %v903_v25 }
  0x32   :  { %297 = vmatmul.mubr.bf16.gmra.mrb[8].mxu0 %v896_v26  ;;  %329 = vmatmul.mubr.bf16.gmra.mrb[8].mxu1 %v905_v27 }
  0x33   :  { %304 = vmatprep.mubr.bf16.mxu0 %v900_v28  ;;  %336 = vmatprep.mubr.bf16.mxu1 %v906_v29 }
  0x3a   :  { %305 = vmatmul.mubr.bf16.gmra.mrb[12].mxu0 %v902_v30  ;;  %337 = vmatmul.mubr.bf16.gmra.mrb[12].mxu1 %v908_v31 }
  0xf5   :  { %v805_v32 = vpop.f32.mrb[0].mxu0  ;;  %v829_v33 = vpop.f32.mrb[0].mxu1 }
  0xf6   :  { %v806_v34 = vpop.f32.mrb[1].mxu0  ;;  %v830_v35 = vpop.f32.mrb[1].mxu1 }
  0xf7   :  { %v1042_v36 = vadd.f32 %v806_v34, %v805_v32  ;;  %v808_v37 = vpop.f32.mrb[2].mxu0  ;;  %v1044_v38 = vadd.f32 %v830_v35, %v829_v33  ;;  %v832_v39 = vpop.f32.mrb[2].mxu1 }
  0xf8   :  { %v809_v40 = vpop.f32.mrb[3].mxu0  ;;  %v833_v41 = vpop.f32.mrb[3].mxu1 }
  0xf9   :  { %v1046_v42 = vadd.f32 %v809_v40, %v808_v37  ;;  %v1048_v43 = vadd.f32 %v833_v41, %v832_v39  ;;  %v369_v55 = vmul.f32 %v1042_v36, %v1042_v36  ;;  %v377_v39 = vmul.f32 %v1044_v38, %v1044_v38 }
  0xfb   :  { %v370_v48 = vmul.f32 %v1046_v42, %v1046_v42  ;;  %v347_v56 = vadd.f32 %v1046_v42, %v1042_v36 }
  0xfd   :  { %v811_v44 = vpop.f32.mrb[4].mxu0  ;;  %v835_v45 = vpop.f32.mrb[4].mxu1  ;;  %v385_v60 = vadd.f32 %v370_v48, %v369_v55 }
  0xfe   :  { %v812_v46 = vpop.f32.mrb[5].mxu0  ;;  %v836_v47 = vpop.f32.mrb[5].mxu1 }
  0xff   :  { %v1052_v49 = vadd.f32 %v812_v46, %v811_v44  ;;  %v814_v50 = vpop.f32.mrb[6].mxu0  ;;  %v1054_v51 = vadd.f32 %v836_v47, %v835_v45  ;;  %v838_v52 = vpop.f32.mrb[6].mxu1  ;;  %v378_v44 = vmul.f32 %v1048_v43, %v1048_v43 }
 0x100   :  { %v815_v53 = vpop.f32.mrb[7].mxu0  ;;  %v839_v54 = vpop.f32.mrb[7].mxu1 }
 0x101   :  { %v371_v57 = vmul.f32 %v1052_v49, %v1052_v49  ;;  %v1062_v58 = vadd.f32 %v815_v53, %v814_v50  ;;  %v1064_v59 = vadd.f32 %v839_v54, %v838_v52  ;;  %v348_v61 = vadd.f32 %v1052_v49, %v347_v56 }
 0x102   :  { %v379_v47 = vmul.f32 %v1054_v51, %v1054_v51 }
 0x103   :  { %v386_v62 = vadd.f32 %v385_v60, %v371_v57  ;;  %v372_v63 = vmul.f32 %v1062_v58, %v1062_v58  ;;  %v349_v4 = vadd.f32 %v1062_v58, %v348_v61  ;;  %v380_v52 = vmul.f32 %v1064_v59, %v1064_v59 }
 0x105   :  { %v817_v0 = vpop.f32.mrb[8].mxu0  ;;  %v841_v1 = vpop.f32.mrb[8].mxu1  ;;  %v387_v11 = vadd.f32 %v386_v62, %v372_v63 }
 0x106   :  { %v818_v2 = vpop.f32.mrb[9].mxu0  ;;  %v842_v3 = vpop.f32.mrb[9].mxu1 }
 0x107   :  { %v1070_v5 = vadd.f32 %v818_v2, %v817_v0  ;;  %v820_v6 = vpop.f32.mrb[10].mxu0  ;;  %v1072_v7 = vadd.f32 %v842_v3, %v841_v1  ;;  %v844_v8 = vpop.f32.mrb[10].mxu1 }
 0x108   :  { %v821_v9 = vpop.f32.mrb[11].mxu0  ;;  %v845_v10 = vpop.f32.mrb[11].mxu1 }
 0x109   :  { %v350_v12 = vadd.f32 %v1070_v5, %v349_v4  ;;  %v373_v13 = vmul.f32 %v1070_v5, %v1070_v5  ;;  %v1077_v14 = vadd.f32 %v821_v9, %v820_v6  ;;  %v1079_v15 = vadd.f32 %v845_v10, %v844_v8 }
 0x10a   :  { %v381_v56 = vmul.f32 %v1072_v7, %v1072_v7 }
 0x10b   :  { %v388_v16 = vadd.f32 %v387_v11, %v373_v13  ;;  %v351_v17 = vadd.f32 %v1077_v14, %v350_v12  ;;  %v374_v18 = vmul.f32 %v1077_v14, %v1077_v14  ;;  %v382_v62 = vmul.f32 %v1079_v15, %v1079_v15 }
 0x10d   :  { %v389_v19 = vadd.f32 %v388_v16, %v374_v18  ;;  %v823_v20 = vpop.f32.mrb[12].mxu0  ;;  %v847_v21 = vpop.f32.mrb[12].mxu1 }
 0x10e   :  { %v824_v22 = vpop.f32.mrb[13].mxu0  ;;  %v848_v23 = vpop.f32.mrb[13].mxu1 }
 0x10f   :  { %v1084_v24 = vadd.f32 %v824_v22, %v823_v20  ;;  %v826_v25 = vpop.f32.mrb[14].mxu0  ;;  %v1086_v26 = vadd.f32 %v848_v23, %v847_v21  ;;  %v850_v27 = vpop.f32.mrb[14].mxu1 }
 0x110   :  { %v827_v28 = vpop.f32.mrb[15].mxu0  ;;  %v851_v29 = vpop.f32.mrb[15].mxu1 }
 0x111   :  { %v352_v30 = vadd.f32 %v1084_v24, %v351_v17  ;;  %v375_v31 = vmul.f32 %v1084_v24, %v1084_v24  ;;  %v1091_v32 = vadd.f32 %v827_v28, %v826_v25  ;;  %v1093_v33 = vadd.f32 %v851_v29, %v850_v27 }
 0x112   :  { %v383_v63 = vmul.f32 %v1086_v26, %v1086_v26 }
 0x113   :  { %v390_v34 = vadd.f32 %v389_v19, %v375_v31  ;;  %v353_v35 = vadd.f32 %v1091_v32, %v352_v30  ;;  %v376_v37 = vmul.f32 %v1091_v32, %v1091_v32  ;;  %v384_v4 = vmul.f32 %v1093_v33, %v1093_v33 }
 0x114   :  { %v416_v30 = vlaneseq }
 0x115   :  { %v354_v40 = vadd.f32 %v1044_v38, %v353_v35  ;;  %v391_v41 = vadd.f32 %v390_v34, %v376_v37  ;;  %v345_v34 = vld [vmem:[%s1266_s2] sm:$0x1] }
 0x116   :  { %v417_v31 = vshrl.u32 %v416_v30, 7  ;;  %v1128_v37 = vld [vmem:[%s1267_s4] sm:$0xff]  }
 0x117   :  { %v355_v45 = vadd.f32 %v1048_v43, %v354_v40  ;;  %v392_v46 = vadd.f32 %v391_v41, %v377_v39  ;;  %v1133_v39 = vld [vmem:[%s1267_s4 + $0x8] sm:$0xff]   ;;  %v1138_v41 = vld [vmem:[%s1267_s4 + $0x10] sm:$0xff]  }
 0x118   :  { %v418_v35 = vsub.s32 0, %v417_v31 }
 0x119   :  { %v393_v48 = vadd.f32 %v392_v46, %v378_v44  ;;  %v356_v50 = vadd.f32 %v1054_v51, %v355_v45  ;;  %v1143_v45 = vld [vmem:[%s1267_s4 + $0x18] sm:$0xff]   ;;  %v1148_v46 = vld [vmem:[%s1267_s4 + $0x20] sm:$0xff]  }
 0x11b   :  { %v357_v53 = vadd.f32 %v1064_v59, %v356_v50  ;;  %v394_v54 = vadd.f32 %v393_v48, %v379_v47  ;;  %v346_v47 = vld [vmem:[%s1268_s3] sm:$0x1]  ;;  %v705_v48 = vunpack.c.l.bf16 %v1128_v37  ;;  %v706_v50 = vunpack.c.h.bf16 %v1128_v37 }
 0x11d   :  { %v358_v55 = vadd.f32 %v1072_v7, %v357_v53  ;;  %v395_v57 = vadd.f32 %v394_v54, %v380_v52  ;;  %v709_v52 = vunpack.c.l.bf16 %v1133_v39  ;;  %v710_v53 = vunpack.c.h.bf16 %v1133_v39  ;;  %v1160_v54 = vld [vmem:[%s1267_s4 + $0x28] sm:$0xff]  }
 0x11f   :  { %v396_v60 = vadd.f32 %v395_v57, %v381_v56  ;;  %v359_v61 = vadd.f32 %v1079_v15, %v358_v55  ;;  %v713_v57 = vunpack.c.l.bf16 %v1138_v41 }
 0x121   :  { %v397_v0 = vadd.f32 %v396_v60, %v382_v62  ;;  %v360_v1 = vadd.f32 %v1086_v26, %v359_v61  ;;  %v714_v60 = vunpack.c.h.bf16 %v1138_v41  ;;  %v717_v61 = vunpack.c.l.bf16 %v1143_v45 }
 0x122   :  { %v718_v62 = vunpack.c.h.bf16 %v1143_v45 }
 0x123   :  { %v398_v2 = vadd.f32 %v397_v0, %v383_v63  ;;  %v361_v3 = vadd.f32 %v1093_v33, %v360_v1  ;;  %v721_v63 = vunpack.c.l.bf16 %v1148_v46  ;;  %v722_v0 = vunpack.c.h.bf16 %v1148_v46 }
 0x125   :  { %v362_v6 = vrot.slane %v361_v3, 4  ;;  %v399_v8 = vadd.f32 %v398_v2, %v384_v4  ;;  %v726_v4 = vunpack.c.h.bf16 %v1160_v54 }
 0x127   :  { %v363_v9 = vadd.f32 %v362_v6, %v361_v3  ;;  %v400_v10 = vrot.slane %v399_v8, 4  ;;  %v725_v3 = vunpack.c.l.bf16 %v1160_v54 }
 0x129   :  { %v364_v11 = vrot.slane %v363_v9, 2  ;;  %v401_v12 = vadd.f32 %v400_v10, %v399_v8 }
 0x12b   :  { %v365_v13 = vadd.f32 %v364_v11, %v363_v9  ;;  %v402_v16 = vrot.slane %v401_v12, 2 }
 0x12d   :  { %v366_v17 = vrot.slane %v365_v13, 1  ;;  %v403_v18 = vadd.f32 %v402_v16, %v401_v12  ;;  %v780_v16 = vld [vmem:[%s1267_s4 + $0x30] sm:$0xff]  }
 0x12f   :  { %v367_v19 = vadd.f32 %v366_v17, %v365_v13  ;;  %v404_v20 = vrot.slane %v403_v18, 1 }
 0x131   :  { %v368_v21 = vmul.f32 0.0078125, %v367_v19  ;;  %v405_v22 = vadd.f32 %v404_v20, %v403_v18  ;;  %v729_v18 = vunpack.c.l.bf16 %v780_v16  ;;  %v730_v19 = vunpack.c.h.bf16 %v780_v16 }
 0x133   :  { %v406_v23 = vmul.f32 0.0078125, %v405_v22  ;;  %v407_v25 = vmul.f32 %v368_v21, %v368_v21 }
 0x135   :  { %v408_v27 = vsub.f32 %v406_v23, %v407_v25 }
 0x137   :  { %v409_v28 = vmax.f32 %v408_v27, 0.0 }
 0x139   :  { %v410_v29 = vadd.f32 1e-05, %v409_v28 }
 0x13b   :  { %909 = vrsqrt.f32 %v410_v29 }
 0x145   :  { %v910_v40 = vpop.eup %909 }
 0x146   :  { %v412_v44 = vmul.f32 %v910_v40, %v345_v34 }
 0x148   :  { %v413_v55 = vmul.f32 %v412_v44, %v368_v21  ;;  %v419_v56 = vrot.slane %v412_v44, %v418_v35 }
 0x14a   :  { %v414_v1 = vsub.f32 %v346_v47, %v413_v55  ;;  %v421_v2 = vmul.f32 %v1042_v36, %v419_v56  ;;  %v422_v6 = vmul.f32 %v1046_v42, %v419_v56  ;;  %v425_v8 = vmul.f32 %v1070_v5, %v419_v56  ;;  %v781_v42 = vld [vmem:[%s1267_s4 + $0x38] sm:$0xff]  }
 0x14b   :  { %v426_v9 = vmul.f32 %v1077_v14, %v419_v56  ;;  %v427_v10 = vmul.f32 %v1084_v24, %v419_v56  ;;  %v428_v11 = vmul.f32 %v1091_v32, %v419_v56  ;;  %v429_v12 = vmul.f32 %v1044_v38, %v419_v56 }
 0x14c   :  { %v430_v13 = vmul.f32 %v1048_v43, %v419_v56  ;;  %v431_v36 = vmul.f32 %v1054_v51, %v419_v56  ;;  %v432_v5 = vmul.f32 %v1064_v59, %v419_v56  ;;  %v433_v14 = vmul.f32 %v1072_v7, %v419_v56 }
 0x14d   :  { %v434_v24 = vmul.f32 %v1079_v15, %v419_v56  ;;  %v435_v38 = vmul.f32 %v1086_v26, %v419_v56  ;;  %v423_v43 = vmul.f32 %v1052_v49, %v419_v56  ;;  %v424_v51 = vmul.f32 %v1062_v58, %v419_v56 }
 0x14e   :  { %v436_v32 = vmul.f32 %v1093_v33, %v419_v56  ;;  %v441_v17 = vrot.slane %v414_v1, %v418_v35  ;;  %v733_v20 = vunpack.c.l.bf16 %v781_v42  ;;  %v734_v21 = vunpack.c.h.bf16 %v781_v42 }
 0x150   :  { %v443_v22 = vadd.f32 %v441_v17, %v421_v2  ;;  %v444_v23 = vadd.f32 %v441_v17, %v422_v6  ;;  %v445_v59 = vadd.f32 %v441_v17, %v423_v43  ;;  %v446_v25 = vadd.f32 %v441_v17, %v424_v51 }
 0x151   :  { %v447_v7 = vadd.f32 %v441_v17, %v425_v8  ;;  %v448_v27 = vadd.f32 %v441_v17, %v426_v9  ;;  %v449_v15 = vadd.f32 %v441_v17, %v427_v10  ;;  %v450_v28 = vadd.f32 %v441_v17, %v428_v11  ;;  %v523_v9 = vld [vmem:[%s1269_s5] sm:$0xff] }
 0x152   :  { %v451_v26 = vadd.f32 %v441_v17, %v429_v12  ;;  %v452_v29 = vadd.f32 %v441_v17, %v430_v13  ;;  %v453_v49 = vadd.f32 %v441_v17, %v431_v36  ;;  %v454_v30 = vadd.f32 %v441_v17, %v432_v5  ;;  %v530_v12 = vld [vmem:[%s1269_s5 + $0x38] sm:$0xff]  ;;  %v531_v13 = vld [vmem:[%s1269_s5 + $0x40] sm:$0xff] }
 0x153   :  { %v455_v58 = vadd.f32 %v441_v17, %v433_v14  ;;  %v456_v31 = vadd.f32 %v441_v17, %v434_v24  ;;  %v457_v33 = vadd.f32 %v441_v17, %v435_v38  ;;  %v458_v34 = vadd.f32 %v441_v17, %v436_v32  ;;  %v532_v14 = vld [vmem:[%s1269_s5 + $0x48] sm:$0xff]  ;;  %v533_v24 = vld [vmem:[%s1269_s5 + $0x50] sm:$0xff]  ;;  %v534_v17 = vld [vmem:[%s1269_s5 + $0x58] sm:$0xff] }
 0x154   :  { %v491_v35 = vadd.f32 %v705_v48, %v443_v22  ;;  %v492_v37 = vadd.f32 %v706_v50, %v444_v23  ;;  %v493_v39 = vadd.f32 %v709_v52, %v445_v59  ;;  %v494_v40 = vadd.f32 %v710_v53, %v446_v25  ;;  %v524_v48 = vld [vmem:[%s1269_s5 + $0x8] sm:$0xff]  ;;  %v525_v50 = vld [vmem:[%s1269_s5 + $0x10] sm:$0xff]  ;;  %v526_v52 = vld [vmem:[%s1269_s5 + $0x18] sm:$0xff] }
 0x155   :  { %v495_v41 = vadd.f32 %v713_v57, %v447_v7  ;;  %v496_v44 = vadd.f32 %v714_v60, %v448_v27  ;;  %v497_v45 = vadd.f32 %v717_v61, %v449_v15  ;;  %v498_v46 = vadd.f32 %v718_v62, %v450_v28  ;;  %v527_v62 = vld [vmem:[%s1269_s5 + $0x20] sm:$0xff] }
 0x156   :  { %v499_v47 = vadd.f32 %v721_v63, %v451_v26  ;;  %v500_v54 = vadd.f32 %v722_v0, %v452_v29  ;;  %v501_v55 = vadd.f32 %v725_v3, %v453_v49  ;;  %v502_v56 = vadd.f32 %v726_v4, %v454_v30  ;;  %v528_v63 = vld [vmem:[%s1269_s5 + $0x28] sm:$0xff]  ;;  %v529_v0 = vld [vmem:[%s1269_s5 + $0x30] sm:$0xff] }
 0x157   :  { %v503_v1 = vadd.f32 %v729_v18, %v455_v58  ;;  %v504_v2 = vadd.f32 %v730_v19, %v456_v31  ;;  %v505_v6 = vadd.f32 %v733_v20, %v457_v33  ;;  %v506_v8 = vadd.f32 %v734_v21, %v458_v34  ;;  %v535_v18 = vld [vmem:[%s1269_s5 + $0x60] sm:$0xff]  ;;  %v536_v19 = vld [vmem:[%s1269_s5 + $0x68] sm:$0xff]  ;;  %v537_v20 = vld [vmem:[%s1269_s5 + $0x70] sm:$0xff] }
 0x158   :  { %v507_v53 = vmax.f32 %v491_v35, 0.0  ;;  %v508_v57 = vmax.f32 %v492_v37, 0.0  ;;  %v509_v60 = vmax.f32 %v493_v39, 0.0  ;;  %v510_v61 = vmax.f32 %v494_v40, 0.0  ;;  %v538_v21 = vld [vmem:[%s1269_s5 + $0x78] sm:$0xff] }
 0x159   :  { %v511_v3 = vmax.f32 %v495_v41, 0.0  ;;  %v512_v4 = vmax.f32 %v496_v44, 0.0  ;;  %v513_v10 = vmax.f32 %v497_v45, 0.0  ;;  %v514_v11 = vmax.f32 %v498_v46, 0.0 }
 0x15a   :  { %v515_v36 = vmax.f32 %v499_v47, 0.0  ;;  %v516_v16 = vmax.f32 %v500_v54, 0.0  ;;  %v517_v42 = vmax.f32 %v501_v55, 0.0  ;;  %v518_v5 = vmax.f32 %v502_v56, 0.0 }
 0x15b   :  { %v519_v38 = vmax.f32 %v503_v1, 0.0  ;;  %v520_v43 = vmax.f32 %v504_v2, 0.0  ;;  %v521_v51 = vmax.f32 %v505_v6, 0.0  ;;  %v522_v32 = vmax.f32 %v506_v8, 0.0 }
 0x15c   :  { %v539_v22 = vmul.f32 %v523_v9, %v507_v53  ;;  %v540_v23 = vmul.f32 %v524_v48, %v508_v57  ;;  %v541_v59 = vmul.f32 %v525_v50, %v509_v60  ;;  %v542_v25 = vmul.f32 %v526_v52, %v510_v61 }
 0x15d   :  { %v543_v7 = vmul.f32 %v527_v62, %v511_v3  ;;  %v544_v27 = vmul.f32 %v528_v63, %v512_v4  ;;  %v545_v15 = vmul.f32 %v529_v0, %v513_v10  ;;  %v546_v28 = vmul.f32 %v530_v12, %v514_v11 }
 0x15e   :  { %v547_v26 = vmul.f32 %v531_v13, %v515_v36  ;;  %v548_v29 = vmul.f32 %v532_v14, %v516_v16  ;;  %v549_v49 = vmul.f32 %v533_v24, %v517_v42  ;;  %v550_v30 = vmul.f32 %v534_v17, %v518_v5 }
 0x15f   :  { %v551_v58 = vmul.f32 %v535_v18, %v519_v38  ;;  %v552_v31 = vmul.f32 %v536_v19, %v520_v43  ;;  %v553_v33 = vmul.f32 %v537_v20, %v521_v51  ;;  %v554_v34 = vmul.f32 %v538_v21, %v522_v32 }
 0x160   :  { %v738_v35 = vpack.c.bf16 %v540_v23, %v539_v22  ;;  %v743_v37 = vpack.c.bf16 %v542_v25, %v541_v59  ;;  %v748_v39 = vpack.c.bf16 %v544_v27, %v543_v7  ;;  %v753_v40 = vpack.c.bf16 %v546_v28, %v545_v15 }
 0x161   :  { %v758_v41 = vpack.c.bf16 %v548_v29, %v547_v26  ;;  %v763_v44 = vpack.c.bf16 %v550_v30, %v549_v49  ;;  %v768_v45 = vpack.c.bf16 %v552_v31, %v551_v58  ;;  %v773_v46 = vpack.c.bf16 %v554_v34, %v553_v33 }
 0x162   :  { %739 = vst [vmem:[%s1270_s6] sm:$0xff] %v738_v35   ;;  %782 = vst [vmem:[%s1270_s6 + $0x8] sm:$0xff] %v743_v37  }
 0x163   :  { %783 = vst [vmem:[%s1270_s6 + $0x10] sm:$0xff] %v748_v39   ;;  %784 = vst [vmem:[%s1270_s6 + $0x18] sm:$0xff] %v753_v40  }
 0x164   :  { %785 = vst [vmem:[%s1270_s6 + $0x20] sm:$0xff] %v758_v41   ;;  %786 = vst [vmem:[%s1270_s6 + $0x28] sm:$0xff] %v763_v44  }
 0x165   :  { %787 = vst [vmem:[%s1270_s6 + $0x30] sm:$0xff] %v768_v45   ;;  %788 = vst [vmem:[%s1270_s6 + $0x38] sm:$0xff] %v773_v46  }

// kernel: _lambda_.27
= control target key start
LH: loop header
LB: loop body
LE: loop exit
PB: predicated region body
PF: predicated region fallthrough
CT: control target
= control target key end

     0   :  { %s524_s1 = inlined_call_operand.vmem [shape: bf16[256,128], index: 1, kind: input, shape index: {}]   ;;  %s525_s0 = inlined_call_operand.vmem [shape: bf16[32,256], index: 0, kind: input, shape index: {}]   ;;  %s526_s2 = inlined_call_operand.vmem [shape: f32[1,128], index: 2, kind: input, shape index: {}, may-alias: {2,4}]   ;;  %s527_s3 = inlined_call_operand.vmem [shape: f32[1,128], index: 3, kind: input, shape index: {}]   ;;  %s528_s4 = inlined_call_operand.vmem [shape: f32[1,128], index: 4, kind: input, shape index: {}, may-alias: {2,4}]   ;;  %s529_s5 = inlined_call_operand.vmem [shape: bf16[32,128], index: 5, kind: output, shape index: {}]  }
   0x1   :  { %v395_v0 = vld [vmem:[%s524_s1 + $0x40] sm:$0xff]   ;;  %v397_v2 = vld [vmem:[%s524_s1 + $0x48] sm:$0xff]   ;;  %v399_v4 = vld [vmem:[%s524_s1 + $0x50] sm:$0xff]  }
   0x2   :  { %v396_v1 = vld [vmem:[%s524_s1] sm:$0xff]   ;;  %351 = vmatprep.subr.bf16.mxu0 %v395_v0  ;;  %379 = vmatprep.subr.bf16.mxu1 %v395_v0  ;;  %v398_v3 = vld [vmem:[%s524_s1 + $0x8] sm:$0xff]   ;;  %v400_v5 = vld [vmem:[%s524_s1 + $0x10] sm:$0xff]  }
   0x3   :  { %352 = vmatpush3.bf16.msra.mxu0 %v396_v1  ;;  %387 = vmatpush3.bf16.msra.mxu1 %v396_v1  ;;  %v401_v6 = vld [vmem:[%s524_s1 + $0x58] sm:$0xff]   ;;  %v403_v8 = vld [vmem:[%s524_s1 + $0x60] sm:$0xff]   ;;  %v405_v10 = vld [vmem:[%s524_s1 + $0x68] sm:$0xff]   ;;  %v264_v1 = vlaneseq }
   0x4   :  { %353 = vmatprep.subr.bf16.mxu0 %v397_v2  ;;  %380 = vmatprep.subr.bf16.mxu1 %v397_v2  ;;  %v402_v7 = vld [vmem:[%s524_s1 + $0x18] sm:$0xff]   ;;  %v404_v9 = vld [vmem:[%s524_s1 + $0x20] sm:$0xff]   ;;  %v406_v13 = vld [vmem:[%s524_s1 + $0x28] sm:$0xff]  }
   0x5   :  { %v413_v11 = vld [vmem:[%s525_s0 + $0x4] ss:$8 sps:$4 sm:$0xff]   ;;  %v416_v12 = vld [vmem:[%s525_s0 + $0x14] ss:$8 sps:$4 sm:$0xff]   ;;  %v411_v18 = vld [vmem:[%s525_s0] ss:$8 sps:$4 sm:$0xff]  }
   0x6   :  { %v407_v14 = vld [vmem:[%s524_s1 + $0x70] sm:$0xff]   ;;  %212 = vmatprep.mubr.bf16.mxu0 %v413_v11  ;;  %220 = vmatprep.mubr.bf16.mxu1 %v416_v12  ;;  %v409_v16 = vld [vmem:[%s524_s1 + $0x78] sm:$0xff]   ;;  %v311_v22 = vld [vmem:[%s526_s2] ss:$0 sm:$0xff]  ;;  %v265_v2 = vshrl.u32 %v264_v1, 7 }
   0x7   :  { %354 = vmatpush3.bf16.msra.mxu0 %v398_v3  ;;  %388 = vmatpush3.bf16.msra.mxu1 %v398_v3  ;;  %v408_v15 = vld [vmem:[%s524_s1 + $0x30] sm:$0xff]   ;;  %v410_v17 = vld [vmem:[%s524_s1 + $0x38] sm:$0xff]   ;;  %v229_v3 = vld [vmem:[%s527_s3] sm:$0x1] }
   0x8   :  { %355 = vmatprep.subr.bf16.mxu0 %v399_v4  ;;  %381 = vmatprep.subr.bf16.mxu1 %v399_v4  ;;  %v414_v19 = vld [vmem:[%s525_s0 + $0x10] ss:$8 sps:$4 sm:$0xff]   ;;  %v266_v4 = vsub.s32 0, %v265_v2 }
   0xb   :  { %356 = vmatpush3.bf16.msra.mxu0 %v400_v5  ;;  %389 = vmatpush3.bf16.msra.mxu1 %v400_v5 }
   0xc   :  { %357 = vmatprep.subr.bf16.mxu0 %v401_v6  ;;  %382 = vmatprep.subr.bf16.mxu1 %v401_v6 }
   0xf   :  { %358 = vmatpush3.bf16.msra.mxu0 %v402_v7  ;;  %390 = vmatpush3.bf16.msra.mxu1 %v402_v7  ;;  %v230_v7 = vld [vmem:[%s528_s4] sm:$0x1] }
  0x10   :  { %359 = vmatprep.subr.bf16.mxu0 %v403_v8  ;;  %383 = vmatprep.subr.bf16.mxu1 %v403_v8 }
  0x13   :  { %360 = vmatpush3.bf16.msra.mxu0 %v404_v9  ;;  %391 = vmatpush3.bf16.msra.mxu1 %v404_v9 }
  0x14   :  { %361 = vmatprep.subr.bf16.mxu0 %v405_v10  ;;  %384 = vmatprep.subr.bf16.mxu1 %v405_v10 }
  0x17   :  { %362 = vmatpush3.bf16.msra.mxu0 %v406_v13  ;;  %392 = vmatpush3.bf16.msra.mxu1 %v406_v13 }
  0x18   :  { %363 = vmatprep.subr.bf16.mxu0 %v407_v14  ;;  %385 = vmatprep.subr.bf16.mxu1 %v407_v14 }
  0x1b   :  { %364 = vmatpush3.bf16.msra.mxu0 %v408_v15  ;;  %393 = vmatpush3.bf16.msra.mxu1 %v408_v15 }
  0x1c   :  { %365 = vmatprep.subr.bf16.mxu0 %v409_v16  ;;  %386 = vmatprep.subr.bf16.mxu1 %v409_v16 }
  0x1f   :  { %366 = vmatpush3.bf16.msra.mxu0 %v410_v17  ;;  %394 = vmatpush3.bf16.msra.mxu1 %v410_v17 }
  0x22   :  { %213 = vmatmul.mubr.bf16.vlgmr.msra.gmra.mrb[0].mxu0 %v411_v18  ;;  %221 = vmatmul.mubr.bf16.vlgmr.msra.gmra.mrb[0].mxu1 %v414_v19 }
  0xf5   :  { %v367_v20 = vpop.f32.mrb[0].mxu0  ;;  %v373_v21 = vpop.f32.mrb[0].mxu1 }
  0xf6   :  { %v368_v23 = vpop.f32.mrb[1].mxu0  ;;  %v374_v24 = vpop.f32.mrb[1].mxu1 }
  0xf7   :  { %v369_v25 = vadd.f32 %v368_v23, %v367_v20  ;;  %v370_v26 = vpop.f32.mrb[2].mxu0  ;;  %v375_v27 = vadd.f32 %v374_v24, %v373_v21  ;;  %v376_v28 = vpop.f32.mrb[2].mxu1 }
  0xf8   :  { %v371_v29 = vpop.f32.mrb[3].mxu0  ;;  %v377_v30 = vpop.f32.mrb[3].mxu1 }
  0xf9   :  { %v215_v31 = vadd.f32 %v369_v25, %v311_v22  ;;  %v223_v32 = vadd.f32 %v375_v27, %v311_v22  ;;  %v372_v33 = vadd.f32 %v371_v29, %v370_v26  ;;  %v378_v34 = vadd.f32 %v377_v30, %v376_v28 }
  0xfb   :  { %v218_v35 = vadd.f32 %v372_v33, %v311_v22  ;;  %v241_v36 = vmul.f32 %v215_v31, %v215_v31  ;;  %v243_v37 = vmul.f32 %v223_v32, %v223_v32  ;;  %v226_v40 = vadd.f32 %v378_v34, %v311_v22 }
  0xfd   :  { %v231_v38 = vadd.f32 %v218_v35, %v215_v31  ;;  %v242_v39 = vmul.f32 %v218_v35, %v218_v35  ;;  %v244_v44 = vmul.f32 %v226_v40, %v226_v40 }
  0xff   :  { %v245_v41 = vadd.f32 %v242_v39, %v241_v36  ;;  %v232_v42 = vadd.f32 %v231_v38, %v223_v32 }
 0x101   :  { %v233_v43 = vadd.f32 %v232_v42, %v226_v40  ;;  %v246_v45 = vadd.f32 %v245_v41, %v243_v37 }
 0x103   :  { %v234_v46 = vrot.slane %v233_v43, 4  ;;  %v247_v47 = vadd.f32 %v246_v45, %v244_v44 }
 0x105   :  { %v235_v48 = vadd.f32 %v234_v46, %v233_v43  ;;  %v248_v49 = vrot.slane %v247_v47, 4 }
 0x107   :  { %v236_v50 = vrot.slane %v235_v48, 2  ;;  %v249_v51 = vadd.f32 %v248_v49, %v247_v47 }
 0x109   :  { %v237_v52 = vadd.f32 %v236_v50, %v235_v48  ;;  %v250_v53 = vrot.slane %v249_v51, 2 }
 0x10b   :  { %v238_v54 = vrot.slane %v237_v52, 1  ;;  %v251_v55 = vadd.f32 %v250_v53, %v249_v51 }
 0x10d   :  { %v239_v56 = vadd.f32 %v238_v54, %v237_v52  ;;  %v252_v57 = vrot.slane %v251_v55, 1 }
 0x10f   :  { %v240_v58 = vmul.f32 0.03125, %v239_v56  ;;  %v253_v59 = vadd.f32 %v252_v57, %v251_v55 }
 0x111   :  { %v254_v60 = vmul.f32 0.03125, %v253_v59  ;;  %v255_v61 = vmul.f32 %v240_v58, %v240_v58 }
 0x113   :  { %v256_v62 = vsub.f32 %v254_v60, %v255_v61 }
 0x115   :  { %v257_v63 = vmax.f32 %v256_v62, 0.0 }
 0x117   :  { %v258_v0 = vadd.f32 1e-05, %v257_v63 }
 0x119   :  { %417 = vrsqrt.f32 %v258_v0 }
 0x123   :  { %v418_v5 = vpop.eup %417 }
 0x124   :  { %v260_v6 = vmul.f32 %v418_v5, %v229_v3 }
 0x126   :  { %v261_v8 = vmul.f32 %v260_v6, %v240_v58  ;;  %v267_v9 = vrot.slane %v260_v6, %v266_v4 }
 0x128   :  { %v262_v10 = vsub.f32 %v230_v7, %v261_v8  ;;  %v269_v11 = vmul.f32 %v267_v9, %v215_v31  ;;  %v270_v12 = vmul.f32 %v267_v9, %v218_v35  ;;  %v271_v13 = vmul.f32 %v267_v9, %v223_v32 }
 0x129   :  { %v272_v14 = vmul.f32 %v267_v9, %v226_v40 }
 0x12a   :  { %v277_v15 = vrot.slane %v262_v10, %v266_v4 }
 0x12c   :  { %v279_v16 = vadd.f32 %v277_v15, %v269_v11  ;;  %v280_v17 = vadd.f32 %v277_v15, %v270_v12  ;;  %v281_v18 = vadd.f32 %v277_v15, %v271_v13  ;;  %v282_v19 = vadd.f32 %v277_v15, %v272_v14 }
 0x12e   :  { %v283_v20 = vmax.f32 %v279_v16, 0.0  ;;  %v284_v21 = vmax.f32 %v280_v17, 0.0  ;;  %v285_v22 = vmax.f32 %v281_v18, 0.0  ;;  %v286_v23 = vmax.f32 %v282_v19, 0.0 }
 0x130   :  { %v343_v24 = vpack.c.bf16 %v284_v21, %v283_v20  ;;  %v348_v25 = vpack.c.bf16 %v286_v23, %v285_v22 }
 0x132   :  { %344 = vst [vmem:[%s529_s5] sm:$0xff] %v343_v24   ;;  %350 = vst [vmem:[%s529_s5 + $0x8] sm:$0xff] %v348_v25  }

// kernel: _lambda_.30
= control target key start
LH: loop header
LB: loop body
LE: loop exit
PB: predicated region body
PF: predicated region fallthrough
CT: control target
= control target key end

     0   :  { %s761_s1 = inlined_call_operand.vmem [shape: bf16[384,128], index: 1, kind: input, shape index: {}]   ;;  %s762_s0 = inlined_call_operand.vmem [shape: bf16[32,384], index: 0, kind: input, shape index: {}]   ;;  %s763_s2 = inlined_call_operand.vmem [shape: f32[1,128], index: 2, kind: input, shape index: {}]   ;;  %s764_s3 = inlined_call_operand.vmem [shape: f32[1,128], index: 3, kind: input, shape index: {}]   ;;  %s765_s4 = inlined_call_operand.vmem [shape: bf16[32,128], index: 4, kind: input, shape index: {}]   ;;  %s766_s5 = inlined_call_operand.vmem [shape: f32[32,128], index: 5, kind: input, shape index: {}]   ;;  %s767_s6 = inlined_call_operand.vmem [shape: bf16[32,128], index: 6, kind: output, shape index: {}]  }
   0x1   :  { %v572_v0 = vld [vmem:[%s761_s1 + $0x40] sm:$0xff]   ;;  %v575_v3 = vld [vmem:[%s761_s1 + $0x48] sm:$0xff]   ;;  %v578_v6 = vld [vmem:[%s761_s1 + $0x50] sm:$0xff]  }
   0x2   :  { %v573_v1 = vld [vmem:[%s761_s1] sm:$0xff]   ;;  %514 = vmatprep.subr.bf16.mxu0 %v572_v0  ;;  %v576_v4 = vld [vmem:[%s761_s1 + $0x8] sm:$0xff]   ;;  %v579_v7 = vld [vmem:[%s761_s1 + $0x10] sm:$0xff]  }
   0x3   :  { %v574_v2 = vld [vmem:[%s761_s1 + $0x80] sm:$0xff]   ;;  %515 = vmatpush3.bf16.msra.mxu0 %v573_v1  ;;  %v577_v5 = vld [vmem:[%s761_s1 + $0x88] sm:$0xff]   ;;  %v580_v8 = vld [vmem:[%s761_s1 + $0x90] sm:$0xff]  }
   0x4   :  { %552 = vmatprep.subr.bf16.mxu1 %v574_v2  ;;  %516 = vmatprep.subr.bf16.mxu0 %v575_v3  ;;  %v581_v9 = vld [vmem:[%s761_s1 + $0x58] sm:$0xff]   ;;  %v584_v12 = vld [vmem:[%s761_s1 + $0x60] sm:$0xff]   ;;  %v587_v15 = vld [vmem:[%s761_s1 + $0x68] sm:$0xff]  }
   0x5   :  { %553 = vmatpush3.bf16.msra.mxu1 %v574_v2  ;;  %v582_v10 = vld [vmem:[%s761_s1 + $0x18] sm:$0xff]   ;;  %v586_v13 = vld [vmem:[%s761_s1 + $0xa0] sm:$0xff]   ;;  %v589_v16 = vld [vmem:[%s761_s1 + $0xa8] sm:$0xff]  }
   0x6   :  { %554 = vmatprep.subr.bf16.mxu1 %v577_v5  ;;  %v583_v11 = vld [vmem:[%s761_s1 + $0x98] sm:$0xff]   ;;  %v585_v14 = vld [vmem:[%s761_s1 + $0x20] sm:$0xff]   ;;  %v588_v17 = vld [vmem:[%s761_s1 + $0x28] sm:$0xff]  }
   0x7   :  { %517 = vmatpush3.bf16.msra.mxu0 %v576_v4  ;;  %v590_v18 = vld [vmem:[%s761_s1 + $0x70] sm:$0xff]   ;;  %v593_v21 = vld [vmem:[%s761_s1 + $0x78] sm:$0xff]   ;;  %v596_v26 = vld [vmem:[%s762_s0] ss:$12 sps:$4 sm:$0xff]  }
   0x8   :  { %518 = vmatprep.subr.bf16.mxu0 %v578_v6  ;;  %v591_v19 = vld [vmem:[%s761_s1 + $0x30] sm:$0xff]   ;;  %v595_v22 = vld [vmem:[%s761_s1 + $0xb8] sm:$0xff]   ;;  %v600_v28 = vld [vmem:[%s762_s0 + $0x20] ss:$12 sps:$4 sm:$0xff]  }
   0x9   :  { %555 = vmatpush3.bf16.msra.mxu1 %v577_v5  ;;  %v592_v20 = vld [vmem:[%s761_s1 + $0xb0] sm:$0xff]   ;;  %v594_v25 = vld [vmem:[%s761_s1 + $0x38] sm:$0xff]  }
   0xa   :  { %556 = vmatprep.subr.bf16.mxu1 %v580_v8  ;;  %v598_v23 = vld [vmem:[%s762_s0 + $0x4] ss:$12 sps:$4 sm:$0xff]   ;;  %v599_v24 = vld [vmem:[%s762_s0 + $0x8] ss:$12 sps:$4 sm:$0xff]  }
   0xb   :  { %519 = vmatpush3.bf16.msra.mxu0 %v579_v7  ;;  %288 = vmatprep.mubr.bf16.mxu0 %v598_v23  ;;  %v601_v27 = vld [vmem:[%s762_s0 + $0x1c] ss:$12 sps:$4 sm:$0xff]   ;;  %v603_v29 = vld [vmem:[%s762_s0 + $0x18] ss:$12 sps:$4 sm:$0xff]  }
   0xc   :  { %520 = vmatprep.subr.bf16.mxu0 %v581_v9  ;;  %568 = vmatprep.mubr.bf16.mxu1 %v599_v24  ;;  %v495_v23 = vld [vmem:[%s765_s4] sm:$0xff]   ;;  %v512_v24 = vld [vmem:[%s765_s4 + $0x8] sm:$0xff]  }
   0xd   :  { %557 = vmatpush3.bf16.msra.mxu1 %v580_v8 }
   0xe   :  { %558 = vmatprep.subr.bf16.mxu1 %v583_v11 }
   0xf   :  { %521 = vmatpush3.bf16.msra.mxu0 %v582_v10 }
  0x10   :  { %522 = vmatprep.subr.bf16.mxu0 %v584_v12 }
  0x11   :  { %559 = vmatpush3.bf16.msra.mxu1 %v583_v11 }
  0x12   :  { %560 = vmatprep.subr.bf16.mxu1 %v586_v13 }
  0x13   :  { %523 = vmatpush3.bf16.msra.mxu0 %v585_v14  ;;  %v389_v14 = vlaneseq }
  0x14   :  { %524 = vmatprep.subr.bf16.mxu0 %v587_v15 }
  0x15   :  { %561 = vmatpush3.bf16.msra.mxu1 %v586_v13  ;;  %v390_v15 = vshrl.u32 %v389_v14, 7 }
  0x16   :  { %562 = vmatprep.subr.bf16.mxu1 %v589_v16 }
  0x17   :  { %525 = vmatpush3.bf16.msra.mxu0 %v588_v17  ;;  %v391_v17 = vsub.s32 0, %v390_v15 }
  0x18   :  { %526 = vmatprep.subr.bf16.mxu0 %v590_v18 }
  0x19   :  { %563 = vmatpush3.bf16.msra.mxu1 %v589_v16  ;;  %v354_v16 = vld [vmem:[%s763_s2] sm:$0x1] }
  0x1a   :  { %564 = vmatprep.subr.bf16.mxu1 %v592_v20 }
  0x1b   :  { %527 = vmatpush3.bf16.msra.mxu0 %v591_v19 }
  0x1c   :  { %528 = vmatprep.subr.bf16.mxu0 %v593_v21 }
  0x1d   :  { %565 = vmatpush3.bf16.msra.mxu1 %v592_v20  ;;  %v355_v20 = vld [vmem:[%s764_s3] sm:$0x1] }
  0x1e   :  { %566 = vmatprep.subr.bf16.mxu1 %v595_v22 }
  0x1f   :  { %529 = vmatpush3.bf16.msra.mxu0 %v594_v25 }
  0x21   :  { %567 = vmatpush3.bf16.msra.mxu1 %v595_v22 }
  0x22   :  { %289 = vmatmul.mubr.bf16.vlgmr.msra.gmra.mrb[0].mxu0 %v596_v26 }
  0x23   :  { %296 = vmatprep.mubr.bf16.mxu0 %v601_v27 }
  0x24   :  { %569 = vmatmul.mubr.bf16.vlgmr.msra.gmra.mrb[0].mxu1 %v600_v28 }
  0x2a   :  { %297 = vmatmul.mubr.bf16.gmra.mrb[4].mxu0 %v603_v29 }
  0xf5   :  { %v530_v30 = vpop.f32.mrb[0].mxu0 }
  0xf6   :  { %v531_v31 = vpop.f32.mrb[1].mxu0 }
  0xf7   :  { %v532_v32 = vadd.f32 %v531_v31, %v530_v30  ;;  %v533_v33 = vpop.f32.mrb[2].mxu0  ;;  %v570_v34 = vpop.f32.mrb[0].mxu1  ;;  %v496_v30 = vunpack.c.l.bf16 %v495_v23 }
  0xf8   :  { %v534_v35 = vpop.f32.mrb[3].mxu0  ;;  %v339_v36 = vpop.f32.mrb[1].mxu1 }
  0xf9   :  { %v535_v37 = vadd.f32 %v534_v35, %v533_v33  ;;  %v340_v38 = vadd.f32 %v532_v32, %v339_v36  ;;  %v571_v39 = vpop.f32.mrb[2].mxu1  ;;  %v497_v32 = vunpack.c.h.bf16 %v495_v23  ;;  %v500_v33 = vunpack.c.l.bf16 %v512_v24 }
  0xfa   :  { %v342_v40 = vpop.f32.mrb[3].mxu1 }
  0xfb   :  { %v343_v41 = vadd.f32 %v535_v37, %v342_v40  ;;  %v366_v42 = vmul.f32 %v340_v38, %v340_v38 }
  0xfd   :  { %v356_v43 = vadd.f32 %v343_v41, %v340_v38  ;;  %v367_v44 = vmul.f32 %v343_v41, %v343_v41  ;;  %v536_v45 = vpop.f32.mrb[4].mxu0 }
  0xfe   :  { %v537_v46 = vpop.f32.mrb[5].mxu0 }
  0xff   :  { %v370_v47 = vadd.f32 %v367_v44, %v366_v42  ;;  %v538_v48 = vadd.f32 %v537_v46, %v536_v45  ;;  %v539_v49 = vpop.f32.mrb[6].mxu0  ;;  %v426_v45 = vld [vmem:[%s766_s5 + $0x10] sm:$0xff]  ;;  %v427_v46 = vld [vmem:[%s766_s5 + $0x18] sm:$0xff] }
 0x100   :  { %v540_v50 = vpop.f32.mrb[7].mxu0 }
 0x101   :  { %v348_v51 = vadd.f32 %v570_v34, %v538_v48  ;;  %v541_v52 = vadd.f32 %v540_v50, %v539_v49  ;;  %v501_v34 = vunpack.c.h.bf16 %v512_v24 }
 0x103   :  { %v357_v53 = vadd.f32 %v356_v43, %v348_v51  ;;  %v368_v54 = vmul.f32 %v348_v51, %v348_v51  ;;  %v351_v55 = vadd.f32 %v571_v39, %v541_v52 }
 0x105   :  { %v371_v56 = vadd.f32 %v370_v47, %v368_v54  ;;  %v358_v57 = vadd.f32 %v357_v53, %v351_v55  ;;  %v369_v58 = vmul.f32 %v351_v55, %v351_v55 }
 0x107   :  { %v359_v59 = vrot.slane %v358_v57, 4  ;;  %v372_v60 = vadd.f32 %v371_v56, %v369_v58 }
 0x109   :  { %v360_v61 = vadd.f32 %v359_v59, %v358_v57  ;;  %v373_v62 = vrot.slane %v372_v60, 4 }
 0x10b   :  { %v361_v63 = vrot.slane %v360_v61, 2  ;;  %v374_v0 = vadd.f32 %v373_v62, %v372_v60 }
 0x10d   :  { %v362_v1 = vadd.f32 %v361_v63, %v360_v61  ;;  %v375_v2 = vrot.slane %v374_v0, 2 }
 0x10f   :  { %v363_v3 = vrot.slane %v362_v1, 1  ;;  %v376_v4 = vadd.f32 %v375_v2, %v374_v0 }
 0x111   :  { %v364_v5 = vadd.f32 %v363_v3, %v362_v1  ;;  %v377_v6 = vrot.slane %v376_v4, 1 }
 0x113   :  { %v365_v7 = vmul.f32 0.03125, %v364_v5  ;;  %v378_v8 = vadd.f32 %v377_v6, %v376_v4 }
 0x115   :  { %v379_v9 = vmul.f32 0.03125, %v378_v8  ;;  %v380_v10 = vmul.f32 %v365_v7, %v365_v7 }
 0x117   :  { %v381_v11 = vsub.f32 %v379_v9, %v380_v10 }
 0x119   :  { %v382_v12 = vmax.f32 %v381_v11, 0.0 }
 0x11b   :  { %v383_v13 = vadd.f32 1e-05, %v382_v12 }
 0x11d   :  { %604 = vrsqrt.f32 %v383_v13 }
 0x127   :  { %v605_v18 = vpop.eup %604 }
 0x128   :  { %v385_v19 = vmul.f32 %v605_v18, %v354_v16 }
 0x12a   :  { %v386_v21 = vmul.f32 %v385_v19, %v365_v7  ;;  %v392_v22 = vrot.slane %v385_v19, %v391_v17 }
 0x12c   :  { %v387_v25 = vsub.f32 %v355_v20, %v386_v21  ;;  %v394_v26 = vmul.f32 %v392_v22, %v340_v38  ;;  %v395_v27 = vmul.f32 %v392_v22, %v343_v41  ;;  %v396_v28 = vmul.f32 %v392_v22, %v348_v51  ;;  %v424_v38 = vld [vmem:[%s766_s5] sm:$0xff]  ;;  %v425_v41 = vld [vmem:[%s766_s5 + $0x8] sm:$0xff] }
 0x12d   :  { %v397_v29 = vmul.f32 %v392_v22, %v351_v55 }
 0x12e   :  { %v402_v31 = vrot.slane %v387_v25, %v391_v17 }
 0x130   :  { %v404_v35 = vadd.f32 %v402_v31, %v394_v26  ;;  %v405_v36 = vadd.f32 %v402_v31, %v395_v27  ;;  %v406_v37 = vadd.f32 %v402_v31, %v396_v28  ;;  %v407_v39 = vadd.f32 %v402_v31, %v397_v29 }
 0x132   :  { %v416_v40 = vadd.f32 %v496_v30, %v404_v35  ;;  %v417_v42 = vadd.f32 %v497_v32, %v405_v36  ;;  %v418_v43 = vadd.f32 %v500_v33, %v406_v37  ;;  %v419_v44 = vadd.f32 %v501_v34, %v407_v39 }
 0x134   :  { %v420_v47 = vmax.f32 %v416_v40, 0.0  ;;  %v421_v48 = vmax.f32 %v417_v42, 0.0  ;;  %v422_v49 = vmax.f32 %v418_v43, 0.0  ;;  %v423_v50 = vmax.f32 %v419_v44, 0.0 }
 0x136   :  { %v428_v51 = vmul.f32 %v424_v38, %v420_v47  ;;  %v429_v52 = vmul.f32 %v425_v41, %v421_v48  ;;  %v430_v53 = vmul.f32 %v426_v45, %v422_v49  ;;  %v431_v54 = vmul.f32 %v427_v46, %v423_v50 }
 0x138   :  { %v505_v55 = vpack.c.bf16 %v429_v52, %v428_v51  ;;  %v510_v56 = vpack.c.bf16 %v431_v54, %v430_v53 }
 0x13a   :  { %506 = vst [vmem:[%s767_s6] sm:$0xff] %v505_v55   ;;  %513 = vst [vmem:[%s767_s6 + $0x8] sm:$0xff] %v510_v56  }

// kernel: _lambda_.29
= control target key start
LH: loop header
LB: loop body
LE: loop exit
PB: predicated region body
PF: predicated region fallthrough
CT: control target
= control target key end

     0   :  { %s717_s1 = inlined_call_operand.vmem [shape: bf16[384,128], index: 1, kind: input, shape index: {}]   ;;  %s718_s0 = inlined_call_operand.vmem [shape: bf16[32,384], index: 0, kind: input, shape index: {}]   ;;  %s719_s2 = inlined_call_operand.vmem [shape: f32[1,128], index: 2, kind: input, shape index: {}, may-alias: {2,4}]   ;;  %s720_s3 = inlined_call_operand.vmem [shape: f32[1,128], index: 3, kind: input, shape index: {}]   ;;  %s721_s4 = inlined_call_operand.vmem [shape: f32[1,128], index: 4, kind: input, shape index: {}, may-alias: {2,4}]   ;;  %s722_s5 = inlined_call_operand.vmem [shape: bf16[32,128], index: 5, kind: output, shape index: {}]  }
   0x1   :  { %v548_v0 = vld [vmem:[%s717_s1 + $0x40] sm:$0xff]   ;;  %v550_v2 = vld [vmem:[%s717_s1 + $0x48] sm:$0xff]   ;;  %v553_v5 = vld [vmem:[%s717_s1 + $0x50] sm:$0xff]  }
   0x2   :  { %v549_v1 = vld [vmem:[%s717_s1] sm:$0xff]   ;;  %490 = vmatprep.subr.bf16.mxu0 %v548_v0  ;;  %v552_v4 = vld [vmem:[%s717_s1 + $0x8] sm:$0xff]   ;;  %v555_v7 = vld [vmem:[%s717_s1 + $0x10] sm:$0xff]  }
   0x3   :  { %491 = vmatpush3.bf16.msra.mxu0 %v549_v1  ;;  %v551_v3 = vld [vmem:[%s717_s1 + $0x80] sm:$0xff]   ;;  %v554_v6 = vld [vmem:[%s717_s1 + $0x88] sm:$0xff]   ;;  %v556_v8 = vld [vmem:[%s717_s1 + $0x58] sm:$0xff]  }
   0x4   :  { %492 = vmatprep.subr.bf16.mxu0 %v550_v2  ;;  %528 = vmatprep.subr.bf16.mxu1 %v551_v3  ;;  %v557_v9 = vld [vmem:[%s717_s1 + $0x90] sm:$0xff]   ;;  %v558_v10 = vld [vmem:[%s717_s1 + $0x18] sm:$0xff]   ;;  %v559_v11 = vld [vmem:[%s717_s1 + $0x60] sm:$0xff]  }
   0x5   :  { %529 = vmatpush3.bf16.msra.mxu1 %v551_v3  ;;  %v560_v12 = vld [vmem:[%s717_s1 + $0x98] sm:$0xff]   ;;  %v561_v13 = vld [vmem:[%s717_s1 + $0x20] sm:$0xff]   ;;  %v562_v15 = vld [vmem:[%s717_s1 + $0x68] sm:$0xff]  }
   0x6   :  { %530 = vmatprep.subr.bf16.mxu1 %v554_v6  ;;  %v563_v14 = vld [vmem:[%s717_s1 + $0xa0] sm:$0xff]   ;;  %v564_v16 = vld [vmem:[%s717_s1 + $0x28] sm:$0xff]   ;;  %v565_v18 = vld [vmem:[%s717_s1 + $0x70] sm:$0xff]  }
   0x7   :  { %493 = vmatpush3.bf16.msra.mxu0 %v552_v4  ;;  %v566_v17 = vld [vmem:[%s717_s1 + $0xa8] sm:$0xff]   ;;  %v567_v19 = vld [vmem:[%s717_s1 + $0x30] sm:$0xff]   ;;  %v568_v20 = vld [vmem:[%s717_s1 + $0x78] sm:$0xff]  }
   0x8   :  { %494 = vmatprep.subr.bf16.mxu0 %v553_v5  ;;  %v569_v21 = vld [vmem:[%s717_s1 + $0xb0] sm:$0xff]   ;;  %v570_v23 = vld [vmem:[%s717_s1 + $0x38] sm:$0xff]   ;;  %v571_v26 = vld [vmem:[%s718_s0] ss:$12 sps:$4 sm:$0xff]  }
   0x9   :  { %531 = vmatpush3.bf16.msra.mxu1 %v554_v6  ;;  %v573_v22 = vld [vmem:[%s718_s0 + $0x4] ss:$12 sps:$4 sm:$0xff]   ;;  %v575_v24 = vld [vmem:[%s718_s0 + $0x8] ss:$12 sps:$4 sm:$0xff]   ;;  %v574_v25 = vld [vmem:[%s717_s1 + $0xb8] sm:$0xff]  }
   0xa   :  { %532 = vmatprep.subr.bf16.mxu1 %v557_v9  ;;  %292 = vmatprep.mubr.bf16.mxu0 %v573_v22  ;;  %v577_v27 = vld [vmem:[%s718_s0 + $0x1c] ss:$12 sps:$4 sm:$0xff]   ;;  %v576_v28 = vld [vmem:[%s718_s0 + $0x20] ss:$12 sps:$4 sm:$0xff]   ;;  %v579_v29 = vld [vmem:[%s718_s0 + $0x18] ss:$12 sps:$4 sm:$0xff]  }
   0xb   :  { %495 = vmatpush3.bf16.msra.mxu0 %v555_v7  ;;  %544 = vmatprep.mubr.bf16.mxu1 %v575_v24  ;;  %v440_v32 = vld [vmem:[%s719_s2] ss:$0 sm:$0xff] }
   0xc   :  { %496 = vmatprep.subr.bf16.mxu0 %v556_v8 }
   0xd   :  { %533 = vmatpush3.bf16.msra.mxu1 %v557_v9 }
   0xe   :  { %534 = vmatprep.subr.bf16.mxu1 %v560_v12 }
   0xf   :  { %497 = vmatpush3.bf16.msra.mxu0 %v558_v10 }
  0x10   :  { %498 = vmatprep.subr.bf16.mxu0 %v559_v11 }
  0x11   :  { %535 = vmatpush3.bf16.msra.mxu1 %v560_v12 }
  0x12   :  { %536 = vmatprep.subr.bf16.mxu1 %v563_v14 }
  0x13   :  { %499 = vmatpush3.bf16.msra.mxu0 %v561_v13 }
  0x14   :  { %500 = vmatprep.subr.bf16.mxu0 %v562_v15 }
  0x15   :  { %537 = vmatpush3.bf16.msra.mxu1 %v563_v14 }
  0x16   :  { %538 = vmatprep.subr.bf16.mxu1 %v566_v17 }
  0x17   :  { %501 = vmatpush3.bf16.msra.mxu0 %v564_v16 }
  0x18   :  { %502 = vmatprep.subr.bf16.mxu0 %v565_v18 }
  0x19   :  { %539 = vmatpush3.bf16.msra.mxu1 %v566_v17 }
  0x1a   :  { %540 = vmatprep.subr.bf16.mxu1 %v569_v21 }
  0x1b   :  { %503 = vmatpush3.bf16.msra.mxu0 %v567_v19  ;;  %v393_v19 = vlaneseq }
  0x1c   :  { %504 = vmatprep.subr.bf16.mxu0 %v568_v20 }
  0x1d   :  { %541 = vmatpush3.bf16.msra.mxu1 %v569_v21  ;;  %v394_v20 = vshrl.u32 %v393_v19, 7  ;;  %v358_v21 = vld [vmem:[%s720_s3] sm:$0x1] }
  0x1e   :  { %542 = vmatprep.subr.bf16.mxu1 %v574_v25 }
  0x1f   :  { %505 = vmatpush3.bf16.msra.mxu0 %v570_v23  ;;  %v395_v22 = vsub.s32 0, %v394_v20 }
  0x21   :  { %543 = vmatpush3.bf16.msra.mxu1 %v574_v25  ;;  %v359_v25 = vld [vmem:[%s721_s4] sm:$0x1] }
  0x22   :  { %293 = vmatmul.mubr.bf16.vlgmr.msra.gmra.mrb[0].mxu0 %v571_v26 }
  0x23   :  { %300 = vmatprep.mubr.bf16.mxu0 %v577_v27 }
  0x24   :  { %545 = vmatmul.mubr.bf16.vlgmr.msra.gmra.mrb[0].mxu1 %v576_v28 }
  0x2a   :  { %301 = vmatmul.mubr.bf16.gmra.mrb[4].mxu0 %v579_v29 }
  0xf5   :  { %v506_v30 = vpop.f32.mrb[0].mxu0 }
  0xf6   :  { %v507_v31 = vpop.f32.mrb[1].mxu0 }
  0xf7   :  { %v508_v33 = vadd.f32 %v507_v31, %v506_v30  ;;  %v509_v34 = vpop.f32.mrb[2].mxu0  ;;  %v546_v36 = vpop.f32.mrb[0].mxu1 }
  0xf8   :  { %v510_v35 = vpop.f32.mrb[3].mxu0  ;;  %v343_v39 = vpop.f32.mrb[1].mxu1 }
  0xf9   :  { %v511_v37 = vadd.f32 %v510_v35, %v509_v34  ;;  %v295_v38 = vadd.f32 %v508_v33, %v440_v32  ;;  %v547_v40 = vpop.f32.mrb[2].mxu1 }
  0xfa   :  { %v346_v43 = vpop.f32.mrb[3].mxu1 }
  0xfb   :  { %v344_v41 = vadd.f32 %v343_v39, %v295_v38  ;;  %v298_v42 = vadd.f32 %v511_v37, %v440_v32 }
  0xfd   :  { %v347_v44 = vadd.f32 %v346_v43, %v298_v42  ;;  %v512_v45 = vpop.f32.mrb[4].mxu0  ;;  %v370_v47 = vmul.f32 %v344_v41, %v344_v41 }
  0xfe   :  { %v513_v46 = vpop.f32.mrb[5].mxu0 }
  0xff   :  { %v360_v48 = vadd.f32 %v347_v44, %v344_v41  ;;  %v371_v49 = vmul.f32 %v347_v44, %v347_v44  ;;  %v514_v50 = vadd.f32 %v513_v46, %v512_v45  ;;  %v515_v51 = vpop.f32.mrb[6].mxu0 }
 0x100   :  { %v516_v52 = vpop.f32.mrb[7].mxu0 }
 0x101   :  { %v374_v53 = vadd.f32 %v371_v49, %v370_v47  ;;  %v303_v54 = vadd.f32 %v514_v50, %v440_v32  ;;  %v517_v55 = vadd.f32 %v516_v52, %v515_v51 }
 0x103   :  { %v352_v56 = vadd.f32 %v546_v36, %v303_v54  ;;  %v306_v57 = vadd.f32 %v517_v55, %v440_v32 }
 0x105   :  { %v361_v58 = vadd.f32 %v360_v48, %v352_v56  ;;  %v372_v59 = vmul.f32 %v352_v56, %v352_v56  ;;  %v355_v60 = vadd.f32 %v547_v40, %v306_v57 }
 0x107   :  { %v375_v61 = vadd.f32 %v374_v53, %v372_v59  ;;  %v362_v62 = vadd.f32 %v361_v58, %v355_v60  ;;  %v373_v63 = vmul.f32 %v355_v60, %v355_v60 }
 0x109   :  { %v363_v0 = vrot.slane %v362_v62, 4  ;;  %v376_v1 = vadd.f32 %v375_v61, %v373_v63 }
 0x10b   :  { %v364_v2 = vadd.f32 %v363_v0, %v362_v62  ;;  %v377_v3 = vrot.slane %v376_v1, 4 }
 0x10d   :  { %v365_v4 = vrot.slane %v364_v2, 2  ;;  %v378_v5 = vadd.f32 %v377_v3, %v376_v1 }
 0x10f   :  { %v366_v6 = vadd.f32 %v365_v4, %v364_v2  ;;  %v379_v7 = vrot.slane %v378_v5, 2 }
 0x111   :  { %v367_v8 = vrot.slane %v366_v6, 1  ;;  %v380_v9 = vadd.f32 %v379_v7, %v378_v5 }
 0x113   :  { %v368_v10 = vadd.f32 %v367_v8, %v366_v6  ;;  %v381_v11 = vrot.slane %v380_v9, 1 }
 0x115   :  { %v369_v12 = vmul.f32 0.03125, %v368_v10  ;;  %v382_v13 = vadd.f32 %v381_v11, %v380_v9 }
 0x117   :  { %v383_v14 = vmul.f32 0.03125, %v382_v13  ;;  %v384_v15 = vmul.f32 %v369_v12, %v369_v12 }
 0x119   :  { %v385_v16 = vsub.f32 %v383_v14, %v384_v15 }
 0x11b   :  { %v386_v17 = vmax.f32 %v385_v16, 0.0 }
 0x11d   :  { %v387_v18 = vadd.f32 1e-05, %v386_v17 }
 0x11f   :  { %580 = vrsqrt.f32 %v387_v18 }
 0x129   :  { %v581_v23 = vpop.eup %580 }
 0x12a   :  { %v389_v24 = vmul.f32 %v581_v23, %v358_v21 }
 0x12c   :  { %v390_v26 = vmul.f32 %v389_v24, %v369_v12  ;;  %v396_v27 = vrot.slane %v389_v24, %v395_v22 }
 0x12e   :  { %v391_v28 = vsub.f32 %v359_v25, %v390_v26  ;;  %v398_v29 = vmul.f32 %v396_v27, %v344_v41  ;;  %v399_v30 = vmul.f32 %v396_v27, %v347_v44  ;;  %v400_v31 = vmul.f32 %v396_v27, %v352_v56 }
 0x12f   :  { %v401_v32 = vmul.f32 %v396_v27, %v355_v60 }
 0x130   :  { %v406_v33 = vrot.slane %v391_v28, %v395_v22 }
 0x132   :  { %v408_v34 = vadd.f32 %v406_v33, %v398_v29  ;;  %v409_v35 = vadd.f32 %v406_v33, %v399_v30  ;;  %v410_v36 = vadd.f32 %v406_v33, %v400_v31  ;;  %v411_v37 = vadd.f32 %v406_v33, %v401_v32 }
 0x134   :  { %v412_v38 = vmax.f32 %v408_v34, 0.0  ;;  %v413_v39 = vmax.f32 %v409_v35, 0.0  ;;  %v414_v40 = vmax.f32 %v410_v36, 0.0  ;;  %v415_v42 = vmax.f32 %v411_v37, 0.0 }
 0x136   :  { %v482_v43 = vpack.c.bf16 %v413_v39, %v412_v38  ;;  %v487_v45 = vpack.c.bf16 %v415_v42, %v414_v40 }
 0x138   :  { %483 = vst [vmem:[%s722_s5] sm:$0xff] %v482_v43   ;;  %489 = vst [vmem:[%s722_s5 + $0x8] sm:$0xff] %v487_v45  }

// kernel: _lambda_.28
= control target key start
LH: loop header
LB: loop body
LE: loop exit
PB: predicated region body
PF: predicated region fallthrough
CT: control target
= control target key end

     0   :  { %s974_s1 = inlined_call_operand.vmem [shape: bf16[384,128], index: 1, kind: input, shape index: {}]   ;;  %s975_s0 = inlined_call_operand.vmem [shape: bf16[32,384], index: 0, kind: input, shape index: {}]   ;;  %s976_s5 = inlined_call_operand.vmem [shape: bf16[128,128], index: 5, kind: input, shape index: {}]   ;;  %s977_s4 = inlined_call_operand.vmem [shape: bf16[32,128], index: 4, kind: input, shape index: {}]   ;;  %s978_s2 = inlined_call_operand.vmem [shape: f32[1,128], index: 2, kind: input, shape index: {}]   ;;  %s979_s3 = inlined_call_operand.vmem [shape: f32[1,128], index: 3, kind: input, shape index: {}]   ;;  %s980_s6 = inlined_call_operand.vmem [shape: f32[1,128], index: 6, kind: input, shape index: {}]   ;;  %s981_s7 = inlined_call_operand.vmem [shape: f32[32,128], index: 7, kind: input, shape index: {}]   ;;  %s982_s8 = inlined_call_operand.vmem [shape: bf16[32,128], index: 8, kind: output, shape index: {}]  }
   0x1   :  { %v738_v0 = vld [vmem:[%s974_s1 + $0x40] sm:$0xff]   ;;  %v741_v3 = vld [vmem:[%s974_s1 + $0x48] sm:$0xff]   ;;  %v744_v6 = vld [vmem:[%s974_s1 + $0x50] sm:$0xff]  }
   0x2   :  { %v739_v1 = vld [vmem:[%s974_s1] sm:$0xff]   ;;  %650 = vmatprep.subr.bf16.mxu0 %v738_v0  ;;  %v742_v4 = vld [vmem:[%s974_s1 + $0x8] sm:$0xff]   ;;  %v745_v7 = vld [vmem:[%s974_s1 + $0x10] sm:$0xff]  }
   0x3   :  { %v740_v2 = vld [vmem:[%s974_s1 + $0x80] sm:$0xff]   ;;  %651 = vmatpush3.bf16.msra.mxu0 %v739_v1  ;;  %v743_v5 = vld [vmem:[%s974_s1 + $0x88] sm:$0xff]   ;;  %v746_v8 = vld [vmem:[%s974_s1 + $0x90] sm:$0xff]  }
   0x4   :  { %698 = vmatprep.subr.bf16.mxu1 %v740_v2  ;;  %652 = vmatprep.subr.bf16.mxu0 %v741_v3  ;;  %v747_v9 = vld [vmem:[%s974_s1 + $0x58] sm:$0xff]   ;;  %v750_v12 = vld [vmem:[%s974_s1 + $0x60] sm:$0xff]   ;;  %v753_v15 = vld [vmem:[%s974_s1 + $0x68] sm:$0xff]  }
   0x5   :  { %699 = vmatpush3.bf16.msra.mxu1 %v740_v2  ;;  %v748_v10 = vld [vmem:[%s974_s1 + $0x18] sm:$0xff]   ;;  %v752_v13 = vld [vmem:[%s974_s1 + $0xa0] sm:$0xff]   ;;  %v755_v16 = vld [vmem:[%s974_s1 + $0xa8] sm:$0xff]  }
   0x6   :  { %700 = vmatprep.subr.bf16.mxu1 %v743_v5  ;;  %v749_v11 = vld [vmem:[%s974_s1 + $0x98] sm:$0xff]   ;;  %v751_v14 = vld [vmem:[%s974_s1 + $0x20] sm:$0xff]   ;;  %v754_v17 = vld [vmem:[%s974_s1 + $0x28] sm:$0xff]  }
   0x7   :  { %653 = vmatpush3.bf16.msra.mxu0 %v742_v4  ;;  %v756_v18 = vld [vmem:[%s974_s1 + $0x70] sm:$0xff]   ;;  %v759_v21 = vld [vmem:[%s974_s1 + $0x78] sm:$0xff]   ;;  %v762_v26 = vld [vmem:[%s975_s0] ss:$12 sps:$4 sm:$0xff]  }
   0x8   :  { %654 = vmatprep.subr.bf16.mxu0 %v744_v6  ;;  %v757_v19 = vld [vmem:[%s974_s1 + $0x30] sm:$0xff]   ;;  %v761_v22 = vld [vmem:[%s974_s1 + $0xb8] sm:$0xff]   ;;  %v770_v27 = vld [vmem:[%s976_s5] sm:$0xff]  }
   0x9   :  { %701 = vmatpush3.bf16.msra.mxu1 %v743_v5  ;;  %v758_v20 = vld [vmem:[%s974_s1 + $0xb0] sm:$0xff]   ;;  %v760_v25 = vld [vmem:[%s974_s1 + $0x38] sm:$0xff]   ;;  %v766_v28 = vld [vmem:[%s975_s0 + $0x20] ss:$12 sps:$4 sm:$0xff]  }
   0xa   :  { %702 = vmatprep.subr.bf16.mxu1 %v746_v8  ;;  %v764_v23 = vld [vmem:[%s975_s0 + $0x4] ss:$12 sps:$4 sm:$0xff]   ;;  %v765_v24 = vld [vmem:[%s975_s0 + $0x8] ss:$12 sps:$4 sm:$0xff]   ;;  %v773_v34 = vld [vmem:[%s976_s5 + $0x18] sm:$0xff]  }
   0xb   :  { %655 = vmatpush3.bf16.msra.mxu0 %v745_v7  ;;  %294 = vmatprep.mubr.bf16.mxu0 %v764_v23  ;;  %v767_v29 = vld [vmem:[%s975_s0 + $0x1c] ss:$12 sps:$4 sm:$0xff]   ;;  %v772_v31 = vld [vmem:[%s976_s5 + $0x10] sm:$0xff]   ;;  %v769_v32 = vld [vmem:[%s975_s0 + $0x18] ss:$12 sps:$4 sm:$0xff]  }
   0xc   :  { %656 = vmatprep.subr.bf16.mxu0 %v747_v9  ;;  %714 = vmatprep.mubr.bf16.mxu1 %v765_v24  ;;  %v771_v30 = vld [vmem:[%s976_s5 + $0x8] sm:$0xff]   ;;  %v778_v33 = vld [vmem:[%s977_s4] sm:$0xff]   ;;  %v776_v37 = vld [vmem:[%s976_s5 + $0x30] sm:$0xff]  }
   0xd   :  { %703 = vmatpush3.bf16.msra.mxu1 %v746_v8  ;;  %v774_v35 = vld [vmem:[%s976_s5 + $0x20] sm:$0xff]   ;;  %v775_v36 = vld [vmem:[%s976_s5 + $0x28] sm:$0xff]   ;;  %v777_v38 = vld [vmem:[%s976_s5 + $0x38] sm:$0xff]  }
   0xe   :  { %704 = vmatprep.subr.bf16.mxu1 %v749_v11  ;;  %v779_v39 = vld [vmem:[%s977_s4 + $0x8] sm:$0xff]  }
   0xf   :  { %657 = vmatpush3.bf16.msra.mxu0 %v748_v10 }
  0x10   :  { %658 = vmatprep.subr.bf16.mxu0 %v750_v12 }
  0x11   :  { %705 = vmatpush3.bf16.msra.mxu1 %v749_v11 }
  0x12   :  { %706 = vmatprep.subr.bf16.mxu1 %v752_v13 }
  0x13   :  { %659 = vmatpush3.bf16.msra.mxu0 %v751_v14 }
  0x14   :  { %660 = vmatprep.subr.bf16.mxu0 %v753_v15 }
  0x15   :  { %707 = vmatpush3.bf16.msra.mxu1 %v752_v13 }
  0x16   :  { %708 = vmatprep.subr.bf16.mxu1 %v755_v16 }
  0x17   :  { %661 = vmatpush3.bf16.msra.mxu0 %v754_v17 }
  0x18   :  { %662 = vmatprep.subr.bf16.mxu0 %v756_v18 }
  0x19   :  { %709 = vmatpush3.bf16.msra.mxu1 %v755_v16 }
  0x1a   :  { %710 = vmatprep.subr.bf16.mxu1 %v758_v20 }
  0x1b   :  { %663 = vmatpush3.bf16.msra.mxu0 %v757_v19 }
  0x1c   :  { %664 = vmatprep.subr.bf16.mxu0 %v759_v21 }
  0x1d   :  { %711 = vmatpush3.bf16.msra.mxu1 %v758_v20 }
  0x1e   :  { %712 = vmatprep.subr.bf16.mxu1 %v761_v22 }
  0x1f   :  { %665 = vmatpush3.bf16.msra.mxu0 %v760_v25 }
  0x20   :  { %718 = vmatprep.subr.bf16.mxu0 %v770_v27 }
  0x21   :  { %713 = vmatpush3.bf16.msra.mxu1 %v761_v22 }
  0x22   :  { %295 = vmatmul.mubr.bf16.vlgmr.msra.gmra.mrb[0].mxu0 %v762_v26 }
  0x23   :  { %302 = vmatprep.mubr.bf16.mxu0 %v767_v29  ;;  %719 = vmatpush3.bf16.msra.mxu0 %v770_v27 }
  0x24   :  { %715 = vmatmul.mubr.bf16.vlgmr.msra.gmra.mrb[0].mxu1 %v766_v28  ;;  %720 = vmatprep.subr.bf16.mxu0 %v771_v30  ;;  %v531_v28 = vlaneseq }
  0x26   :  { %v532_v29 = vshrl.u32 %v531_v28, 7 }
  0x27   :  { %721 = vmatpush3.bf16.msra.mxu0 %v771_v30  ;;  %v496_v30 = vld [vmem:[%s978_s2] sm:$0x1] }
  0x28   :  { %722 = vmatprep.subr.bf16.mxu0 %v772_v31 }
  0x2a   :  { %303 = vmatmul.mubr.bf16.gmra.mrb[4].mxu0 %v769_v32 }
  0x2b   :  { %723 = vmatpush3.bf16.msra.mxu0 %v772_v31  ;;  %734 = vmatprep.mubr.bf16.mxu0 %v778_v33  ;;  %v533_v31 = vsub.s32 0, %v532_v29 }
  0x2c   :  { %724 = vmatprep.subr.bf16.mxu0 %v773_v34 }
  0x2f   :  { %725 = vmatpush3.bf16.msra.mxu0 %v773_v34  ;;  %v497_v34 = vld [vmem:[%s979_s3] sm:$0x1] }
  0x30   :  { %726 = vmatprep.subr.bf16.mxu0 %v774_v35 }
  0x33   :  { %727 = vmatpush3.bf16.msra.mxu0 %v774_v35 }
  0x34   :  { %728 = vmatprep.subr.bf16.mxu0 %v775_v36 }
  0x37   :  { %729 = vmatpush3.bf16.msra.mxu0 %v775_v36 }
  0x38   :  { %730 = vmatprep.subr.bf16.mxu0 %v776_v37 }
  0x3b   :  { %731 = vmatpush3.bf16.msra.mxu0 %v776_v37  ;;  %v620_v37 = vld [vmem:[%s980_s6] ss:$0 sm:$0xff] }
  0x3c   :  { %732 = vmatprep.subr.bf16.mxu0 %v777_v38 }
  0x3f   :  { %733 = vmatpush3.bf16.msra.mxu0 %v777_v38 }
  0x42   :  { %735 = vmatmul.mubr.bf16.vlgmr.msra.gmra.mrb[8].mxu0 %v779_v39 }
  0xf5   :  { %v666_v40 = vpop.f32.mrb[0].mxu0 }
  0xf6   :  { %v667_v41 = vpop.f32.mrb[1].mxu0 }
  0xf7   :  { %v668_v42 = vadd.f32 %v667_v41, %v666_v40  ;;  %v669_v43 = vpop.f32.mrb[2].mxu0  ;;  %v716_v44 = vpop.f32.mrb[0].mxu1 }
  0xf8   :  { %v670_v45 = vpop.f32.mrb[3].mxu0  ;;  %v345_v46 = vpop.f32.mrb[1].mxu1 }
  0xf9   :  { %v671_v47 = vadd.f32 %v670_v45, %v669_v43  ;;  %v346_v48 = vadd.f32 %v668_v42, %v345_v46  ;;  %v717_v49 = vpop.f32.mrb[2].mxu1 }
  0xfa   :  { %v348_v50 = vpop.f32.mrb[3].mxu1 }
  0xfb   :  { %v349_v51 = vadd.f32 %v671_v47, %v348_v50  ;;  %v508_v52 = vmul.f32 %v346_v48, %v346_v48 }
  0xfd   :  { %v498_v53 = vadd.f32 %v349_v51, %v346_v48  ;;  %v509_v54 = vmul.f32 %v349_v51, %v349_v51  ;;  %v672_v55 = vpop.f32.mrb[4].mxu0 }
  0xfe   :  { %v673_v56 = vpop.f32.mrb[5].mxu0 }
  0xff   :  { %v512_v57 = vadd.f32 %v509_v54, %v508_v52  ;;  %v674_v58 = vadd.f32 %v673_v56, %v672_v55  ;;  %v675_v59 = vpop.f32.mrb[6].mxu0  ;;  %v560_v55 = vld [vmem:[%s981_s7 + $0x10] sm:$0xff] }
 0x100   :  { %v676_v60 = vpop.f32.mrb[7].mxu0 }
 0x101   :  { %v354_v61 = vadd.f32 %v716_v44, %v674_v58  ;;  %v677_v62 = vadd.f32 %v676_v60, %v675_v59  ;;  %v559_v59 = vld [vmem:[%s981_s7 + $0x8] sm:$0xff] }
 0x103   :  { %v499_v63 = vadd.f32 %v498_v53, %v354_v61  ;;  %v510_v0 = vmul.f32 %v354_v61, %v354_v61  ;;  %v357_v1 = vadd.f32 %v717_v49, %v677_v62 }
 0x105   :  { %v513_v2 = vadd.f32 %v512_v57, %v510_v0  ;;  %v500_v3 = vadd.f32 %v499_v63, %v357_v1  ;;  %v511_v4 = vmul.f32 %v357_v1, %v357_v1 }
 0x107   :  { %v501_v5 = vrot.slane %v500_v3, 4  ;;  %v514_v6 = vadd.f32 %v513_v2, %v511_v4 }
 0x109   :  { %v502_v7 = vadd.f32 %v501_v5, %v500_v3  ;;  %v515_v8 = vrot.slane %v514_v6, 4 }
 0x10b   :  { %v503_v9 = vrot.slane %v502_v7, 2  ;;  %v516_v10 = vadd.f32 %v515_v8, %v514_v6 }
 0x10d   :  { %v504_v11 = vadd.f32 %v503_v9, %v502_v7  ;;  %v517_v12 = vrot.slane %v516_v10, 2 }
 0x10f   :  { %v505_v13 = vrot.slane %v504_v11, 1  ;;  %v518_v14 = vadd.f32 %v517_v12, %v516_v10 }
 0x111   :  { %v506_v15 = vadd.f32 %v505_v13, %v504_v11  ;;  %v519_v16 = vrot.slane %v518_v14, 1 }
 0x113   :  { %v507_v17 = vmul.f32 0.03125, %v506_v15  ;;  %v520_v18 = vadd.f32 %v519_v16, %v518_v14 }
 0x115   :  { %v521_v19 = vmul.f32 0.03125, %v520_v18  ;;  %v522_v20 = vmul.f32 %v507_v17, %v507_v17  ;;  %v736_v21 = vpop.f32.mrb[8].mxu0 }
 0x116   :  { %v481_v22 = vpop.f32.mrb[9].mxu0  ;;  %v490_v44 = vadd.f32 %v736_v21, %v620_v37 }
 0x117   :  { %v523_v23 = vsub.f32 %v521_v19, %v522_v20  ;;  %v737_v24 = vpop.f32.mrb[10].mxu0  ;;  %v482_v45 = vadd.f32 %v620_v37, %v481_v22 }
 0x118   :  { %v484_v25 = vpop.f32.mrb[11].mxu0  ;;  %v493_v46 = vadd.f32 %v737_v24, %v620_v37 }
 0x119   :  { %v524_v26 = vmax.f32 %v523_v23, 0.0  ;;  %v485_v47 = vadd.f32 %v620_v37, %v484_v25 }
 0x11b   :  { %v525_v27 = vadd.f32 1e-05, %v524_v26 }
 0x11d   :  { %780 = vrsqrt.f32 %v525_v27 }
 0x127   :  { %v781_v32 = vpop.eup %780 }
 0x128   :  { %v527_v33 = vmul.f32 %v781_v32, %v496_v30 }
 0x12a   :  { %v528_v35 = vmul.f32 %v527_v33, %v507_v17  ;;  %v534_v36 = vrot.slane %v527_v33, %v533_v31 }
 0x12c   :  { %v529_v38 = vsub.f32 %v497_v34, %v528_v35  ;;  %v538_v39 = vmul.f32 %v534_v36, %v354_v61  ;;  %v536_v40 = vmul.f32 %v534_v36, %v346_v48  ;;  %v539_v41 = vmul.f32 %v534_v36, %v357_v1  ;;  %v558_v48 = vld [vmem:[%s981_s7] sm:$0xff] }
 0x12d   :  { %v537_v42 = vmul.f32 %v534_v36, %v349_v51  ;;  %v561_v51 = vld [vmem:[%s981_s7 + $0x18] sm:$0xff] }
 0x12e   :  { %v544_v43 = vrot.slane %v529_v38, %v533_v31 }
 0x130   :  { %v548_v49 = vadd.f32 %v544_v43, %v538_v39  ;;  %v546_v50 = vadd.f32 %v544_v43, %v536_v40  ;;  %v549_v52 = vadd.f32 %v544_v43, %v539_v41  ;;  %v547_v53 = vadd.f32 %v544_v43, %v537_v42 }
 0x132   :  { %v552_v54 = vadd.f32 %v548_v49, %v490_v44  ;;  %v550_v56 = vadd.f32 %v546_v50, %v482_v45  ;;  %v553_v57 = vadd.f32 %v549_v52, %v493_v46  ;;  %v551_v58 = vadd.f32 %v547_v53, %v485_v47 }
 0x134   :  { %v556_v60 = vmax.f32 %v552_v54, 0.0  ;;  %v554_v61 = vmax.f32 %v550_v56, 0.0  ;;  %v557_v62 = vmax.f32 %v553_v57, 0.0  ;;  %v555_v63 = vmax.f32 %v551_v58, 0.0 }
 0x136   :  { %v564_v0 = vmul.f32 %v560_v55, %v556_v60  ;;  %v562_v1 = vmul.f32 %v558_v48, %v554_v61  ;;  %v565_v2 = vmul.f32 %v561_v51, %v557_v62  ;;  %v563_v3 = vmul.f32 %v559_v59, %v555_v63 }
 0x138   :  { %v647_v4 = vpack.c.bf16 %v565_v2, %v564_v0  ;;  %v642_v5 = vpack.c.bf16 %v563_v3, %v562_v1 }
 0x13a   :  { %649 = vst [vmem:[%s982_s8 + $0x8] sm:$0xff] %v647_v4   ;;  %643 = vst [vmem:[%s982_s8] sm:$0xff] %v642_v5  }

// kernel: _lambda_.31
= control target key start
LH: loop header
LB: loop body
LE: loop exit
PB: predicated region body
PF: predicated region fallthrough
CT: control target
= control target key end

     0   :  { %v469_v1 = vmov 0.0   ;;  %vm470_vm0 = vmmov 0   ;;  %v339_v60 = vlaneseq  ;;  %s591_s1 = inlined_call_operand.vmem [shape: bf16[384,128], index: 1, kind: input, shape index: {}]   ;;  %s592_s0 = inlined_call_operand.vmem [shape: bf16[8,384], index: 0, kind: input, shape index: {}]   ;;  %s593_s2 = inlined_call_operand.vmem [shape: f32[1,128], index: 2, kind: input, shape index: {}, may-alias: {2,4}]   ;;  %s594_s3 = inlined_call_operand.vmem [shape: f32[1,128], index: 3, kind: input, shape index: {}]   ;;  %s595_s4 = inlined_call_operand.vmem [shape: f32[1,128], index: 4, kind: input, shape index: {}, may-alias: {2,4}]   ;;  %s596_s5 = inlined_call_operand.vmem [shape: bf16[8,128], index: 5, kind: output, shape index: {}]  }
   0x1   :  { %v440_v0 = vld [vmem:[%s591_s1 + $0x40] sm:$0xff]   ;;  %418 = vmatprep.subr.bf16.mxu1 %v469_v1  ;;  %434 = vmatprep.mubr.msk.bf16.mxu1 %vm470_vm0, %v469_v1  ;;  %v443_v4 = vld [vmem:[%s591_s1 + $0x48] sm:$0xff]   ;;  %v446_v7 = vld [vmem:[%s591_s1 + $0x50] sm:$0xff]  }
   0x2   :  { %v441_v2 = vld [vmem:[%s591_s1] sm:$0xff]   ;;  %387 = vmatprep.subr.bf16.mxu0 %v440_v0  ;;  %v444_v5 = vld [vmem:[%s591_s1 + $0x8] sm:$0xff]   ;;  %v447_v8 = vld [vmem:[%s591_s1 + $0x10] sm:$0xff]   ;;  %v340_v61 = vshrl.u32 %v339_v60, 7 }
   0x3   :  { %v442_v3 = vld [vmem:[%s591_s1 + $0x80] sm:$0xff]   ;;  %388 = vmatpush3.bf16.msra.mxu0 %v441_v2  ;;  %v445_v6 = vld [vmem:[%s591_s1 + $0x88] sm:$0xff]   ;;  %v448_v9 = vld [vmem:[%s591_s1 + $0x90] sm:$0xff]  }
   0x4   :  { %419 = vmatpush3.bf16.msra.mxu1 %v442_v3  ;;  %389 = vmatprep.subr.bf16.mxu0 %v443_v4  ;;  %v449_v10 = vld [vmem:[%s591_s1 + $0x58] sm:$0xff]   ;;  %v452_v13 = vld [vmem:[%s591_s1 + $0x60] sm:$0xff]   ;;  %v455_v16 = vld [vmem:[%s591_s1 + $0x68] sm:$0xff]   ;;  %v341_v63 = vsub.s32 0, %v340_v61 }
   0x5   :  { %420 = vmatprep.subr.bf16.mxu1 %v469_v1  ;;  %v450_v11 = vld [vmem:[%s591_s1 + $0x18] sm:$0xff]   ;;  %v453_v14 = vld [vmem:[%s591_s1 + $0x20] sm:$0xff]   ;;  %v456_v17 = vld [vmem:[%s591_s1 + $0x28] sm:$0xff]  }
   0x6   :  { %v451_v12 = vld [vmem:[%s591_s1 + $0x98] sm:$0xff]   ;;  %v454_v15 = vld [vmem:[%s591_s1 + $0xa0] sm:$0xff]   ;;  %v457_v18 = vld [vmem:[%s591_s1 + $0xa8] sm:$0xff]  }
   0x7   :  { %390 = vmatpush3.bf16.msra.mxu0 %v444_v5  ;;  %v458_v19 = vld [vmem:[%s591_s1 + $0x70] sm:$0xff]   ;;  %v21_v22 = vld [vmem:[%s592_s0] sm:$0xff]  ;;  %v461_v23 = vld [vmem:[%s591_s1 + $0x78] sm:$0xff]  }
   0x8   :  { %421 = vmatpush3.bf16.msra.mxu1 %v445_v6  ;;  %391 = vmatprep.subr.bf16.mxu0 %v446_v7  ;;  %v459_v20 = vld [vmem:[%s591_s1 + $0x30] sm:$0xff]   ;;  %v361_v24 = vcombine.high %v21_v22, %v21_v22  ;;  %v462_v25 = vld [vmem:[%s591_s1 + $0x38] sm:$0xff]   ;;  %v360_v27 = vcombine.low %v21_v22, %v21_v22  ;;  %v465_v28 = vld [vmem:[%s592_s0 + $0x8] ss:$0 sps:$4 sm:$0xff]  }
   0x9   :  { %422 = vmatprep.subr.bf16.mxu1 %v469_v1  ;;  %v460_v21 = vld [vmem:[%s591_s1 + $0xb0] sm:$0xff]   ;;  %v466_v26 = vld [vmem:[%s591_s1 + $0xb8] sm:$0xff]   ;;  %v359_v31 = vld [vmem:[%s593_s2] ss:$0 sm:$0xff] }
   0xa   :  { %265 = vmatprep.mubr.bf16.mxu0 %v361_v24  ;;  %v313_v62 = vld [vmem:[%s594_s3] sm:$0x1] }
   0xb   :  { %392 = vmatpush3.bf16.msra.mxu0 %v447_v8  ;;  %v314_v2 = vld [vmem:[%s595_s4] sm:$0x1] }
   0xc   :  { %423 = vmatpush3.bf16.msra.mxu1 %v448_v9  ;;  %393 = vmatprep.subr.bf16.mxu0 %v449_v10 }
   0xd   :  { %424 = vmatprep.subr.bf16.mxu1 %v469_v1 }
   0xf   :  { %394 = vmatpush3.bf16.msra.mxu0 %v450_v11 }
  0x10   :  { %425 = vmatpush3.bf16.msra.mxu1 %v451_v12  ;;  %395 = vmatprep.subr.bf16.mxu0 %v452_v13 }
  0x11   :  { %426 = vmatprep.subr.bf16.mxu1 %v469_v1 }
  0x13   :  { %396 = vmatpush3.bf16.msra.mxu0 %v453_v14 }
  0x14   :  { %427 = vmatpush3.bf16.msra.mxu1 %v454_v15  ;;  %397 = vmatprep.subr.bf16.mxu0 %v455_v16 }
  0x15   :  { %428 = vmatprep.subr.bf16.mxu1 %v469_v1 }
  0x17   :  { %398 = vmatpush3.bf16.msra.mxu0 %v456_v17 }
  0x18   :  { %429 = vmatpush3.bf16.msra.mxu1 %v457_v18  ;;  %399 = vmatprep.subr.bf16.mxu0 %v458_v19 }
  0x19   :  { %430 = vmatprep.subr.bf16.mxu1 %v469_v1 }
  0x1b   :  { %400 = vmatpush3.bf16.msra.mxu0 %v459_v20 }
  0x1c   :  { %431 = vmatpush3.bf16.msra.mxu1 %v460_v21  ;;  %401 = vmatprep.subr.bf16.mxu0 %v461_v23 }
  0x1d   :  { %432 = vmatprep.subr.bf16.mxu1 %v469_v1 }
  0x1f   :  { %402 = vmatpush3.bf16.msra.mxu0 %v462_v25 }
  0x20   :  { %433 = vmatpush3.bf16.msra.mxu1 %v466_v26 }
  0x22   :  { %266 = vmatmul.mubr.bf16.vlgmr.msra.gmra.mrb[0].mxu0 %v360_v27 }
  0x23   :  { %435 = vmatmul.mubr.bf16.vlgmr.msra.gmra.mrb[0].mxu1 %v465_v28 }
  0xf5   :  { %v403_v29 = vpop.f32.mrb[0].mxu0 }
  0xf6   :  { %v404_v30 = vpop.f32.mrb[1].mxu0  ;;  %v307_v32 = vpop.f32.mrb[0].mxu1 }
  0xf7   :  { %v405_v33 = vadd.f32 %v404_v30, %v403_v29  ;;  %v406_v34 = vpop.f32.mrb[2].mxu0  ;;  %v436_v35 = vpop.f32.mrb[1].mxu1 }
  0xf8   :  { %v407_v36 = vpop.f32.mrb[3].mxu0  ;;  %v310_v37 = vpop.f32.mrb[2].mxu1 }
  0xf9   :  { %v268_v38 = vadd.f32 %v405_v33, %v359_v31  ;;  %v437_v39 = vpop.f32.mrb[3].mxu1 }
  0xfb   :  { %v308_v40 = vadd.f32 %v307_v32, %v268_v38 }
  0xfd   :  { %v315_v41 = vrot.slane %v308_v40, 4  ;;  %v322_v42 = vmul.f32 %v308_v40, %v308_v40 }
  0xff   :  { %v316_v43 = vadd.f32 %v315_v41, %v308_v40  ;;  %v323_v44 = vrot.slane %v322_v42, 4 }
 0x101   :  { %v317_v45 = vrot.slane %v316_v43, 2  ;;  %v324_v46 = vadd.f32 %v323_v44, %v322_v42 }
 0x103   :  { %v318_v47 = vadd.f32 %v317_v45, %v316_v43  ;;  %v325_v48 = vrot.slane %v324_v46, 2 }
 0x105   :  { %v319_v49 = vrot.slane %v318_v47, 1  ;;  %v326_v50 = vadd.f32 %v325_v48, %v324_v46 }
 0x107   :  { %v320_v51 = vadd.f32 %v319_v49, %v318_v47  ;;  %v327_v52 = vrot.slane %v326_v50, 1 }
 0x109   :  { %v321_v53 = vmul.f32 0.125, %v320_v51  ;;  %v328_v54 = vadd.f32 %v327_v52, %v326_v50 }
 0x10b   :  { %v329_v55 = vmul.f32 0.125, %v328_v54  ;;  %v330_v56 = vmul.f32 %v321_v53, %v321_v53 }
 0x10d   :  { %v331_v57 = vsub.f32 %v329_v55, %v330_v56 }
 0x10f   :  { %v332_v58 = vmax.f32 %v331_v57, 0.0 }
 0x111   :  { %v333_v59 = vadd.f32 1e-05, %v332_v58 }
 0x113   :  { %467 = vrsqrt.f32 %v333_v59 }
 0x11d   :  { %v468_v0 = vpop.eup %467 }
 0x11e   :  { %v335_v1 = vmul.f32 %v468_v0, %v313_v62 }
 0x120   :  { %v336_v3 = vmul.f32 %v335_v1, %v321_v53  ;;  %v342_v4 = vrot.slane %v335_v1, %v341_v63 }
 0x122   :  { %v337_v5 = vsub.f32 %v314_v2, %v336_v3  ;;  %v344_v6 = vmul.f32 %v342_v4, %v308_v40 }
 0x124   :  { %v349_v7 = vrot.slane %v337_v5, %v341_v63 }
 0x126   :  { %v351_v8 = vadd.f32 %v349_v7, %v344_v6 }
 0x128   :  { %v352_v9 = vmax.f32 %v351_v8, 0.0 }
 0x12a   :  { %v353_v10 = vpack.c.bf16 %v352_v9, %v352_v9 }
 0x12c   :  { %354 = vst [vmem:[%s596_s5] sm:$0xf] %v353_v10 }

// kernel: _lambda_.33
= control target key start
LH: loop header
LB: loop body
LE: loop exit
PB: predicated region body
PF: predicated region fallthrough
CT: control target
= control target key end

     0   :  { %v703_v35 = vmov 0.0   ;;  %vm704_vm0 = vmmov 0   ;;  %s876_s1 = inlined_call_operand.vmem [shape: bf16[640,128], index: 1, kind: input, shape index: {}]   ;;  %s877_s0 = inlined_call_operand.vmem [shape: bf16[8,640], index: 0, kind: input, shape index: {}]   ;;  %s878_s2 = inlined_call_operand.vmem [shape: f32[1,128], index: 2, kind: input, shape index: {}, may-alias: {2,4}]   ;;  %s879_s3 = inlined_call_operand.vmem [shape: f32[1,128], index: 3, kind: input, shape index: {}]   ;;  %s880_s4 = inlined_call_operand.vmem [shape: f32[1,128], index: 4, kind: input, shape index: {}, may-alias: {2,4}]   ;;  %s881_s5 = inlined_call_operand.vmem [shape: bf16[8,128], index: 5, kind: output, shape index: {}]  }
   0x1   :  { %v656_v0 = vld [vmem:[%s876_s1 + $0x40] sm:$0xff]   ;;  %v660_v4 = vld [vmem:[%s876_s1 + $0x48] sm:$0xff]   ;;  %v664_v8 = vld [vmem:[%s876_s1 + $0x50] sm:$0xff]  }
   0x2   :  { %v657_v1 = vld [vmem:[%s876_s1] sm:$0xff]   ;;  %581 = vmatprep.subr.bf16.mxu0 %v656_v0  ;;  %v661_v5 = vld [vmem:[%s876_s1 + $0x8] sm:$0xff]   ;;  %v665_v9 = vld [vmem:[%s876_s1 + $0x10] sm:$0xff]  }
   0x3   :  { %v658_v2 = vld [vmem:[%s876_s1 + $0xc0] sm:$0xff]   ;;  %582 = vmatpush3.bf16.msra.mxu0 %v657_v1  ;;  %v662_v6 = vld [vmem:[%s876_s1 + $0xc8] sm:$0xff]   ;;  %v666_v10 = vld [vmem:[%s876_s1 + $0xd0] sm:$0xff]  }
   0x4   :  { %v659_v3 = vld [vmem:[%s876_s1 + $0x80] sm:$0xff]   ;;  %603 = vmatprep.subr.bf16.mxu1 %v658_v2  ;;  %583 = vmatprep.subr.bf16.mxu0 %v660_v4  ;;  %v663_v7 = vld [vmem:[%s876_s1 + $0x88] sm:$0xff]   ;;  %v667_v11 = vld [vmem:[%s876_s1 + $0x90] sm:$0xff]  }
   0x5   :  { %604 = vmatpush3.bf16.msra.mxu1 %v659_v3  ;;  %v668_v12 = vld [vmem:[%s876_s1 + $0x58] sm:$0xff]   ;;  %v672_v16 = vld [vmem:[%s876_s1 + $0x60] sm:$0xff]   ;;  %v676_v20 = vld [vmem:[%s876_s1 + $0x68] sm:$0xff]  }
   0x6   :  { %605 = vmatprep.subr.bf16.mxu1 %v662_v6  ;;  %v669_v13 = vld [vmem:[%s876_s1 + $0x18] sm:$0xff]   ;;  %v673_v17 = vld [vmem:[%s876_s1 + $0x20] sm:$0xff]   ;;  %v677_v21 = vld [vmem:[%s876_s1 + $0x28] sm:$0xff]  }
   0x7   :  { %584 = vmatpush3.bf16.msra.mxu0 %v661_v5  ;;  %v670_v14 = vld [vmem:[%s876_s1 + $0xd8] sm:$0xff]   ;;  %v674_v18 = vld [vmem:[%s876_s1 + $0xe0] sm:$0xff]   ;;  %v678_v22 = vld [vmem:[%s876_s1 + $0xe8] sm:$0xff]  }
   0x8   :  { %585 = vmatprep.subr.bf16.mxu0 %v664_v8  ;;  %v671_v15 = vld [vmem:[%s876_s1 + $0x98] sm:$0xff]   ;;  %v675_v19 = vld [vmem:[%s876_s1 + $0xa0] sm:$0xff]   ;;  %v679_v23 = vld [vmem:[%s876_s1 + $0xa8] sm:$0xff]  }
   0x9   :  { %606 = vmatpush3.bf16.msra.mxu1 %v663_v7  ;;  %v680_v24 = vld [vmem:[%s876_s1 + $0x70] sm:$0xff]   ;;  %v684_v28 = vld [vmem:[%s876_s1 + $0x78] sm:$0xff]   ;;  %v21_v31 = vld [vmem:[%s877_s0] sm:$0xff] }
   0xa   :  { %607 = vmatprep.subr.bf16.mxu1 %v666_v10  ;;  %v681_v25 = vld [vmem:[%s876_s1 + $0x30] sm:$0xff]   ;;  %v685_v29 = vld [vmem:[%s876_s1 + $0x38] sm:$0xff]   ;;  %v536_v32 = vcombine.low %v21_v31, %v21_v31  ;;  %v537_v33 = vcombine.high %v21_v31, %v21_v31  ;;  %v22_v36 = vld [vmem:[%s877_s0 + $0x8] sm:$0xff] }
   0xb   :  { %586 = vmatpush3.bf16.msra.mxu0 %v665_v9  ;;  %v682_v26 = vld [vmem:[%s876_s1 + $0xf0] sm:$0xff]   ;;  %v686_v30 = vld [vmem:[%s876_s1 + $0xf8] sm:$0xff]   ;;  %v538_v37 = vcombine.low %v22_v36, %v22_v36  ;;  %v539_v38 = vcombine.high %v22_v36, %v22_v36  ;;  %v693_v39 = vld [vmem:[%s876_s1 + $0x100] sm:$0xff]  }
   0xc   :  { %587 = vmatprep.subr.bf16.mxu0 %v668_v12  ;;  %v683_v27 = vld [vmem:[%s876_s1 + $0xb0] sm:$0xff]   ;;  %v690_v34 = vld [vmem:[%s876_s1 + $0xb8] sm:$0xff]   ;;  %401 = vmatprep.mubr.bf16.mxu0 %v537_v33  ;;  %v694_v40 = vld [vmem:[%s876_s1 + $0x108] sm:$0xff]  }
   0xd   :  { %608 = vmatpush3.bf16.msra.mxu1 %v667_v11  ;;  %441 = vmatprep.mubr.bf16.mxu1 %v539_v38  ;;  %v695_v41 = vld [vmem:[%s876_s1 + $0x110] sm:$0xff]   ;;  %v696_v42 = vld [vmem:[%s876_s1 + $0x118] sm:$0xff]   ;;  %v697_v43 = vld [vmem:[%s876_s1 + $0x120] sm:$0xff]  }
   0xe   :  { %609 = vmatprep.subr.bf16.mxu1 %v670_v14  ;;  %v698_v44 = vld [vmem:[%s876_s1 + $0x128] sm:$0xff]   ;;  %v699_v45 = vld [vmem:[%s876_s1 + $0x130] sm:$0xff]   ;;  %v700_v46 = vld [vmem:[%s876_s1 + $0x138] sm:$0xff]  }
   0xf   :  { %588 = vmatpush3.bf16.msra.mxu0 %v669_v13  ;;  %v689_v47 = vld [vmem:[%s877_s0 + $0x10] ss:$0 sps:$4 sm:$0xff]   ;;  %v535_v49 = vld [vmem:[%s878_s2] ss:$0 sm:$0xff] }
  0x10   :  { %589 = vmatprep.subr.bf16.mxu0 %v672_v16 }
  0x11   :  { %610 = vmatpush3.bf16.msra.mxu1 %v671_v15 }
  0x12   :  { %611 = vmatprep.subr.bf16.mxu1 %v674_v18 }
  0x13   :  { %590 = vmatpush3.bf16.msra.mxu0 %v673_v17 }
  0x14   :  { %591 = vmatprep.subr.bf16.mxu0 %v676_v20 }
  0x15   :  { %612 = vmatpush3.bf16.msra.mxu1 %v675_v19 }
  0x16   :  { %613 = vmatprep.subr.bf16.mxu1 %v678_v22 }
  0x17   :  { %592 = vmatpush3.bf16.msra.mxu0 %v677_v21  ;;  %v515_v21 = vlaneseq }
  0x18   :  { %593 = vmatprep.subr.bf16.mxu0 %v680_v24 }
  0x19   :  { %614 = vmatpush3.bf16.msra.mxu1 %v679_v23  ;;  %v516_v22 = vshrl.u32 %v515_v21, 7  ;;  %v489_v23 = vld [vmem:[%s879_s3] sm:$0x1] }
  0x1a   :  { %615 = vmatprep.subr.bf16.mxu1 %v682_v26 }
  0x1b   :  { %594 = vmatpush3.bf16.msra.mxu0 %v681_v25  ;;  %v517_v24 = vsub.s32 0, %v516_v22 }
  0x1c   :  { %595 = vmatprep.subr.bf16.mxu0 %v684_v28 }
  0x1d   :  { %616 = vmatpush3.bf16.msra.mxu1 %v683_v27  ;;  %v490_v27 = vld [vmem:[%s880_s4] sm:$0x1] }
  0x1e   :  { %617 = vmatprep.subr.bf16.mxu1 %v686_v30 }
  0x1f   :  { %596 = vmatpush3.bf16.msra.mxu0 %v685_v29 }
  0x20   :  { %634 = vmatprep.subr.bf16.mxu0 %v703_v35 }
  0x21   :  { %618 = vmatpush3.bf16.msra.mxu1 %v690_v34 }
  0x22   :  { %402 = vmatmul.mubr.bf16.vlgmr.msra.gmra.mrb[0].mxu0 %v536_v32 }
  0x23   :  { %635 = vmatpush3.bf16.msra.mxu0 %v693_v39  ;;  %650 = vmatprep.mubr.msk.bf16.mxu0 %vm704_vm0, %v703_v35 }
  0x24   :  { %442 = vmatmul.mubr.bf16.vlgmr.msra.gmra.mrb[0].mxu1 %v538_v37  ;;  %636 = vmatprep.subr.bf16.mxu0 %v703_v35 }
  0x27   :  { %637 = vmatpush3.bf16.msra.mxu0 %v694_v40 }
  0x28   :  { %638 = vmatprep.subr.bf16.mxu0 %v703_v35 }
  0x2b   :  { %639 = vmatpush3.bf16.msra.mxu0 %v695_v41 }
  0x2c   :  { %640 = vmatprep.subr.bf16.mxu0 %v703_v35 }
  0x2f   :  { %641 = vmatpush3.bf16.msra.mxu0 %v696_v42 }
  0x30   :  { %642 = vmatprep.subr.bf16.mxu0 %v703_v35 }
  0x33   :  { %643 = vmatpush3.bf16.msra.mxu0 %v697_v43 }
  0x34   :  { %644 = vmatprep.subr.bf16.mxu0 %v703_v35 }
  0x37   :  { %645 = vmatpush3.bf16.msra.mxu0 %v698_v44 }
  0x38   :  { %646 = vmatprep.subr.bf16.mxu0 %v703_v35 }
  0x3b   :  { %647 = vmatpush3.bf16.msra.mxu0 %v699_v45 }
  0x3c   :  { %648 = vmatprep.subr.bf16.mxu0 %v703_v35 }
  0x3f   :  { %649 = vmatpush3.bf16.msra.mxu0 %v700_v46 }
  0x42   :  { %651 = vmatmul.mubr.bf16.vlgmr.msra.gmra.mrb[4].mxu0 %v689_v47 }
  0xf5   :  { %v597_v48 = vpop.f32.mrb[0].mxu0 }
  0xf6   :  { %v598_v50 = vpop.f32.mrb[1].mxu0 }
  0xf7   :  { %v599_v51 = vadd.f32 %v598_v50, %v597_v48  ;;  %v600_v52 = vpop.f32.mrb[2].mxu0  ;;  %v619_v53 = vpop.f32.mrb[0].mxu1 }
  0xf8   :  { %v601_v54 = vpop.f32.mrb[3].mxu0  ;;  %v620_v55 = vpop.f32.mrb[1].mxu1 }
  0xf9   :  { %v404_v56 = vadd.f32 %v599_v51, %v535_v49  ;;  %v621_v57 = vadd.f32 %v620_v55, %v619_v53  ;;  %v622_v58 = vpop.f32.mrb[2].mxu1 }
  0xfa   :  { %v623_v59 = vpop.f32.mrb[3].mxu1 }
  0xfb   :  { %v444_v60 = vadd.f32 %v621_v57, %v404_v56 }
 0x115   :  { %v483_v61 = vpop.f32.mrb[4].mxu0 }
 0x116   :  { %v484_v62 = vadd.f32 %v483_v61, %v444_v60  ;;  %v652_v63 = vpop.f32.mrb[5].mxu0 }
 0x117   :  { %v486_v0 = vpop.f32.mrb[6].mxu0 }
 0x118   :  { %v491_v1 = vrot.slane %v484_v62, 4  ;;  %v498_v2 = vmul.f32 %v484_v62, %v484_v62  ;;  %v653_v3 = vpop.f32.mrb[7].mxu0 }
 0x11a   :  { %v492_v4 = vadd.f32 %v491_v1, %v484_v62  ;;  %v499_v5 = vrot.slane %v498_v2, 4 }
 0x11c   :  { %v493_v6 = vrot.slane %v492_v4, 2  ;;  %v500_v7 = vadd.f32 %v499_v5, %v498_v2 }
 0x11e   :  { %v494_v8 = vadd.f32 %v493_v6, %v492_v4  ;;  %v501_v9 = vrot.slane %v500_v7, 2 }
 0x120   :  { %v495_v10 = vrot.slane %v494_v8, 1  ;;  %v502_v11 = vadd.f32 %v501_v9, %v500_v7 }
 0x122   :  { %v496_v12 = vadd.f32 %v495_v10, %v494_v8  ;;  %v503_v13 = vrot.slane %v502_v11, 1 }
 0x124   :  { %v497_v14 = vmul.f32 0.125, %v496_v12  ;;  %v504_v15 = vadd.f32 %v503_v13, %v502_v11 }
 0x126   :  { %v505_v16 = vmul.f32 0.125, %v504_v15  ;;  %v506_v17 = vmul.f32 %v497_v14, %v497_v14 }
 0x128   :  { %v507_v18 = vsub.f32 %v505_v16, %v506_v17 }
 0x12a   :  { %v508_v19 = vmax.f32 %v507_v18, 0.0 }
 0x12c   :  { %v509_v20 = vadd.f32 1e-05, %v508_v19 }
 0x12e   :  { %701 = vrsqrt.f32 %v509_v20 }
 0x138   :  { %v702_v25 = vpop.eup %701 }
 0x139   :  { %v511_v26 = vmul.f32 %v702_v25, %v489_v23 }
 0x13b   :  { %v512_v28 = vmul.f32 %v511_v26, %v497_v14  ;;  %v518_v29 = vrot.slane %v511_v26, %v517_v24 }
 0x13d   :  { %v513_v30 = vsub.f32 %v490_v27, %v512_v28  ;;  %v520_v31 = vmul.f32 %v518_v29, %v484_v62 }
 0x13f   :  { %v525_v32 = vrot.slane %v513_v30, %v517_v24 }
 0x141   :  { %v527_v33 = vadd.f32 %v525_v32, %v520_v31 }
 0x143   :  { %v528_v34 = vmax.f32 %v527_v33, 0.0 }
 0x145   :  { %v529_v35 = vpack.c.bf16 %v528_v34, %v528_v34 }
 0x147   :  { %530 = vst [vmem:[%s881_s5] sm:$0xf] %v529_v35 }

// kernel: _lambda_.34
= control target key start
LH: loop header
LB: loop body
LE: loop exit
PB: predicated region body
PF: predicated region fallthrough
CT: control target
= control target key end

     0   :  { %v703_v36 = vmov 0.0   ;;  %vm704_vm0 = vmmov 0   ;;  %s884_s1 = inlined_call_operand.vmem [shape: bf16[640,128], index: 1, kind: input, shape index: {}]   ;;  %s885_s0 = inlined_call_operand.vmem [shape: bf16[8,640], index: 0, kind: input, shape index: {}]   ;;  %s886_s2 = inlined_call_operand.vmem [shape: f32[1,128], index: 2, kind: input, shape index: {}]   ;;  %s887_s3 = inlined_call_operand.vmem [shape: f32[1,128], index: 3, kind: input, shape index: {}]   ;;  %s888_s4 = inlined_call_operand.vmem [shape: bf16[8,128], index: 4, kind: input, shape index: {}]   ;;  %s889_s5 = inlined_call_operand.vmem [shape: f32[8,128], index: 5, kind: input, shape index: {}]   ;;  %s890_s6 = inlined_call_operand.vmem [shape: bf16[8,128], index: 6, kind: output, shape index: {}]  }
   0x1   :  { %v656_v0 = vld [vmem:[%s884_s1 + $0x40] sm:$0xff]   ;;  %v660_v4 = vld [vmem:[%s884_s1 + $0x48] sm:$0xff]   ;;  %v664_v8 = vld [vmem:[%s884_s1 + $0x50] sm:$0xff]  }
   0x2   :  { %v657_v1 = vld [vmem:[%s884_s1 + $0xc0] sm:$0xff]   ;;  %581 = vmatprep.subr.bf16.mxu0 %v656_v0  ;;  %v661_v5 = vld [vmem:[%s884_s1 + $0xc8] sm:$0xff]   ;;  %v665_v9 = vld [vmem:[%s884_s1 + $0xd0] sm:$0xff]  }
   0x3   :  { %v658_v2 = vld [vmem:[%s884_s1] sm:$0xff]   ;;  %603 = vmatprep.subr.bf16.mxu1 %v657_v1  ;;  %v662_v6 = vld [vmem:[%s884_s1 + $0x8] sm:$0xff]   ;;  %v666_v10 = vld [vmem:[%s884_s1 + $0x10] sm:$0xff]  }
   0x4   :  { %v659_v3 = vld [vmem:[%s884_s1 + $0x80] sm:$0xff]   ;;  %582 = vmatpush3.bf16.msra.mxu0 %v658_v2  ;;  %v663_v7 = vld [vmem:[%s884_s1 + $0x88] sm:$0xff]   ;;  %v667_v11 = vld [vmem:[%s884_s1 + $0x90] sm:$0xff]  }
   0x5   :  { %604 = vmatpush3.bf16.msra.mxu1 %v659_v3  ;;  %583 = vmatprep.subr.bf16.mxu0 %v660_v4  ;;  %v668_v12 = vld [vmem:[%s884_s1 + $0x58] sm:$0xff]   ;;  %v672_v16 = vld [vmem:[%s884_s1 + $0x60] sm:$0xff]   ;;  %v676_v20 = vld [vmem:[%s884_s1 + $0x68] sm:$0xff]  }
   0x6   :  { %605 = vmatprep.subr.bf16.mxu1 %v661_v5  ;;  %v669_v13 = vld [vmem:[%s884_s1 + $0xd8] sm:$0xff]   ;;  %v673_v17 = vld [vmem:[%s884_s1 + $0xe0] sm:$0xff]   ;;  %v677_v21 = vld [vmem:[%s884_s1 + $0xe8] sm:$0xff]  }
   0x7   :  { %v670_v14 = vld [vmem:[%s884_s1 + $0x18] sm:$0xff]   ;;  %v674_v18 = vld [vmem:[%s884_s1 + $0x20] sm:$0xff]   ;;  %v678_v22 = vld [vmem:[%s884_s1 + $0x28] sm:$0xff]  }
   0x8   :  { %584 = vmatpush3.bf16.msra.mxu0 %v662_v6  ;;  %v671_v15 = vld [vmem:[%s884_s1 + $0x98] sm:$0xff]   ;;  %v675_v19 = vld [vmem:[%s884_s1 + $0xa0] sm:$0xff]   ;;  %v679_v23 = vld [vmem:[%s884_s1 + $0xa8] sm:$0xff]  }
   0x9   :  { %606 = vmatpush3.bf16.msra.mxu1 %v663_v7  ;;  %585 = vmatprep.subr.bf16.mxu0 %v664_v8  ;;  %v680_v24 = vld [vmem:[%s884_s1 + $0x70] sm:$0xff]   ;;  %v684_v28 = vld [vmem:[%s884_s1 + $0x78] sm:$0xff]   ;;  %v24_v32 = vld [vmem:[%s885_s0] sm:$0xff] }
   0xa   :  { %607 = vmatprep.subr.bf16.mxu1 %v665_v9  ;;  %v681_v25 = vld [vmem:[%s884_s1 + $0xf0] sm:$0xff]   ;;  %v685_v29 = vld [vmem:[%s884_s1 + $0xf8] sm:$0xff]   ;;  %v536_v33 = vcombine.low %v24_v32, %v24_v32  ;;  %v537_v34 = vcombine.high %v24_v32, %v24_v32  ;;  %v25_v35 = vld [vmem:[%s885_s0 + $0x8] sm:$0xff] }
   0xb   :  { %v682_v26 = vld [vmem:[%s884_s1 + $0x30] sm:$0xff]   ;;  %v686_v30 = vld [vmem:[%s884_s1 + $0x38] sm:$0xff]   ;;  %v538_v37 = vcombine.low %v25_v35, %v25_v35  ;;  %v539_v38 = vcombine.high %v25_v35, %v25_v35  ;;  %v693_v39 = vld [vmem:[%s884_s1 + $0x100] sm:$0xff]  }
   0xc   :  { %586 = vmatpush3.bf16.msra.mxu0 %v666_v10  ;;  %v683_v27 = vld [vmem:[%s884_s1 + $0xb0] sm:$0xff]   ;;  %v687_v31 = vld [vmem:[%s884_s1 + $0xb8] sm:$0xff]   ;;  %397 = vmatprep.mubr.bf16.mxu0 %v537_v34  ;;  %v694_v40 = vld [vmem:[%s884_s1 + $0x108] sm:$0xff]  }
   0xd   :  { %608 = vmatpush3.bf16.msra.mxu1 %v667_v11  ;;  %587 = vmatprep.subr.bf16.mxu0 %v668_v12  ;;  %v695_v41 = vld [vmem:[%s884_s1 + $0x110] sm:$0xff]   ;;  %v696_v42 = vld [vmem:[%s884_s1 + $0x118] sm:$0xff]   ;;  %v697_v43 = vld [vmem:[%s884_s1 + $0x120] sm:$0xff]  }
   0xe   :  { %609 = vmatprep.subr.bf16.mxu1 %v669_v13  ;;  %437 = vmatprep.mubr.bf16.mxu1 %v539_v38  ;;  %v698_v44 = vld [vmem:[%s884_s1 + $0x128] sm:$0xff]   ;;  %v699_v45 = vld [vmem:[%s884_s1 + $0x130] sm:$0xff]   ;;  %v700_v46 = vld [vmem:[%s884_s1 + $0x138] sm:$0xff]  }
   0xf   :  { %v690_v47 = vld [vmem:[%s885_s0 + $0x10] ss:$0 sps:$4 sm:$0xff]   ;;  %v528_v35 = vld [vmem:[%s889_s5] sm:$0xff] }
  0x10   :  { %588 = vmatpush3.bf16.msra.mxu0 %v670_v14 }
  0x11   :  { %610 = vmatpush3.bf16.msra.mxu1 %v671_v15  ;;  %589 = vmatprep.subr.bf16.mxu0 %v672_v16 }
  0x12   :  { %611 = vmatprep.subr.bf16.mxu1 %v673_v17 }
  0x14   :  { %590 = vmatpush3.bf16.msra.mxu0 %v674_v18 }
  0x15   :  { %612 = vmatpush3.bf16.msra.mxu1 %v675_v19  ;;  %591 = vmatprep.subr.bf16.mxu0 %v676_v20  ;;  %v511_v19 = vlaneseq }
  0x16   :  { %613 = vmatprep.subr.bf16.mxu1 %v677_v21  ;;  %v485_v21 = vld [vmem:[%s886_s2] sm:$0x1] }
  0x17   :  { %v512_v20 = vshrl.u32 %v511_v19, 7 }
  0x18   :  { %592 = vmatpush3.bf16.msra.mxu0 %v678_v22 }
  0x19   :  { %614 = vmatpush3.bf16.msra.mxu1 %v679_v23  ;;  %593 = vmatprep.subr.bf16.mxu0 %v680_v24  ;;  %v513_v22 = vsub.s32 0, %v512_v20 }
  0x1a   :  { %615 = vmatprep.subr.bf16.mxu1 %v681_v25  ;;  %v486_v25 = vld [vmem:[%s887_s3] sm:$0x1] }
  0x1c   :  { %594 = vmatpush3.bf16.msra.mxu0 %v682_v26 }
  0x1d   :  { %616 = vmatpush3.bf16.msra.mxu1 %v683_v27  ;;  %595 = vmatprep.subr.bf16.mxu0 %v684_v28  ;;  %v524_v28 = vld [vmem:[%s888_s4] sm:$0xf] }
  0x1e   :  { %617 = vmatprep.subr.bf16.mxu1 %v685_v29  ;;  %v525_v32 = vunpack.c.l.bf16 %v524_v28 }
  0x20   :  { %596 = vmatpush3.bf16.msra.mxu0 %v686_v30 }
  0x21   :  { %618 = vmatpush3.bf16.msra.mxu1 %v687_v31  ;;  %634 = vmatprep.subr.bf16.mxu0 %v703_v36 }
  0x23   :  { %398 = vmatmul.mubr.bf16.vlgmr.msra.gmra.mrb[0].mxu0 %v536_v33 }
  0x24   :  { %438 = vmatmul.mubr.bf16.vlgmr.msra.gmra.mrb[0].mxu1 %v538_v37  ;;  %635 = vmatpush3.bf16.msra.mxu0 %v693_v39 }
  0x25   :  { %636 = vmatprep.subr.bf16.mxu0 %v703_v36  ;;  %650 = vmatprep.mubr.msk.bf16.mxu0 %vm704_vm0, %v703_v36 }
  0x28   :  { %637 = vmatpush3.bf16.msra.mxu0 %v694_v40 }
  0x29   :  { %638 = vmatprep.subr.bf16.mxu0 %v703_v36 }
  0x2c   :  { %639 = vmatpush3.bf16.msra.mxu0 %v695_v41 }
  0x2d   :  { %640 = vmatprep.subr.bf16.mxu0 %v703_v36 }
  0x30   :  { %641 = vmatpush3.bf16.msra.mxu0 %v696_v42 }
  0x31   :  { %642 = vmatprep.subr.bf16.mxu0 %v703_v36 }
  0x34   :  { %643 = vmatpush3.bf16.msra.mxu0 %v697_v43 }
  0x35   :  { %644 = vmatprep.subr.bf16.mxu0 %v703_v36 }
  0x38   :  { %645 = vmatpush3.bf16.msra.mxu0 %v698_v44 }
  0x39   :  { %646 = vmatprep.subr.bf16.mxu0 %v703_v36 }
  0x3c   :  { %647 = vmatpush3.bf16.msra.mxu0 %v699_v45 }
  0x3d   :  { %648 = vmatprep.subr.bf16.mxu0 %v703_v36 }
  0x40   :  { %649 = vmatpush3.bf16.msra.mxu0 %v700_v46 }
  0x43   :  { %651 = vmatmul.mubr.bf16.vlgmr.msra.gmra.mrb[4].mxu0 %v690_v47 }
  0xf6   :  { %v597_v48 = vpop.f32.mrb[0].mxu0 }
  0xf7   :  { %v619_v49 = vpop.f32.mrb[0].mxu1  ;;  %v598_v50 = vpop.f32.mrb[1].mxu0 }
  0xf8   :  { %v599_v51 = vadd.f32 %v598_v50, %v597_v48  ;;  %v620_v52 = vpop.f32.mrb[1].mxu1  ;;  %v600_v53 = vpop.f32.mrb[2].mxu0 }
  0xf9   :  { %v621_v54 = vadd.f32 %v620_v52, %v619_v49  ;;  %v601_v55 = vpop.f32.mrb[3].mxu0  ;;  %v622_v56 = vpop.f32.mrb[2].mxu1 }
  0xfa   :  { %v623_v57 = vpop.f32.mrb[3].mxu1 }
  0xfb   :  { %v440_v58 = vadd.f32 %v621_v54, %v599_v51 }
 0x116   :  { %v479_v59 = vpop.f32.mrb[4].mxu0 }
 0x117   :  { %v480_v60 = vadd.f32 %v479_v59, %v440_v58  ;;  %v652_v61 = vpop.f32.mrb[5].mxu0 }
 0x118   :  { %v482_v62 = vpop.f32.mrb[6].mxu0 }
 0x119   :  { %v487_v63 = vrot.slane %v480_v60, 4  ;;  %v494_v0 = vmul.f32 %v480_v60, %v480_v60  ;;  %v653_v1 = vpop.f32.mrb[7].mxu0 }
 0x11b   :  { %v488_v2 = vadd.f32 %v487_v63, %v480_v60  ;;  %v495_v3 = vrot.slane %v494_v0, 4 }
 0x11d   :  { %v489_v4 = vrot.slane %v488_v2, 2  ;;  %v496_v5 = vadd.f32 %v495_v3, %v494_v0 }
 0x11f   :  { %v490_v6 = vadd.f32 %v489_v4, %v488_v2  ;;  %v497_v7 = vrot.slane %v496_v5, 2 }
 0x121   :  { %v491_v8 = vrot.slane %v490_v6, 1  ;;  %v498_v9 = vadd.f32 %v497_v7, %v496_v5 }
 0x123   :  { %v492_v10 = vadd.f32 %v491_v8, %v490_v6  ;;  %v499_v11 = vrot.slane %v498_v9, 1 }
 0x125   :  { %v493_v12 = vmul.f32 0.125, %v492_v10  ;;  %v500_v13 = vadd.f32 %v499_v11, %v498_v9 }
 0x127   :  { %v501_v14 = vmul.f32 0.125, %v500_v13  ;;  %v502_v15 = vmul.f32 %v493_v12, %v493_v12 }
 0x129   :  { %v503_v16 = vsub.f32 %v501_v14, %v502_v15 }
 0x12b   :  { %v504_v17 = vmax.f32 %v503_v16, 0.0 }
 0x12d   :  { %v505_v18 = vadd.f32 1e-05, %v504_v17 }
 0x12f   :  { %701 = vrsqrt.f32 %v505_v18 }
 0x139   :  { %v702_v23 = vpop.eup %701 }
 0x13a   :  { %v507_v24 = vmul.f32 %v702_v23, %v485_v21 }
 0x13c   :  { %v508_v26 = vmul.f32 %v507_v24, %v493_v12  ;;  %v514_v27 = vrot.slane %v507_v24, %v513_v22 }
 0x13e   :  { %v509_v29 = vsub.f32 %v486_v25, %v508_v26  ;;  %v516_v30 = vmul.f32 %v514_v27, %v480_v60 }
 0x140   :  { %v521_v31 = vrot.slane %v509_v29, %v513_v22 }
 0x142   :  { %v523_v33 = vadd.f32 %v521_v31, %v516_v30 }
 0x144   :  { %v526_v34 = vadd.f32 %v525_v32, %v523_v33 }
 0x146   :  { %v527_v36 = vmax.f32 %v526_v34, 0.0 }
 0x148   :  { %v529_v37 = vmul.f32 %v528_v35, %v527_v36 }
 0x14a   :  { %v530_v38 = vpack.c.bf16 %v529_v37, %v529_v37 }
 0x14c   :  { %531 = vst [vmem:[%s890_s6] sm:$0xf] %v530_v38 }

// kernel: _lambda_.32
= control target key start
LH: loop header
LB: loop body
LE: loop exit
PB: predicated region body
PF: predicated region fallthrough
CT: control target
= control target key end

     0   :  { %v865_v36 = vmov 0.0   ;;  %vm866_vm0 = vmmov 0   ;;  %s1083_s1 = inlined_call_operand.vmem [shape: bf16[640,128], index: 1, kind: input, shape index: {}]   ;;  %s1084_s0 = inlined_call_operand.vmem [shape: bf16[8,640], index: 0, kind: input, shape index: {}]   ;;  %s1085_s5 = inlined_call_operand.vmem [shape: bf16[128,128], index: 5, kind: input, shape index: {}]   ;;  %s1086_s4 = inlined_call_operand.vmem [shape: bf16[8,128], index: 4, kind: input, shape index: {}]   ;;  %s1087_s2 = inlined_call_operand.vmem [shape: f32[1,128], index: 2, kind: input, shape index: {}]   ;;  %s1088_s3 = inlined_call_operand.vmem [shape: f32[1,128], index: 3, kind: input, shape index: {}]   ;;  %s1089_s6 = inlined_call_operand.vmem [shape: f32[1,128], index: 6, kind: input, shape index: {}]   ;;  %s1090_s7 = inlined_call_operand.vmem [shape: f32[8,128], index: 7, kind: input, shape index: {}]   ;;  %s1091_s8 = inlined_call_operand.vmem [shape: bf16[8,128], index: 8, kind: output, shape index: {}]  }
   0x1   :  { %v810_v0 = vld [vmem:[%s1083_s1 + $0x40] sm:$0xff]   ;;  %v814_v4 = vld [vmem:[%s1083_s1 + $0x48] sm:$0xff]   ;;  %v818_v8 = vld [vmem:[%s1083_s1 + $0x50] sm:$0xff]  }
   0x2   :  { %v811_v1 = vld [vmem:[%s1083_s1 + $0xc0] sm:$0xff]   ;;  %706 = vmatprep.subr.bf16.mxu0 %v810_v0  ;;  %v815_v5 = vld [vmem:[%s1083_s1 + $0xc8] sm:$0xff]   ;;  %v819_v9 = vld [vmem:[%s1083_s1 + $0xd0] sm:$0xff]  }
   0x3   :  { %v812_v2 = vld [vmem:[%s1083_s1] sm:$0xff]   ;;  %728 = vmatprep.subr.bf16.mxu1 %v811_v1  ;;  %v816_v6 = vld [vmem:[%s1083_s1 + $0x8] sm:$0xff]   ;;  %v820_v10 = vld [vmem:[%s1083_s1 + $0x10] sm:$0xff]  }
   0x4   :  { %v813_v3 = vld [vmem:[%s1083_s1 + $0x80] sm:$0xff]   ;;  %707 = vmatpush3.bf16.msra.mxu0 %v812_v2  ;;  %v817_v7 = vld [vmem:[%s1083_s1 + $0x88] sm:$0xff]   ;;  %v821_v11 = vld [vmem:[%s1083_s1 + $0x90] sm:$0xff]  }
   0x5   :  { %729 = vmatpush3.bf16.msra.mxu1 %v813_v3  ;;  %708 = vmatprep.subr.bf16.mxu0 %v814_v4  ;;  %v822_v12 = vld [vmem:[%s1083_s1 + $0x58] sm:$0xff]   ;;  %v826_v16 = vld [vmem:[%s1083_s1 + $0x60] sm:$0xff]   ;;  %v830_v20 = vld [vmem:[%s1083_s1 + $0x68] sm:$0xff]  }
   0x6   :  { %730 = vmatprep.subr.bf16.mxu1 %v815_v5  ;;  %v823_v13 = vld [vmem:[%s1083_s1 + $0xd8] sm:$0xff]   ;;  %v827_v17 = vld [vmem:[%s1083_s1 + $0xe0] sm:$0xff]   ;;  %v831_v21 = vld [vmem:[%s1083_s1 + $0xe8] sm:$0xff]  }
   0x7   :  { %v824_v14 = vld [vmem:[%s1083_s1 + $0x18] sm:$0xff]   ;;  %v828_v18 = vld [vmem:[%s1083_s1 + $0x20] sm:$0xff]   ;;  %v832_v22 = vld [vmem:[%s1083_s1 + $0x28] sm:$0xff]  }
   0x8   :  { %709 = vmatpush3.bf16.msra.mxu0 %v816_v6  ;;  %v825_v15 = vld [vmem:[%s1083_s1 + $0x98] sm:$0xff]   ;;  %v829_v19 = vld [vmem:[%s1083_s1 + $0xa0] sm:$0xff]   ;;  %v833_v23 = vld [vmem:[%s1083_s1 + $0xa8] sm:$0xff]  }
   0x9   :  { %731 = vmatpush3.bf16.msra.mxu1 %v817_v7  ;;  %710 = vmatprep.subr.bf16.mxu0 %v818_v8  ;;  %v834_v24 = vld [vmem:[%s1083_s1 + $0x70] sm:$0xff]   ;;  %v838_v28 = vld [vmem:[%s1083_s1 + $0x78] sm:$0xff]   ;;  %v30_v32 = vld [vmem:[%s1084_s0] sm:$0xff] }
   0xa   :  { %732 = vmatprep.subr.bf16.mxu1 %v819_v9  ;;  %v835_v25 = vld [vmem:[%s1083_s1 + $0xf0] sm:$0xff]   ;;  %v839_v29 = vld [vmem:[%s1083_s1 + $0xf8] sm:$0xff]   ;;  %v652_v33 = vcombine.low %v30_v32, %v30_v32  ;;  %v653_v34 = vcombine.high %v30_v32, %v30_v32  ;;  %v31_v35 = vld [vmem:[%s1084_s0 + $0x8] sm:$0xff]  ;;  %v629_v32 = vlaneseq }
   0xb   :  { %v836_v26 = vld [vmem:[%s1083_s1 + $0x30] sm:$0xff]   ;;  %v840_v30 = vld [vmem:[%s1083_s1 + $0x38] sm:$0xff]   ;;  %v654_v37 = vcombine.low %v31_v35, %v31_v35  ;;  %v655_v38 = vcombine.high %v31_v35, %v31_v35  ;;  %v847_v39 = vld [vmem:[%s1083_s1 + $0x100] sm:$0xff]  }
   0xc   :  { %711 = vmatpush3.bf16.msra.mxu0 %v820_v10  ;;  %v837_v27 = vld [vmem:[%s1083_s1 + $0xb0] sm:$0xff]   ;;  %v841_v31 = vld [vmem:[%s1083_s1 + $0xb8] sm:$0xff]   ;;  %403 = vmatprep.mubr.bf16.mxu0 %v653_v34  ;;  %v848_v40 = vld [vmem:[%s1083_s1 + $0x108] sm:$0xff]  }
   0xd   :  { %733 = vmatpush3.bf16.msra.mxu1 %v821_v11  ;;  %712 = vmatprep.subr.bf16.mxu0 %v822_v12  ;;  %v849_v41 = vld [vmem:[%s1083_s1 + $0x110] sm:$0xff]   ;;  %v855_v42 = vld [vmem:[%s1085_s5] sm:$0xff]   ;;  %v856_v43 = vld [vmem:[%s1085_s5 + $0x8] sm:$0xff]  }
   0xe   :  { %734 = vmatprep.subr.bf16.mxu1 %v823_v13  ;;  %443 = vmatprep.mubr.bf16.mxu1 %v655_v38  ;;  %v850_v44 = vld [vmem:[%s1083_s1 + $0x118] sm:$0xff]   ;;  %v857_v45 = vld [vmem:[%s1085_s5 + $0x10] sm:$0xff]   ;;  %v851_v46 = vld [vmem:[%s1083_s1 + $0x120] sm:$0xff]  }
   0xf   :  { %v858_v47 = vld [vmem:[%s1085_s5 + $0x18] sm:$0xff]   ;;  %v852_v48 = vld [vmem:[%s1083_s1 + $0x128] sm:$0xff]   ;;  %v859_v49 = vld [vmem:[%s1085_s5 + $0x20] sm:$0xff]  }
  0x10   :  { %713 = vmatpush3.bf16.msra.mxu0 %v824_v14  ;;  %v853_v50 = vld [vmem:[%s1083_s1 + $0x130] sm:$0xff]   ;;  %v860_v51 = vld [vmem:[%s1085_s5 + $0x28] sm:$0xff]   ;;  %v854_v52 = vld [vmem:[%s1083_s1 + $0x138] sm:$0xff]  }
  0x11   :  { %735 = vmatpush3.bf16.msra.mxu1 %v825_v15  ;;  %714 = vmatprep.subr.bf16.mxu0 %v826_v16  ;;  %v844_v53 = vld [vmem:[%s1084_s0 + $0x10] ss:$0 sps:$4 sm:$0xff]   ;;  %v862_v55 = vld [vmem:[%s1085_s5 + $0x38] sm:$0xff]   ;;  %v491_v56 = vld [vmem:[%s1086_s4] sm:$0xf] }
  0x12   :  { %736 = vmatprep.subr.bf16.mxu1 %v827_v17  ;;  %v861_v54 = vld [vmem:[%s1085_s5 + $0x30] sm:$0xff]   ;;  %v603_v34 = vld [vmem:[%s1087_s2] sm:$0x1] }
  0x13   :  { %v604_v38 = vld [vmem:[%s1088_s3] sm:$0x1] }
  0x14   :  { %715 = vmatpush3.bf16.msra.mxu0 %v828_v18 }
  0x15   :  { %737 = vmatpush3.bf16.msra.mxu1 %v829_v19  ;;  %716 = vmatprep.subr.bf16.mxu0 %v830_v20 }
  0x16   :  { %738 = vmatprep.subr.bf16.mxu1 %v831_v21 }
  0x18   :  { %717 = vmatpush3.bf16.msra.mxu0 %v832_v22 }
  0x19   :  { %739 = vmatpush3.bf16.msra.mxu1 %v833_v23  ;;  %718 = vmatprep.subr.bf16.mxu0 %v834_v24 }
  0x1a   :  { %740 = vmatprep.subr.bf16.mxu1 %v835_v25 }
  0x1c   :  { %719 = vmatpush3.bf16.msra.mxu0 %v836_v26 }
  0x1d   :  { %741 = vmatpush3.bf16.msra.mxu1 %v837_v27  ;;  %720 = vmatprep.subr.bf16.mxu0 %v838_v28 }
  0x1e   :  { %742 = vmatprep.subr.bf16.mxu1 %v839_v29 }
  0x20   :  { %721 = vmatpush3.bf16.msra.mxu0 %v840_v30 }
  0x21   :  { %743 = vmatpush3.bf16.msra.mxu1 %v841_v31  ;;  %768 = vmatprep.subr.bf16.mxu0 %v865_v36 }
  0x22   :  { %788 = vmatprep.subr.bf16.mxu1 %v865_v36 }
  0x23   :  { %404 = vmatmul.mubr.bf16.vlgmr.msra.gmra.mrb[0].mxu0 %v652_v33  ;;  %v630_v33 = vshrl.u32 %v629_v32, 7 }
  0x24   :  { %444 = vmatmul.mubr.bf16.vlgmr.msra.gmra.mrb[0].mxu1 %v654_v37  ;;  %769 = vmatpush3.bf16.msra.mxu0 %v847_v39 }
  0x25   :  { %770 = vmatprep.subr.bf16.mxu0 %v865_v36  ;;  %784 = vmatprep.mubr.msk.bf16.mxu0 %vm866_vm0, %v865_v36  ;;  %v631_v35 = vsub.s32 0, %v630_v33 }
  0x26   :  { %804 = vmatprep.mubr.msk.bf16.mxu1 %vm866_vm0, %v865_v36  ;;  %789 = vmatpush3.bf16.msra.mxu1 %v855_v42 }
  0x27   :  { %790 = vmatprep.subr.bf16.mxu1 %v865_v36 }
  0x28   :  { %771 = vmatpush3.bf16.msra.mxu0 %v848_v40 }
  0x29   :  { %772 = vmatprep.subr.bf16.mxu0 %v865_v36 }
  0x2a   :  { %791 = vmatpush3.bf16.msra.mxu1 %v856_v43 }
  0x2b   :  { %792 = vmatprep.subr.bf16.mxu1 %v865_v36 }
  0x2c   :  { %773 = vmatpush3.bf16.msra.mxu0 %v849_v41  ;;  %v697_v41 = vld [vmem:[%s1089_s6] ss:$0 sm:$0xff] }
  0x2d   :  { %774 = vmatprep.subr.bf16.mxu0 %v865_v36 }
  0x2e   :  { %793 = vmatpush3.bf16.msra.mxu1 %v857_v45 }
  0x2f   :  { %794 = vmatprep.subr.bf16.mxu1 %v865_v36 }
  0x30   :  { %775 = vmatpush3.bf16.msra.mxu0 %v850_v44 }
  0x31   :  { %776 = vmatprep.subr.bf16.mxu0 %v865_v36 }
  0x32   :  { %795 = vmatpush3.bf16.msra.mxu1 %v858_v47 }
  0x33   :  { %796 = vmatprep.subr.bf16.mxu1 %v865_v36 }
  0x34   :  { %777 = vmatpush3.bf16.msra.mxu0 %v851_v46 }
  0x35   :  { %778 = vmatprep.subr.bf16.mxu0 %v865_v36 }
  0x36   :  { %797 = vmatpush3.bf16.msra.mxu1 %v859_v49 }
  0x37   :  { %798 = vmatprep.subr.bf16.mxu1 %v865_v36 }
  0x38   :  { %779 = vmatpush3.bf16.msra.mxu0 %v852_v48  ;;  %v644_v48 = vld [vmem:[%s1090_s7] sm:$0xff] }
  0x39   :  { %780 = vmatprep.subr.bf16.mxu0 %v865_v36 }
  0x3a   :  { %799 = vmatpush3.bf16.msra.mxu1 %v860_v51 }
  0x3b   :  { %800 = vmatprep.subr.bf16.mxu1 %v865_v36 }
  0x3c   :  { %781 = vmatpush3.bf16.msra.mxu0 %v853_v50 }
  0x3d   :  { %782 = vmatprep.subr.bf16.mxu0 %v865_v36 }
  0x3e   :  { %801 = vmatpush3.bf16.msra.mxu1 %v861_v54 }
  0x3f   :  { %802 = vmatprep.subr.bf16.mxu1 %v865_v36 }
  0x40   :  { %783 = vmatpush3.bf16.msra.mxu0 %v854_v52 }
  0x42   :  { %803 = vmatpush3.bf16.msra.mxu1 %v862_v55 }
  0x43   :  { %785 = vmatmul.mubr.bf16.vlgmr.msra.gmra.mrb[4].mxu0 %v844_v53 }
  0x45   :  { %805 = vmatmul.mubr.bf16.vlgmr.msra.gmra.mrb[4].mxu1 %v491_v56 }
  0xf6   :  { %v722_v57 = vpop.f32.mrb[0].mxu0 }
  0xf7   :  { %v744_v58 = vpop.f32.mrb[0].mxu1  ;;  %v723_v59 = vpop.f32.mrb[1].mxu0 }
  0xf8   :  { %v724_v60 = vadd.f32 %v723_v59, %v722_v57  ;;  %v745_v61 = vpop.f32.mrb[1].mxu1  ;;  %v725_v62 = vpop.f32.mrb[2].mxu0 }
  0xf9   :  { %v746_v63 = vadd.f32 %v745_v61, %v744_v58  ;;  %v726_v0 = vpop.f32.mrb[3].mxu0  ;;  %v747_v1 = vpop.f32.mrb[2].mxu1 }
  0xfa   :  { %v748_v2 = vpop.f32.mrb[3].mxu1 }
  0xfb   :  { %v446_v3 = vadd.f32 %v746_v63, %v724_v60 }
 0x116   :  { %v485_v4 = vpop.f32.mrb[4].mxu0 }
 0x117   :  { %v486_v5 = vadd.f32 %v485_v4, %v446_v3  ;;  %v786_v6 = vpop.f32.mrb[5].mxu0 }
 0x118   :  { %v488_v7 = vpop.f32.mrb[6].mxu0  ;;  %v597_v15 = vpop.f32.mrb[4].mxu1 }
 0x119   :  { %v605_v8 = vrot.slane %v486_v5, 4  ;;  %v612_v9 = vmul.f32 %v486_v5, %v486_v5  ;;  %v787_v10 = vpop.f32.mrb[7].mxu0  ;;  %v806_v16 = vpop.f32.mrb[5].mxu1  ;;  %v598_v43 = vadd.f32 %v697_v41, %v597_v15 }
 0x11a   :  { %v600_v19 = vpop.f32.mrb[6].mxu1 }
 0x11b   :  { %v606_v11 = vadd.f32 %v605_v8, %v486_v5  ;;  %v613_v12 = vrot.slane %v612_v9, 4  ;;  %v807_v20 = vpop.f32.mrb[7].mxu1 }
 0x11d   :  { %v607_v13 = vrot.slane %v606_v11, 2  ;;  %v614_v14 = vadd.f32 %v613_v12, %v612_v9 }
 0x11f   :  { %v608_v17 = vadd.f32 %v607_v13, %v606_v11  ;;  %v615_v18 = vrot.slane %v614_v14, 2 }
 0x121   :  { %v609_v21 = vrot.slane %v608_v17, 1  ;;  %v616_v22 = vadd.f32 %v615_v18, %v614_v14 }
 0x123   :  { %v610_v23 = vadd.f32 %v609_v21, %v608_v17  ;;  %v617_v24 = vrot.slane %v616_v22, 1 }
 0x125   :  { %v618_v25 = vadd.f32 %v617_v24, %v616_v22  ;;  %v611_v26 = vmul.f32 0.125, %v610_v23 }
 0x127   :  { %v619_v27 = vmul.f32 0.125, %v618_v25  ;;  %v620_v28 = vmul.f32 %v611_v26, %v611_v26 }
 0x129   :  { %v621_v29 = vsub.f32 %v619_v27, %v620_v28 }
 0x12b   :  { %v622_v30 = vmax.f32 %v621_v29, 0.0 }
 0x12d   :  { %v623_v31 = vadd.f32 1e-05, %v622_v30 }
 0x12f   :  { %863 = vrsqrt.f32 %v623_v31 }
 0x139   :  { %v864_v36 = vpop.eup %863 }
 0x13a   :  { %v625_v37 = vmul.f32 %v864_v36, %v603_v34 }
 0x13c   :  { %v626_v39 = vmul.f32 %v625_v37, %v611_v26  ;;  %v632_v40 = vrot.slane %v625_v37, %v631_v35 }
 0x13e   :  { %v627_v42 = vsub.f32 %v604_v38, %v626_v39  ;;  %v634_v44 = vmul.f32 %v632_v40, %v486_v5 }
 0x140   :  { %v639_v45 = vrot.slane %v627_v42, %v631_v35 }
 0x142   :  { %v641_v46 = vadd.f32 %v639_v45, %v634_v44 }
 0x144   :  { %v642_v47 = vadd.f32 %v641_v46, %v598_v43 }
 0x146   :  { %v643_v49 = vmax.f32 %v642_v47, 0.0 }
 0x148   :  { %v645_v50 = vmul.f32 %v644_v48, %v643_v49 }
 0x14a   :  { %v646_v51 = vpack.c.bf16 %v645_v50, %v645_v50 }
 0x14c   :  { %647 = vst [vmem:[%s1091_s8] sm:$0xf] %v646_v51 }

// kernel: _lambda_.35
= control target key start
LH: loop header
LB: loop body
LE: loop exit
PB: predicated region body
PF: predicated region fallthrough
CT: control target
= control target key end

     0   :  { %v707_v35 = vmov 0.0   ;;  %vm708_vm0 = vmmov 0   ;;  %v491_v61 = vlaneseq  ;;  %s880_s1 = inlined_call_operand.vmem [shape: bf16[640,128], index: 1, kind: input, shape index: {}]   ;;  %s881_s0 = inlined_call_operand.vmem [shape: bf16[8,640], index: 0, kind: input, shape index: {}]   ;;  %s882_s2 = inlined_call_operand.vmem [shape: f32[1,128], index: 2, kind: input, shape index: {}, may-alias: {2,4}]   ;;  %s883_s3 = inlined_call_operand.vmem [shape: f32[1,128], index: 3, kind: input, shape index: {}]   ;;  %s884_s4 = inlined_call_operand.vmem [shape: f32[1,128], index: 4, kind: input, shape index: {}, may-alias: {2,4}]   ;;  %s885_s5 = inlined_call_operand.vmem [shape: bf16[8,128], index: 5, kind: output, shape index: {}]  }
   0x1   :  { %v660_v0 = vld [vmem:[%s880_s1 + $0x40] sm:$0xff]   ;;  %v664_v4 = vld [vmem:[%s880_s1 + $0x48] sm:$0xff]   ;;  %v668_v8 = vld [vmem:[%s880_s1 + $0x50] sm:$0xff]  }
   0x2   :  { %v661_v1 = vld [vmem:[%s880_s1] sm:$0xff]   ;;  %585 = vmatprep.subr.bf16.mxu0 %v660_v0  ;;  %v665_v5 = vld [vmem:[%s880_s1 + $0x8] sm:$0xff]   ;;  %v669_v9 = vld [vmem:[%s880_s1 + $0x10] sm:$0xff]   ;;  %v492_v62 = vshrl.u32 %v491_v61, 7 }
   0x3   :  { %v662_v2 = vld [vmem:[%s880_s1 + $0xc0] sm:$0xff]   ;;  %586 = vmatpush3.bf16.msra.mxu0 %v661_v1  ;;  %v666_v6 = vld [vmem:[%s880_s1 + $0xc8] sm:$0xff]   ;;  %v670_v10 = vld [vmem:[%s880_s1 + $0xd0] sm:$0xff]  }
   0x4   :  { %v663_v3 = vld [vmem:[%s880_s1 + $0x80] sm:$0xff]   ;;  %607 = vmatprep.subr.bf16.mxu1 %v662_v2  ;;  %587 = vmatprep.subr.bf16.mxu0 %v664_v4  ;;  %v667_v7 = vld [vmem:[%s880_s1 + $0x88] sm:$0xff]   ;;  %v671_v11 = vld [vmem:[%s880_s1 + $0x90] sm:$0xff]   ;;  %vm493_vm1 = vcmp.lt.s32.totalorder %v492_v62, 2 }
   0x5   :  { %608 = vmatpush3.bf16.msra.mxu1 %v663_v3  ;;  %v672_v12 = vld [vmem:[%s880_s1 + $0x58] sm:$0xff]   ;;  %v676_v16 = vld [vmem:[%s880_s1 + $0x60] sm:$0xff]   ;;  %v680_v20 = vld [vmem:[%s880_s1 + $0x68] sm:$0xff]  }
   0x6   :  { %609 = vmatprep.subr.bf16.mxu1 %v666_v6  ;;  %v673_v13 = vld [vmem:[%s880_s1 + $0x18] sm:$0xff]   ;;  %v677_v17 = vld [vmem:[%s880_s1 + $0x20] sm:$0xff]   ;;  %v681_v21 = vld [vmem:[%s880_s1 + $0x28] sm:$0xff]  }
   0x7   :  { %588 = vmatpush3.bf16.msra.mxu0 %v665_v5  ;;  %v674_v14 = vld [vmem:[%s880_s1 + $0xd8] sm:$0xff]   ;;  %v678_v18 = vld [vmem:[%s880_s1 + $0xe0] sm:$0xff]   ;;  %v682_v22 = vld [vmem:[%s880_s1 + $0xe8] sm:$0xff]  }
   0x8   :  { %589 = vmatprep.subr.bf16.mxu0 %v668_v8  ;;  %v675_v15 = vld [vmem:[%s880_s1 + $0x98] sm:$0xff]   ;;  %v679_v19 = vld [vmem:[%s880_s1 + $0xa0] sm:$0xff]   ;;  %v683_v23 = vld [vmem:[%s880_s1 + $0xa8] sm:$0xff]  }
   0x9   :  { %610 = vmatpush3.bf16.msra.mxu1 %v667_v7  ;;  %v684_v24 = vld [vmem:[%s880_s1 + $0x70] sm:$0xff]   ;;  %v688_v28 = vld [vmem:[%s880_s1 + $0x78] sm:$0xff]   ;;  %v21_v31 = vld [vmem:[%s881_s0] sm:$0xff] }
   0xa   :  { %611 = vmatprep.subr.bf16.mxu1 %v670_v10  ;;  %v685_v25 = vld [vmem:[%s880_s1 + $0x30] sm:$0xff]   ;;  %v689_v29 = vld [vmem:[%s880_s1 + $0x38] sm:$0xff]   ;;  %v540_v32 = vcombine.low %v21_v31, %v21_v31  ;;  %v541_v33 = vcombine.high %v21_v31, %v21_v31  ;;  %v22_v36 = vld [vmem:[%s881_s0 + $0x8] sm:$0xff] }
   0xb   :  { %590 = vmatpush3.bf16.msra.mxu0 %v669_v9  ;;  %v686_v26 = vld [vmem:[%s880_s1 + $0xf0] sm:$0xff]   ;;  %v690_v30 = vld [vmem:[%s880_s1 + $0xf8] sm:$0xff]   ;;  %v542_v37 = vcombine.low %v22_v36, %v22_v36  ;;  %v543_v38 = vcombine.high %v22_v36, %v22_v36  ;;  %v697_v39 = vld [vmem:[%s880_s1 + $0x100] sm:$0xff]  }
   0xc   :  { %591 = vmatprep.subr.bf16.mxu0 %v672_v12  ;;  %v687_v27 = vld [vmem:[%s880_s1 + $0xb0] sm:$0xff]   ;;  %v694_v34 = vld [vmem:[%s880_s1 + $0xb8] sm:$0xff]   ;;  %401 = vmatprep.mubr.bf16.mxu0 %v541_v33  ;;  %v698_v40 = vld [vmem:[%s880_s1 + $0x108] sm:$0xff]  }
   0xd   :  { %612 = vmatpush3.bf16.msra.mxu1 %v671_v11  ;;  %441 = vmatprep.mubr.bf16.mxu1 %v543_v38  ;;  %v699_v41 = vld [vmem:[%s880_s1 + $0x110] sm:$0xff]   ;;  %v700_v42 = vld [vmem:[%s880_s1 + $0x118] sm:$0xff]   ;;  %v701_v43 = vld [vmem:[%s880_s1 + $0x120] sm:$0xff]  }
   0xe   :  { %613 = vmatprep.subr.bf16.mxu1 %v674_v14  ;;  %v702_v44 = vld [vmem:[%s880_s1 + $0x128] sm:$0xff]   ;;  %v703_v45 = vld [vmem:[%s880_s1 + $0x130] sm:$0xff]   ;;  %v704_v46 = vld [vmem:[%s880_s1 + $0x138] sm:$0xff]  }
   0xf   :  { %592 = vmatpush3.bf16.msra.mxu0 %v673_v13  ;;  %v693_v47 = vld [vmem:[%s881_s0 + $0x10] ss:$0 sps:$4 sm:$0xff]   ;;  %v539_v49 = vld [vmem:[%s882_s2] ss:$0 sm:$0xff] }
  0x10   :  { %593 = vmatprep.subr.bf16.mxu0 %v676_v16 }
  0x11   :  { %614 = vmatpush3.bf16.msra.mxu1 %v675_v15 }
  0x12   :  { %615 = vmatprep.subr.bf16.mxu1 %v678_v18 }
  0x13   :  { %594 = vmatpush3.bf16.msra.mxu0 %v677_v17 }
  0x14   :  { %595 = vmatprep.subr.bf16.mxu0 %v680_v20 }
  0x15   :  { %616 = vmatpush3.bf16.msra.mxu1 %v679_v19 }
  0x16   :  { %617 = vmatprep.subr.bf16.mxu1 %v682_v22 }
  0x17   :  { %596 = vmatpush3.bf16.msra.mxu0 %v681_v21 }
  0x18   :  { %597 = vmatprep.subr.bf16.mxu0 %v684_v24  ;;  %v489_v24 = vld [vmem:[%s883_s3] sm:$0x1] }
  0x19   :  { %618 = vmatpush3.bf16.msra.mxu1 %v683_v23 }
  0x1a   :  { %619 = vmatprep.subr.bf16.mxu1 %v686_v26 }
  0x1b   :  { %598 = vmatpush3.bf16.msra.mxu0 %v685_v25  ;;  %v521_v25 = vsub.s32 0, %v492_v62 }
  0x1c   :  { %599 = vmatprep.subr.bf16.mxu0 %v688_v28  ;;  %v490_v28 = vld [vmem:[%s884_s4] sm:$0x1] }
  0x1d   :  { %620 = vmatpush3.bf16.msra.mxu1 %v687_v27 }
  0x1e   :  { %621 = vmatprep.subr.bf16.mxu1 %v690_v30 }
  0x1f   :  { %600 = vmatpush3.bf16.msra.mxu0 %v689_v29 }
  0x20   :  { %638 = vmatprep.subr.bf16.mxu0 %v707_v35 }
  0x21   :  { %622 = vmatpush3.bf16.msra.mxu1 %v694_v34 }
  0x22   :  { %402 = vmatmul.mubr.bf16.vlgmr.msra.gmra.mrb[0].mxu0 %v540_v32 }
  0x23   :  { %639 = vmatpush3.bf16.msra.mxu0 %v697_v39  ;;  %654 = vmatprep.mubr.msk.bf16.mxu0 %vm708_vm0, %v707_v35 }
  0x24   :  { %442 = vmatmul.mubr.bf16.vlgmr.msra.gmra.mrb[0].mxu1 %v542_v37  ;;  %640 = vmatprep.subr.bf16.mxu0 %v707_v35 }
  0x27   :  { %641 = vmatpush3.bf16.msra.mxu0 %v698_v40 }
  0x28   :  { %642 = vmatprep.subr.bf16.mxu0 %v707_v35 }
  0x2b   :  { %643 = vmatpush3.bf16.msra.mxu0 %v699_v41 }
  0x2c   :  { %644 = vmatprep.subr.bf16.mxu0 %v707_v35 }
  0x2f   :  { %645 = vmatpush3.bf16.msra.mxu0 %v700_v42 }
  0x30   :  { %646 = vmatprep.subr.bf16.mxu0 %v707_v35 }
  0x33   :  { %647 = vmatpush3.bf16.msra.mxu0 %v701_v43 }
  0x34   :  { %648 = vmatprep.subr.bf16.mxu0 %v707_v35 }
  0x37   :  { %649 = vmatpush3.bf16.msra.mxu0 %v702_v44 }
  0x38   :  { %650 = vmatprep.subr.bf16.mxu0 %v707_v35 }
  0x3b   :  { %651 = vmatpush3.bf16.msra.mxu0 %v703_v45 }
  0x3c   :  { %652 = vmatprep.subr.bf16.mxu0 %v707_v35 }
  0x3f   :  { %653 = vmatpush3.bf16.msra.mxu0 %v704_v46 }
  0x42   :  { %655 = vmatmul.mubr.bf16.vlgmr.msra.gmra.mrb[4].mxu0 %v693_v47 }
  0xf5   :  { %v601_v48 = vpop.f32.mrb[0].mxu0 }
  0xf6   :  { %v602_v50 = vpop.f32.mrb[1].mxu0 }
  0xf7   :  { %v603_v51 = vadd.f32 %v602_v50, %v601_v48  ;;  %v604_v52 = vpop.f32.mrb[2].mxu0  ;;  %v623_v53 = vpop.f32.mrb[0].mxu1 }
  0xf8   :  { %v605_v54 = vpop.f32.mrb[3].mxu0  ;;  %v624_v55 = vpop.f32.mrb[1].mxu1 }
  0xf9   :  { %v404_v56 = vadd.f32 %v603_v51, %v539_v49  ;;  %v625_v57 = vadd.f32 %v624_v55, %v623_v53  ;;  %v626_v58 = vpop.f32.mrb[2].mxu1 }
  0xfa   :  { %v627_v59 = vpop.f32.mrb[3].mxu1 }
  0xfb   :  { %v444_v60 = vadd.f32 %v625_v57, %v404_v56 }
 0x115   :  { %v483_v63 = vpop.f32.mrb[4].mxu0 }
 0x116   :  { %v484_v0 = vadd.f32 %v483_v63, %v444_v60  ;;  %v656_v1 = vpop.f32.mrb[5].mxu0 }
 0x117   :  { %v486_v2 = vpop.f32.mrb[6].mxu0 }
 0x118   :  { %v494_v3 = vsel %vm493_vm1, %v484_v0, 0.0  ;;  %v657_v4 = vpop.f32.mrb[7].mxu0 }
 0x119   :  { %v495_v5 = vrot.slane %v494_v3, 4  ;;  %v502_v6 = vmul.f32 %v494_v3, %v494_v3 }
 0x11b   :  { %v496_v7 = vadd.f32 %v495_v5, %v494_v3  ;;  %v503_v8 = vrot.slane %v502_v6, 4 }
 0x11d   :  { %v497_v9 = vrot.slane %v496_v7, 2  ;;  %v504_v10 = vadd.f32 %v503_v8, %v502_v6 }
 0x11f   :  { %v498_v11 = vadd.f32 %v497_v9, %v496_v7  ;;  %v505_v12 = vrot.slane %v504_v10, 2 }
 0x121   :  { %v499_v13 = vrot.slane %v498_v11, 1  ;;  %v506_v14 = vadd.f32 %v505_v12, %v504_v10 }
 0x123   :  { %v500_v15 = vadd.f32 %v499_v13, %v498_v11  ;;  %v507_v16 = vrot.slane %v506_v14, 1 }
 0x125   :  { %v501_v17 = vmul.f32 0.5, %v500_v15  ;;  %v508_v18 = vadd.f32 %v507_v16, %v506_v14 }
 0x127   :  { %v509_v19 = vmul.f32 0.5, %v508_v18  ;;  %v510_v20 = vmul.f32 %v501_v17, %v501_v17 }
 0x129   :  { %v511_v21 = vsub.f32 %v509_v19, %v510_v20 }
 0x12b   :  { %v512_v22 = vmax.f32 %v511_v21, 0.0 }
 0x12d   :  { %v513_v23 = vadd.f32 1e-05, %v512_v22 }
 0x12f   :  { %705 = vrsqrt.f32 %v513_v23 }
 0x139   :  { %v706_v26 = vpop.eup %705 }
 0x13a   :  { %v515_v27 = vmul.f32 %v706_v26, %v489_v24 }
 0x13c   :  { %v516_v29 = vmul.f32 %v515_v27, %v501_v17  ;;  %v522_v30 = vrot.slane %v515_v27, %v521_v25 }
 0x13e   :  { %v517_v31 = vsub.f32 %v490_v28, %v516_v29  ;;  %v524_v32 = vmul.f32 %v522_v30, %v484_v0 }
 0x140   :  { %v529_v33 = vrot.slane %v517_v31, %v521_v25 }
 0x142   :  { %v531_v34 = vadd.f32 %v529_v33, %v524_v32 }
 0x144   :  { %v532_v35 = vmax.f32 %v531_v34, 0.0 }
 0x146   :  { %v533_v36 = vpack.c.bf16 %v532_v35, %v532_v35 }
 0x148   :  { %534 = vst [vmem:[%s885_s5] sm:$0xf] %v533_v36 }

// kernel: _lambda_.37
= control target key start
LH: loop header
LB: loop body
LE: loop exit
PB: predicated region body
PF: predicated region fallthrough
CT: control target
= control target key end

     0   :  { %v180_v0 = vmov 0.0   ;;  %vm181_vm0 = vmmov 0   ;;  %s235_s1 = inlined_call_operand.vmem [shape: bf16[128,128], index: 1, kind: input, shape index: {}]   ;;  %s236_s0 = inlined_call_operand.vmem [shape: bf16[8,128], index: 0, kind: input, shape index: {}]   ;;  %s237_s2 = inlined_call_operand.vmem [shape: f32[1,128], index: 2, kind: input, shape index: {}]   ;;  %s238_s3 = inlined_call_operand.vmem [shape: f32[8,128], index: 3, kind: output, shape index: {}]  }
   0x1   :  { %150 = vmatprep.subr.bf16.mxu0 %v180_v0  ;;  %v172_v1 = vld [vmem:[%s235_s1] sm:$0xff]   ;;  %166 = vmatprep.mubr.msk.bf16.mxu0 %vm181_vm0, %v180_v0  ;;  %v173_v2 = vld [vmem:[%s235_s1 + $0x8] sm:$0xff]   ;;  %v174_v3 = vld [vmem:[%s235_s1 + $0x10] sm:$0xff]  }
   0x2   :  { %151 = vmatpush3.bf16.msra.mxu0 %v172_v1  ;;  %v175_v4 = vld [vmem:[%s235_s1 + $0x18] sm:$0xff]   ;;  %v176_v5 = vld [vmem:[%s235_s1 + $0x20] sm:$0xff]   ;;  %v177_v6 = vld [vmem:[%s235_s1 + $0x28] sm:$0xff]  }
   0x3   :  { %152 = vmatprep.subr.bf16.mxu0 %v180_v0  ;;  %v178_v7 = vld [vmem:[%s235_s1 + $0x30] sm:$0xff]   ;;  %v179_v8 = vld [vmem:[%s235_s1 + $0x38] sm:$0xff]   ;;  %v15_v9 = vld [vmem:[%s236_s0] sm:$0xf] }
   0x4   :  { %v132_v10 = vld [vmem:[%s237_s2] ss:$0 sm:$0xff] }
   0x6   :  { %153 = vmatpush3.bf16.msra.mxu0 %v173_v2 }
   0x7   :  { %154 = vmatprep.subr.bf16.mxu0 %v180_v0 }
   0xa   :  { %155 = vmatpush3.bf16.msra.mxu0 %v174_v3 }
   0xb   :  { %156 = vmatprep.subr.bf16.mxu0 %v180_v0 }
   0xe   :  { %157 = vmatpush3.bf16.msra.mxu0 %v175_v4 }
   0xf   :  { %158 = vmatprep.subr.bf16.mxu0 %v180_v0 }
  0x12   :  { %159 = vmatpush3.bf16.msra.mxu0 %v176_v5 }
  0x13   :  { %160 = vmatprep.subr.bf16.mxu0 %v180_v0 }
  0x16   :  { %161 = vmatpush3.bf16.msra.mxu0 %v177_v6 }
  0x17   :  { %162 = vmatprep.subr.bf16.mxu0 %v180_v0 }
  0x1a   :  { %163 = vmatpush3.bf16.msra.mxu0 %v178_v7 }
  0x1b   :  { %164 = vmatprep.subr.bf16.mxu0 %v180_v0 }
  0x1e   :  { %165 = vmatpush3.bf16.msra.mxu0 %v179_v8 }
  0x21   :  { %167 = vmatmul.mubr.bf16.vlgmr.msra.gmra.mrb[0].mxu0 %v15_v9 }
  0xf4   :  { %v121_v11 = vpop.f32.mrb[0].mxu0 }
  0xf5   :  { %v122_v12 = vadd.f32 %v132_v10, %v121_v11  ;;  %v168_v13 = vpop.f32.mrb[1].mxu0 }
  0xf6   :  { %v124_v14 = vpop.f32.mrb[2].mxu0 }
  0xf7   :  { %127 = vst [vmem:[%s238_s3] sm:$0xff] %v122_v12  ;;  %v169_v15 = vpop.f32.mrb[3].mxu0 }

// kernel: _lambda_.36
= control target key start
LH: loop header
LB: loop body
LE: loop exit
PB: predicated region body
PF: predicated region fallthrough
CT: control target
= control target key end

     0   :  { %vm1422_vm0 = vmmov 0   ;;  %s1765_s1 = inlined_call_operand.vmem [shape: bf16[1152,128], index: 1, kind: input, shape index: {}]   ;;  %s1766_s0 = inlined_call_operand.vmem [shape: bf16[8,1152], index: 0, kind: input, shape index: {}]   ;;  %s1767_s5 = inlined_call_operand.vmem [shape: bf16[256,128], index: 5, kind: input, shape index: {}]   ;;  %s1768_s4 = inlined_call_operand.vmem [shape: bf16[8,256], index: 4, kind: input, shape index: {}]   ;;  %s1769_s2 = inlined_call_operand.vmem [shape: f32[1,128], index: 2, kind: input, shape index: {}]   ;;  %s1770_s3 = inlined_call_operand.vmem [shape: f32[1,128], index: 3, kind: input, shape index: {}]   ;;  %s1771_s6 = inlined_call_operand.vmem [shape: f32[1,128], index: 6, kind: input, shape index: {}]   ;;  %s1772_s7 = inlined_call_operand.vmem [shape: f32[8,128], index: 7, kind: input, shape index: {}]   ;;  %s1773_s8 = inlined_call_operand.vmem [shape: bf16[8,128], index: 8, kind: output, shape index: {}]  }
   0x1   :  { %v1320_v0 = vld [vmem:[%s1765_s1 + $0x40] sm:$0xff]   ;;  %v1324_v4 = vld [vmem:[%s1765_s1 + $0x48] sm:$0xff]   ;;  %v1328_v8 = vld [vmem:[%s1765_s1 + $0x50] sm:$0xff]  }
   0x2   :  { %v1321_v1 = vld [vmem:[%s1765_s1 + $0xc0] sm:$0xff]   ;;  %1179 = vmatprep.subr.bf16.mxu0 %v1320_v0  ;;  %v1325_v5 = vld [vmem:[%s1765_s1 + $0xc8] sm:$0xff]   ;;  %v1329_v9 = vld [vmem:[%s1765_s1 + $0xd0] sm:$0xff]  }
   0x3   :  { %v1322_v2 = vld [vmem:[%s1765_s1] sm:$0xff]   ;;  %1201 = vmatprep.subr.bf16.mxu1 %v1321_v1  ;;  %v1326_v6 = vld [vmem:[%s1765_s1 + $0x8] sm:$0xff]   ;;  %v1330_v10 = vld [vmem:[%s1765_s1 + $0x10] sm:$0xff]  }
   0x4   :  { %v1323_v3 = vld [vmem:[%s1765_s1 + $0x80] sm:$0xff]   ;;  %1180 = vmatpush3.bf16.msra.mxu0 %v1322_v2  ;;  %v1327_v7 = vld [vmem:[%s1765_s1 + $0x88] sm:$0xff]   ;;  %v1331_v11 = vld [vmem:[%s1765_s1 + $0x90] sm:$0xff]  }
   0x5   :  { %1202 = vmatpush3.bf16.msra.mxu1 %v1323_v3  ;;  %1181 = vmatprep.subr.bf16.mxu0 %v1324_v4  ;;  %v1332_v12 = vld [vmem:[%s1765_s1 + $0x58] sm:$0xff]   ;;  %v1336_v16 = vld [vmem:[%s1765_s1 + $0x60] sm:$0xff]   ;;  %v1340_v20 = vld [vmem:[%s1765_s1 + $0x68] sm:$0xff]  }
   0x6   :  { %1203 = vmatprep.subr.bf16.mxu1 %v1325_v5  ;;  %v1333_v13 = vld [vmem:[%s1765_s1 + $0xd8] sm:$0xff]   ;;  %v1337_v17 = vld [vmem:[%s1765_s1 + $0xe0] sm:$0xff]   ;;  %v1341_v21 = vld [vmem:[%s1765_s1 + $0xe8] sm:$0xff]  }
   0x7   :  { %v1334_v14 = vld [vmem:[%s1765_s1 + $0x18] sm:$0xff]   ;;  %v1338_v18 = vld [vmem:[%s1765_s1 + $0x20] sm:$0xff]   ;;  %v1342_v22 = vld [vmem:[%s1765_s1 + $0x28] sm:$0xff]  }
   0x8   :  { %1182 = vmatpush3.bf16.msra.mxu0 %v1326_v6  ;;  %v1335_v15 = vld [vmem:[%s1765_s1 + $0x98] sm:$0xff]   ;;  %v1339_v19 = vld [vmem:[%s1765_s1 + $0xa0] sm:$0xff]   ;;  %v1343_v23 = vld [vmem:[%s1765_s1 + $0xa8] sm:$0xff]  }
   0x9   :  { %1204 = vmatpush3.bf16.msra.mxu1 %v1327_v7  ;;  %1183 = vmatprep.subr.bf16.mxu0 %v1328_v8  ;;  %v1344_v24 = vld [vmem:[%s1765_s1 + $0x70] sm:$0xff]   ;;  %v1348_v28 = vld [vmem:[%s1765_s1 + $0x78] sm:$0xff]   ;;  %v30_v32 = vld [vmem:[%s1766_s0] sm:$0xff] }
   0xa   :  { %1205 = vmatprep.subr.bf16.mxu1 %v1329_v9  ;;  %v1345_v25 = vld [vmem:[%s1765_s1 + $0xf0] sm:$0xff]   ;;  %v1349_v29 = vld [vmem:[%s1765_s1 + $0xf8] sm:$0xff]   ;;  %v31_v33 = vld [vmem:[%s1766_s0 + $0x8] sm:$0xff]  ;;  %v1079_v34 = vcombine.low %v30_v32, %v30_v32  ;;  %v1080_v35 = vcombine.high %v30_v32, %v30_v32 }
   0xb   :  { %v1346_v26 = vld [vmem:[%s1765_s1 + $0x30] sm:$0xff]   ;;  %v1350_v30 = vld [vmem:[%s1765_s1 + $0x38] sm:$0xff]   ;;  %v1081_v36 = vcombine.low %v31_v33, %v31_v33  ;;  %v1082_v37 = vcombine.high %v31_v33, %v31_v33  ;;  %v1356_v38 = vld [vmem:[%s1765_s1 + $0x140] sm:$0xff]  }
   0xc   :  { %1184 = vmatpush3.bf16.msra.mxu0 %v1330_v10  ;;  %v1347_v27 = vld [vmem:[%s1765_s1 + $0xb0] sm:$0xff]   ;;  %v1351_v31 = vld [vmem:[%s1765_s1 + $0xb8] sm:$0xff]   ;;  %v1357_v39 = vld [vmem:[%s1765_s1 + $0x100] sm:$0xff]   ;;  %675 = vmatprep.mubr.bf16.mxu0 %v1080_v35 }
   0xd   :  { %1206 = vmatpush3.bf16.msra.mxu1 %v1331_v11  ;;  %1185 = vmatprep.subr.bf16.mxu0 %v1332_v12  ;;  %v1358_v40 = vld [vmem:[%s1765_s1 + $0x1c0] sm:$0xff]   ;;  %v1360_v42 = vld [vmem:[%s1765_s1 + $0x148] sm:$0xff]   ;;  %v1364_v46 = vld [vmem:[%s1765_s1 + $0x150] sm:$0xff]  }
   0xe   :  { %1207 = vmatprep.subr.bf16.mxu1 %v1333_v13  ;;  %715 = vmatprep.mubr.bf16.mxu1 %v1082_v37  ;;  %v1359_v41 = vld [vmem:[%s1765_s1 + $0x180] sm:$0xff]   ;;  %v1361_v43 = vld [vmem:[%s1765_s1 + $0x108] sm:$0xff]   ;;  %v1365_v47 = vld [vmem:[%s1765_s1 + $0x110] sm:$0xff]   ;;  %v1421_v13 = vmov 0.0  }
   0xf   :  { %v1362_v44 = vld [vmem:[%s1765_s1 + $0x1c8] sm:$0xff]   ;;  %v1366_v48 = vld [vmem:[%s1765_s1 + $0x1d0] sm:$0xff]   ;;  %v1368_v50 = vld [vmem:[%s1765_s1 + $0x158] sm:$0xff]  }
  0x10   :  { %1186 = vmatpush3.bf16.msra.mxu0 %v1334_v14  ;;  %v1363_v45 = vld [vmem:[%s1765_s1 + $0x188] sm:$0xff]   ;;  %v1367_v49 = vld [vmem:[%s1765_s1 + $0x190] sm:$0xff]   ;;  %v1369_v51 = vld [vmem:[%s1765_s1 + $0x118] sm:$0xff]  }
  0x11   :  { %1208 = vmatpush3.bf16.msra.mxu1 %v1335_v15  ;;  %1187 = vmatprep.subr.bf16.mxu0 %v1336_v16  ;;  %v1370_v52 = vld [vmem:[%s1765_s1 + $0x1d8] sm:$0xff]   ;;  %v1372_v54 = vld [vmem:[%s1765_s1 + $0x160] sm:$0xff]   ;;  %v1376_v58 = vld [vmem:[%s1765_s1 + $0x168] sm:$0xff]  }
  0x12   :  { %1209 = vmatprep.subr.bf16.mxu1 %v1337_v17  ;;  %v1371_v53 = vld [vmem:[%s1765_s1 + $0x198] sm:$0xff]   ;;  %v1373_v55 = vld [vmem:[%s1765_s1 + $0x120] sm:$0xff]   ;;  %v1377_v59 = vld [vmem:[%s1765_s1 + $0x128] sm:$0xff]  }
  0x13   :  { %v1374_v56 = vld [vmem:[%s1765_s1 + $0x1e0] sm:$0xff]   ;;  %v1378_v60 = vld [vmem:[%s1765_s1 + $0x1e8] sm:$0xff]   ;;  %v1380_v62 = vld [vmem:[%s1765_s1 + $0x170] sm:$0xff]  }
  0x14   :  { %1188 = vmatpush3.bf16.msra.mxu0 %v1338_v18  ;;  %v1375_v57 = vld [vmem:[%s1765_s1 + $0x1a0] sm:$0xff]   ;;  %v1379_v61 = vld [vmem:[%s1765_s1 + $0x1a8] sm:$0xff]   ;;  %v1381_v63 = vld [vmem:[%s1765_s1 + $0x130] sm:$0xff]  }
  0x15   :  { %1210 = vmatpush3.bf16.msra.mxu1 %v1339_v19  ;;  %1189 = vmatprep.subr.bf16.mxu0 %v1340_v20  ;;  %v1382_v0 = vld [vmem:[%s1765_s1 + $0x1f0] sm:$0xff]   ;;  %v1384_v2 = vld [vmem:[%s1765_s1 + $0x178] sm:$0xff]   ;;  %v1392_v12 = vld [vmem:[%s1765_s1 + $0x200] sm:$0xff]  }
  0x16   :  { %1211 = vmatprep.subr.bf16.mxu1 %v1341_v21  ;;  %v1383_v1 = vld [vmem:[%s1765_s1 + $0x1b0] sm:$0xff]   ;;  %v1385_v3 = vld [vmem:[%s1765_s1 + $0x138] sm:$0xff]   ;;  %v1393_v14 = vld [vmem:[%s1765_s1 + $0x208] sm:$0xff]  }
  0x17   :  { %v1386_v4 = vld [vmem:[%s1765_s1 + $0x1f8] sm:$0xff]   ;;  %v32_v5 = vld [vmem:[%s1766_s0 + $0x10] sm:$0xff]  ;;  %v1401_v16 = vld [vmem:[%s1767_s5 + $0x40] sm:$0xff]  }
  0x18   :  { %1190 = vmatpush3.bf16.msra.mxu0 %v1342_v22  ;;  %v1084_v6 = vcombine.high %v32_v5, %v32_v5  ;;  %v1389_v7 = vld [vmem:[%s1765_s1 + $0x1b8] sm:$0xff]   ;;  %v1083_v8 = vcombine.low %v32_v5, %v32_v5  ;;  %v1394_v15 = vld [vmem:[%s1765_s1 + $0x210] sm:$0xff]   ;;  %v1402_v17 = vld [vmem:[%s1767_s5] sm:$0xff]  }
  0x19   :  { %1212 = vmatpush3.bf16.msra.mxu1 %v1343_v23  ;;  %1191 = vmatprep.subr.bf16.mxu0 %v1344_v24  ;;  %v33_v9 = vld [vmem:[%s1766_s0 + $0x18] sm:$0xff]  ;;  %v1403_v19 = vld [vmem:[%s1767_s5 + $0x48] sm:$0xff]   ;;  %v1405_v21 = vld [vmem:[%s1767_s5 + $0x50] sm:$0xff]  }
  0x1a   :  { %1213 = vmatprep.subr.bf16.mxu1 %v1345_v25  ;;  %v1085_v10 = vcombine.low %v33_v9, %v33_v9  ;;  %v1086_v11 = vcombine.high %v33_v9, %v33_v9  ;;  %v1395_v18 = vld [vmem:[%s1765_s1 + $0x218] sm:$0xff]   ;;  %v1404_v20 = vld [vmem:[%s1767_s5 + $0x8] sm:$0xff]   ;;  %v1396_v22 = vld [vmem:[%s1765_s1 + $0x220] sm:$0xff]  }
  0x1b   :  { %v1406_v23 = vld [vmem:[%s1767_s5 + $0x10] sm:$0xff]   ;;  %v1407_v24 = vld [vmem:[%s1767_s5 + $0x58] sm:$0xff]   ;;  %v1397_v25 = vld [vmem:[%s1765_s1 + $0x228] sm:$0xff]  }
  0x1c   :  { %1192 = vmatpush3.bf16.msra.mxu0 %v1346_v26  ;;  %v1408_v26 = vld [vmem:[%s1767_s5 + $0x18] sm:$0xff]   ;;  %v1412_v33 = vld [vmem:[%s1767_s5 + $0x28] sm:$0xff]   ;;  %v1413_v35 = vld [vmem:[%s1767_s5 + $0x70] sm:$0xff]  }
  0x1d   :  { %1214 = vmatpush3.bf16.msra.mxu1 %v1347_v27  ;;  %1193 = vmatprep.subr.bf16.mxu0 %v1348_v28  ;;  %v1409_v27 = vld [vmem:[%s1767_s5 + $0x60] sm:$0xff]   ;;  %v1414_v37 = vld [vmem:[%s1767_s5 + $0x30] sm:$0xff]  }
  0x1e   :  { %1215 = vmatprep.subr.bf16.mxu1 %v1349_v29  ;;  %v1410_v28 = vld [vmem:[%s1767_s5 + $0x20] sm:$0xff]   ;;  %v1398_v29 = vld [vmem:[%s1765_s1 + $0x230] sm:$0xff]  }
  0x20   :  { %1194 = vmatpush3.bf16.msra.mxu0 %v1350_v30  ;;  %v1411_v30 = vld [vmem:[%s1767_s5 + $0x68] sm:$0xff]  }
  0x21   :  { %1216 = vmatpush3.bf16.msra.mxu1 %v1351_v31  ;;  %1223 = vmatprep.subr.bf16.mxu0 %v1356_v38  ;;  %v843_v31 = vld [vmem:[%s1768_s4] sm:$0xff]  ;;  %v1415_v38 = vld [vmem:[%s1767_s5 + $0x78] sm:$0xff]  }
  0x22   :  { %1245 = vmatprep.subr.bf16.mxu1 %v1358_v40  ;;  %v1162_v32 = vcombine.high %v843_v31, %v843_v31  ;;  %v1161_v40 = vcombine.low %v843_v31, %v843_v31 }
  0x23   :  { %676 = vmatmul.mubr.bf16.vlgmr.msra.gmra.mrb[0].mxu0 %v1079_v34  ;;  %v1399_v34 = vld [vmem:[%s1765_s1 + $0x238] sm:$0xff]  }
  0x24   :  { %716 = vmatmul.mubr.bf16.vlgmr.msra.gmra.mrb[0].mxu1 %v1081_v36  ;;  %1224 = vmatpush3.bf16.msra.mxu0 %v1357_v39  ;;  %v1400_v36 = vld [vmem:[%s1766_s0 + $0x20] ss:$0 sps:$4 sm:$0xff]   ;;  %v1416_v39 = vld [vmem:[%s1767_s5 + $0x38] sm:$0xff]  }
  0x25   :  { %1246 = vmatpush3.bf16.msra.mxu1 %v1359_v41  ;;  %1225 = vmatprep.subr.bf16.mxu0 %v1360_v42 }
  0x26   :  { %1247 = vmatprep.subr.bf16.mxu1 %v1362_v44  ;;  %755 = vmatprep.mubr.bf16.mxu0 %v1084_v6 }
  0x27   :  { %795 = vmatprep.mubr.bf16.mxu1 %v1086_v11 }
  0x28   :  { %1226 = vmatpush3.bf16.msra.mxu0 %v1361_v43 }
  0x29   :  { %1248 = vmatpush3.bf16.msra.mxu1 %v1363_v45  ;;  %1227 = vmatprep.subr.bf16.mxu0 %v1364_v46 }
  0x2a   :  { %1249 = vmatprep.subr.bf16.mxu1 %v1366_v48 }
  0x2c   :  { %1228 = vmatpush3.bf16.msra.mxu0 %v1365_v47 }
  0x2d   :  { %1250 = vmatpush3.bf16.msra.mxu1 %v1367_v49  ;;  %1229 = vmatprep.subr.bf16.mxu0 %v1368_v50 }
  0x2e   :  { %1251 = vmatprep.subr.bf16.mxu1 %v1370_v52 }
  0x30   :  { %1230 = vmatpush3.bf16.msra.mxu0 %v1369_v51 }
  0x31   :  { %1252 = vmatpush3.bf16.msra.mxu1 %v1371_v53  ;;  %1231 = vmatprep.subr.bf16.mxu0 %v1372_v54 }
  0x32   :  { %1253 = vmatprep.subr.bf16.mxu1 %v1374_v56 }
  0x34   :  { %1232 = vmatpush3.bf16.msra.mxu0 %v1373_v55 }
  0x35   :  { %1254 = vmatpush3.bf16.msra.mxu1 %v1375_v57  ;;  %1233 = vmatprep.subr.bf16.mxu0 %v1376_v58 }
  0x36   :  { %1255 = vmatprep.subr.bf16.mxu1 %v1378_v60 }
  0x38   :  { %1234 = vmatpush3.bf16.msra.mxu0 %v1377_v59 }
  0x39   :  { %1256 = vmatpush3.bf16.msra.mxu1 %v1379_v61  ;;  %1235 = vmatprep.subr.bf16.mxu0 %v1380_v62 }
  0x3a   :  { %1257 = vmatprep.subr.bf16.mxu1 %v1382_v0  ;;  %v1028_v0 = vlaneseq }
  0x3c   :  { %1236 = vmatpush3.bf16.msra.mxu0 %v1381_v63 }
  0x3d   :  { %1258 = vmatpush3.bf16.msra.mxu1 %v1383_v1  ;;  %1237 = vmatprep.subr.bf16.mxu0 %v1384_v2  ;;  %v1029_v1 = vshrl.u32 %v1028_v0, 7 }
  0x3e   :  { %1259 = vmatprep.subr.bf16.mxu1 %v1386_v4 }
  0x3f   :  { %vm1030_vm1 = vcmp.lt.s32.totalorder %v1029_v1, 2 }
  0x40   :  { %1238 = vmatpush3.bf16.msra.mxu0 %v1385_v3 }
  0x41   :  { %1260 = vmatpush3.bf16.msra.mxu1 %v1389_v7  ;;  %1298 = vmatprep.subr.bf16.mxu0 %v1421_v13 }
  0x42   :  { %1276 = vmatprep.subr.bf16.mxu1 %v1401_v16 }
  0x43   :  { %756 = vmatmul.mubr.bf16.vlgmr.msra.gmra.mrb[4].mxu0 %v1083_v8 }
  0x44   :  { %1299 = vmatpush3.bf16.msra.mxu0 %v1392_v12  ;;  %796 = vmatmul.mubr.bf16.vlgmr.msra.gmra.mrb[4].mxu1 %v1085_v10 }
  0x45   :  { %1300 = vmatprep.subr.bf16.mxu0 %v1421_v13  ;;  %1314 = vmatprep.mubr.msk.bf16.mxu0 %vm1422_vm0, %v1421_v13 }
  0x46   :  { %1277 = vmatpush3.bf16.msra.mxu1 %v1402_v17  ;;  %1018 = vmatprep.mubr.bf16.mxu1 %v1162_v32  ;;  %v1026_v32 = vld [vmem:[%s1769_s2] sm:$0x1] }
  0x47   :  { %1278 = vmatprep.subr.bf16.mxu1 %v1403_v19 }
  0x48   :  { %1301 = vmatpush3.bf16.msra.mxu0 %v1393_v14 }
  0x49   :  { %1302 = vmatprep.subr.bf16.mxu0 %v1421_v13 }
  0x4a   :  { %1279 = vmatpush3.bf16.msra.mxu1 %v1404_v20 }
  0x4b   :  { %1280 = vmatprep.subr.bf16.mxu1 %v1405_v21 }
  0x4c   :  { %1303 = vmatpush3.bf16.msra.mxu0 %v1394_v15 }
  0x4d   :  { %1304 = vmatprep.subr.bf16.mxu0 %v1421_v13 }
  0x4e   :  { %1281 = vmatpush3.bf16.msra.mxu1 %v1406_v23 }
  0x4f   :  { %1282 = vmatprep.subr.bf16.mxu1 %v1407_v24 }
  0x50   :  { %1305 = vmatpush3.bf16.msra.mxu0 %v1395_v18 }
  0x51   :  { %1306 = vmatprep.subr.bf16.mxu0 %v1421_v13 }
  0x52   :  { %1283 = vmatpush3.bf16.msra.mxu1 %v1408_v26 }
  0x53   :  { %1284 = vmatprep.subr.bf16.mxu1 %v1409_v27 }
  0x54   :  { %1307 = vmatpush3.bf16.msra.mxu0 %v1396_v22 }
  0x55   :  { %1308 = vmatprep.subr.bf16.mxu0 %v1421_v13 }
  0x56   :  { %1285 = vmatpush3.bf16.msra.mxu1 %v1410_v28 }
  0x57   :  { %1286 = vmatprep.subr.bf16.mxu1 %v1411_v30 }
  0x58   :  { %1309 = vmatpush3.bf16.msra.mxu0 %v1397_v25 }
  0x59   :  { %1310 = vmatprep.subr.bf16.mxu0 %v1421_v13 }
  0x5a   :  { %1287 = vmatpush3.bf16.msra.mxu1 %v1412_v33  ;;  %v1058_v33 = vsub.s32 0, %v1029_v1 }
  0x5b   :  { %1288 = vmatprep.subr.bf16.mxu1 %v1413_v35 }
  0x5c   :  { %1311 = vmatpush3.bf16.msra.mxu0 %v1398_v29 }
  0x5d   :  { %1312 = vmatprep.subr.bf16.mxu0 %v1421_v13 }
  0x5e   :  { %1289 = vmatpush3.bf16.msra.mxu1 %v1414_v37 }
  0x5f   :  { %1290 = vmatprep.subr.bf16.mxu1 %v1415_v38 }
  0x60   :  { %1313 = vmatpush3.bf16.msra.mxu0 %v1399_v34 }
  0x62   :  { %1291 = vmatpush3.bf16.msra.mxu1 %v1416_v39  ;;  %v1160_v39 = vld [vmem:[%s1771_s6] ss:$0 sm:$0xff] }
  0x63   :  { %1315 = vmatmul.mubr.bf16.vlgmr.msra.gmra.mrb[8].mxu0 %v1400_v36  ;;  %v1027_v36 = vld [vmem:[%s1770_s3] sm:$0x1] }
  0x65   :  { %1019 = vmatmul.mubr.bf16.vlgmr.msra.gmra.mrb[8].mxu1 %v1161_v40 }
  0xf6   :  { %v1195_v41 = vpop.f32.mrb[0].mxu0 }
  0xf7   :  { %v1217_v42 = vpop.f32.mrb[0].mxu1  ;;  %v1196_v43 = vpop.f32.mrb[1].mxu0 }
  0xf8   :  { %v1218_v44 = vpop.f32.mrb[1].mxu1  ;;  %v1197_v45 = vadd.f32 %v1196_v43, %v1195_v41  ;;  %v1198_v47 = vpop.f32.mrb[2].mxu0 }
  0xf9   :  { %v1219_v46 = vadd.f32 %v1218_v44, %v1217_v42  ;;  %v1220_v48 = vpop.f32.mrb[2].mxu1  ;;  %v1199_v49 = vpop.f32.mrb[3].mxu0 }
  0xfa   :  { %v1221_v50 = vpop.f32.mrb[3].mxu1 }
  0xfb   :  { %v718_v51 = vadd.f32 %v1219_v46, %v1197_v45  ;;  %v1071_v46 = vld [vmem:[%s1772_s7] sm:$0xff] }
 0x116   :  { %v1239_v52 = vpop.f32.mrb[4].mxu0 }
 0x117   :  { %v1240_v53 = vpop.f32.mrb[5].mxu0  ;;  %v1261_v54 = vpop.f32.mrb[4].mxu1 }
 0x118   :  { %v1241_v55 = vadd.f32 %v1240_v53, %v1239_v52  ;;  %v1242_v56 = vpop.f32.mrb[6].mxu0  ;;  %v1262_v57 = vpop.f32.mrb[5].mxu1 }
 0x119   :  { %v1243_v58 = vpop.f32.mrb[7].mxu0  ;;  %v1263_v59 = vadd.f32 %v1262_v57, %v1261_v54  ;;  %v1264_v60 = vpop.f32.mrb[6].mxu1 }
 0x11a   :  { %v758_v61 = vadd.f32 %v1241_v55, %v718_v51  ;;  %v1265_v62 = vpop.f32.mrb[7].mxu1 }
 0x11c   :  { %v798_v63 = vadd.f32 %v1263_v59, %v758_v61 }
 0x136   :  { %v837_v2 = vpop.f32.mrb[8].mxu0 }
 0x137   :  { %v838_v3 = vadd.f32 %v837_v2, %v798_v63  ;;  %v1316_v4 = vpop.f32.mrb[9].mxu0 }
 0x138   :  { %v840_v5 = vpop.f32.mrb[10].mxu0  ;;  %v1292_v12 = vpop.f32.mrb[8].mxu1 }
 0x139   :  { %v1031_v6 = vsel %vm1030_vm1, %v838_v3, 0.0  ;;  %v1317_v7 = vpop.f32.mrb[11].mxu0  ;;  %v1293_v15 = vpop.f32.mrb[9].mxu1 }
 0x13a   :  { %v1032_v8 = vrot.slane %v1031_v6, 4  ;;  %v1039_v9 = vmul.f32 %v1031_v6, %v1031_v6  ;;  %v1294_v16 = vadd.f32 %v1293_v15, %v1292_v12  ;;  %v1295_v17 = vpop.f32.mrb[10].mxu1 }
 0x13b   :  { %v1296_v20 = vpop.f32.mrb[11].mxu1 }
 0x13c   :  { %v1033_v10 = vadd.f32 %v1032_v8, %v1031_v6  ;;  %v1040_v11 = vrot.slane %v1039_v9, 4  ;;  %v1021_v43 = vadd.f32 %v1294_v16, %v1160_v39 }
 0x13e   :  { %v1034_v13 = vrot.slane %v1033_v10, 2  ;;  %v1041_v14 = vadd.f32 %v1040_v11, %v1039_v9 }
 0x140   :  { %v1035_v18 = vadd.f32 %v1034_v13, %v1033_v10  ;;  %v1042_v19 = vrot.slane %v1041_v14, 2 }
 0x142   :  { %v1036_v21 = vrot.slane %v1035_v18, 1  ;;  %v1043_v22 = vadd.f32 %v1042_v19, %v1041_v14 }
 0x144   :  { %v1037_v23 = vadd.f32 %v1036_v21, %v1035_v18  ;;  %v1044_v24 = vrot.slane %v1043_v22, 1 }
 0x146   :  { %v1038_v25 = vmul.f32 0.5, %v1037_v23  ;;  %v1045_v26 = vadd.f32 %v1044_v24, %v1043_v22 }
 0x148   :  { %v1046_v27 = vmul.f32 0.5, %v1045_v26  ;;  %v1047_v28 = vmul.f32 %v1038_v25, %v1038_v25 }
 0x14a   :  { %v1048_v29 = vsub.f32 %v1046_v27, %v1047_v28 }
 0x14c   :  { %v1049_v30 = vmax.f32 %v1048_v29, 0.0 }
 0x14e   :  { %v1050_v31 = vadd.f32 1e-05, %v1049_v30 }
 0x150   :  { %1419 = vrsqrt.f32 %v1050_v31 }
 0x15a   :  { %v1420_v34 = vpop.eup %1419 }
 0x15b   :  { %v1052_v35 = vmul.f32 %v1420_v34, %v1026_v32 }
 0x15d   :  { %v1053_v37 = vmul.f32 %v1052_v35, %v1038_v25  ;;  %v1059_v38 = vrot.slane %v1052_v35, %v1058_v33 }
 0x15f   :  { %v1054_v40 = vsub.f32 %v1027_v36, %v1053_v37  ;;  %v1061_v41 = vmul.f32 %v1059_v38, %v838_v3 }
 0x161   :  { %v1066_v42 = vrot.slane %v1054_v40, %v1058_v33 }
 0x163   :  { %v1068_v44 = vadd.f32 %v1066_v42, %v1061_v41 }
 0x165   :  { %v1069_v45 = vadd.f32 %v1068_v44, %v1021_v43 }
 0x167   :  { %v1070_v47 = vmax.f32 %v1069_v45, 0.0 }
 0x169   :  { %v1072_v48 = vmul.f32 %v1071_v46, %v1070_v47 }
 0x16b   :  { %v1073_v49 = vpack.c.bf16 %v1072_v48, %v1072_v48 }
 0x16d   :  { %1074 = vst [vmem:[%s1773_s8] sm:$0xf] %v1073_v49 }

</bundles_post_ra>
